<compile_context>
chip_gen: v7x
topology: tpu7x:2x2x1
jax: 0.10.0
libtpu: 0.0.40
codegen_flags: <defaults>
</compile_context>

<pallas_src>
import functools

import jax
import jax.numpy as jnp
from jax.experimental import pallas as pl
from jax.experimental.pallas import tpu as pltpu

EPS = 1e-5
VMEM_LIMIT = 32 * 1024 * 1024


# =============================================================================
# kernels
# =============================================================================
def _enc_kernel(x_ref, w_ref, b_ref, o_ref, *, R):
    """conv3x3(pad=1) + folded-BN + ReLU + maxpool2x2 as one GEMM + parity max.

    x_ref: (4*R, 9*Cin) bf16, rows parity-major (py, px, n, yo, xo)
    w_ref: (9*Cin, Cout) bf16, BN scale already folded in
    b_ref: (1, Cout) f32 folded bias
    o_ref: (R, Cout) bf16 pooled rows (n, yo, xo)
    """
    y = jnp.dot(x_ref[...], w_ref[...], preferred_element_type=jnp.float32)
    # maxpool first (exact: scale is inside the GEMM, bias+ReLU are monotone)
    y = jnp.maximum(jnp.maximum(y[0 * R:1 * R, :], y[1 * R:2 * R, :]),
                    jnp.maximum(y[2 * R:3 * R, :], y[3 * R:4 * R, :]))
    o_ref[...] = jnp.maximum(y + b_ref[...], 0.0).astype(o_ref.dtype)


def _tail_kernel(x4_ref, we_ref, be_ref,
                 w1_ref, b1_ref, w2_ref, b2_ref, w3_ref, b3_ref, w4_ref, b4_ref,
                 o_ref, s1, s2, s3, *, R):
    """Encoder layer 4 + entire decoder, fused.

    R = number of latent pixels (N * 2 * 2).
    x4_ref: (4*R, 2304) bf16 im2col'd input of encoder layer 4.
    Decoder weights have columns ordered (sub-pixel, cout); layers 3/4 are padded
    to 128-lane channel slabs so every register slice / store is lane-aligned.
    Output: (64*R, 128) f32, rows (s3, s2, s1, n, y0, x0), cols (s4*3 + c) in [:12].
    """
    # ---- encoder layer 4: GEMM + parity max + bias + ReLU -> latent (R, 512)
    y = jnp.dot(x4_ref[...], we_ref[...], preferred_element_type=jnp.float32)
    y = jnp.maximum(jnp.maximum(y[0 * R:1 * R, :], y[1 * R:2 * R, :]),
                    jnp.maximum(y[2 * R:3 * R, :], y[3 * R:4 * R, :]))
    z = jnp.maximum(y + be_ref[...], 0.0).astype(jnp.bfloat16)

    # ---- decoder layer 1: (R,512)@(512,1024) -> ReLU -> 4 row slabs of s1 (4R,256)
    y = jnp.dot(z, w1_ref[...], preferred_element_type=jnp.float32) + b1_ref[...]
    y = jnp.maximum(y, 0.0).astype(jnp.bfloat16)
    for s in range(4):
        s1[s * R:(s + 1) * R, :] = y[:, s * 256:(s + 1) * 256]

    # ---- decoder layer 2: (4R,256)@(256,512) -> ReLU -> s2 (16R,128)
    y = jnp.dot(s1[...], w2_ref[...], preferred_element_type=jnp.float32) + b2_ref[...]
    y = jnp.maximum(y, 0.0).astype(jnp.bfloat16)
    for s in range(4):
        s2[s * 4 * R:(s + 1) * 4 * R, :] = y[:, s * 128:(s + 1) * 128]

    # ---- decoder layer 3: (16R,128)@(128,512) -> ReLU -> s3 (64R,128)  (Cout 64 padded to 128)
    y = jnp.dot(s2[...], w3_ref[...], preferred_element_type=jnp.float32) + b3_ref[...]
    y = jnp.maximum(y, 0.0).astype(jnp.bfloat16)
    for s in range(4):
        s3[s * 16 * R:(s + 1) * 16 * R, :] = y[:, s * 128:(s + 1) * 128]

    # ---- decoder layer 4: (64R,128)@(128,128) + sigmoid (12 real cols, rest padding)
    y = jnp.dot(s3[...], w4_ref[...], preferred_element_type=jnp.float32) + b4_ref[...]
    y = pl.reciprocal(1.0 + jnp.exp(-y), approx=True)
    o_ref[...] = jnp.maximum(jnp.minimum(y, 1.0), 0.0).astype(o_ref.dtype)


# =============================================================================
# XLA-side glue + wrappers
# =============================================================================
def _im2col_parity(x):
    """(N,H,W,C) -> (4*N*(H/2)*(W/2), 9*C); rows (py, px, n, yo, xo), K = (tap, c)."""
    N, H, W, C = x.shape
    Ho, Wo = H // 2, W // 2
    xp = jnp.pad(x, ((0, 0), (1, 1), (1, 1), (0, 0)))
    taps = [xp[:, dy:dy + H, dx:dx + W, :] for dy in range(3) for dx in range(3)]
    xt = jnp.concatenate(taps, axis=-1)                       # (N, H, W, 9*C)
    xt = xt.reshape(N, Ho, 2, Wo, 2, 9 * C)                   # (n, yo, py, xo, px, k)
    return xt.transpose(2, 4, 0, 1, 3, 5).reshape(4 * N * Ho * Wo, 9 * C)


def conv_bn_relu_pool(x, wt, b):
    """Encoder layers 1-3.  x: (N,H,W,Cin) bf16, wt: (9*Cin,Cout) bf16 folded, b: (1,Cout) f32."""
    N, H, W, Cin = x.shape
    K, Cout = wt.shape
    Ho, Wo = H // 2, W // 2
    R = N * Ho * Wo
    xg = _im2col_parity(x)
    out = pl.pallas_call(
        functools.partial(_enc_kernel, R=R),
        out_shape=jax.ShapeDtypeStruct((R, Cout), jnp.bfloat16),
        grid_spec=pltpu.PrefetchScalarGridSpec(
            num_scalar_prefetch=0,
            grid=(1,),
            in_specs=[
                pl.BlockSpec((4 * R, K), lambda i: (0, 0)),
                pl.BlockSpec((K, Cout), lambda i: (0, 0)),
                pl.BlockSpec((1, Cout), lambda i: (0, 0)),
            ],
            out_specs=pl.BlockSpec((R, Cout), lambda i: (0, 0)),
        ),
        compiler_params=pltpu.CompilerParams(
            dimension_semantics=("arbitrary",),
            vmem_limit_bytes=VMEM_LIMIT,
        ),
    )(xg, wt, b)
    return out.reshape(N, Ho, Wo, Cout)


def encode4_and_decode(x3, enc4, dec):
    """x3: (N,4,4,256) bf16 output of encoder layer 3.  One fused pallas_call."""
    N = x3.shape[0]
    R = N * 2 * 2                                   # latent pixel count
    we, be = enc4
    (w1, b1), (w2, b2), (w3, b3), (w4, b4) = dec
    x4 = _im2col_parity(x3)                         # (4*R, 2304) bf16
    operands = (x4, we, be, w1, b1, w2, b2, w3, b3, w4, b4)
    return pl.pallas_call(
        functools.partial(_tail_kernel, R=R),
        out_shape=jax.ShapeDtypeStruct((64 * R, 128), jnp.float32),
        grid_spec=pltpu.PrefetchScalarGridSpec(
            num_scalar_prefetch=0,
            grid=(1,),
            in_specs=[pl.BlockSpec(a.shape, lambda i: (0, 0)) for a in operands],
            out_specs=pl.BlockSpec((64 * R, 128), lambda i: (0, 0)),
            scratch_shapes=[
                pltpu.VMEM((4 * R, 256), jnp.bfloat16),    # decoder act 1
                pltpu.VMEM((16 * R, 128), jnp.bfloat16),   # decoder act 2
                pltpu.VMEM((64 * R, 128), jnp.bfloat16),   # decoder act 3 (64 real + 64 zero cols)
            ],
        ),
        compiler_params=pltpu.CompilerParams(
            dimension_semantics=("arbitrary",),
            vmem_limit_bytes=VMEM_LIMIT,
        ),
    )(*operands)


# =============================================================================
# parameters (synthetic, matching the nn.Module shapes) + kernel-ready prep
# =============================================================================
def _fold_bn(conv_b, gamma, beta, rmean, rvar):
    scale = gamma / jnp.sqrt(rvar + EPS)
    bias = beta + (conv_b - rmean) * scale
    return scale, bias


def init_params(key):
    enc_io = [(3, 64), (64, 128), (128, 256), (256, 512)]
    dec_io = [(512, 256), (256, 128), (128, 64), (64, 3)]
    keys = iter(jax.random.split(key, 64))
    enc, dec = [], []
    for cin, cout in enc_io:
        w = jax.random.normal(next(keys), (cout, cin, 3, 3), jnp.float32) / jnp.sqrt(9.0 * cin)
        b = 0.01 * jax.random.normal(next(keys), (cout,), jnp.float32)
        gamma = 1.0 + 0.1 * jax.random.normal(next(keys), (cout,), jnp.float32)
        beta = 0.1 * jax.random.normal(next(keys), (cout,), jnp.float32)
        rmean = jnp.zeros((cout,), jnp.float32)    # fresh running stats (eval mode)
        rvar = jnp.ones((cout,), jnp.float32)
        enc.append((w, b, gamma, beta, rmean, rvar))
    for i, (cin, cout) in enumerate(dec_io):
        w = jax.random.normal(next(keys), (cin, cout, 2, 2), jnp.float32) / jnp.sqrt(4.0 * cin)
        b = 0.01 * jax.random.normal(next(keys), (cout,), jnp.float32)
        if i < 3:
            gamma = 1.0 + 0.1 * jax.random.normal(next(keys), (cout,), jnp.float32)
            beta = 0.1 * jax.random.normal(next(keys), (cout,), jnp.float32)
            bn = (gamma, beta, jnp.zeros((cout,), jnp.float32), jnp.ones((cout,), jnp.float32))
        else:
            bn = None
        dec.append((w, b, bn))
    return {"enc": enc, "dec": dec}


def prepare_params(raw):
    """Fold eval-mode BN into the conv weights/bias and re-layout for the kernels."""
    enc = []
    for w, b, gamma, beta, rmean, rvar in raw["enc"]:
        scale, bias = _fold_bn(b, gamma, beta, rmean, rvar)
        cout = w.shape[0]
        wf = w * scale[:, None, None, None]                       # fold scale into W
        wt = jnp.transpose(wf, (2, 3, 1, 0)).reshape(-1, cout)    # (9*Cin, Cout)
        enc.append((wt.astype(jnp.bfloat16), bias.reshape(1, cout).astype(jnp.float32)))

    dec = []
    for i, (w, b, bn) in enumerate(raw["dec"]):
        cin, cout = w.shape[0], w.shape[1]
        if bn is not None:
            gamma, beta, rmean, rvar = bn
            scale, bias = _fold_bn(b, gamma, beta, rmean, rvar)
        else:
            scale, bias = jnp.ones((cout,), jnp.float32), b
        wf = w * scale[None, :, None, None]
        wt = jnp.transpose(wf, (0, 2, 3, 1))                      # (Cin, 2, 2, Cout)
        if cout < 128 and i < 3:                                  # pad channel dim to 128 lanes
            wt = jnp.pad(wt, ((0, 0), (0, 0), (0, 0), (0, 128 - cout)))
            bias = jnp.pad(bias, (0, 128 - cout))
            cout = 128
        wt = wt.reshape(cin, 4 * cout)                            # col index = (2*dy+dx)*Cout + c
        bt = jnp.tile(bias, 4)
        if i == 3:                                                # last layer: 12 real cols -> 128
            wt = jnp.pad(wt, ((0, 128 - cin), (0, 128 - 4 * cout)))
            bt = jnp.pad(bt, (0, 128 - 4 * cout))
        dec.append((wt.astype(jnp.bfloat16), bt.reshape(1, -1).astype(jnp.float32)))
    return {"enc": enc, "dec": dec}


# =============================================================================
# forward
# =============================================================================
def conv_autoencoder_forward(params, x_nchw):
    x = jnp.transpose(x_nchw, (0, 2, 3, 1)).astype(jnp.bfloat16)   # NCHW -> NHWC, bf16
    N = x.shape[0]

    for wt, b in params["enc"][:3]:                                 # encoder layers 1-3
        x = conv_bn_relu_pool(x, wt, b)

    out = encode4_and_decode(x, params["enc"][3], params["dec"])    # enc-4 + full decoder

    # out: (256*N, 128) f32, rows (d3y,d3x, d2y,d2x, d1y,d1x, n, y0, x0), cols (d4y,d4x,c) in [:12]
    o = out[:, :12]
    o = o.reshape(2, 2, 2, 2, 2, 2, N, 2, 2, 2, 2, 3)
    # -> (n, c, y0, d1y, d2y, d3y, d4y, x0, d1x, d2x, d3x, d4x)
    o = o.transpose(6, 11, 7, 4, 2, 0, 9, 8, 5, 3, 1, 10)
    return o.reshape(N, 3, 32, 32)


# =============================================================================
# main
# =============================================================================
if __name__ == "__main__":
    key = jax.random.PRNGKey(0)
    kx, kp = jax.random.split(key)
    x = jax.random.uniform(kx, (2, 3, 32, 32), jnp.float32)   # NCHW, like the PyTorch module
    params = prepare_params(init_params(kp))

    fwd = jax.jit(functools.partial(conv_autoencoder_forward, params))
    y = jax.block_until_ready(fwd(x))

    assert y.shape == (2, 3, 32, 32), y.shape
    assert bool(jnp.all((y >= 0.0) & (y <= 1.0))), "sigmoid output out of range"
    print("KERNEL_OK")
</pallas_src>

<mosaic_0001>
module attributes {stable_mosaic.version = 11 : i64} {
  func.func @_enc_kernel(%arg0: i32, %arg1: memref<2048x27xbf16, #tpu.memory_space<vmem>>, %arg2: memref<27x64xbf16, #tpu.memory_space<vmem>>, %arg3: memref<1x64xf32, #tpu.memory_space<vmem>>, %arg4: memref<512x64xbf16, #tpu.memory_space<vmem>>) attributes {dimension_semantics = [#tpu.dimension_semantics<arbitrary>], iteration_bounds = array<i64: 1>, scalar_prefetch = 0 : i64, scratch_operands = 0 : i64, tpu.core_type = #tpu.core_type<tc>, window_params = [{pipeline_mode = #tpu.pipeline_mode<synchronous>, transform_indices = @transform_0, window_bounds = array<i64: 2048, 27>}, {pipeline_mode = #tpu.pipeline_mode<synchronous>, transform_indices = @transform_1, window_bounds = array<i64: 27, 64>}, {pipeline_mode = #tpu.pipeline_mode<synchronous>, transform_indices = @transform_2, window_bounds = array<i64: 1, 64>}, {pipeline_mode = #tpu.pipeline_mode<synchronous>, transform_indices = @transform_3, window_bounds = array<i64: 512, 64>}]} {
    %c0 = arith.constant 0 : index
    %c0_0 = arith.constant 0 : index
    %0 = vector.load %arg1[%c0, %c0_0] : memref<2048x27xbf16, #tpu.memory_space<vmem>>, vector<2048x27xbf16>
    %c0_1 = arith.constant 0 : index
    %c0_2 = arith.constant 0 : index
    %1 = vector.load %arg2[%c0_1, %c0_2] : memref<27x64xbf16, #tpu.memory_space<vmem>>, vector<27x64xbf16>
    %cst = arith.constant dense<0.000000e+00> : vector<2048x64xf32>
    %2 = tpu.matmul %0, %1, %cst {dimension_numbers = #tpu.dot_dimension_numbers<[1], [0], [0], [1], [0, 0, 1, 1], [], []>} : vector<2048x27xbf16>, vector<27x64xbf16>, vector<2048x64xf32> -> vector<2048x64xf32>
    %3 = vector.extract_strided_slice %2 {offsets = [0, 0], sizes = [512, 64], strides = [1, 1]} : vector<2048x64xf32> to vector<512x64xf32>
    %4 = vector.extract_strided_slice %2 {offsets = [512, 0], sizes = [512, 64], strides = [1, 1]} : vector<2048x64xf32> to vector<512x64xf32>
    %5 = arith.maximumf %3, %4 : vector<512x64xf32>
    %6 = vector.extract_strided_slice %2 {offsets = [1024, 0], sizes = [512, 64], strides = [1, 1]} : vector<2048x64xf32> to vector<512x64xf32>
    %7 = vector.extract_strided_slice %2 {offsets = [1536, 0], sizes = [512, 64], strides = [1, 1]} : vector<2048x64xf32> to vector<512x64xf32>
    %8 = arith.maximumf %6, %7 : vector<512x64xf32>
    %9 = arith.maximumf %5, %8 : vector<512x64xf32>
    %c0_3 = arith.constant 0 : index
    %c0_4 = arith.constant 0 : index
    %10 = vector.load %arg3[%c0_3, %c0_4] : memref<1x64xf32, #tpu.memory_space<vmem>>, vector<1x64xf32>
    %11 = vector.broadcast %10 : vector<1x64xf32> to vector<512x64xf32>
    %12 = arith.addf %9, %11 : vector<512x64xf32>
    %cst_5 = arith.constant 0.000000e+00 : f32
    %13 = vector.broadcast %cst_5 : f32 to vector<512x64xf32>
    %14 = arith.maximumf %12, %13 : vector<512x64xf32>
    %15 = arith.truncf %14 : vector<512x64xf32> to vector<512x64xbf16>
    %c0_6 = arith.constant 0 : index
    %c0_7 = arith.constant 0 : index
    %16 = vector.load %arg4[%c0_6, %c0_7] : memref<512x64xbf16, #tpu.memory_space<vmem>>, vector<512x64xbf16>
    tpu.vector_store %arg4[%c0_6, %c0_7], %15 {strides = array<i32>} : memref<512x64xbf16, #tpu.memory_space<vmem>>, vector<512x64xbf16>,
    return
  }
  func.func @transform_0(%arg0: i32) -> (i32, i32) {
    %c0_i32 = arith.constant 0 : i32
    %c0_i32_0 = arith.constant 0 : i32
    %c0_i32_1 = arith.constant 0 : i32
    return %c0_i32, %c0_i32_0 : i32, i32
  }
  func.func @transform_1(%arg0: i32) -> (i32, i32) {
    %c0_i32 = arith.constant 0 : i32
    %c0_i32_0 = arith.constant 0 : i32
    %c0_i32_1 = arith.constant 0 : i32
    return %c0_i32, %c0_i32_0 : i32, i32
  }
  func.func @transform_2(%arg0: i32) -> (i32, i32) {
    %c0_i32 = arith.constant 0 : i32
    %c0_i32_0 = arith.constant 0 : i32
    %c0_i32_1 = arith.constant 0 : i32
    return %c0_i32, %c0_i32_0 : i32, i32
  }
  func.func @transform_3(%arg0: i32) -> (i32, i32) {
    %c0_i32 = arith.constant 0 : i32
    %c0_i32_0 = arith.constant 0 : i32
    %c0_i32_1 = arith.constant 0 : i32
    return %c0_i32, %c0_i32_0 : i32, i32
  }
}

module attributes {stable_mosaic.version = 11 : i64} {
  func.func @_enc_kernel(%arg0: i32, %arg1: memref<512x576xbf16, #tpu.memory_space<vmem>>, %arg2: memref<576x128xbf16, #tpu.memory_space<vmem>>, %arg3: memref<1x128xf32, #tpu.memory_space<vmem>>, %arg4: memref<128x128xbf16, #tpu.memory_space<vmem>>) attributes {dimension_semantics = [#tpu.dimension_semantics<arbitrary>], iteration_bounds = array<i64: 1>, scalar_prefetch = 0 : i64, scratch_operands = 0 : i64, tpu.core_type = #tpu.core_type<tc>, window_params = [{pipeline_mode = #tpu.pipeline_mode<synchronous>, transform_indices = @transform_0, window_bounds = array<i64: 512, 576>}, {pipeline_mode = #tpu.pipeline_mode<synchronous>, transform_indices = @transform_1, window_bounds = array<i64: 576, 128>}, {pipeline_mode = #tpu.pipeline_mode<synchronous>, transform_indices = @transform_2, window_bounds = array<i64: 1, 128>}, {pipeline_mode = #tpu.pipeline_mode<synchronous>, transform_indices = @transform_3, window_bounds = array<i64: 128, 128>}]} {
    %c0 = arith.constant 0 : index
    %c0_0 = arith.constant 0 : index
    %0 = vector.load %arg1[%c0, %c0_0] : memref<512x576xbf16, #tpu.memory_space<vmem>>, vector<512x576xbf16>
    %c0_1 = arith.constant 0 : index
    %c0_2 = arith.constant 0 : index
    %1 = vector.load %arg2[%c0_1, %c0_2] : memref<576x128xbf16, #tpu.memory_space<vmem>>, vector<576x128xbf16>
    %cst = arith.constant dense<0.000000e+00> : vector<512x128xf32>
    %2 = tpu.matmul %0, %1, %cst {dimension_numbers = #tpu.dot_dimension_numbers<[1], [0], [0], [1], [0, 0, 1, 1], [], []>} : vector<512x576xbf16>, vector<576x128xbf16>, vector<512x128xf32> -> vector<512x128xf32>
    %3 = vector.extract_strided_slice %2 {offsets = [0, 0], sizes = [128, 128], strides = [1, 1]} : vector<512x128xf32> to vector<128x128xf32>
    %4 = vector.extract_strided_slice %2 {offsets = [128, 0], sizes = [128, 128], strides = [1, 1]} : vector<512x128xf32> to vector<128x128xf32>
    %5 = arith.maximumf %3, %4 : vector<128x128xf32>
    %6 = vector.extract_strided_slice %2 {offsets = [256, 0], sizes = [128, 128], strides = [1, 1]} : vector<512x128xf32> to vector<128x128xf32>
    %7 = vector.extract_strided_slice %2 {offsets = [384, 0], sizes = [128, 128], strides = [1, 1]} : vector<512x128xf32> to vector<128x128xf32>
    %8 = arith.maximumf %6, %7 : vector<128x128xf32>
    %9 = arith.maximumf %5, %8 : vector<128x128xf32>
    %c0_3 = arith.constant 0 : index
    %c0_4 = arith.constant 0 : index
    %10 = vector.load %arg3[%c0_3, %c0_4] : memref<1x128xf32, #tpu.memory_space<vmem>>, vector<1x128xf32>
    %11 = vector.broadcast %10 : vector<1x128xf32> to vector<128x128xf32>
    %12 = arith.addf %9, %11 : vector<128x128xf32>
    %cst_5 = arith.constant 0.000000e+00 : f32
    %13 = vector.broadcast %cst_5 : f32 to vector<128x128xf32>
    %14 = arith.maximumf %12, %13 : vector<128x128xf32>
    %15 = arith.truncf %14 : vector<128x128xf32> to vector<128x128xbf16>
    %c0_6 = arith.constant 0 : index
    %c0_7 = arith.constant 0 : index
    %16 = vector.load %arg4[%c0_6, %c0_7] : memref<128x128xbf16, #tpu.memory_space<vmem>>, vector<128x128xbf16>
    tpu.vector_store %arg4[%c0_6, %c0_7], %15 {strides = array<i32>} : memref<128x128xbf16, #tpu.memory_space<vmem>>, vector<128x128xbf16>,
    return
  }
  func.func @transform_0(%arg0: i32) -> (i32, i32) {
    %c0_i32 = arith.constant 0 : i32
    %c0_i32_0 = arith.constant 0 : i32
    %c0_i32_1 = arith.constant 0 : i32
    return %c0_i32, %c0_i32_0 : i32, i32
  }
  func.func @transform_1(%arg0: i32) -> (i32, i32) {
    %c0_i32 = arith.constant 0 : i32
    %c0_i32_0 = arith.constant 0 : i32
    %c0_i32_1 = arith.constant 0 : i32
    return %c0_i32, %c0_i32_0 : i32, i32
  }
  func.func @transform_2(%arg0: i32) -> (i32, i32) {
    %c0_i32 = arith.constant 0 : i32
    %c0_i32_0 = arith.constant 0 : i32
    %c0_i32_1 = arith.constant 0 : i32
    return %c0_i32, %c0_i32_0 : i32, i32
  }
  func.func @transform_3(%arg0: i32) -> (i32, i32) {
    %c0_i32 = arith.constant 0 : i32
    %c0_i32_0 = arith.constant 0 : i32
    %c0_i32_1 = arith.constant 0 : i32
    return %c0_i32, %c0_i32_0 : i32, i32
  }
}

module attributes {stable_mosaic.version = 11 : i64} {
  func.func @_enc_kernel(%arg0: i32, %arg1: memref<128x1152xbf16, #tpu.memory_space<vmem>>, %arg2: memref<1152x256xbf16, #tpu.memory_space<vmem>>, %arg3: memref<1x256xf32, #tpu.memory_space<vmem>>, %arg4: memref<32x256xbf16, #tpu.memory_space<vmem>>) attributes {dimension_semantics = [#tpu.dimension_semantics<arbitrary>], iteration_bounds = array<i64: 1>, scalar_prefetch = 0 : i64, scratch_operands = 0 : i64, tpu.core_type = #tpu.core_type<tc>, window_params = [{pipeline_mode = #tpu.pipeline_mode<synchronous>, transform_indices = @transform_0, window_bounds = array<i64: 128, 1152>}, {pipeline_mode = #tpu.pipeline_mode<synchronous>, transform_indices = @transform_1, window_bounds = array<i64: 1152, 256>}, {pipeline_mode = #tpu.pipeline_mode<synchronous>, transform_indices = @transform_2, window_bounds = array<i64: 1, 256>}, {pipeline_mode = #tpu.pipeline_mode<synchronous>, transform_indices = @transform_3, window_bounds = array<i64: 32, 256>}]} {
    %c0 = arith.constant 0 : index
    %c0_0 = arith.constant 0 : index
    %0 = vector.load %arg1[%c0, %c0_0] : memref<128x1152xbf16, #tpu.memory_space<vmem>>, vector<128x1152xbf16>
    %c0_1 = arith.constant 0 : index
    %c0_2 = arith.constant 0 : index
    %1 = vector.load %arg2[%c0_1, %c0_2] : memref<1152x256xbf16, #tpu.memory_space<vmem>>, vector<1152x256xbf16>
    %cst = arith.constant dense<0.000000e+00> : vector<128x256xf32>
    %2 = tpu.matmul %0, %1, %cst {dimension_numbers = #tpu.dot_dimension_numbers<[1], [0], [0], [1], [0, 0, 1, 1], [], []>} : vector<128x1152xbf16>, vector<1152x256xbf16>, vector<128x256xf32> -> vector<128x256xf32>
    %3 = vector.extract_strided_slice %2 {offsets = [0, 0], sizes = [32, 256], strides = [1, 1]} : vector<128x256xf32> to vector<32x256xf32>
    %4 = vector.extract_strided_slice %2 {offsets = [32, 0], sizes = [32, 256], strides = [1, 1]} : vector<128x256xf32> to vector<32x256xf32>
    %5 = arith.maximumf %3, %4 : vector<32x256xf32>
    %6 = vector.extract_strided_slice %2 {offsets = [64, 0], sizes = [32, 256], strides = [1, 1]} : vector<128x256xf32> to vector<32x256xf32>
    %7 = vector.extract_strided_slice %2 {offsets = [96, 0], sizes = [32, 256], strides = [1, 1]} : vector<128x256xf32> to vector<32x256xf32>
    %8 = arith.maximumf %6, %7 : vector<32x256xf32>
    %9 = arith.maximumf %5, %8 : vector<32x256xf32>
    %c0_3 = arith.constant 0 : index
    %c0_4 = arith.constant 0 : index
    %10 = vector.load %arg3[%c0_3, %c0_4] : memref<1x256xf32, #tpu.memory_space<vmem>>, vector<1x256xf32>
    %11 = vector.broadcast %10 : vector<1x256xf32> to vector<32x256xf32>
    %12 = arith.addf %9, %11 : vector<32x256xf32>
    %cst_5 = arith.constant 0.000000e+00 : f32
    %13 = vector.broadcast %cst_5 : f32 to vector<32x256xf32>
    %14 = arith.maximumf %12, %13 : vector<32x256xf32>
    %15 = arith.truncf %14 : vector<32x256xf32> to vector<32x256xbf16>
    %c0_6 = arith.constant 0 : index
    %c0_7 = arith.constant 0 : index
    %16 = vector.load %arg4[%c0_6, %c0_7] : memref<32x256xbf16, #tpu.memory_space<vmem>>, vector<32x256xbf16>
    tpu.vector_store %arg4[%c0_6, %c0_7], %15 {strides = array<i32>} : memref<32x256xbf16, #tpu.memory_space<vmem>>, vector<32x256xbf16>,
    return
  }
  func.func @transform_0(%arg0: i32) -> (i32, i32) {
    %c0_i32 = arith.constant 0 : i32
    %c0_i32_0 = arith.constant 0 : i32
    %c0_i32_1 = arith.constant 0 : i32
    return %c0_i32, %c0_i32_0 : i32, i32
  }
  func.func @transform_1(%arg0: i32) -> (i32, i32) {
    %c0_i32 = arith.constant 0 : i32
    %c0_i32_0 = arith.constant 0 : i32
    %c0_i32_1 = arith.constant 0 : i32
    return %c0_i32, %c0_i32_0 : i32, i32
  }
  func.func @transform_2(%arg0: i32) -> (i32, i32) {
    %c0_i32 = arith.constant 0 : i32
    %c0_i32_0 = arith.constant 0 : i32
    %c0_i32_1 = arith.constant 0 : i32
    return %c0_i32, %c0_i32_0 : i32, i32
  }
  func.func @transform_3(%arg0: i32) -> (i32, i32) {
    %c0_i32 = arith.constant 0 : i32
    %c0_i32_0 = arith.constant 0 : i32
    %c0_i32_1 = arith.constant 0 : i32
    return %c0_i32, %c0_i32_0 : i32, i32
  }
}

module attributes {stable_mosaic.version = 11 : i64} {
  func.func @_tail_kernel(%arg0: i32, %arg1: memref<32x2304xbf16, #tpu.memory_space<vmem>>, %arg2: memref<2304x512xbf16, #tpu.memory_space<vmem>>, %arg3: memref<1x512xf32, #tpu.memory_space<vmem>>, %arg4: memref<512x1024xbf16, #tpu.memory_space<vmem>>, %arg5: memref<1x1024xf32, #tpu.memory_space<vmem>>, %arg6: memref<256x512xbf16, #tpu.memory_space<vmem>>, %arg7: memref<1x512xf32, #tpu.memory_space<vmem>>, %arg8: memref<128x512xbf16, #tpu.memory_space<vmem>>, %arg9: memref<1x512xf32, #tpu.memory_space<vmem>>, %arg10: memref<128x128xbf16, #tpu.memory_space<vmem>>, %arg11: memref<1x128xf32, #tpu.memory_space<vmem>>, %arg12: memref<512x128xf32, #tpu.memory_space<vmem>>, %arg13: memref<32x256xbf16, #tpu.memory_space<vmem>>, %arg14: memref<128x128xbf16, #tpu.memory_space<vmem>>, %arg15: memref<512x128xbf16, #tpu.memory_space<vmem>>) attributes {dimension_semantics = [#tpu.dimension_semantics<arbitrary>], iteration_bounds = array<i64: 1>, scalar_prefetch = 0 : i64, scratch_operands = 3 : i64, tpu.core_type = #tpu.core_type<tc>, window_params = [{pipeline_mode = #tpu.pipeline_mode<synchronous>, transform_indices = @transform_0, window_bounds = array<i64: 32, 2304>}, {pipeline_mode = #tpu.pipeline_mode<synchronous>, transform_indices = @transform_1, window_bounds = array<i64: 2304, 512>}, {pipeline_mode = #tpu.pipeline_mode<synchronous>, transform_indices = @transform_2, window_bounds = array<i64: 1, 512>}, {pipeline_mode = #tpu.pipeline_mode<synchronous>, transform_indices = @transform_3, window_bounds = array<i64: 512, 1024>}, {pipeline_mode = #tpu.pipeline_mode<synchronous>, transform_indices = @transform_4, window_bounds = array<i64: 1, 1024>}, {pipeline_mode = #tpu.pipeline_mode<synchronous>, transform_indices = @transform_5, window_bounds = array<i64: 256, 512>}, {pipeline_mode = #tpu.pipeline_mode<synchronous>, transform_indices = @transform_6, window_bounds = array<i64: 1, 512>}, {pipeline_mode = #tpu.pipeline_mode<synchronous>, transform_indices = @transform_7, window_bounds = array<i64: 128, 512>}, {pipeline_mode = #tpu.pipeline_mode<synchronous>, transform_indices = @transform_8, window_bounds = array<i64: 1, 512>}, {pipeline_mode = #tpu.pipeline_mode<synchronous>, transform_indices = @transform_9, window_bounds = array<i64: 128, 128>}, {pipeline_mode = #tpu.pipeline_mode<synchronous>, transform_indices = @transform_10, window_bounds = array<i64: 1, 128>}, {pipeline_mode = #tpu.pipeline_mode<synchronous>, transform_indices = @transform_11, window_bounds = array<i64: 512, 128>}]} {
    %c0 = arith.constant 0 : index
    %c0_0 = arith.constant 0 : index
    %0 = vector.load %arg1[%c0, %c0_0] : memref<32x2304xbf16, #tpu.memory_space<vmem>>, vector<32x2304xbf16>
    %c0_1 = arith.constant 0 : index
    %c0_2 = arith.constant 0 : index
    %1 = vector.load %arg2[%c0_1, %c0_2] : memref<2304x512xbf16, #tpu.memory_space<vmem>>, vector<2304x512xbf16>
    %cst = arith.constant dense<0.000000e+00> : vector<32x512xf32>
    %2 = tpu.matmul %0, %1, %cst {dimension_numbers = #tpu.dot_dimension_numbers<[1], [0], [0], [1], [0, 0, 1, 1], [], []>} : vector<32x2304xbf16>, vector<2304x512xbf16>, vector<32x512xf32> -> vector<32x512xf32>
    %3 = vector.extract_strided_slice %2 {offsets = [0, 0], sizes = [8, 512], strides = [1, 1]} : vector<32x512xf32> to vector<8x512xf32>
    %4 = vector.extract_strided_slice %2 {offsets = [8, 0], sizes = [8, 512], strides = [1, 1]} : vector<32x512xf32> to vector<8x512xf32>
    %5 = arith.maximumf %3, %4 : vector<8x512xf32>
    %6 = vector.extract_strided_slice %2 {offsets = [16, 0], sizes = [8, 512], strides = [1, 1]} : vector<32x512xf32> to vector<8x512xf32>
    %7 = vector.extract_strided_slice %2 {offsets = [24, 0], sizes = [8, 512], strides = [1, 1]} : vector<32x512xf32> to vector<8x512xf32>
    %8 = arith.maximumf %6, %7 : vector<8x512xf32>
    %9 = arith.maximumf %5, %8 : vector<8x512xf32>
    %c0_3 = arith.constant 0 : index
    %c0_4 = arith.constant 0 : index
    %10 = vector.load %arg3[%c0_3, %c0_4] : memref<1x512xf32, #tpu.memory_space<vmem>>, vector<1x512xf32>
    %11 = vector.broadcast %10 : vector<1x512xf32> to vector<8x512xf32>
    %12 = arith.addf %9, %11 : vector<8x512xf32>
    %cst_5 = arith.constant 0.000000e+00 : f32
    %13 = vector.broadcast %cst_5 : f32 to vector<8x512xf32>
    %14 = arith.maximumf %12, %13 : vector<8x512xf32>
    %15 = arith.truncf %14 : vector<8x512xf32> to vector<8x512xbf16>
    %c0_6 = arith.constant 0 : index
    %c0_7 = arith.constant 0 : index
    %16 = vector.load %arg4[%c0_6, %c0_7] : memref<512x1024xbf16, #tpu.memory_space<vmem>>, vector<512x1024xbf16>
    %cst_8 = arith.constant dense<0.000000e+00> : vector<8x1024xf32>
    %17 = tpu.matmul %15, %16, %cst_8 {dimension_numbers = #tpu.dot_dimension_numbers<[1], [0], [0], [1], [0, 0, 1, 1], [], []>} : vector<8x512xbf16>, vector<512x1024xbf16>, vector<8x1024xf32> -> vector<8x1024xf32>
    %c0_9 = arith.constant 0 : index
    %c0_10 = arith.constant 0 : index
    %18 = vector.load %arg5[%c0_9, %c0_10] : memref<1x1024xf32, #tpu.memory_space<vmem>>, vector<1x1024xf32>
    %19 = vector.broadcast %18 : vector<1x1024xf32> to vector<8x1024xf32>
    %20 = arith.addf %17, %19 : vector<8x1024xf32>
    %cst_11 = arith.constant 0.000000e+00 : f32
    %21 = vector.broadcast %cst_11 : f32 to vector<8x1024xf32>
    %22 = arith.maximumf %20, %21 : vector<8x1024xf32>
    %23 = arith.truncf %22 : vector<8x1024xf32> to vector<8x1024xbf16>
    %24 = vector.extract_strided_slice %23 {offsets = [0, 0], sizes = [8, 256], strides = [1, 1]} : vector<8x1024xbf16> to vector<8x256xbf16>
    %c0_12 = arith.constant 0 : index
    %c0_13 = arith.constant 0 : index
    %25 = vector.load %arg13[%c0_12, %c0_13] : memref<32x256xbf16, #tpu.memory_space<vmem>>, vector<8x256xbf16>
    tpu.vector_store %arg13[%c0_12, %c0_13], %24 {strides = array<i32>} : memref<32x256xbf16, #tpu.memory_space<vmem>>, vector<8x256xbf16>,
    %26 = vector.extract_strided_slice %23 {offsets = [0, 256], sizes = [8, 256], strides = [1, 1]} : vector<8x1024xbf16> to vector<8x256xbf16>
    %c8 = arith.constant 8 : index
    %c0_14 = arith.constant 0 : index
    %27 = vector.load %arg13[%c8, %c0_14] : memref<32x256xbf16, #tpu.memory_space<vmem>>, vector<8x256xbf16>
    tpu.vector_store %arg13[%c8, %c0_14], %26 {strides = array<i32>} : memref<32x256xbf16, #tpu.memory_space<vmem>>, vector<8x256xbf16>,
    %28 = vector.extract_strided_slice %23 {offsets = [0, 512], sizes = [8, 256], strides = [1, 1]} : vector<8x1024xbf16> to vector<8x256xbf16>
    %c16 = arith.constant 16 : index
    %c0_15 = arith.constant 0 : index
    %29 = vector.load %arg13[%c16, %c0_15] : memref<32x256xbf16, #tpu.memory_space<vmem>>, vector<8x256xbf16>
    tpu.vector_store %arg13[%c16, %c0_15], %28 {strides = array<i32>} : memref<32x256xbf16, #tpu.memory_space<vmem>>, vector<8x256xbf16>,
    %30 = vector.extract_strided_slice %23 {offsets = [0, 768], sizes = [8, 256], strides = [1, 1]} : vector<8x1024xbf16> to vector<8x256xbf16>
    %c24 = arith.constant 24 : index
    %c0_16 = arith.constant 0 : index
    %31 = vector.load %arg13[%c24, %c0_16] : memref<32x256xbf16, #tpu.memory_space<vmem>>, vector<8x256xbf16>
    tpu.vector_store %arg13[%c24, %c0_16], %30 {strides = array<i32>} : memref<32x256xbf16, #tpu.memory_space<vmem>>, vector<8x256xbf16>,
    %c0_17 = arith.constant 0 : index
    %c0_18 = arith.constant 0 : index
    %32 = vector.load %arg13[%c0_17, %c0_18] : memref<32x256xbf16, #tpu.memory_space<vmem>>, vector<32x256xbf16>
    %c0_19 = arith.constant 0 : index
    %c0_20 = arith.constant 0 : index
    %33 = vector.load %arg6[%c0_19, %c0_20] : memref<256x512xbf16, #tpu.memory_space<vmem>>, vector<256x512xbf16>
    %cst_21 = arith.constant dense<0.000000e+00> : vector<32x512xf32>
    %34 = tpu.matmul %32, %33, %cst_21 {dimension_numbers = #tpu.dot_dimension_numbers<[1], [0], [0], [1], [0, 0, 1, 1], [], []>} : vector<32x256xbf16>, vector<256x512xbf16>, vector<32x512xf32> -> vector<32x512xf32>
    %c0_22 = arith.constant 0 : index
    %c0_23 = arith.constant 0 : index
    %35 = vector.load %arg7[%c0_22, %c0_23] : memref<1x512xf32, #tpu.memory_space<vmem>>, vector<1x512xf32>
    %36 = vector.broadcast %35 : vector<1x512xf32> to vector<32x512xf32>
    %37 = arith.addf %34, %36 : vector<32x512xf32>
    %cst_24 = arith.constant 0.000000e+00 : f32
    %38 = vector.broadcast %cst_24 : f32 to vector<32x512xf32>
    %39 = arith.maximumf %37, %38 : vector<32x512xf32>
    %40 = arith.truncf %39 : vector<32x512xf32> to vector<32x512xbf16>
    %41 = vector.extract_strided_slice %40 {offsets = [0, 0], sizes = [32, 128], strides = [1, 1]} : vector<32x512xbf16> to vector<32x128xbf16>
    %c0_25 = arith.constant 0 : index
    %c0_26 = arith.constant 0 : index
    %42 = vector.load %arg14[%c0_25, %c0_26] : memref<128x128xbf16, #tpu.memory_space<vmem>>, vector<32x128xbf16>
    tpu.vector_store %arg14[%c0_25, %c0_26], %41 {strides = array<i32>} : memref<128x128xbf16, #tpu.memory_space<vmem>>, vector<32x128xbf16>,
    %43 = vector.extract_strided_slice %40 {offsets = [0, 128], sizes = [32, 128], strides = [1, 1]} : vector<32x512xbf16> to vector<32x128xbf16>
    %c32 = arith.constant 32 : index
    %c0_27 = arith.constant 0 : index
    %44 = vector.load %arg14[%c32, %c0_27] : memref<128x128xbf16, #tpu.memory_space<vmem>>, vector<32x128xbf16>
    tpu.vector_store %arg14[%c32, %c0_27], %43 {strides = array<i32>} : memref<128x128xbf16, #tpu.memory_space<vmem>>, vector<32x128xbf16>,
    %45 = vector.extract_strided_slice %40 {offsets = [0, 256], sizes = [32, 128], strides = [1, 1]} : vector<32x512xbf16> to vector<32x128xbf16>
    %c64 = arith.constant 64 : index
    %c0_28 = arith.constant 0 : index
    %46 = vector.load %arg14[%c64, %c0_28] : memref<128x128xbf16, #tpu.memory_space<vmem>>, vector<32x128xbf16>
    tpu.vector_store %arg14[%c64, %c0_28], %45 {strides = array<i32>} : memref<128x128xbf16, #tpu.memory_space<vmem>>, vector<32x128xbf16>,
    %47 = vector.extract_strided_slice %40 {offsets = [0, 384], sizes = [32, 128], strides = [1, 1]} : vector<32x512xbf16> to vector<32x128xbf16>
    %c96 = arith.constant 96 : index
    %c0_29 = arith.constant 0 : index
    %48 = vector.load %arg14[%c96, %c0_29] : memref<128x128xbf16, #tpu.memory_space<vmem>>, vector<32x128xbf16>
    tpu.vector_store %arg14[%c96, %c0_29], %47 {strides = array<i32>} : memref<128x128xbf16, #tpu.memory_space<vmem>>, vector<32x128xbf16>,
    %c0_30 = arith.constant 0 : index
    %c0_31 = arith.constant 0 : index
    %49 = vector.load %arg14[%c0_30, %c0_31] : memref<128x128xbf16, #tpu.memory_space<vmem>>, vector<128x128xbf16>
    %c0_32 = arith.constant 0 : index
    %c0_33 = arith.constant 0 : index
    %50 = vector.load %arg8[%c0_32, %c0_33] : memref<128x512xbf16, #tpu.memory_space<vmem>>, vector<128x512xbf16>
    %cst_34 = arith.constant dense<0.000000e+00> : vector<128x512xf32>
    %51 = tpu.matmul %49, %50, %cst_34 {dimension_numbers = #tpu.dot_dimension_numbers<[1], [0], [0], [1], [0, 0, 1, 1], [], []>} : vector<128x128xbf16>, vector<128x512xbf16>, vector<128x512xf32> -> vector<128x512xf32>
    %c0_35 = arith.constant 0 : index
    %c0_36 = arith.constant 0 : index
    %52 = vector.load %arg9[%c0_35, %c0_36] : memref<1x512xf32, #tpu.memory_space<vmem>>, vector<1x512xf32>
    %53 = vector.broadcast %52 : vector<1x512xf32> to vector<128x512xf32>
    %54 = arith.addf %51, %53 : vector<128x512xf32>
    %cst_37 = arith.constant 0.000000e+00 : f32
    %55 = vector.broadcast %cst_37 : f32 to vector<128x512xf32>
    %56 = arith.maximumf %54, %55 : vector<128x512xf32>
    %57 = arith.truncf %56 : vector<128x512xf32> to vector<128x512xbf16>
    %58 = vector.extract_strided_slice %57 {offsets = [0, 0], sizes = [128, 128], strides = [1, 1]} : vector<128x512xbf16> to vector<128x128xbf16>
    %c0_38 = arith.constant 0 : index
    %c0_39 = arith.constant 0 : index
    %59 = vector.load %arg15[%c0_38, %c0_39] : memref<512x128xbf16, #tpu.memory_space<vmem>>, vector<128x128xbf16>
    tpu.vector_store %arg15[%c0_38, %c0_39], %58 {strides = array<i32>} : memref<512x128xbf16, #tpu.memory_space<vmem>>, vector<128x128xbf16>,
    %60 = vector.extract_strided_slice %57 {offsets = [0, 128], sizes = [128, 128], strides = [1, 1]} : vector<128x512xbf16> to vector<128x128xbf16>
    %c128 = arith.constant 128 : index
    %c0_40 = arith.constant 0 : index
    %61 = vector.load %arg15[%c128, %c0_40] : memref<512x128xbf16, #tpu.memory_space<vmem>>, vector<128x128xbf16>
    tpu.vector_store %arg15[%c128, %c0_40], %60 {strides = array<i32>} : memref<512x128xbf16, #tpu.memory_space<vmem>>, vector<128x128xbf16>,
    %62 = vector.extract_strided_slice %57 {offsets = [0, 256], sizes = [128, 128], strides = [1, 1]} : vector<128x512xbf16> to vector<128x128xbf16>
    %c256 = arith.constant 256 : index
    %c0_41 = arith.constant 0 : index
    %63 = vector.load %arg15[%c256, %c0_41] : memref<512x128xbf16, #tpu.memory_space<vmem>>, vector<128x128xbf16>
    tpu.vector_store %arg15[%c256, %c0_41], %62 {strides = array<i32>} : memref<512x128xbf16, #tpu.memory_space<vmem>>, vector<128x128xbf16>,
    %64 = vector.extract_strided_slice %57 {offsets = [0, 384], sizes = [128, 128], strides = [1, 1]} : vector<128x512xbf16> to vector<128x128xbf16>
    %c384 = arith.constant 384 : index
    %c0_42 = arith.constant 0 : index
    %65 = vector.load %arg15[%c384, %c0_42] : memref<512x128xbf16, #tpu.memory_space<vmem>>, vector<128x128xbf16>
    tpu.vector_store %arg15[%c384, %c0_42], %64 {strides = array<i32>} : memref<512x128xbf16, #tpu.memory_space<vmem>>, vector<128x128xbf16>,
    %c0_43 = arith.constant 0 : index
    %c0_44 = arith.constant 0 : index
    %66 = vector.load %arg15[%c0_43, %c0_44] : memref<512x128xbf16, #tpu.memory_space<vmem>>, vector<512x128xbf16>
    %c0_45 = arith.constant 0 : index
    %c0_46 = arith.constant 0 : index
    %67 = vector.load %arg10[%c0_45, %c0_46] : memref<128x128xbf16, #tpu.memory_space<vmem>>, vector<128x128xbf16>
    %cst_47 = arith.constant dense<0.000000e+00> : vector<512x128xf32>
    %68 = tpu.matmul %66, %67, %cst_47 {dimension_numbers = #tpu.dot_dimension_numbers<[1], [0], [0], [1], [0, 0, 1, 1], [], []>} : vector<512x128xbf16>, vector<128x128xbf16>, vector<512x128xf32> -> vector<512x128xf32>
    %c0_48 = arith.constant 0 : index
    %c0_49 = arith.constant 0 : index
    %69 = vector.load %arg11[%c0_48, %c0_49] : memref<1x128xf32, #tpu.memory_space<vmem>>, vector<1x128xf32>
    %70 = vector.broadcast %69 : vector<1x128xf32> to vector<512x128xf32>
    %71 = arith.addf %68, %70 : vector<512x128xf32>
    %cst_50 = arith.constant 0.000000e+00 : f32
    %72 = vector.broadcast %cst_50 : f32 to vector<512x128xf32>
    %73 = arith.subf %72, %71 : vector<512x128xf32>
    %74 = math.exp %73 : vector<512x128xf32>
    %cst_51 = arith.constant 1.000000e+00 : f32
    %75 = vector.broadcast %cst_51 : f32 to vector<512x128xf32>
    %76 = arith.addf %75, %74 : vector<512x128xf32>
    %77 = tpu.reciprocal %76 {approx = true} : vector<512x128xf32> -> vector<512x128xf32>
    %cst_52 = arith.constant 1.000000e+00 : f32
    %78 = vector.broadcast %cst_52 : f32 to vector<512x128xf32>
    %79 = arith.minimumf %77, %78 : vector<512x128xf32>
    %cst_53 = arith.constant 0.000000e+00 : f32
    %80 = vector.broadcast %cst_53 : f32 to vector<512x128xf32>
    %81 = arith.maximumf %79, %80 : vector<512x128xf32>
    %c0_54 = arith.constant 0 : index
    %c0_55 = arith.constant 0 : index
    %82 = vector.load %arg12[%c0_54, %c0_55] : memref<512x128xf32, #tpu.memory_space<vmem>>, vector<512x128xf32>
    tpu.vector_store %arg12[%c0_54, %c0_55], %81 {strides = array<i32>} : memref<512x128xf32, #tpu.memory_space<vmem>>, vector<512x128xf32>,
    return
  }
  func.func @transform_0(%arg0: i32) -> (i32, i32) {
    %c0_i32 = arith.constant 0 : i32
    %c0_i32_0 = arith.constant 0 : i32
    %c0_i32_1 = arith.constant 0 : i32
    return %c0_i32, %c0_i32_0 : i32, i32
  }
  func.func @transform_1(%arg0: i32) -> (i32, i32) {
    %c0_i32 = arith.constant 0 : i32
    %c0_i32_0 = arith.constant 0 : i32
    %c0_i32_1 = arith.constant 0 : i32
    return %c0_i32, %c0_i32_0 : i32, i32
  }
  func.func @transform_2(%arg0: i32) -> (i32, i32) {
    %c0_i32 = arith.constant 0 : i32
    %c0_i32_0 = arith.constant 0 : i32
    %c0_i32_1 = arith.constant 0 : i32
    return %c0_i32, %c0_i32_0 : i32, i32
  }
  func.func @transform_3(%arg0: i32) -> (i32, i32) {
    %c0_i32 = arith.constant 0 : i32
    %c0_i32_0 = arith.constant 0 : i32
    %c0_i32_1 = arith.constant 0 : i32
    return %c0_i32, %c0_i32_0 : i32, i32
  }
  func.func @transform_4(%arg0: i32) -> (i32, i32) {
    %c0_i32 = arith.constant 0 : i32
    %c0_i32_0 = arith.constant 0 : i32
    %c0_i32_1 = arith.constant 0 : i32
    return %c0_i32, %c0_i32_0 : i32, i32
  }
  func.func @transform_5(%arg0: i32) -> (i32, i32) {
    %c0_i32 = arith.constant 0 : i32
    %c0_i32_0 = arith.constant 0 : i32
    %c0_i32_1 = arith.constant 0 : i32
    return %c0_i32, %c0_i32_0 : i32, i32
  }
  func.func @transform_6(%arg0: i32) -> (i32, i32) {
    %c0_i32 = arith.constant 0 : i32
    %c0_i32_0 = arith.constant 0 : i32
    %c0_i32_1 = arith.constant 0 : i32
    return %c0_i32, %c0_i32_0 : i32, i32
  }
  func.func @transform_7(%arg0: i32) -> (i32, i32) {
    %c0_i32 = arith.constant 0 : i32
    %c0_i32_0 = arith.constant 0 : i32
    %c0_i32_1 = arith.constant 0 : i32
    return %c0_i32, %c0_i32_0 : i32, i32
  }
  func.func @transform_8(%arg0: i32) -> (i32, i32) {
    %c0_i32 = arith.constant 0 : i32
    %c0_i32_0 = arith.constant 0 : i32
    %c0_i32_1 = arith.constant 0 : i32
    return %c0_i32, %c0_i32_0 : i32, i32
  }
  func.func @transform_9(%arg0: i32) -> (i32, i32) {
    %c0_i32 = arith.constant 0 : i32
    %c0_i32_0 = arith.constant 0 : i32
    %c0_i32_1 = arith.constant 0 : i32
    return %c0_i32, %c0_i32_0 : i32, i32
  }
  func.func @transform_10(%arg0: i32) -> (i32, i32) {
    %c0_i32 = arith.constant 0 : i32
    %c0_i32_0 = arith.constant 0 : i32
    %c0_i32_1 = arith.constant 0 : i32
    return %c0_i32, %c0_i32_0 : i32, i32
  }
  func.func @transform_11(%arg0: i32) -> (i32, i32) {
    %c0_i32 = arith.constant 0 : i32
    %c0_i32_0 = arith.constant 0 : i32
    %c0_i32_1 = arith.constant 0 : i32
    return %c0_i32, %c0_i32_0 : i32, i32
  }
}

</mosaic_0001>

<bundles_post_ra>
// kernel: conv_autoencoder_forward.4
= control target key start
LH: loop header
LB: loop body
LE: loop exit
PB: predicated region body
PF: predicated region fallthrough
CT: control target
= control target key end

     0   :  { %vm1311_vm0 = vcmask 1044480   ;;  %vm1312_vm1 = vcmask 1045504   ;;  %vm926_vm2 = vcmask 220160   ;;  %v3940_v1 = vmov 65535   ;;  %s5183_s1 = inlined_call_operand.vmem [shape: bf16[27,64], index: 1, kind: input, shape index: {}]   ;;  %s5184_s0 = inlined_call_operand.vmem [shape: bf16[2048,27], index: 0, kind: input, shape index: {}]   ;;  %s5185_s2 = inlined_call_operand.vmem [shape: f32[1,64], index: 2, kind: input, shape index: {}]   ;;  %s5186_s3 = inlined_call_operand.vmem [shape: bf16[512,64], index: 3, kind: output, shape index: {}]  }
   0x1   :  { %v3809_v0 = vld [vmem:[%s5183_s1] sm:$0xff]   ;;  %v1313_v2 = vsel %vm1311_vm0, 4294967295, %v3940_v1  ;;  %v3810_v3 = vld [vmem:[%s5183_s1 + $0x8] sm:$0x3f]   ;;  %v3815_v10 = vld [vmem:[%s5184_s0 + $0x10] sm:$0xff]   ;;  %vm2958_vm3 = vcmask 519168  }
   0x2   :  { %3544 = vmatprep.subr.bf16.mxu0 %v3809_v0  ;;  %3804 = vmatprep.subr.bf16.mxu1 %v3809_v0  ;;  %v1314_v4 = vsel %vm1312_vm1, %v1313_v2, 0  ;;  %v3811_v5 = vld [vmem:[%s5184_s0] sm:$0xff]   ;;  %v3813_v8 = vld [vmem:[%s5184_s0 + $0x8] sm:$0xff]   ;;  %v3816_v11 = vld [vmem:[%s5184_s0 + $0x210] sm:$0xff]  }
   0x3   :  { %3545 = vmatpush3.bf16.msra.mxu0 %v3809_v0  ;;  %3806 = vmatpush3.bf16.msra.mxu1 %v3809_v0  ;;  %v1316_v6 = vand.u32 %v3810_v3, %v1314_v4  ;;  %v3812_v7 = vld [vmem:[%s5184_s0 + $0x200] sm:$0xff]   ;;  %v3814_v9 = vld [vmem:[%s5184_s0 + $0x208] sm:$0xff]   ;;  %v3817_v12 = vld [vmem:[%s5184_s0 + $0x18] sm:$0xff]  }
   0x4   :  { %3548 = vmatprep.mubr.msk.bf16.mxu0 %vm926_vm2, %v3811_v5  ;;  %3676 = vmatprep.mubr.msk.bf16.mxu1 %vm926_vm2, %v3812_v7  ;;  %v3818_v13 = vld [vmem:[%s5184_s0 + $0x218] sm:$0xff]   ;;  %v3819_v14 = vld [vmem:[%s5184_s0 + $0x20] sm:$0xff]   ;;  %v3821_v16 = vld [vmem:[%s5184_s0 + $0x28] sm:$0xff]  }
   0x5   :  { %3546 = vmatprep.subr.bf16.mxu0 %v1316_v6  ;;  %3805 = vmatprep.subr.bf16.mxu1 %v1316_v6  ;;  %v3820_v15 = vld [vmem:[%s5184_s0 + $0x220] sm:$0xff]   ;;  %v3822_v17 = vld [vmem:[%s5184_s0 + $0x228] sm:$0xff]   ;;  %v3823_v18 = vld [vmem:[%s5184_s0 + $0x30] sm:$0xff]  }
   0x6   :  { %v3824_v19 = vld [vmem:[%s5184_s0 + $0x230] sm:$0xff]   ;;  %v3825_v20 = vld [vmem:[%s5184_s0 + $0x38] sm:$0xff]   ;;  %v3827_v22 = vld [vmem:[%s5184_s0 + $0x40] sm:$0xff]  }
   0x7   :  { %3547 = vmatpush3.bf16.msra.mxu0 %v1316_v6  ;;  %3807 = vmatpush3.bf16.msra.mxu1 %v1316_v6  ;;  %v3826_v21 = vld [vmem:[%s5184_s0 + $0x238] sm:$0xff]   ;;  %v3828_v23 = vld [vmem:[%s5184_s0 + $0x240] sm:$0xff]   ;;  %v3829_v24 = vld [vmem:[%s5184_s0 + $0x48] sm:$0xff]  }
   0x8   :  { %v3830_v25 = vld [vmem:[%s5184_s0 + $0x248] sm:$0xff]   ;;  %v3831_v26 = vld [vmem:[%s5184_s0 + $0x50] sm:$0xff]   ;;  %v3833_v28 = vld [vmem:[%s5184_s0 + $0x58] sm:$0xff]  }
   0x9   :  { %v3832_v27 = vld [vmem:[%s5184_s0 + $0x250] sm:$0xff]   ;;  %v3834_v29 = vld [vmem:[%s5184_s0 + $0x258] sm:$0xff]   ;;  %v3835_v30 = vld [vmem:[%s5184_s0 + $0x60] sm:$0xff]  }
   0xa   :  { %3549 = vmatmul.mubr.msk.bf16.vlgmr.msra.gmra.mrb[0].mxu0 %vm926_vm2, %v3813_v8  ;;  %3677 = vmatmul.mubr.msk.bf16.vlgmr.msra.gmra.mrb[0].mxu1 %vm926_vm2, %v3814_v9  ;;  %v3836_v31 = vld [vmem:[%s5184_s0 + $0x260] sm:$0xff]   ;;  %v3837_v32 = vld [vmem:[%s5184_s0 + $0x68] sm:$0xff]   ;;  %v3839_v34 = vld [vmem:[%s5184_s0 + $0x70] sm:$0xff]  }
   0xb   :  { %3552 = vmatprep.mubr.msk.bf16.mxu0 %vm926_vm2, %v3815_v10  ;;  %3680 = vmatprep.mubr.msk.bf16.mxu1 %vm926_vm2, %v3816_v11  ;;  %v3838_v33 = vld [vmem:[%s5184_s0 + $0x268] sm:$0xff]   ;;  %v3840_v35 = vld [vmem:[%s5184_s0 + $0x270] sm:$0xff]   ;;  %v3841_v36 = vld [vmem:[%s5184_s0 + $0x78] sm:$0xff]  }
   0xc   :  { %v3842_v37 = vld [vmem:[%s5184_s0 + $0x278] sm:$0xff]   ;;  %v3843_v38 = vld [vmem:[%s5184_s0 + $0x80] sm:$0xff]   ;;  %v3845_v40 = vld [vmem:[%s5184_s0 + $0x88] sm:$0xff]  }
   0xd   :  { %v3844_v39 = vld [vmem:[%s5184_s0 + $0x280] sm:$0xff]   ;;  %v3846_v41 = vld [vmem:[%s5184_s0 + $0x288] sm:$0xff]   ;;  %v3847_v42 = vld [vmem:[%s5184_s0 + $0x90] sm:$0xff]  }
   0xe   :  { %v3848_v43 = vld [vmem:[%s5184_s0 + $0x290] sm:$0xff]   ;;  %v3849_v44 = vld [vmem:[%s5184_s0 + $0x98] sm:$0xff]   ;;  %v3851_v46 = vld [vmem:[%s5184_s0 + $0xa0] sm:$0xff]  }
   0xf   :  { %v3850_v45 = vld [vmem:[%s5184_s0 + $0x298] sm:$0xff]   ;;  %v3852_v47 = vld [vmem:[%s5184_s0 + $0x2a0] sm:$0xff]   ;;  %v3853_v48 = vld [vmem:[%s5184_s0 + $0xa8] sm:$0xff]  }
  0x10   :  { %v3854_v49 = vld [vmem:[%s5184_s0 + $0x2a8] sm:$0xff]   ;;  %v3855_v50 = vld [vmem:[%s5184_s0 + $0xb0] sm:$0xff]   ;;  %v3857_v52 = vld [vmem:[%s5184_s0 + $0xb8] sm:$0xff]  }
  0x11   :  { %v3856_v51 = vld [vmem:[%s5184_s0 + $0x2b0] sm:$0xff]   ;;  %v3858_v53 = vld [vmem:[%s5184_s0 + $0x2b8] sm:$0xff]   ;;  %v3859_v54 = vld [vmem:[%s5184_s0 + $0xc0] sm:$0xff]  }
  0x12   :  { %3553 = vmatmul.mubr.msk.bf16.gmra.mrb[4].mxu0 %vm926_vm2, %v3817_v12  ;;  %3681 = vmatmul.mubr.msk.bf16.gmra.mrb[4].mxu1 %vm926_vm2, %v3818_v13  ;;  %v3860_v55 = vld [vmem:[%s5184_s0 + $0x2c0] sm:$0xff]   ;;  %v3861_v56 = vld [vmem:[%s5184_s0 + $0xc8] sm:$0xff]   ;;  %v3863_v58 = vld [vmem:[%s5184_s0 + $0xd0] sm:$0xff]  }
  0x13   :  { %3556 = vmatprep.mubr.msk.bf16.mxu0 %vm926_vm2, %v3819_v14  ;;  %3684 = vmatprep.mubr.msk.bf16.mxu1 %vm926_vm2, %v3820_v15  ;;  %v3862_v57 = vld [vmem:[%s5184_s0 + $0x2c8] sm:$0xff]   ;;  %v3864_v59 = vld [vmem:[%s5184_s0 + $0x2d0] sm:$0xff]   ;;  %v3865_v60 = vld [vmem:[%s5184_s0 + $0xd8] sm:$0xff]  }
  0x14   :  { %v3866_v61 = vld [vmem:[%s5184_s0 + $0x2d8] sm:$0xff]   ;;  %v3867_v62 = vld [vmem:[%s5184_s0 + $0xe0] sm:$0xff]   ;;  %v3869_v0 = vld [vmem:[%s5184_s0 + $0xe8] sm:$0xff]  }
  0x15   :  { %v3868_v63 = vld [vmem:[%s5184_s0 + $0x2e0] sm:$0xff]   ;;  %v3870_v1 = vld [vmem:[%s5184_s0 + $0x2e8] sm:$0xff]   ;;  %v3871_v2 = vld [vmem:[%s5184_s0 + $0xf0] sm:$0xff]  }
  0x16   :  { %v3872_v3 = vld [vmem:[%s5184_s0 + $0x2f0] sm:$0xff]   ;;  %v3873_v4 = vld [vmem:[%s5184_s0 + $0xf8] sm:$0xff]   ;;  %v3875_v6 = vld [vmem:[%s5184_s0 + $0x100] sm:$0xff]  }
  0x17   :  { %v3874_v5 = vld [vmem:[%s5184_s0 + $0x2f8] sm:$0xff]   ;;  %v3876_v7 = vld [vmem:[%s5184_s0 + $0x300] sm:$0xff]   ;;  %v3877_v8 = vld [vmem:[%s5184_s0 + $0x108] sm:$0xff]  }
  0x18   :  { %v3878_v9 = vld [vmem:[%s5184_s0 + $0x308] sm:$0xff]   ;;  %v3879_v10 = vld [vmem:[%s5184_s0 + $0x110] sm:$0xff]   ;;  %v3881_v12 = vld [vmem:[%s5184_s0 + $0x118] sm:$0xff]  }
  0x19   :  { %v3880_v11 = vld [vmem:[%s5184_s0 + $0x310] sm:$0xff]   ;;  %v3882_v13 = vld [vmem:[%s5184_s0 + $0x318] sm:$0xff]   ;;  %v3883_v14 = vld [vmem:[%s5184_s0 + $0x120] sm:$0xff]  }
  0x1a   :  { %3557 = vmatmul.mubr.msk.bf16.gmra.mrb[8].mxu0 %vm926_vm2, %v3821_v16  ;;  %3685 = vmatmul.mubr.msk.bf16.gmra.mrb[8].mxu1 %vm926_vm2, %v3822_v17  ;;  %v3884_v15 = vld [vmem:[%s5184_s0 + $0x320] sm:$0xff]   ;;  %v3885_v16 = vld [vmem:[%s5184_s0 + $0x128] sm:$0xff]  }
  0x1b   :  { %3560 = vmatprep.mubr.msk.bf16.mxu0 %vm926_vm2, %v3823_v18  ;;  %3688 = vmatprep.mubr.msk.bf16.mxu1 %vm926_vm2, %v3824_v19  ;;  %v3886_v17 = vld [vmem:[%s5184_s0 + $0x328] sm:$0xff]   ;;  %v3887_v18 = vld [vmem:[%s5184_s0 + $0x130] sm:$0xff]  }
  0x1c   :  { %v3888_v19 = vld [vmem:[%s5184_s0 + $0x330] sm:$0xff]  }
  0x22   :  { %3561 = vmatmul.mubr.msk.bf16.gmra.mrb[12].mxu0 %vm926_vm2, %v3825_v20  ;;  %3689 = vmatmul.mubr.msk.bf16.gmra.mrb[12].mxu1 %vm926_vm2, %v3826_v21  ;;  %v3889_v20 = vld [vmem:[%s5184_s0 + $0x138] sm:$0xff]  }
  0x23   :  { %3564 = vmatprep.mubr.msk.bf16.mxu0 %vm926_vm2, %v3827_v22  ;;  %3692 = vmatprep.mubr.msk.bf16.mxu1 %vm926_vm2, %v3828_v23  ;;  %v3890_v21 = vld [vmem:[%s5184_s0 + $0x338] sm:$0xff]   ;;  %v3891_v22 = vld [vmem:[%s5184_s0 + $0x140] sm:$0xff]  }
  0x24   :  { %v3892_v23 = vld [vmem:[%s5184_s0 + $0x340] sm:$0xff]  }
  0x2a   :  { %3565 = vmatmul.mubr.msk.bf16.gmra.mrb[16].mxu0 %vm926_vm2, %v3829_v24  ;;  %3693 = vmatmul.mubr.msk.bf16.gmra.mrb[16].mxu1 %vm926_vm2, %v3830_v25  ;;  %v3893_v24 = vld [vmem:[%s5184_s0 + $0x148] sm:$0xff]  }
  0x2b   :  { %3568 = vmatprep.mubr.msk.bf16.mxu0 %vm926_vm2, %v3831_v26  ;;  %3696 = vmatprep.mubr.msk.bf16.mxu1 %vm926_vm2, %v3832_v27  ;;  %v3894_v25 = vld [vmem:[%s5184_s0 + $0x348] sm:$0xff]   ;;  %v3895_v26 = vld [vmem:[%s5184_s0 + $0x150] sm:$0xff]  }
  0x2c   :  { %v3896_v27 = vld [vmem:[%s5184_s0 + $0x350] sm:$0xff]  }
  0x32   :  { %3569 = vmatmul.mubr.msk.bf16.gmra.mrb[20].mxu0 %vm926_vm2, %v3833_v28  ;;  %3697 = vmatmul.mubr.msk.bf16.gmra.mrb[20].mxu1 %vm926_vm2, %v3834_v29  ;;  %v3897_v28 = vld [vmem:[%s5184_s0 + $0x158] sm:$0xff]  }
  0x33   :  { %3572 = vmatprep.mubr.msk.bf16.mxu0 %vm926_vm2, %v3835_v30  ;;  %3700 = vmatprep.mubr.msk.bf16.mxu1 %vm926_vm2, %v3836_v31  ;;  %v3898_v29 = vld [vmem:[%s5184_s0 + $0x358] sm:$0xff]   ;;  %v3899_v30 = vld [vmem:[%s5184_s0 + $0x160] sm:$0xff]  }
  0x34   :  { %v3900_v31 = vld [vmem:[%s5184_s0 + $0x360] sm:$0xff]  }
  0x3a   :  { %3573 = vmatmul.mubr.msk.bf16.gmra.mrb[24].mxu0 %vm926_vm2, %v3837_v32  ;;  %3701 = vmatmul.mubr.msk.bf16.gmra.mrb[24].mxu1 %vm926_vm2, %v3838_v33  ;;  %v3901_v32 = vld [vmem:[%s5184_s0 + $0x168] sm:$0xff]  }
  0x3b   :  { %3576 = vmatprep.mubr.msk.bf16.mxu0 %vm926_vm2, %v3839_v34  ;;  %3704 = vmatprep.mubr.msk.bf16.mxu1 %vm926_vm2, %v3840_v35  ;;  %v3902_v33 = vld [vmem:[%s5184_s0 + $0x368] sm:$0xff]   ;;  %v3903_v34 = vld [vmem:[%s5184_s0 + $0x170] sm:$0xff]  }
  0x3c   :  { %v3904_v35 = vld [vmem:[%s5184_s0 + $0x370] sm:$0xff]  }
  0x42   :  { %3577 = vmatmul.mubr.msk.bf16.gmra.mrb[28].mxu0 %vm926_vm2, %v3841_v36  ;;  %3705 = vmatmul.mubr.msk.bf16.gmra.mrb[28].mxu1 %vm926_vm2, %v3842_v37  ;;  %v3905_v36 = vld [vmem:[%s5184_s0 + $0x178] sm:$0xff]  }
  0x43   :  { %3580 = vmatprep.mubr.msk.bf16.mxu0 %vm926_vm2, %v3843_v38  ;;  %3708 = vmatprep.mubr.msk.bf16.mxu1 %vm926_vm2, %v3844_v39  ;;  %v3906_v37 = vld [vmem:[%s5184_s0 + $0x378] sm:$0xff]   ;;  %v3907_v38 = vld [vmem:[%s5184_s0 + $0x180] sm:$0xff]  }
  0x44   :  { %v3908_v39 = vld [vmem:[%s5184_s0 + $0x380] sm:$0xff]  }
  0x4a   :  { %3581 = vmatmul.mubr.msk.bf16.gmra.mrb[32].mxu0 %vm926_vm2, %v3845_v40  ;;  %3709 = vmatmul.mubr.msk.bf16.gmra.mrb[32].mxu1 %vm926_vm2, %v3846_v41  ;;  %v3909_v40 = vld [vmem:[%s5184_s0 + $0x188] sm:$0xff]  }
  0x4b   :  { %3584 = vmatprep.mubr.msk.bf16.mxu0 %vm926_vm2, %v3847_v42  ;;  %3712 = vmatprep.mubr.msk.bf16.mxu1 %vm926_vm2, %v3848_v43  ;;  %v3910_v41 = vld [vmem:[%s5184_s0 + $0x388] sm:$0xff]   ;;  %v3911_v42 = vld [vmem:[%s5184_s0 + $0x190] sm:$0xff]  }
  0x4c   :  { %v3912_v43 = vld [vmem:[%s5184_s0 + $0x390] sm:$0xff]  }
  0x52   :  { %3585 = vmatmul.mubr.msk.bf16.gmra.mrb[36].mxu0 %vm926_vm2, %v3849_v44  ;;  %3713 = vmatmul.mubr.msk.bf16.gmra.mrb[36].mxu1 %vm926_vm2, %v3850_v45  ;;  %v3913_v44 = vld [vmem:[%s5184_s0 + $0x198] sm:$0xff]  }
  0x53   :  { %3588 = vmatprep.mubr.msk.bf16.mxu0 %vm926_vm2, %v3851_v46  ;;  %3716 = vmatprep.mubr.msk.bf16.mxu1 %vm926_vm2, %v3852_v47  ;;  %v3914_v45 = vld [vmem:[%s5184_s0 + $0x398] sm:$0xff]   ;;  %v3915_v46 = vld [vmem:[%s5184_s0 + $0x1a0] sm:$0xff]  }
  0x54   :  { %v3916_v47 = vld [vmem:[%s5184_s0 + $0x3a0] sm:$0xff]  }
  0x5a   :  { %3589 = vmatmul.mubr.msk.bf16.gmra.mrb[40].mxu0 %vm926_vm2, %v3853_v48  ;;  %3717 = vmatmul.mubr.msk.bf16.gmra.mrb[40].mxu1 %vm926_vm2, %v3854_v49  ;;  %v3917_v48 = vld [vmem:[%s5184_s0 + $0x1a8] sm:$0xff]  }
  0x5b   :  { %3592 = vmatprep.mubr.msk.bf16.mxu0 %vm926_vm2, %v3855_v50  ;;  %3720 = vmatprep.mubr.msk.bf16.mxu1 %vm926_vm2, %v3856_v51  ;;  %v3918_v49 = vld [vmem:[%s5184_s0 + $0x3a8] sm:$0xff]   ;;  %v3919_v50 = vld [vmem:[%s5184_s0 + $0x1b0] sm:$0xff]  }
  0x5c   :  { %v3920_v51 = vld [vmem:[%s5184_s0 + $0x3b0] sm:$0xff]  }
  0x62   :  { %3593 = vmatmul.mubr.msk.bf16.gmra.mrb[44].mxu0 %vm926_vm2, %v3857_v52  ;;  %3721 = vmatmul.mubr.msk.bf16.gmra.mrb[44].mxu1 %vm926_vm2, %v3858_v53 }
  0x63   :  { %3596 = vmatprep.mubr.msk.bf16.mxu0 %vm926_vm2, %v3859_v54  ;;  %3724 = vmatprep.mubr.msk.bf16.mxu1 %vm926_vm2, %v3860_v55 }
  0x6a   :  { %3597 = vmatmul.mubr.msk.bf16.gmra.mrb[48].mxu0 %vm926_vm2, %v3861_v56  ;;  %3725 = vmatmul.mubr.msk.bf16.gmra.mrb[48].mxu1 %vm926_vm2, %v3862_v57  ;;  %v3921_v56 = vld [vmem:[%s5184_s0 + $0x1b8] sm:$0xff]  }
  0x6b   :  { %3600 = vmatprep.mubr.msk.bf16.mxu0 %vm926_vm2, %v3863_v58  ;;  %3728 = vmatprep.mubr.msk.bf16.mxu1 %vm926_vm2, %v3864_v59  ;;  %v3922_v57 = vld [vmem:[%s5184_s0 + $0x3b8] sm:$0xff]  }
  0x72   :  { %3601 = vmatmul.mubr.msk.bf16.gmra.mrb[52].mxu0 %vm926_vm2, %v3865_v60  ;;  %3729 = vmatmul.mubr.msk.bf16.gmra.mrb[52].mxu1 %vm926_vm2, %v3866_v61  ;;  %v3923_v60 = vld [vmem:[%s5184_s0 + $0x1c0] sm:$0xff]  }
  0x73   :  { %3604 = vmatprep.mubr.msk.bf16.mxu0 %vm926_vm2, %v3867_v62  ;;  %3732 = vmatprep.mubr.msk.bf16.mxu1 %vm926_vm2, %v3868_v63  ;;  %v3924_v61 = vld [vmem:[%s5184_s0 + $0x3c0] sm:$0xff]  }
  0x7a   :  { %3605 = vmatmul.mubr.msk.bf16.gmra.mrb[56].mxu0 %vm926_vm2, %v3869_v0  ;;  %3733 = vmatmul.mubr.msk.bf16.gmra.mrb[56].mxu1 %vm926_vm2, %v3870_v1 }
  0x7b   :  { %3608 = vmatprep.mubr.msk.bf16.mxu0 %vm926_vm2, %v3871_v2  ;;  %3736 = vmatprep.mubr.msk.bf16.mxu1 %vm926_vm2, %v3872_v3 }
  0x82   :  { %3609 = vmatmul.mubr.msk.bf16.gmra.mrb[60].mxu0 %vm926_vm2, %v3873_v4  ;;  %3737 = vmatmul.mubr.msk.bf16.gmra.mrb[60].mxu1 %vm926_vm2, %v3874_v5  ;;  %v3925_v4 = vld [vmem:[%s5184_s0 + $0x1c8] sm:$0xff]  }
  0x83   :  { %3612 = vmatprep.mubr.msk.bf16.mxu0 %vm926_vm2, %v3875_v6  ;;  %3740 = vmatprep.mubr.msk.bf16.mxu1 %vm926_vm2, %v3876_v7  ;;  %v3926_v5 = vld [vmem:[%s5184_s0 + $0x3c8] sm:$0xff]  }
  0x8a   :  { %3613 = vmatmul.mubr.msk.bf16.gmra.mrb[64].mxu0 %vm926_vm2, %v3877_v8  ;;  %3741 = vmatmul.mubr.msk.bf16.gmra.mrb[64].mxu1 %vm926_vm2, %v3878_v9  ;;  %v3927_v8 = vld [vmem:[%s5184_s0 + $0x1d0] sm:$0xff]  }
  0x8b   :  { %3616 = vmatprep.mubr.msk.bf16.mxu0 %vm926_vm2, %v3879_v10  ;;  %3744 = vmatprep.mubr.msk.bf16.mxu1 %vm926_vm2, %v3880_v11  ;;  %v3928_v9 = vld [vmem:[%s5184_s0 + $0x3d0] sm:$0xff]  }
  0x92   :  { %3617 = vmatmul.mubr.msk.bf16.gmra.mrb[68].mxu0 %vm926_vm2, %v3881_v12  ;;  %3745 = vmatmul.mubr.msk.bf16.gmra.mrb[68].mxu1 %vm926_vm2, %v3882_v13 }
  0x93   :  { %3620 = vmatprep.mubr.msk.bf16.mxu0 %vm926_vm2, %v3883_v14  ;;  %3748 = vmatprep.mubr.msk.bf16.mxu1 %vm926_vm2, %v3884_v15 }
  0x9a   :  { %3621 = vmatmul.mubr.msk.bf16.gmra.mrb[72].mxu0 %vm926_vm2, %v3885_v16  ;;  %3749 = vmatmul.mubr.msk.bf16.gmra.mrb[72].mxu1 %vm926_vm2, %v3886_v17  ;;  %v3929_v16 = vld [vmem:[%s5184_s0 + $0x1d8] sm:$0xff]  }
  0x9b   :  { %3624 = vmatprep.mubr.msk.bf16.mxu0 %vm926_vm2, %v3887_v18  ;;  %3752 = vmatprep.mubr.msk.bf16.mxu1 %vm926_vm2, %v3888_v19  ;;  %v3930_v17 = vld [vmem:[%s5184_s0 + $0x3d8] sm:$0xff]  }
  0xa2   :  { %3625 = vmatmul.mubr.msk.bf16.gmra.mrb[76].mxu0 %vm926_vm2, %v3889_v20  ;;  %3753 = vmatmul.mubr.msk.bf16.gmra.mrb[76].mxu1 %vm926_vm2, %v3890_v21  ;;  %v3931_v20 = vld [vmem:[%s5184_s0 + $0x1e0] sm:$0xff]  }
  0xa3   :  { %3628 = vmatprep.mubr.msk.bf16.mxu0 %vm926_vm2, %v3891_v22  ;;  %3756 = vmatprep.mubr.msk.bf16.mxu1 %vm926_vm2, %v3892_v23  ;;  %v3932_v21 = vld [vmem:[%s5184_s0 + $0x3e0] sm:$0xff]  }
  0xaa   :  { %3629 = vmatmul.mubr.msk.bf16.gmra.mrb[80].mxu0 %vm926_vm2, %v3893_v24  ;;  %3757 = vmatmul.mubr.msk.bf16.gmra.mrb[80].mxu1 %vm926_vm2, %v3894_v25 }
  0xab   :  { %3632 = vmatprep.mubr.msk.bf16.mxu0 %vm926_vm2, %v3895_v26  ;;  %3760 = vmatprep.mubr.msk.bf16.mxu1 %vm926_vm2, %v3896_v27 }
  0xb2   :  { %3633 = vmatmul.mubr.msk.bf16.gmra.mrb[84].mxu0 %vm926_vm2, %v3897_v28  ;;  %3761 = vmatmul.mubr.msk.bf16.gmra.mrb[84].mxu1 %vm926_vm2, %v3898_v29  ;;  %v3933_v28 = vld [vmem:[%s5184_s0 + $0x1e8] sm:$0xff]  }
  0xb3   :  { %3636 = vmatprep.mubr.msk.bf16.mxu0 %vm926_vm2, %v3899_v30  ;;  %3764 = vmatprep.mubr.msk.bf16.mxu1 %vm926_vm2, %v3900_v31  ;;  %v3934_v29 = vld [vmem:[%s5184_s0 + $0x3e8] sm:$0xff]  }
  0xba   :  { %3637 = vmatmul.mubr.msk.bf16.gmra.mrb[88].mxu0 %vm926_vm2, %v3901_v32  ;;  %3765 = vmatmul.mubr.msk.bf16.gmra.mrb[88].mxu1 %vm926_vm2, %v3902_v33  ;;  %v3935_v32 = vld [vmem:[%s5184_s0 + $0x1f0] sm:$0xff]  }
  0xbb   :  { %3640 = vmatprep.mubr.msk.bf16.mxu0 %vm926_vm2, %v3903_v34  ;;  %3768 = vmatprep.mubr.msk.bf16.mxu1 %vm926_vm2, %v3904_v35  ;;  %v3936_v33 = vld [vmem:[%s5184_s0 + $0x3f0] sm:$0xff]  }
  0xc2   :  { %3641 = vmatmul.mubr.msk.bf16.gmra.mrb[92].mxu0 %vm926_vm2, %v3905_v36  ;;  %3769 = vmatmul.mubr.msk.bf16.gmra.mrb[92].mxu1 %vm926_vm2, %v3906_v37 }
  0xc3   :  { %3644 = vmatprep.mubr.msk.bf16.mxu0 %vm926_vm2, %v3907_v38  ;;  %3772 = vmatprep.mubr.msk.bf16.mxu1 %vm926_vm2, %v3908_v39 }
  0xca   :  { %3645 = vmatmul.mubr.msk.bf16.gmra.mrb[96].mxu0 %vm926_vm2, %v3909_v40  ;;  %3773 = vmatmul.mubr.msk.bf16.gmra.mrb[96].mxu1 %vm926_vm2, %v3910_v41  ;;  %v3937_v40 = vld [vmem:[%s5184_s0 + $0x1f8] sm:$0xff]  }
  0xcb   :  { %3648 = vmatprep.mubr.msk.bf16.mxu0 %vm926_vm2, %v3911_v42  ;;  %3776 = vmatprep.mubr.msk.bf16.mxu1 %vm926_vm2, %v3912_v43  ;;  %v3938_v41 = vld [vmem:[%s5184_s0 + $0x3f8] sm:$0xff]  }
  0xd2   :  { %3649 = vmatmul.mubr.msk.bf16.gmra.mrb[100].mxu0 %vm926_vm2, %v3913_v44  ;;  %3777 = vmatmul.mubr.msk.bf16.gmra.mrb[100].mxu1 %vm926_vm2, %v3914_v45 }
  0xd3   :  { %3652 = vmatprep.mubr.msk.bf16.mxu0 %vm926_vm2, %v3915_v46  ;;  %3780 = vmatprep.mubr.msk.bf16.mxu1 %vm926_vm2, %v3916_v47 }
  0xda   :  { %3653 = vmatmul.mubr.msk.bf16.gmra.mrb[104].mxu0 %vm926_vm2, %v3917_v48  ;;  %3781 = vmatmul.mubr.msk.bf16.gmra.mrb[104].mxu1 %vm926_vm2, %v3918_v49 }
  0xdb   :  { %3656 = vmatprep.mubr.msk.bf16.mxu0 %vm926_vm2, %v3919_v50  ;;  %3784 = vmatprep.mubr.msk.bf16.mxu1 %vm926_vm2, %v3920_v51 }
  0xdd   :  { %v4407_v52 = vpop.f32.mrb[0].mxu0  ;;  %v4409_v53 = vpop.f32.mrb[0].mxu1 }
  0xde   :  { %v4411_v54 = vpop.f32.mrb[1].mxu0  ;;  %v4413_v55 = vpop.f32.mrb[1].mxu1 }
  0xdf   :  { %v4421_v58 = vpop.f32.mrb[2].mxu0  ;;  %v4423_v59 = vpop.f32.mrb[2].mxu1 }
  0xe0   :  { %v4431_v62 = vpop.f32.mrb[3].mxu0  ;;  %v4433_v63 = vpop.f32.mrb[3].mxu1 }
  0xe2   :  { %3657 = vmatmul.mubr.msk.bf16.gmra.mrb[108].mxu0 %vm926_vm2, %v3921_v56  ;;  %3785 = vmatmul.mubr.msk.bf16.gmra.mrb[108].mxu1 %vm926_vm2, %v3922_v57 }
  0xe3   :  { %3660 = vmatprep.mubr.msk.bf16.mxu0 %vm926_vm2, %v3923_v60  ;;  %3788 = vmatprep.mubr.msk.bf16.mxu1 %vm926_vm2, %v3924_v61 }
  0xe5   :  { %v4439_v0 = vpop.f32.mrb[4].mxu0  ;;  %v4441_v1 = vpop.f32.mrb[4].mxu1 }
  0xe6   :  { %v4443_v2 = vpop.f32.mrb[5].mxu0  ;;  %v4445_v3 = vpop.f32.mrb[5].mxu1 }
  0xe7   :  { %v4453_v6 = vpop.f32.mrb[6].mxu0  ;;  %v4455_v7 = vpop.f32.mrb[6].mxu1 }
  0xe8   :  { %v4463_v10 = vpop.f32.mrb[7].mxu0  ;;  %v4465_v11 = vpop.f32.mrb[7].mxu1 }
  0xea   :  { %3661 = vmatmul.mubr.msk.bf16.gmra.mrb[112].mxu0 %vm926_vm2, %v3925_v4  ;;  %3789 = vmatmul.mubr.msk.bf16.gmra.mrb[112].mxu1 %vm926_vm2, %v3926_v5 }
  0xeb   :  { %3664 = vmatprep.mubr.msk.bf16.mxu0 %vm926_vm2, %v3927_v8  ;;  %3792 = vmatprep.mubr.msk.bf16.mxu1 %vm926_vm2, %v3928_v9 }
  0xed   :  { %v4471_v12 = vpop.f32.mrb[8].mxu0  ;;  %v4473_v13 = vpop.f32.mrb[8].mxu1 }
  0xee   :  { %v4475_v14 = vpop.f32.mrb[9].mxu0  ;;  %v4477_v15 = vpop.f32.mrb[9].mxu1 }
  0xef   :  { %v4485_v18 = vpop.f32.mrb[10].mxu0  ;;  %v4487_v19 = vpop.f32.mrb[10].mxu1 }
  0xf0   :  { %v4495_v22 = vpop.f32.mrb[11].mxu0  ;;  %v4497_v23 = vpop.f32.mrb[11].mxu1 }
  0xf2   :  { %3665 = vmatmul.mubr.msk.bf16.gmra.mrb[116].mxu0 %vm926_vm2, %v3929_v16  ;;  %3793 = vmatmul.mubr.msk.bf16.gmra.mrb[116].mxu1 %vm926_vm2, %v3930_v17 }
  0xf3   :  { %3668 = vmatprep.mubr.msk.bf16.mxu0 %vm926_vm2, %v3931_v20  ;;  %3796 = vmatprep.mubr.msk.bf16.mxu1 %vm926_vm2, %v3932_v21 }
  0xf5   :  { %v4503_v24 = vpop.f32.mrb[12].mxu0  ;;  %v4505_v25 = vpop.f32.mrb[12].mxu1 }
  0xf6   :  { %v4507_v26 = vpop.f32.mrb[13].mxu0  ;;  %v4509_v27 = vpop.f32.mrb[13].mxu1 }
  0xf7   :  { %v4517_v30 = vpop.f32.mrb[14].mxu0  ;;  %v4519_v31 = vpop.f32.mrb[14].mxu1 }
  0xf8   :  { %v4527_v34 = vpop.f32.mrb[15].mxu0  ;;  %v4529_v35 = vpop.f32.mrb[15].mxu1 }
  0xfa   :  { %3669 = vmatmul.mubr.msk.bf16.gmra.mrb[120].mxu0 %vm926_vm2, %v3933_v28  ;;  %3797 = vmatmul.mubr.msk.bf16.gmra.mrb[120].mxu1 %vm926_vm2, %v3934_v29 }
  0xfb   :  { %3672 = vmatprep.mubr.msk.bf16.mxu0 %vm926_vm2, %v3935_v32  ;;  %3800 = vmatprep.mubr.msk.bf16.mxu1 %vm926_vm2, %v3936_v33 }
  0xfd   :  { %v4535_v36 = vpop.f32.mrb[16].mxu0  ;;  %v4537_v37 = vpop.f32.mrb[16].mxu1 }
  0xfe   :  { %v4539_v38 = vpop.f32.mrb[17].mxu0  ;;  %v4541_v39 = vpop.f32.mrb[17].mxu1 }
  0xff   :  { %v4549_v42 = vpop.f32.mrb[18].mxu0  ;;  %v4551_v43 = vpop.f32.mrb[18].mxu1 }
 0x100   :  { %v4553_v44 = vpop.f32.mrb[19].mxu0  ;;  %v4555_v45 = vpop.f32.mrb[19].mxu1 }
 0x102   :  { %3673 = vmatmul.mubr.msk.bf16.gmra.mrb[124].mxu0 %vm926_vm2, %v3937_v40  ;;  %3801 = vmatmul.mubr.msk.bf16.gmra.mrb[124].mxu1 %vm926_vm2, %v3938_v41 }
 0x105   :  { %v4559_v46 = vpop.f32.mrb[20].mxu0  ;;  %v4561_v47 = vpop.f32.mrb[20].mxu1 }
 0x106   :  { %v4563_v48 = vpop.f32.mrb[21].mxu0  ;;  %v4565_v49 = vpop.f32.mrb[21].mxu1 }
 0x107   :  { %v4567_v50 = vpop.f32.mrb[22].mxu0  ;;  %v4569_v51 = vpop.f32.mrb[22].mxu1 }
 0x108   :  { %v4571_v56 = vpop.f32.mrb[23].mxu0  ;;  %v4573_v57 = vpop.f32.mrb[23].mxu1 }
 0x109   :  { %5187 = vst [vmem:[#allocation2_spill] sm:$0xff] %v4573_v57 }
 0x10d   :  { %v4575_v60 = vpop.f32.mrb[24].mxu0  ;;  %v4577_v61 = vpop.f32.mrb[24].mxu1 }
 0x10e   :  { %5188 = vst [vmem:[#allocation3_spill] sm:$0xff] %v4575_v60  ;;  %5189 = vst [vmem:[#allocation4_spill] sm:$0xff] %v4577_v61  ;;  %v4579_v4 = vpop.f32.mrb[25].mxu0  ;;  %v4581_v5 = vpop.f32.mrb[25].mxu1 }
 0x10f   :  { %5190 = vst [vmem:[#allocation5_spill] sm:$0xff] %v4579_v4  ;;  %5191 = vst [vmem:[#allocation6_spill] sm:$0xff] %v4581_v5  ;;  %v4583_v8 = vpop.f32.mrb[26].mxu0  ;;  %v4585_v9 = vpop.f32.mrb[26].mxu1 }
 0x110   :  { %5192 = vst [vmem:[#allocation7_spill] sm:$0xff] %v4583_v8  ;;  %5193 = vst [vmem:[#allocation8_spill] sm:$0xff] %v4585_v9  ;;  %v4587_v16 = vpop.f32.mrb[27].mxu0  ;;  %v4589_v17 = vpop.f32.mrb[27].mxu1 }
 0x111   :  { %5194 = vst [vmem:[#allocation9_spill] sm:$0xff] %v4587_v16  ;;  %5195 = vst [vmem:[#allocation10_spill] sm:$0xff] %v4589_v17 }
 0x115   :  { %v4591_v20 = vpop.f32.mrb[28].mxu0  ;;  %v4593_v21 = vpop.f32.mrb[28].mxu1 }
 0x116   :  { %5196 = vst [vmem:[#allocation11_spill] sm:$0xff] %v4591_v20  ;;  %5197 = vst [vmem:[#allocation12_spill] sm:$0xff] %v4593_v21  ;;  %v4595_v28 = vpop.f32.mrb[29].mxu0  ;;  %v4597_v29 = vpop.f32.mrb[29].mxu1 }
 0x117   :  { %5198 = vst [vmem:[#allocation13_spill] sm:$0xff] %v4595_v28  ;;  %5199 = vst [vmem:[#allocation14_spill] sm:$0xff] %v4597_v29  ;;  %v4599_v32 = vpop.f32.mrb[30].mxu0  ;;  %v4601_v33 = vpop.f32.mrb[30].mxu1 }
 0x118   :  { %5200 = vst [vmem:[#allocation15_spill] sm:$0xff] %v4599_v32  ;;  %5201 = vst [vmem:[#allocation16_spill] sm:$0xff] %v4601_v33  ;;  %v4603_v40 = vpop.f32.mrb[31].mxu0  ;;  %v4605_v41 = vpop.f32.mrb[31].mxu1 }
 0x119   :  { %5202 = vst [vmem:[#allocation17_spill] sm:$0xff] %v4603_v40  ;;  %5203 = vst [vmem:[#allocation18_spill] sm:$0xff] %v4605_v41 }
 0x11d   :  { %v4607_v9 = vpop.f32.mrb[32].mxu0  ;;  %v4609_v16 = vpop.f32.mrb[32].mxu1 }
 0x11e   :  { %5204 = vst [vmem:[#allocation19_spill] sm:$0xff] %v4607_v9  ;;  %5205 = vst [vmem:[#allocation20_spill] sm:$0xff] %v4609_v16  ;;  %v4611_v17 = vpop.f32.mrb[33].mxu0  ;;  %v4613_v20 = vpop.f32.mrb[33].mxu1 }
 0x11f   :  { %5206 = vst [vmem:[#allocation21_spill] sm:$0xff] %v4611_v17  ;;  %5207 = vst [vmem:[#allocation22_spill] sm:$0xff] %v4613_v20  ;;  %v4615_v21 = vpop.f32.mrb[34].mxu0  ;;  %v4617_v28 = vpop.f32.mrb[34].mxu1 }
 0x120   :  { %5208 = vst [vmem:[#allocation23_spill] sm:$0xff] %v4615_v21  ;;  %5209 = vst [vmem:[#allocation24_spill] sm:$0xff] %v4617_v28  ;;  %v4619_v29 = vpop.f32.mrb[35].mxu0  ;;  %v4621_v32 = vpop.f32.mrb[35].mxu1 }
 0x121   :  { %5210 = vst [vmem:[#allocation25_spill] sm:$0xff] %v4619_v29  ;;  %5211 = vst [vmem:[#allocation26_spill] sm:$0xff] %v4621_v32 }
 0x125   :  { %v4623_v33 = vpop.f32.mrb[36].mxu0  ;;  %v4625_v40 = vpop.f32.mrb[36].mxu1 }
 0x126   :  { %5212 = vst [vmem:[#allocation27_spill] sm:$0xff] %v4623_v33  ;;  %5213 = vst [vmem:[#allocation28_spill] sm:$0xff] %v4625_v40  ;;  %v4627_v41 = vpop.f32.mrb[37].mxu0  ;;  %v4629_v9 = vpop.f32.mrb[37].mxu1 }
 0x127   :  { %5214 = vst [vmem:[#allocation29_spill] sm:$0xff] %v4627_v41  ;;  %5215 = vst [vmem:[#allocation30_spill] sm:$0xff] %v4629_v9  ;;  %v4631_v16 = vpop.f32.mrb[38].mxu0  ;;  %v4633_v17 = vpop.f32.mrb[38].mxu1 }
 0x128   :  { %5216 = vst [vmem:[#allocation31_spill] sm:$0xff] %v4631_v16  ;;  %5217 = vst [vmem:[#allocation32_spill] sm:$0xff] %v4633_v17  ;;  %v4635_v20 = vpop.f32.mrb[39].mxu0  ;;  %v4637_v21 = vpop.f32.mrb[39].mxu1 }
 0x129   :  { %5218 = vst [vmem:[#allocation33_spill] sm:$0xff] %v4635_v20  ;;  %5219 = vst [vmem:[#allocation34_spill] sm:$0xff] %v4637_v21 }
 0x12d   :  { %v4639_v28 = vpop.f32.mrb[40].mxu0  ;;  %v4641_v29 = vpop.f32.mrb[40].mxu1 }
 0x12e   :  { %5220 = vst [vmem:[#allocation35_spill] sm:$0xff] %v4639_v28  ;;  %5221 = vst [vmem:[#allocation36_spill] sm:$0xff] %v4641_v29  ;;  %v4643_v32 = vpop.f32.mrb[41].mxu0  ;;  %v4645_v33 = vpop.f32.mrb[41].mxu1 }
 0x12f   :  { %5222 = vst [vmem:[#allocation37_spill] sm:$0xff] %v4643_v32  ;;  %5223 = vst [vmem:[#allocation38_spill] sm:$0xff] %v4645_v33  ;;  %v4647_v40 = vpop.f32.mrb[42].mxu0  ;;  %v4649_v41 = vpop.f32.mrb[42].mxu1 }
 0x130   :  { %5224 = vst [vmem:[#allocation39_spill] sm:$0xff] %v4647_v40  ;;  %5225 = vst [vmem:[#allocation40_spill] sm:$0xff] %v4649_v41  ;;  %v4651_v9 = vpop.f32.mrb[43].mxu0  ;;  %v4653_v16 = vpop.f32.mrb[43].mxu1 }
 0x131   :  { %5226 = vst [vmem:[#allocation41_spill] sm:$0xff] %v4651_v9  ;;  %5227 = vst [vmem:[#allocation42_spill] sm:$0xff] %v4653_v16 }
 0x135   :  { %v4655_v17 = vpop.f32.mrb[44].mxu0  ;;  %v4657_v20 = vpop.f32.mrb[44].mxu1 }
 0x136   :  { %5228 = vst [vmem:[#allocation43_spill] sm:$0xff] %v4655_v17  ;;  %5229 = vst [vmem:[#allocation44_spill] sm:$0xff] %v4657_v20  ;;  %v4659_v21 = vpop.f32.mrb[45].mxu0  ;;  %v4661_v28 = vpop.f32.mrb[45].mxu1 }
 0x137   :  { %5230 = vst [vmem:[#allocation45_spill] sm:$0xff] %v4659_v21  ;;  %5231 = vst [vmem:[#allocation46_spill] sm:$0xff] %v4661_v28  ;;  %v4663_v29 = vpop.f32.mrb[46].mxu0  ;;  %v4665_v32 = vpop.f32.mrb[46].mxu1 }
 0x138   :  { %5232 = vst [vmem:[#allocation47_spill] sm:$0xff] %v4663_v29  ;;  %5233 = vst [vmem:[#allocation48_spill] sm:$0xff] %v4665_v32  ;;  %v4667_v33 = vpop.f32.mrb[47].mxu0  ;;  %v4669_v40 = vpop.f32.mrb[47].mxu1 }
 0x139   :  { %5234 = vst [vmem:[#allocation49_spill] sm:$0xff] %v4667_v33  ;;  %5235 = vst [vmem:[#allocation50_spill] sm:$0xff] %v4669_v40 }
 0x13d   :  { %v4671_v41 = vpop.f32.mrb[48].mxu0  ;;  %v4673_v9 = vpop.f32.mrb[48].mxu1 }
 0x13e   :  { %5236 = vst [vmem:[#allocation51_spill] sm:$0xff] %v4671_v41  ;;  %5237 = vst [vmem:[#allocation52_spill] sm:$0xff] %v4673_v9  ;;  %v4675_v16 = vpop.f32.mrb[49].mxu0  ;;  %v4677_v17 = vpop.f32.mrb[49].mxu1 }
 0x13f   :  { %5238 = vst [vmem:[#allocation53_spill] sm:$0xff] %v4675_v16  ;;  %5239 = vst [vmem:[#allocation54_spill] sm:$0xff] %v4677_v17  ;;  %v4679_v20 = vpop.f32.mrb[50].mxu0  ;;  %v4681_v21 = vpop.f32.mrb[50].mxu1 }
 0x140   :  { %5240 = vst [vmem:[#allocation55_spill] sm:$0xff] %v4679_v20  ;;  %5241 = vst [vmem:[#allocation56_spill] sm:$0xff] %v4681_v21  ;;  %v4683_v28 = vpop.f32.mrb[51].mxu0  ;;  %v4685_v29 = vpop.f32.mrb[51].mxu1 }
 0x141   :  { %5242 = vst [vmem:[#allocation57_spill] sm:$0xff] %v4683_v28  ;;  %5243 = vst [vmem:[#allocation58_spill] sm:$0xff] %v4685_v29 }
 0x145   :  { %v4687_v32 = vpop.f32.mrb[52].mxu0  ;;  %v4689_v33 = vpop.f32.mrb[52].mxu1 }
 0x146   :  { %5244 = vst [vmem:[#allocation59_spill] sm:$0xff] %v4687_v32  ;;  %5245 = vst [vmem:[#allocation60_spill] sm:$0xff] %v4689_v33  ;;  %v4691_v40 = vpop.f32.mrb[53].mxu0  ;;  %v4693_v41 = vpop.f32.mrb[53].mxu1 }
 0x147   :  { %5246 = vst [vmem:[#allocation61_spill] sm:$0xff] %v4691_v40  ;;  %5247 = vst [vmem:[#allocation62_spill] sm:$0xff] %v4693_v41  ;;  %v4695_v9 = vpop.f32.mrb[54].mxu0  ;;  %v4697_v16 = vpop.f32.mrb[54].mxu1 }
 0x148   :  { %5248 = vst [vmem:[#allocation63_spill] sm:$0xff] %v4695_v9  ;;  %5249 = vst [vmem:[#allocation64_spill] sm:$0xff] %v4697_v16  ;;  %v4699_v17 = vpop.f32.mrb[55].mxu0  ;;  %v4701_v20 = vpop.f32.mrb[55].mxu1 }
 0x149   :  { %5250 = vst [vmem:[#allocation65_spill] sm:$0xff] %v4699_v17  ;;  %5251 = vst [vmem:[#allocation66_spill] sm:$0xff] %v4701_v20 }
 0x14d   :  { %v4703_v21 = vpop.f32.mrb[56].mxu0  ;;  %v4705_v28 = vpop.f32.mrb[56].mxu1 }
 0x14e   :  { %5252 = vst [vmem:[#allocation67_spill] sm:$0xff] %v4703_v21  ;;  %5253 = vst [vmem:[#allocation68_spill] sm:$0xff] %v4705_v28  ;;  %v4707_v29 = vpop.f32.mrb[57].mxu0  ;;  %v4709_v32 = vpop.f32.mrb[57].mxu1 }
 0x14f   :  { %5254 = vst [vmem:[#allocation69_spill] sm:$0xff] %v4707_v29  ;;  %5255 = vst [vmem:[#allocation70_spill] sm:$0xff] %v4709_v32  ;;  %v4711_v33 = vpop.f32.mrb[58].mxu0  ;;  %v4713_v40 = vpop.f32.mrb[58].mxu1 }
 0x150   :  { %5256 = vst [vmem:[#allocation71_spill] sm:$0xff] %v4711_v33  ;;  %5257 = vst [vmem:[#allocation72_spill] sm:$0xff] %v4713_v40  ;;  %v4715_v41 = vpop.f32.mrb[59].mxu0  ;;  %v4717_v9 = vpop.f32.mrb[59].mxu1 }
 0x151   :  { %5258 = vst [vmem:[#allocation73_spill] sm:$0xff] %v4715_v41  ;;  %5259 = vst [vmem:[#allocation74_spill] sm:$0xff] %v4717_v9 }
 0x155   :  { %v4719_v16 = vpop.f32.mrb[60].mxu0  ;;  %v4721_v17 = vpop.f32.mrb[60].mxu1 }
 0x156   :  { %5260 = vst [vmem:[#allocation75_spill] sm:$0xff] %v4719_v16  ;;  %5261 = vst [vmem:[#allocation76_spill] sm:$0xff] %v4721_v17  ;;  %v4723_v20 = vpop.f32.mrb[61].mxu0  ;;  %v4725_v21 = vpop.f32.mrb[61].mxu1 }
 0x157   :  { %5262 = vst [vmem:[#allocation77_spill] sm:$0xff] %v4723_v20  ;;  %5263 = vst [vmem:[#allocation78_spill] sm:$0xff] %v4725_v21  ;;  %v4727_v28 = vpop.f32.mrb[62].mxu0  ;;  %v4729_v29 = vpop.f32.mrb[62].mxu1  ;;  %v4740_v21 = vld [vmem:[%s5185_s2] ss:$0 sm:$0xff] }
 0x158   :  { %5264 = vst [vmem:[#allocation79_spill] sm:$0xff] %v4727_v28  ;;  %5265 = vst [vmem:[#allocation80_spill] sm:$0xff] %v4729_v29  ;;  %v4731_v32 = vpop.f32.mrb[63].mxu0  ;;  %v4733_v33 = vpop.f32.mrb[63].mxu1 }
 0x159   :  { %5266 = vst [vmem:[#allocation81_spill] sm:$0xff] %v4731_v32  ;;  %5267 = vst [vmem:[#allocation82_spill] sm:$0xff] %v4733_v33 }
 0x15d   :  { %v3614_v40 = vpop.f32.mrb[64].mxu0  ;;  %v3742_v41 = vpop.f32.mrb[64].mxu1 }
 0x15e   :  { %v2377_v9 = vmax.f32 %v4407_v52, %v3614_v40  ;;  %v2441_v16 = vmax.f32 %v4409_v53, %v3742_v41  ;;  %v1608_v8 = vpop.f32.mrb[65].mxu0  ;;  %v2120_v17 = vpop.f32.mrb[65].mxu1 }
 0x15f   :  { %v2375_v28 = vmax.f32 %v4411_v54, %v1608_v8  ;;  %v2439_v29 = vmax.f32 %v4413_v55, %v2120_v17  ;;  %v3615_v32 = vpop.f32.mrb[66].mxu0  ;;  %v3743_v20 = vpop.f32.mrb[66].mxu1 }
 0x160   :  { %v2505_v33 = vmax.f32 %v2377_v9, %v2441_v16  ;;  %v2378_v5 = vmax.f32 %v4421_v58, %v3615_v32  ;;  %v2442_v52 = vmax.f32 %v4423_v59, %v3743_v20  ;;  %v1611_v40 = vpop.f32.mrb[67].mxu0  ;;  %v2123_v53 = vpop.f32.mrb[67].mxu1 }
 0x161   :  { %v2503_v41 = vmax.f32 %v2375_v28, %v2439_v29  ;;  %v2376_v4 = vmax.f32 %v4431_v62, %v1611_v40  ;;  %v2440_v61 = vmax.f32 %v4433_v63, %v2123_v53 }
 0x162   :  { %v2576_v60 = vadd.f32 %v4740_v21, %v2505_v33  ;;  %v2506_v57 = vmax.f32 %v2378_v5, %v2442_v52 }
 0x163   :  { %v2574_v54 = vadd.f32 %v4740_v21, %v2503_v41  ;;  %v2504_v55 = vmax.f32 %v2376_v4, %v2440_v61 }
 0x164   :  { %v2640_v8 = vmax.f32 %v2576_v60, 0.0  ;;  %v2577_v9 = vadd.f32 %v4740_v21, %v2506_v57 }
 0x165   :  { %v2638_v58 = vmax.f32 %v2574_v54, 0.0  ;;  %v2575_v59 = vadd.f32 %v4740_v21, %v2504_v55  ;;  %v3618_v16 = vpop.f32.mrb[68].mxu0  ;;  %v3746_v17 = vpop.f32.mrb[68].mxu1 }
 0x166   :  { %v3352_v20 = vpack.c.bf16 %v2640_v8, %v2640_v8  ;;  %v2641_v28 = vmax.f32 %v2577_v9, 0.0  ;;  %v2381_v62 = vmax.f32 %v4439_v0, %v3618_v16  ;;  %v2445_v63 = vmax.f32 %v4441_v1, %v3746_v17  ;;  %v1624_v29 = vpop.f32.mrb[69].mxu0  ;;  %v2136_v5 = vpop.f32.mrb[69].mxu1 }
 0x167   :  { %v3350_v32 = vpack.c.bf16 %v2638_v58, %v2638_v58  ;;  %v2639_v33 = vmax.f32 %v2575_v59, 0.0  ;;  %v2379_v60 = vmax.f32 %v4443_v2, %v1624_v29  ;;  %v2443_v57 = vmax.f32 %v4445_v3, %v2136_v5  ;;  %v3619_v61 = vpop.f32.mrb[70].mxu0  ;;  %v3747_v4 = vpop.f32.mrb[70].mxu1 }
 0x168   :  { %2961 = vst.msk [vmem:[%s5186_s3 + $0x8] sm:$0xf] %vm2958_vm3, %v3352_v20  ;;  %v3353_v52 = vpack.c.bf16 %v2641_v28, %v2641_v28  ;;  %v2509_v40 = vmax.f32 %v2381_v62, %v2445_v63  ;;  %v2382_v0 = vmax.f32 %v4453_v6, %v3619_v61  ;;  %v2446_v1 = vmax.f32 %v4455_v7, %v3747_v4  ;;  %v1627_v53 = vpop.f32.mrb[71].mxu0  ;;  %v2139_v41 = vpop.f32.mrb[71].mxu1 }
 0x169   :  { %2959 = vst.msk [vmem:[%s5186_s3] sm:$0xf] %vm2958_vm3, %v3350_v32  ;;  %v3351_v2 = vpack.c.bf16 %v2639_v33, %v2639_v33  ;;  %v2507_v3 = vmax.f32 %v2379_v60, %v2443_v57  ;;  %v2380_v54 = vmax.f32 %v4463_v10, %v1627_v53  ;;  %v2444_v55 = vmax.f32 %v4465_v11, %v2139_v41 }
 0x16a   :  { %2962 = vst.msk [vmem:[%s5186_s3 + $0xc] sm:$0xf] %vm2958_vm3, %v3353_v52  ;;  %v2580_v6 = vadd.f32 %v4740_v21, %v2509_v40  ;;  %v2510_v7 = vmax.f32 %v2382_v0, %v2446_v1 }
 0x16b   :  { %2960 = vst.msk [vmem:[%s5186_s3 + $0x4] sm:$0xf] %vm2958_vm3, %v3351_v2  ;;  %v2578_v8 = vadd.f32 %v4740_v21, %v2507_v3  ;;  %v2508_v9 = vmax.f32 %v2380_v54, %v2444_v55 }
 0x16c   :  { %v2644_v58 = vmax.f32 %v2580_v6, 0.0  ;;  %v2581_v10 = vadd.f32 %v4740_v21, %v2510_v7 }
 0x16d   :  { %v2642_v11 = vmax.f32 %v2578_v8, 0.0  ;;  %v2579_v59 = vadd.f32 %v4740_v21, %v2508_v9  ;;  %v3622_v16 = vpop.f32.mrb[72].mxu0  ;;  %v3750_v17 = vpop.f32.mrb[72].mxu1 }
 0x16e   :  { %v3356_v20 = vpack.c.bf16 %v2644_v58, %v2644_v58  ;;  %v2645_v28 = vmax.f32 %v2581_v10, 0.0  ;;  %v2385_v62 = vmax.f32 %v4471_v12, %v3622_v16  ;;  %v2449_v63 = vmax.f32 %v4473_v13, %v3750_v17  ;;  %v1640_v29 = vpop.f32.mrb[73].mxu0  ;;  %v2152_v5 = vpop.f32.mrb[73].mxu1 }
 0x16f   :  { %v3354_v32 = vpack.c.bf16 %v2642_v11, %v2642_v11  ;;  %v2643_v33 = vmax.f32 %v2579_v59, 0.0  ;;  %v2383_v60 = vmax.f32 %v4475_v14, %v1640_v29  ;;  %v2447_v57 = vmax.f32 %v4477_v15, %v2152_v5  ;;  %v3623_v61 = vpop.f32.mrb[74].mxu0  ;;  %v3751_v4 = vpop.f32.mrb[74].mxu1 }
 0x170   :  { %2965 = vst.msk [vmem:[%s5186_s3 + $0x18] sm:$0xf] %vm2958_vm3, %v3356_v20  ;;  %v3357_v52 = vpack.c.bf16 %v2645_v28, %v2645_v28  ;;  %v2513_v40 = vmax.f32 %v2385_v62, %v2449_v63  ;;  %v2386_v12 = vmax.f32 %v4485_v18, %v3623_v61  ;;  %v2450_v13 = vmax.f32 %v4487_v19, %v3751_v4  ;;  %v1643_v0 = vpop.f32.mrb[75].mxu0  ;;  %v2155_v1 = vpop.f32.mrb[75].mxu1 }
 0x171   :  { %2963 = vst.msk [vmem:[%s5186_s3 + $0x10] sm:$0xf] %vm2958_vm3, %v3354_v32  ;;  %v3355_v14 = vpack.c.bf16 %v2643_v33, %v2643_v33  ;;  %v2511_v15 = vmax.f32 %v2383_v60, %v2447_v57  ;;  %v2384_v53 = vmax.f32 %v4495_v22, %v1643_v0  ;;  %v2448_v41 = vmax.f32 %v4497_v23, %v2155_v1 }
 0x172   :  { %2966 = vst.msk [vmem:[%s5186_s3 + $0x1c] sm:$0xf] %vm2958_vm3, %v3357_v52  ;;  %v2584_v18 = vadd.f32 %v4740_v21, %v2513_v40  ;;  %v2514_v19 = vmax.f32 %v2386_v12, %v2450_v13 }
 0x173   :  { %2964 = vst.msk [vmem:[%s5186_s3 + $0x14] sm:$0xf] %vm2958_vm3, %v3355_v14  ;;  %v2582_v2 = vadd.f32 %v4740_v21, %v2511_v15  ;;  %v2512_v3 = vmax.f32 %v2384_v53, %v2448_v41 }
 0x174   :  { %v2648_v54 = vmax.f32 %v2584_v18, 0.0  ;;  %v2585_v22 = vadd.f32 %v4740_v21, %v2514_v19 }
 0x175   :  { %v2646_v23 = vmax.f32 %v2582_v2, 0.0  ;;  %v2583_v55 = vadd.f32 %v4740_v21, %v2512_v3  ;;  %v3626_v6 = vpop.f32.mrb[76].mxu0  ;;  %v3754_v7 = vpop.f32.mrb[76].mxu1 }
 0x176   :  { %v3360_v8 = vpack.c.bf16 %v2648_v54, %v2648_v54  ;;  %v2649_v9 = vmax.f32 %v2585_v22, 0.0  ;;  %v2389_v58 = vmax.f32 %v4503_v24, %v3626_v6  ;;  %v2453_v10 = vmax.f32 %v4505_v25, %v3754_v7  ;;  %v1656_v11 = vpop.f32.mrb[77].mxu0  ;;  %v2168_v59 = vpop.f32.mrb[77].mxu1 }
 0x177   :  { %v3358_v16 = vpack.c.bf16 %v2646_v23, %v2646_v23  ;;  %v2647_v17 = vmax.f32 %v2583_v55, 0.0  ;;  %v2387_v20 = vmax.f32 %v4507_v26, %v1656_v11  ;;  %v2451_v28 = vmax.f32 %v4509_v27, %v2168_v59  ;;  %v3627_v62 = vpop.f32.mrb[78].mxu0  ;;  %v3755_v63 = vpop.f32.mrb[78].mxu1 }
 0x178   :  { %2969 = vst.msk [vmem:[%s5186_s3 + $0x28] sm:$0xf] %vm2958_vm3, %v3360_v8  ;;  %v3361_v29 = vpack.c.bf16 %v2649_v9, %v2649_v9  ;;  %v2517_v5 = vmax.f32 %v2389_v58, %v2453_v10  ;;  %v2390_v24 = vmax.f32 %v4517_v30, %v3627_v62  ;;  %v2454_v25 = vmax.f32 %v4519_v31, %v3755_v63  ;;  %v1659_v32 = vpop.f32.mrb[79].mxu0  ;;  %v2171_v33 = vpop.f32.mrb[79].mxu1 }
 0x179   :  { %2967 = vst.msk [vmem:[%s5186_s3 + $0x20] sm:$0xf] %vm2958_vm3, %v3358_v16  ;;  %v3359_v26 = vpack.c.bf16 %v2647_v17, %v2647_v17  ;;  %v2515_v27 = vmax.f32 %v2387_v20, %v2451_v28  ;;  %v2388_v60 = vmax.f32 %v4527_v34, %v1659_v32  ;;  %v2452_v57 = vmax.f32 %v4529_v35, %v2171_v33 }
 0x17a   :  { %2970 = vst.msk [vmem:[%s5186_s3 + $0x2c] sm:$0xf] %vm2958_vm3, %v3361_v29  ;;  %v2588_v30 = vadd.f32 %v4740_v21, %v2517_v5  ;;  %v2518_v31 = vmax.f32 %v2390_v24, %v2454_v25 }
 0x17b   :  { %2968 = vst.msk [vmem:[%s5186_s3 + $0x24] sm:$0xf] %vm2958_vm3, %v3359_v26  ;;  %v2586_v61 = vadd.f32 %v4740_v21, %v2515_v27  ;;  %v2516_v4 = vmax.f32 %v2388_v60, %v2452_v57 }
 0x17c   :  { %v2652_v52 = vmax.f32 %v2588_v30, 0.0  ;;  %v2589_v34 = vadd.f32 %v4740_v21, %v2518_v31 }
 0x17d   :  { %v2650_v35 = vmax.f32 %v2586_v61, 0.0  ;;  %v2587_v40 = vadd.f32 %v4740_v21, %v2516_v4  ;;  %v3630_v12 = vpop.f32.mrb[80].mxu0  ;;  %v3758_v13 = vpop.f32.mrb[80].mxu1  ;;  %v5268_v4 = vld [vmem:[#allocation2_spill] sm:$0xff] }
 0x17e   :  { %v3364_v0 = vpack.c.bf16 %v2652_v52, %v2652_v52  ;;  %v2653_v1 = vmax.f32 %v2589_v34, 0.0  ;;  %v2393_v14 = vmax.f32 %v4535_v36, %v3630_v12  ;;  %v2457_v15 = vmax.f32 %v4537_v37, %v3758_v13  ;;  %v1672_v53 = vpop.f32.mrb[81].mxu0  ;;  %v2184_v41 = vpop.f32.mrb[81].mxu1 }
 0x17f   :  { %v3362_v18 = vpack.c.bf16 %v2650_v35, %v2650_v35  ;;  %v2651_v19 = vmax.f32 %v2587_v40, 0.0  ;;  %v2391_v2 = vmax.f32 %v4539_v38, %v1672_v53  ;;  %v2455_v3 = vmax.f32 %v4541_v39, %v2184_v41  ;;  %v3631_v54 = vpop.f32.mrb[82].mxu0  ;;  %v3759_v22 = vpop.f32.mrb[82].mxu1  ;;  %v5269_v53 = vld [vmem:[#allocation3_spill] sm:$0xff] }
 0x180   :  { %2973 = vst.msk [vmem:[%s5186_s3 + $0x38] sm:$0xf] %vm2958_vm3, %v3364_v0  ;;  %v3365_v23 = vpack.c.bf16 %v2653_v1, %v2653_v1  ;;  %v2521_v55 = vmax.f32 %v2393_v14, %v2457_v15  ;;  %v2394_v36 = vmax.f32 %v4549_v42, %v3631_v54  ;;  %v2458_v37 = vmax.f32 %v4551_v43, %v3759_v22  ;;  %v1675_v6 = vpop.f32.mrb[83].mxu0  ;;  %v2187_v7 = vpop.f32.mrb[83].mxu1 }
 0x181   :  { %2971 = vst.msk [vmem:[%s5186_s3 + $0x30] sm:$0xf] %vm2958_vm3, %v3362_v18  ;;  %v3363_v38 = vpack.c.bf16 %v2651_v19, %v2651_v19  ;;  %v2519_v39 = vmax.f32 %v2391_v2, %v2455_v3  ;;  %v2392_v8 = vmax.f32 %v4553_v44, %v1675_v6  ;;  %v2456_v9 = vmax.f32 %v4555_v45, %v2187_v7  ;;  %v5270_v18 = vld [vmem:[#allocation4_spill] sm:$0xff] }
 0x182   :  { %2974 = vst.msk [vmem:[%s5186_s3 + $0x3c] sm:$0xf] %vm2958_vm3, %v3365_v23  ;;  %v2592_v42 = vadd.f32 %v4740_v21, %v2521_v55  ;;  %v2522_v43 = vmax.f32 %v2394_v36, %v2458_v37  ;;  %v5271_v23 = vld [vmem:[#allocation5_spill] sm:$0xff]  ;;  %v5272_v36 = vld [vmem:[#allocation6_spill] sm:$0xff] }
 0x183   :  { %2972 = vst.msk [vmem:[%s5186_s3 + $0x34] sm:$0xf] %vm2958_vm3, %v3363_v38  ;;  %v2590_v58 = vadd.f32 %v4740_v21, %v2519_v39  ;;  %v2520_v10 = vmax.f32 %v2392_v8, %v2456_v9  ;;  %v5273_v8 = vld [vmem:[#allocation7_spill] sm:$0xff] }
 0x184   :  { %v2656_v11 = vmax.f32 %v2592_v42, 0.0  ;;  %v2593_v44 = vadd.f32 %v4740_v21, %v2522_v43  ;;  %v5274_v42 = vld [vmem:[#allocation8_spill] sm:$0xff] }
 0x185   :  { %v2654_v45 = vmax.f32 %v2590_v58, 0.0  ;;  %v2591_v59 = vadd.f32 %v4740_v21, %v2520_v10  ;;  %v3634_v16 = vpop.f32.mrb[84].mxu0  ;;  %v3762_v17 = vpop.f32.mrb[84].mxu1 }
 0x186   :  { %v3368_v20 = vpack.c.bf16 %v2656_v11, %v2656_v11  ;;  %v2657_v28 = vmax.f32 %v2593_v44, 0.0  ;;  %v2397_v62 = vmax.f32 %v4559_v46, %v3634_v16  ;;  %v2461_v63 = vmax.f32 %v4561_v47, %v3762_v17  ;;  %v1688_v29 = vpop.f32.mrb[85].mxu0  ;;  %v2200_v5 = vpop.f32.mrb[85].mxu1  ;;  %v5276_v16 = vld [vmem:[#allocation10_spill] sm:$0xff] }
 0x187   :  { %v3366_v24 = vpack.c.bf16 %v2654_v45, %v2654_v45  ;;  %v2655_v25 = vmax.f32 %v2591_v59, 0.0  ;;  %v2395_v32 = vmax.f32 %v4563_v48, %v1688_v29  ;;  %v2459_v33 = vmax.f32 %v4565_v49, %v2200_v5  ;;  %v3635_v26 = vpop.f32.mrb[86].mxu0  ;;  %v3763_v27 = vpop.f32.mrb[86].mxu1  ;;  %v5275_v45 = vld [vmem:[#allocation9_spill] sm:$0xff] }
 0x188   :  { %2977 = vst.msk [vmem:[%s5186_s3 + $0x48] sm:$0xf] %vm2958_vm3, %v3368_v20  ;;  %v3369_v60 = vpack.c.bf16 %v2657_v28, %v2657_v28  ;;  %v2525_v57 = vmax.f32 %v2397_v62, %v2461_v63  ;;  %v2398_v46 = vmax.f32 %v4567_v50, %v3635_v26  ;;  %v2462_v47 = vmax.f32 %v4569_v51, %v3763_v27  ;;  %v1691_v30 = vpop.f32.mrb[87].mxu0  ;;  %v2203_v31 = vpop.f32.mrb[87].mxu1 }
 0x189   :  { %2975 = vst.msk [vmem:[%s5186_s3 + $0x40] sm:$0xf] %vm2958_vm3, %v3366_v24  ;;  %v3367_v48 = vpack.c.bf16 %v2655_v25, %v2655_v25  ;;  %v2523_v49 = vmax.f32 %v2395_v32, %v2459_v33  ;;  %v2396_v61 = vmax.f32 %v4571_v56, %v1691_v30  ;;  %v2460_v52 = vmax.f32 %v5268_v4, %v2203_v31 }
 0x18a   :  { %2978 = vst.msk [vmem:[%s5186_s3 + $0x4c] sm:$0xf] %vm2958_vm3, %v3369_v60  ;;  %v2596_v50 = vadd.f32 %v4740_v21, %v2525_v57  ;;  %v2526_v51 = vmax.f32 %v2398_v46, %v2462_v47  ;;  %v5277_v60 = vld [vmem:[#allocation11_spill] sm:$0xff]  ;;  %v5278_v46 = vld [vmem:[#allocation12_spill] sm:$0xff] }
 0x18b   :  { %2976 = vst.msk [vmem:[%s5186_s3 + $0x44] sm:$0xf] %vm2958_vm3, %v3367_v48  ;;  %v2594_v34 = vadd.f32 %v4740_v21, %v2523_v49  ;;  %v2524_v35 = vmax.f32 %v2396_v61, %v2460_v52  ;;  %v5279_v61 = vld [vmem:[#allocation13_spill] sm:$0xff]  ;;  %v5280_v52 = vld [vmem:[#allocation14_spill] sm:$0xff] }
 0x18c   :  { %v2660_v40 = vmax.f32 %v2596_v50, 0.0  ;;  %v2597_v56 = vadd.f32 %v4740_v21, %v2526_v51 }
 0x18d   :  { %v2658_v12 = vmax.f32 %v2594_v34, 0.0  ;;  %v2595_v13 = vadd.f32 %v4740_v21, %v2524_v35  ;;  %v3638_v0 = vpop.f32.mrb[88].mxu0  ;;  %v3766_v1 = vpop.f32.mrb[88].mxu1 }
 0x18e   :  { %v3372_v14 = vpack.c.bf16 %v2660_v40, %v2660_v40  ;;  %v2661_v15 = vmax.f32 %v2597_v56, 0.0  ;;  %v2401_v41 = vmax.f32 %v5269_v53, %v3638_v0  ;;  %v2465_v19 = vmax.f32 %v5270_v18, %v3766_v1  ;;  %v1704_v2 = vpop.f32.mrb[89].mxu0  ;;  %v2216_v3 = vpop.f32.mrb[89].mxu1  ;;  %v5281_v56 = vld [vmem:[#allocation15_spill] sm:$0xff] }
 0x18f   :  { %v3370_v54 = vpack.c.bf16 %v2658_v12, %v2658_v12  ;;  %v2659_v22 = vmax.f32 %v2595_v13, 0.0  ;;  %v2399_v55 = vmax.f32 %v5271_v23, %v1704_v2  ;;  %v2463_v37 = vmax.f32 %v5272_v36, %v2216_v3  ;;  %v3639_v6 = vpop.f32.mrb[90].mxu0  ;;  %v3767_v7 = vpop.f32.mrb[90].mxu1  ;;  %v5282_v13 = vld [vmem:[#allocation16_spill] sm:$0xff] }
 0x190   :  { %2981 = vst.msk [vmem:[%s5186_s3 + $0x58] sm:$0xf] %vm2958_vm3, %v3372_v14  ;;  %v3373_v38 = vpack.c.bf16 %v2661_v15, %v2661_v15  ;;  %v2529_v39 = vmax.f32 %v2401_v41, %v2465_v19  ;;  %v2402_v9 = vmax.f32 %v5273_v8, %v3639_v6  ;;  %v2466_v43 = vmax.f32 %v5274_v42, %v3767_v7  ;;  %v1707_v58 = vpop.f32.mrb[91].mxu0  ;;  %v2219_v10 = vpop.f32.mrb[91].mxu1  ;;  %v5283_v41 = vld [vmem:[#allocation17_spill] sm:$0xff]  ;;  %v5284_v19 = vld [vmem:[#allocation18_spill] sm:$0xff] }
 0x191   :  { %2979 = vst.msk [vmem:[%s5186_s3 + $0x50] sm:$0xf] %vm2958_vm3, %v3370_v54  ;;  %v3371_v11 = vpack.c.bf16 %v2659_v22, %v2659_v22  ;;  %v2527_v44 = vmax.f32 %v2399_v55, %v2463_v37  ;;  %v2400_v59 = vmax.f32 %v5275_v45, %v1707_v58  ;;  %v2464_v17 = vmax.f32 %v5276_v16, %v2219_v10 }
 0x192   :  { %2982 = vst.msk [vmem:[%s5186_s3 + $0x5c] sm:$0xf] %vm2958_vm3, %v3373_v38  ;;  %v2600_v20 = vadd.f32 %v4740_v21, %v2529_v39  ;;  %v2530_v28 = vmax.f32 %v2402_v9, %v2466_v43  ;;  %v5285_v9 = vld [vmem:[#allocation19_spill] sm:$0xff]  ;;  %v5286_v43 = vld [vmem:[#allocation20_spill] sm:$0xff] }
 0x193   :  { %2980 = vst.msk [vmem:[%s5186_s3 + $0x54] sm:$0xf] %vm2958_vm3, %v3371_v11  ;;  %v2598_v62 = vadd.f32 %v4740_v21, %v2527_v44  ;;  %v2528_v63 = vmax.f32 %v2400_v59, %v2464_v17  ;;  %v5287_v59 = vld [vmem:[#allocation21_spill] sm:$0xff]  ;;  %v5288_v17 = vld [vmem:[#allocation22_spill] sm:$0xff] }
 0x194   :  { %v2664_v29 = vmax.f32 %v2600_v20, 0.0  ;;  %v2601_v5 = vadd.f32 %v4740_v21, %v2530_v28 }
 0x195   :  { %v2662_v24 = vmax.f32 %v2598_v62, 0.0  ;;  %v2599_v25 = vadd.f32 %v4740_v21, %v2528_v63  ;;  %v3642_v32 = vpop.f32.mrb[92].mxu0  ;;  %v3770_v33 = vpop.f32.mrb[92].mxu1 }
 0x196   :  { %v3376_v26 = vpack.c.bf16 %v2664_v29, %v2664_v29  ;;  %v2665_v27 = vmax.f32 %v2601_v5, 0.0  ;;  %v2405_v57 = vmax.f32 %v5277_v60, %v3642_v32  ;;  %v2469_v47 = vmax.f32 %v5278_v46, %v3770_v33  ;;  %v1720_v30 = vpop.f32.mrb[93].mxu0  ;;  %v2232_v31 = vpop.f32.mrb[93].mxu1  ;;  %v5289_v5 = vld [vmem:[#allocation23_spill] sm:$0xff] }
 0x197   :  { %v3374_v48 = vpack.c.bf16 %v2662_v24, %v2662_v24  ;;  %v2663_v49 = vmax.f32 %v2599_v25, 0.0  ;;  %v2403_v4 = vmax.f32 %v5279_v61, %v1720_v30  ;;  %v2467_v50 = vmax.f32 %v5280_v52, %v2232_v31  ;;  %v3643_v51 = vpop.f32.mrb[94].mxu0  ;;  %v3771_v34 = vpop.f32.mrb[94].mxu1  ;;  %v5290_v25 = vld [vmem:[#allocation24_spill] sm:$0xff] }
 0x198   :  { %2985 = vst.msk [vmem:[%s5186_s3 + $0x68] sm:$0xf] %vm2958_vm3, %v3376_v26  ;;  %v3377_v35 = vpack.c.bf16 %v2665_v27, %v2665_v27  ;;  %v2533_v40 = vmax.f32 %v2405_v57, %v2469_v47  ;;  %v2406_v12 = vmax.f32 %v5281_v56, %v3643_v51  ;;  %v2470_v0 = vmax.f32 %v5282_v13, %v3771_v34  ;;  %v1723_v1 = vpop.f32.mrb[95].mxu0  ;;  %v2235_v14 = vpop.f32.mrb[95].mxu1  ;;  %v5291_v57 = vld [vmem:[#allocation25_spill] sm:$0xff]  ;;  %v5292_v47 = vld [vmem:[#allocation26_spill] sm:$0xff] }
 0x199   :  { %2983 = vst.msk [vmem:[%s5186_s3 + $0x60] sm:$0xf] %vm2958_vm3, %v3374_v48  ;;  %v3375_v15 = vpack.c.bf16 %v2663_v49, %v2663_v49  ;;  %v2531_v53 = vmax.f32 %v2403_v4, %v2467_v50  ;;  %v2404_v18 = vmax.f32 %v5283_v41, %v1723_v1  ;;  %v2468_v2 = vmax.f32 %v5284_v19, %v2235_v14 }
 0x19a   :  { %2986 = vst.msk [vmem:[%s5186_s3 + $0x6c] sm:$0xf] %vm2958_vm3, %v3377_v35  ;;  %v2604_v3 = vadd.f32 %v4740_v21, %v2533_v40  ;;  %v2534_v54 = vmax.f32 %v2406_v12, %v2470_v0  ;;  %v5293_v12 = vld [vmem:[#allocation27_spill] sm:$0xff]  ;;  %v5294_v0 = vld [vmem:[#allocation28_spill] sm:$0xff] }
 0x19b   :  { %2984 = vst.msk [vmem:[%s5186_s3 + $0x64] sm:$0xf] %vm2958_vm3, %v3375_v15  ;;  %v2602_v22 = vadd.f32 %v4740_v21, %v2531_v53  ;;  %v2532_v23 = vmax.f32 %v2404_v18, %v2468_v2  ;;  %v5295_v18 = vld [vmem:[#allocation29_spill] sm:$0xff]  ;;  %v5296_v2 = vld [vmem:[#allocation30_spill] sm:$0xff] }
 0x19c   :  { %v2668_v55 = vmax.f32 %v2604_v3, 0.0  ;;  %v2605_v36 = vadd.f32 %v4740_v21, %v2534_v54 }
 0x19d   :  { %v2666_v37 = vmax.f32 %v2602_v22, 0.0  ;;  %v2603_v6 = vadd.f32 %v4740_v21, %v2532_v23  ;;  %v3646_v7 = vpop.f32.mrb[96].mxu0  ;;  %v3774_v38 = vpop.f32.mrb[96].mxu1 }
 0x19e   :  { %v3380_v39 = vpack.c.bf16 %v2668_v55, %v2668_v55  ;;  %v2669_v8 = vmax.f32 %v2605_v36, 0.0  ;;  %v2409_v42 = vmax.f32 %v5285_v9, %v3646_v7  ;;  %v2473_v58 = vmax.f32 %v5286_v43, %v3774_v38  ;;  %v1736_v10 = vpop.f32.mrb[97].mxu0  ;;  %v2248_v11 = vpop.f32.mrb[97].mxu1  ;;  %v5297_v36 = vld [vmem:[#allocation31_spill] sm:$0xff] }
 0x19f   :  { %v3378_v44 = vpack.c.bf16 %v2666_v37, %v2666_v37  ;;  %v2667_v45 = vmax.f32 %v2603_v6, 0.0  ;;  %v2407_v16 = vmax.f32 %v5287_v59, %v1736_v10  ;;  %v2471_v20 = vmax.f32 %v5288_v17, %v2248_v11  ;;  %v3647_v28 = vpop.f32.mrb[98].mxu0  ;;  %v3775_v62 = vpop.f32.mrb[98].mxu1  ;;  %v5298_v6 = vld [vmem:[#allocation32_spill] sm:$0xff] }
 0x1a0   :  { %2989 = vst.msk [vmem:[%s5186_s3 + $0x78] sm:$0xf] %vm2958_vm3, %v3380_v39  ;;  %v3381_v63 = vpack.c.bf16 %v2669_v8, %v2669_v8  ;;  %v2537_v29 = vmax.f32 %v2409_v42, %v2473_v58  ;;  %v2410_v24 = vmax.f32 %v5289_v5, %v3647_v28  ;;  %v2474_v32 = vmax.f32 %v5290_v25, %v3775_v62  ;;  %v1739_v33 = vpop.f32.mrb[99].mxu0  ;;  %v2251_v26 = vpop.f32.mrb[99].mxu1  ;;  %v5299_v42 = vld [vmem:[#allocation33_spill] sm:$0xff]  ;;  %v5300_v58 = vld [vmem:[#allocation34_spill] sm:$0xff] }
 0x1a1   :  { %2987 = vst.msk [vmem:[%s5186_s3 + $0x70] sm:$0xf] %vm2958_vm3, %v3378_v44  ;;  %v3379_v27 = vpack.c.bf16 %v2667_v45, %v2667_v45  ;;  %v2535_v60 = vmax.f32 %v2407_v16, %v2471_v20  ;;  %v2408_v46 = vmax.f32 %v5291_v57, %v1739_v33  ;;  %v2472_v30 = vmax.f32 %v5292_v47, %v2251_v26 }
 0x1a2   :  { %2990 = vst.msk [vmem:[%s5186_s3 + $0x7c] sm:$0xf] %vm2958_vm3, %v3381_v63  ;;  %v2608_v31 = vadd.f32 %v4740_v21, %v2537_v29  ;;  %v2538_v48 = vmax.f32 %v2410_v24, %v2474_v32  ;;  %v5301_v24 = vld [vmem:[#allocation35_spill] sm:$0xff]  ;;  %v5302_v32 = vld [vmem:[#allocation36_spill] sm:$0xff] }
 0x1a3   :  { %2988 = vst.msk [vmem:[%s5186_s3 + $0x74] sm:$0xf] %vm2958_vm3, %v3379_v27  ;;  %v2606_v49 = vadd.f32 %v4740_v21, %v2535_v60  ;;  %v2536_v61 = vmax.f32 %v2408_v46, %v2472_v30  ;;  %v5303_v46 = vld [vmem:[#allocation37_spill] sm:$0xff]  ;;  %v5304_v30 = vld [vmem:[#allocation38_spill] sm:$0xff] }
 0x1a4   :  { %v2672_v4 = vmax.f32 %v2608_v31, 0.0  ;;  %v2609_v52 = vadd.f32 %v4740_v21, %v2538_v48 }
 0x1a5   :  { %v2670_v50 = vmax.f32 %v2606_v49, 0.0  ;;  %v2607_v51 = vadd.f32 %v4740_v21, %v2536_v61  ;;  %v3650_v34 = vpop.f32.mrb[100].mxu0  ;;  %v3778_v35 = vpop.f32.mrb[100].mxu1 }
 0x1a6   :  { %v3384_v40 = vpack.c.bf16 %v2672_v4, %v2672_v4  ;;  %v2673_v56 = vmax.f32 %v2609_v52, 0.0  ;;  %v2413_v13 = vmax.f32 %v5293_v12, %v3650_v34  ;;  %v2477_v1 = vmax.f32 %v5294_v0, %v3778_v35  ;;  %v1752_v14 = vpop.f32.mrb[101].mxu0  ;;  %v2264_v15 = vpop.f32.mrb[101].mxu1  ;;  %v5305_v52 = vld [vmem:[#allocation39_spill] sm:$0xff] }
 0x1a7   :  { %v3382_v53 = vpack.c.bf16 %v2670_v50, %v2670_v50  ;;  %v2671_v41 = vmax.f32 %v2607_v51, 0.0  ;;  %v2411_v19 = vmax.f32 %v5295_v18, %v1752_v14  ;;  %v2475_v3 = vmax.f32 %v5296_v2, %v2264_v15  ;;  %v3651_v54 = vpop.f32.mrb[102].mxu0  ;;  %v3779_v22 = vpop.f32.mrb[102].mxu1  ;;  %v5306_v51 = vld [vmem:[#allocation40_spill] sm:$0xff] }
 0x1a8   :  { %2993 = vst.msk [vmem:[%s5186_s3 + $0x88] sm:$0xf] %vm2958_vm3, %v3384_v40  ;;  %v3385_v23 = vpack.c.bf16 %v2673_v56, %v2673_v56  ;;  %v2541_v55 = vmax.f32 %v2413_v13, %v2477_v1  ;;  %v2414_v37 = vmax.f32 %v5297_v36, %v3651_v54  ;;  %v2478_v7 = vmax.f32 %v5298_v6, %v3779_v22  ;;  %v1755_v38 = vpop.f32.mrb[103].mxu0  ;;  %v2267_v39 = vpop.f32.mrb[103].mxu1  ;;  %v5307_v13 = vld [vmem:[#allocation41_spill] sm:$0xff]  ;;  %v5308_v1 = vld [vmem:[#allocation42_spill] sm:$0xff] }
 0x1a9   :  { %2991 = vst.msk [vmem:[%s5186_s3 + $0x80] sm:$0xf] %vm2958_vm3, %v3382_v53  ;;  %v3383_v8 = vpack.c.bf16 %v2671_v41, %v2671_v41  ;;  %v2539_v9 = vmax.f32 %v2411_v19, %v2475_v3  ;;  %v2412_v43 = vmax.f32 %v5299_v42, %v1755_v38  ;;  %v2476_v10 = vmax.f32 %v5300_v58, %v2267_v39 }
 0x1aa   :  { %2994 = vst.msk [vmem:[%s5186_s3 + $0x8c] sm:$0xf] %vm2958_vm3, %v3385_v23  ;;  %v2612_v11 = vadd.f32 %v4740_v21, %v2541_v55  ;;  %v2542_v44 = vmax.f32 %v2414_v37, %v2478_v7  ;;  %v5309_v37 = vld [vmem:[#allocation43_spill] sm:$0xff]  ;;  %v5310_v7 = vld [vmem:[#allocation44_spill] sm:$0xff] }
 0x1ab   :  { %2992 = vst.msk [vmem:[%s5186_s3 + $0x84] sm:$0xf] %vm2958_vm3, %v3383_v8  ;;  %v2610_v45 = vadd.f32 %v4740_v21, %v2539_v9  ;;  %v2540_v59 = vmax.f32 %v2412_v43, %v2476_v10  ;;  %v5311_v43 = vld [vmem:[#allocation45_spill] sm:$0xff]  ;;  %v5312_v10 = vld [vmem:[#allocation46_spill] sm:$0xff] }
 0x1ac   :  { %v2676_v16 = vmax.f32 %v2612_v11, 0.0  ;;  %v2613_v17 = vadd.f32 %v4740_v21, %v2542_v44 }
 0x1ad   :  { %v2674_v20 = vmax.f32 %v2610_v45, 0.0  ;;  %v2611_v28 = vadd.f32 %v4740_v21, %v2540_v59  ;;  %v3654_v62 = vpop.f32.mrb[104].mxu0  ;;  %v3782_v63 = vpop.f32.mrb[104].mxu1 }
 0x1ae   :  { %v3388_v29 = vpack.c.bf16 %v2676_v16, %v2676_v16  ;;  %v2677_v5 = vmax.f32 %v2613_v17, 0.0  ;;  %v2417_v25 = vmax.f32 %v5301_v24, %v3654_v62  ;;  %v2481_v33 = vmax.f32 %v5302_v32, %v3782_v63  ;;  %v1768_v26 = vpop.f32.mrb[105].mxu0  ;;  %v2280_v27 = vpop.f32.mrb[105].mxu1  ;;  %v5313_v17 = vld [vmem:[#allocation47_spill] sm:$0xff] }
 0x1af   :  { %v3386_v60 = vpack.c.bf16 %v2674_v20, %v2674_v20  ;;  %v2675_v57 = vmax.f32 %v2611_v28, 0.0  ;;  %v2415_v47 = vmax.f32 %v5303_v46, %v1768_v26  ;;  %v2479_v31 = vmax.f32 %v5304_v30, %v2280_v27  ;;  %v3655_v48 = vpop.f32.mrb[106].mxu0  ;;  %v3783_v49 = vpop.f32.mrb[106].mxu1  ;;  %v5314_v28 = vld [vmem:[#allocation48_spill] sm:$0xff] }
 0x1b0   :  { %2997 = vst.msk [vmem:[%s5186_s3 + $0x98] sm:$0xf] %vm2958_vm3, %v3388_v29  ;;  %v3389_v61 = vpack.c.bf16 %v2677_v5, %v2677_v5  ;;  %v2545_v4 = vmax.f32 %v2417_v25, %v2481_v33  ;;  %v2418_v50 = vmax.f32 %v5305_v52, %v3655_v48  ;;  %v2482_v34 = vmax.f32 %v5306_v51, %v3783_v49  ;;  %v1771_v35 = vpop.f32.mrb[107].mxu0  ;;  %v2283_v40 = vpop.f32.mrb[107].mxu1  ;;  %v5315_v25 = vld [vmem:[#allocation49_spill] sm:$0xff]  ;;  %v5316_v33 = vld [vmem:[#allocation50_spill] sm:$0xff] }
 0x1b1   :  { %2995 = vst.msk [vmem:[%s5186_s3 + $0x90] sm:$0xf] %vm2958_vm3, %v3386_v60  ;;  %v3387_v56 = vpack.c.bf16 %v2675_v57, %v2675_v57  ;;  %v2543_v12 = vmax.f32 %v2415_v47, %v2479_v31  ;;  %v2416_v0 = vmax.f32 %v5307_v13, %v1771_v35  ;;  %v2480_v14 = vmax.f32 %v5308_v1, %v2283_v40 }
 0x1b2   :  { %2998 = vst.msk [vmem:[%s5186_s3 + $0x9c] sm:$0xf] %vm2958_vm3, %v3389_v61  ;;  %v2616_v15 = vadd.f32 %v4740_v21, %v2545_v4  ;;  %v2546_v53 = vmax.f32 %v2418_v50, %v2482_v34  ;;  %v5317_v50 = vld [vmem:[#allocation51_spill] sm:$0xff]  ;;  %v5318_v34 = vld [vmem:[#allocation52_spill] sm:$0xff] }
 0x1b3   :  { %2996 = vst.msk [vmem:[%s5186_s3 + $0x94] sm:$0xf] %vm2958_vm3, %v3387_v56  ;;  %v2614_v41 = vadd.f32 %v4740_v21, %v2543_v12  ;;  %v2544_v18 = vmax.f32 %v2416_v0, %v2480_v14  ;;  %v5319_v0 = vld [vmem:[#allocation53_spill] sm:$0xff]  ;;  %v5320_v14 = vld [vmem:[#allocation54_spill] sm:$0xff] }
 0x1b4   :  { %v2680_v19 = vmax.f32 %v2616_v15, 0.0  ;;  %v2617_v2 = vadd.f32 %v4740_v21, %v2546_v53 }
 0x1b5   :  { %v2678_v3 = vmax.f32 %v2614_v41, 0.0  ;;  %v2615_v54 = vadd.f32 %v4740_v21, %v2544_v18  ;;  %v3658_v22 = vpop.f32.mrb[108].mxu0  ;;  %v3786_v23 = vpop.f32.mrb[108].mxu1 }
 0x1b6   :  { %v3392_v55 = vpack.c.bf16 %v2680_v19, %v2680_v19  ;;  %v2681_v36 = vmax.f32 %v2617_v2, 0.0  ;;  %v2421_v6 = vmax.f32 %v5309_v37, %v3658_v22  ;;  %v2485_v38 = vmax.f32 %v5310_v7, %v3786_v23  ;;  %v1784_v39 = vpop.f32.mrb[109].mxu0  ;;  %v2296_v8 = vpop.f32.mrb[109].mxu1  ;;  %v5321_v2 = vld [vmem:[#allocation55_spill] sm:$0xff] }
 0x1b7   :  { %v3390_v9 = vpack.c.bf16 %v2678_v3, %v2678_v3  ;;  %v2679_v42 = vmax.f32 %v2615_v54, 0.0  ;;  %v2419_v58 = vmax.f32 %v5311_v43, %v1784_v39  ;;  %v2483_v11 = vmax.f32 %v5312_v10, %v2296_v8  ;;  %v3659_v44 = vpop.f32.mrb[110].mxu0  ;;  %v3787_v45 = vpop.f32.mrb[110].mxu1  ;;  %v5322_v54 = vld [vmem:[#allocation56_spill] sm:$0xff] }
 0x1b8   :  { %3001 = vst.msk [vmem:[%s5186_s3 + $0xa8] sm:$0xf] %vm2958_vm3, %v3392_v55  ;;  %v3393_v59 = vpack.c.bf16 %v2681_v36, %v2681_v36  ;;  %v2549_v16 = vmax.f32 %v2421_v6, %v2485_v38  ;;  %v2422_v20 = vmax.f32 %v5313_v17, %v3659_v44  ;;  %v2486_v62 = vmax.f32 %v5314_v28, %v3787_v45  ;;  %v1787_v63 = vpop.f32.mrb[111].mxu0  ;;  %v2299_v29 = vpop.f32.mrb[111].mxu1  ;;  %v5323_v6 = vld [vmem:[#allocation57_spill] sm:$0xff]  ;;  %v5324_v38 = vld [vmem:[#allocation58_spill] sm:$0xff] }
 0x1b9   :  { %2999 = vst.msk [vmem:[%s5186_s3 + $0xa0] sm:$0xf] %vm2958_vm3, %v3390_v9  ;;  %v3391_v5 = vpack.c.bf16 %v2679_v42, %v2679_v42  ;;  %v2547_v24 = vmax.f32 %v2419_v58, %v2483_v11  ;;  %v2420_v32 = vmax.f32 %v5315_v25, %v1787_v63  ;;  %v2484_v26 = vmax.f32 %v5316_v33, %v2299_v29 }
 0x1ba   :  { %3002 = vst.msk [vmem:[%s5186_s3 + $0xac] sm:$0xf] %vm2958_vm3, %v3393_v59  ;;  %v2620_v27 = vadd.f32 %v4740_v21, %v2549_v16  ;;  %v2550_v60 = vmax.f32 %v2422_v20, %v2486_v62  ;;  %v5325_v20 = vld [vmem:[#allocation59_spill] sm:$0xff]  ;;  %v5326_v62 = vld [vmem:[#allocation60_spill] sm:$0xff] }
 0x1bb   :  { %3000 = vst.msk [vmem:[%s5186_s3 + $0xa4] sm:$0xf] %vm2958_vm3, %v3391_v5  ;;  %v2618_v57 = vadd.f32 %v4740_v21, %v2547_v24  ;;  %v2548_v46 = vmax.f32 %v2420_v32, %v2484_v26  ;;  %v5327_v32 = vld [vmem:[#allocation61_spill] sm:$0xff]  ;;  %v5328_v26 = vld [vmem:[#allocation62_spill] sm:$0xff] }
 0x1bc   :  { %v2684_v47 = vmax.f32 %v2620_v27, 0.0  ;;  %v2621_v30 = vadd.f32 %v4740_v21, %v2550_v60 }
 0x1bd   :  { %v2682_v31 = vmax.f32 %v2618_v57, 0.0  ;;  %v2619_v48 = vadd.f32 %v4740_v21, %v2548_v46  ;;  %v3662_v49 = vpop.f32.mrb[112].mxu0  ;;  %v3790_v61 = vpop.f32.mrb[112].mxu1 }
 0x1be   :  { %v3396_v4 = vpack.c.bf16 %v2684_v47, %v2684_v47  ;;  %v2685_v52 = vmax.f32 %v2621_v30, 0.0  ;;  %v2425_v51 = vmax.f32 %v5317_v50, %v3662_v49  ;;  %v2489_v35 = vmax.f32 %v5318_v34, %v3790_v61  ;;  %v1800_v40 = vpop.f32.mrb[113].mxu0  ;;  %v2312_v56 = vpop.f32.mrb[113].mxu1  ;;  %v5329_v30 = vld [vmem:[#allocation63_spill] sm:$0xff] }
 0x1bf   :  { %v3394_v12 = vpack.c.bf16 %v2682_v31, %v2682_v31  ;;  %v2683_v13 = vmax.f32 %v2619_v48, 0.0  ;;  %v2423_v1 = vmax.f32 %v5319_v0, %v1800_v40  ;;  %v2487_v15 = vmax.f32 %v5320_v14, %v2312_v56  ;;  %v3663_v53 = vpop.f32.mrb[114].mxu0  ;;  %v3791_v41 = vpop.f32.mrb[114].mxu1  ;;  %v5330_v48 = vld [vmem:[#allocation64_spill] sm:$0xff] }
 0x1c0   :  { %3005 = vst.msk [vmem:[%s5186_s3 + $0xb8] sm:$0xf] %vm2958_vm3, %v3396_v4  ;;  %v3397_v18 = vpack.c.bf16 %v2685_v52, %v2685_v52  ;;  %v2553_v19 = vmax.f32 %v2425_v51, %v2489_v35  ;;  %v2426_v3 = vmax.f32 %v5321_v2, %v3663_v53  ;;  %v2490_v22 = vmax.f32 %v5322_v54, %v3791_v41  ;;  %v1803_v23 = vpop.f32.mrb[115].mxu0  ;;  %v2315_v55 = vpop.f32.mrb[115].mxu1  ;;  %v5331_v51 = vld [vmem:[#allocation65_spill] sm:$0xff]  ;;  %v5332_v35 = vld [vmem:[#allocation66_spill] sm:$0xff] }
 0x1c1   :  { %3003 = vst.msk [vmem:[%s5186_s3 + $0xb0] sm:$0xf] %vm2958_vm3, %v3394_v12  ;;  %v3395_v36 = vpack.c.bf16 %v2683_v13, %v2683_v13  ;;  %v2551_v37 = vmax.f32 %v2423_v1, %v2487_v15  ;;  %v2424_v7 = vmax.f32 %v5323_v6, %v1803_v23  ;;  %v2488_v39 = vmax.f32 %v5324_v38, %v2315_v55 }
 0x1c2   :  { %3006 = vst.msk [vmem:[%s5186_s3 + $0xbc] sm:$0xf] %vm2958_vm3, %v3397_v18  ;;  %v2624_v8 = vadd.f32 %v4740_v21, %v2553_v19  ;;  %v2554_v9 = vmax.f32 %v2426_v3, %v2490_v22  ;;  %v5333_v3 = vld [vmem:[#allocation67_spill] sm:$0xff]  ;;  %v5334_v22 = vld [vmem:[#allocation68_spill] sm:$0xff] }
 0x1c3   :  { %3004 = vst.msk [vmem:[%s5186_s3 + $0xb4] sm:$0xf] %vm2958_vm3, %v3395_v36  ;;  %v2622_v42 = vadd.f32 %v4740_v21, %v2551_v37  ;;  %v2552_v43 = vmax.f32 %v2424_v7, %v2488_v39  ;;  %v5335_v7 = vld [vmem:[#allocation69_spill] sm:$0xff]  ;;  %v5336_v39 = vld [vmem:[#allocation70_spill] sm:$0xff] }
 0x1c4   :  { %v2688_v58 = vmax.f32 %v2624_v8, 0.0  ;;  %v2625_v10 = vadd.f32 %v4740_v21, %v2554_v9 }
 0x1c5   :  { %v2686_v11 = vmax.f32 %v2622_v42, 0.0  ;;  %v2623_v44 = vadd.f32 %v4740_v21, %v2552_v43  ;;  %v3666_v45 = vpop.f32.mrb[116].mxu0  ;;  %v3794_v59 = vpop.f32.mrb[116].mxu1 }
 0x1c6   :  { %v3400_v16 = vpack.c.bf16 %v2688_v58, %v2688_v58  ;;  %v2689_v17 = vmax.f32 %v2625_v10, 0.0  ;;  %v2429_v28 = vmax.f32 %v5325_v20, %v3666_v45  ;;  %v2493_v63 = vmax.f32 %v5326_v62, %v3794_v59  ;;  %v1816_v29 = vpop.f32.mrb[117].mxu0  ;;  %v2328_v5 = vpop.f32.mrb[117].mxu1  ;;  %v5337_v58 = vld [vmem:[#allocation71_spill] sm:$0xff]  ;;  %v5339_v20 = vld [vmem:[#allocation73_spill] sm:$0xff]  ;;  %v5340_v62 = vld [vmem:[#allocation74_spill] sm:$0xff] }
 0x1c7   :  { %v3398_v24 = vpack.c.bf16 %v2686_v11, %v2686_v11  ;;  %v2687_v25 = vmax.f32 %v2623_v44, 0.0  ;;  %v2427_v33 = vmax.f32 %v5327_v32, %v1816_v29  ;;  %v2491_v27 = vmax.f32 %v5328_v26, %v2328_v5  ;;  %v3667_v60 = vpop.f32.mrb[118].mxu0  ;;  %v3795_v57 = vpop.f32.mrb[118].mxu1  ;;  %v5338_v11 = vld [vmem:[#allocation72_spill] sm:$0xff]  ;;  %v3939_v29 = vld [vmem:[%s5185_s2] ss:$0 sm:$0xff] }
 0x1c8   :  { %3009 = vst.msk [vmem:[%s5186_s3 + $0xc8] sm:$0xf] %vm2958_vm3, %v3400_v16  ;;  %v3401_v46 = vpack.c.bf16 %v2689_v17, %v2689_v17  ;;  %v2557_v47 = vmax.f32 %v2429_v28, %v2493_v63  ;;  %v2430_v31 = vmax.f32 %v5329_v30, %v3667_v60  ;;  %v2494_v49 = vmax.f32 %v5330_v48, %v3795_v57  ;;  %v1819_v61 = vpop.f32.mrb[119].mxu0  ;;  %v2331_v4 = vpop.f32.mrb[119].mxu1 }
 0x1c9   :  { %3007 = vst.msk [vmem:[%s5186_s3 + $0xc0] sm:$0xf] %vm2958_vm3, %v3398_v24  ;;  %v3399_v52 = vpack.c.bf16 %v2687_v25, %v2687_v25  ;;  %v2555_v50 = vmax.f32 %v2427_v33, %v2491_v27  ;;  %v2428_v34 = vmax.f32 %v5331_v51, %v1819_v61  ;;  %v2492_v40 = vmax.f32 %v5332_v35, %v2331_v4 }
 0x1ca   :  { %3010 = vst.msk [vmem:[%s5186_s3 + $0xcc] sm:$0xf] %vm2958_vm3, %v3401_v46  ;;  %v2628_v56 = vadd.f32 %v4740_v21, %v2557_v47  ;;  %v2558_v12 = vmax.f32 %v2430_v31, %v2494_v49  ;;  %v5341_v31 = vld [vmem:[#allocation75_spill] sm:$0xff]  ;;  %v5342_v49 = vld [vmem:[#allocation76_spill] sm:$0xff] }
 0x1cb   :  { %3008 = vst.msk [vmem:[%s5186_s3 + $0xc4] sm:$0xf] %vm2958_vm3, %v3399_v52  ;;  %v2626_v13 = vadd.f32 %v4740_v21, %v2555_v50  ;;  %v2556_v0 = vmax.f32 %v2428_v34, %v2492_v40  ;;  %v5343_v34 = vld [vmem:[#allocation77_spill] sm:$0xff]  ;;  %v5344_v40 = vld [vmem:[#allocation78_spill] sm:$0xff] }
 0x1cc   :  { %v2692_v1 = vmax.f32 %v2628_v56, 0.0  ;;  %v2629_v14 = vadd.f32 %v4740_v21, %v2558_v12 }
 0x1cd   :  { %v2690_v15 = vmax.f32 %v2626_v13, 0.0  ;;  %v2627_v53 = vadd.f32 %v4740_v21, %v2556_v0  ;;  %v3670_v41 = vpop.f32.mrb[120].mxu0  ;;  %v3798_v18 = vpop.f32.mrb[120].mxu1 }
 0x1ce   :  { %v3404_v19 = vpack.c.bf16 %v2692_v1, %v2692_v1  ;;  %v2693_v2 = vmax.f32 %v2629_v14, 0.0  ;;  %v2433_v54 = vmax.f32 %v5333_v3, %v3670_v41  ;;  %v2497_v23 = vmax.f32 %v5334_v22, %v3798_v18  ;;  %v1832_v55 = vpop.f32.mrb[121].mxu0  ;;  %v2344_v36 = vpop.f32.mrb[121].mxu1  ;;  %v5345_v14 = vld [vmem:[#allocation79_spill] sm:$0xff] }
 0x1cf   :  { %v3402_v37 = vpack.c.bf16 %v2690_v15, %v2690_v15  ;;  %v2691_v6 = vmax.f32 %v2627_v53, 0.0  ;;  %v2431_v38 = vmax.f32 %v5335_v7, %v1832_v55  ;;  %v2495_v8 = vmax.f32 %v5336_v39, %v2344_v36  ;;  %v3671_v9 = vpop.f32.mrb[122].mxu0  ;;  %v3799_v42 = vpop.f32.mrb[122].mxu1  ;;  %v5346_v53 = vld [vmem:[#allocation80_spill] sm:$0xff] }
 0x1d0   :  { %3013 = vst.msk [vmem:[%s5186_s3 + $0xd8] sm:$0xf] %vm2958_vm3, %v3404_v19  ;;  %v3405_v21 = vpack.c.bf16 %v2693_v2, %v2693_v2  ;;  %v2561_v43 = vmax.f32 %v2433_v54, %v2497_v23  ;;  %v2434_v10 = vmax.f32 %v5337_v58, %v3671_v9  ;;  %v2498_v44 = vmax.f32 %v5338_v11, %v3799_v42  ;;  %v1835_v45 = vpop.f32.mrb[123].mxu0  ;;  %v2347_v59 = vpop.f32.mrb[123].mxu1  ;;  %v5347_v54 = vld [vmem:[#allocation81_spill] sm:$0xff]  ;;  %v5348_v23 = vld [vmem:[#allocation82_spill] sm:$0xff] }
 0x1d1   :  { %3011 = vst.msk [vmem:[%s5186_s3 + $0xd0] sm:$0xf] %vm2958_vm3, %v3402_v37  ;;  %v3403_v16 = vpack.c.bf16 %v2691_v6, %v2691_v6  ;;  %v2559_v17 = vmax.f32 %v2431_v38, %v2495_v8  ;;  %v2432_v28 = vmax.f32 %v5339_v20, %v1835_v45  ;;  %v2496_v63 = vmax.f32 %v5340_v62, %v2347_v59 }
 0x1d2   :  { %3014 = vst.msk [vmem:[%s5186_s3 + $0xdc] sm:$0xf] %vm2958_vm3, %v3405_v21  ;;  %v2632_v5 = vadd.f32 %v3939_v29, %v2561_v43  ;;  %v2562_v24 = vmax.f32 %v2434_v10, %v2498_v44 }
 0x1d3   :  { %3012 = vst.msk [vmem:[%s5186_s3 + $0xd4] sm:$0xf] %vm2958_vm3, %v3403_v16  ;;  %v2630_v25 = vadd.f32 %v3939_v29, %v2559_v17  ;;  %v2560_v32 = vmax.f32 %v2432_v28, %v2496_v63 }
 0x1d4   :  { %v2696_v33 = vmax.f32 %v2632_v5, 0.0  ;;  %v2633_v26 = vadd.f32 %v3939_v29, %v2562_v24 }
 0x1d5   :  { %v2694_v27 = vmax.f32 %v2630_v25, 0.0  ;;  %v2631_v60 = vadd.f32 %v3939_v29, %v2560_v32  ;;  %v3674_v57 = vpop.f32.mrb[124].mxu0  ;;  %v3802_v46 = vpop.f32.mrb[124].mxu1 }
 0x1d6   :  { %v3408_v47 = vpack.c.bf16 %v2696_v33, %v2696_v33  ;;  %v2697_v30 = vmax.f32 %v2633_v26, 0.0  ;;  %v2437_v48 = vmax.f32 %v5341_v31, %v3674_v57  ;;  %v2501_v61 = vmax.f32 %v5342_v49, %v3802_v46  ;;  %v1848_v4 = vpop.f32.mrb[125].mxu0  ;;  %v2360_v52 = vpop.f32.mrb[125].mxu1 }
 0x1d7   :  { %v3406_v50 = vpack.c.bf16 %v2694_v27, %v2694_v27  ;;  %v2695_v51 = vmax.f32 %v2631_v60, 0.0  ;;  %v2435_v35 = vmax.f32 %v5343_v34, %v1848_v4  ;;  %v2499_v56 = vmax.f32 %v5344_v40, %v2360_v52  ;;  %v3675_v12 = vpop.f32.mrb[126].mxu0  ;;  %v3803_v13 = vpop.f32.mrb[126].mxu1 }
 0x1d8   :  { %3017 = vst.msk [vmem:[%s5186_s3 + $0xe8] sm:$0xf] %vm2958_vm3, %v3408_v47  ;;  %v3409_v0 = vpack.c.bf16 %v2697_v30, %v2697_v30  ;;  %v2565_v1 = vmax.f32 %v2437_v48, %v2501_v61  ;;  %v2438_v15 = vmax.f32 %v5345_v14, %v3675_v12  ;;  %v2502_v41 = vmax.f32 %v5346_v53, %v3803_v13  ;;  %v1851_v18 = vpop.f32.mrb[127].mxu0  ;;  %v2363_v19 = vpop.f32.mrb[127].mxu1 }
 0x1d9   :  { %3015 = vst.msk [vmem:[%s5186_s3 + $0xe0] sm:$0xf] %vm2958_vm3, %v3406_v50  ;;  %v3407_v2 = vpack.c.bf16 %v2695_v51, %v2695_v51  ;;  %v2563_v3 = vmax.f32 %v2435_v35, %v2499_v56  ;;  %v2436_v22 = vmax.f32 %v5347_v54, %v1851_v18  ;;  %v2500_v55 = vmax.f32 %v5348_v23, %v2363_v19 }
 0x1da   :  { %3018 = vst.msk [vmem:[%s5186_s3 + $0xec] sm:$0xf] %vm2958_vm3, %v3409_v0  ;;  %v2636_v36 = vadd.f32 %v3939_v29, %v2565_v1  ;;  %v2566_v37 = vmax.f32 %v2438_v15, %v2502_v41 }
 0x1db   :  { %3016 = vst.msk [vmem:[%s5186_s3 + $0xe4] sm:$0xf] %vm2958_vm3, %v3407_v2  ;;  %v2634_v6 = vadd.f32 %v3939_v29, %v2563_v3  ;;  %v2564_v7 = vmax.f32 %v2436_v22, %v2500_v55 }
 0x1dc   :  { %v2700_v38 = vmax.f32 %v2636_v36, 0.0  ;;  %v2637_v39 = vadd.f32 %v3939_v29, %v2566_v37 }
 0x1dd   :  { %v2698_v8 = vmax.f32 %v2634_v6, 0.0  ;;  %v2635_v9 = vadd.f32 %v3939_v29, %v2564_v7 }
 0x1de   :  { %v3412_v42 = vpack.c.bf16 %v2700_v38, %v2700_v38  ;;  %v2701_v21 = vmax.f32 %v2637_v39, 0.0 }
 0x1df   :  { %v3410_v43 = vpack.c.bf16 %v2698_v8, %v2698_v8  ;;  %v2699_v58 = vmax.f32 %v2635_v9, 0.0 }
 0x1e0   :  { %3021 = vst.msk [vmem:[%s5186_s3 + $0xf8] sm:$0xf] %vm2958_vm3, %v3412_v42  ;;  %v3413_v10 = vpack.c.bf16 %v2701_v21, %v2701_v21 }
 0x1e1   :  { %3019 = vst.msk [vmem:[%s5186_s3 + $0xf0] sm:$0xf] %vm2958_vm3, %v3410_v43  ;;  %v3411_v11 = vpack.c.bf16 %v2699_v58, %v2699_v58 }
 0x1e2   :  { %3022 = vst.msk [vmem:[%s5186_s3 + $0xfc] sm:$0xf] %vm2958_vm3, %v3413_v10 }
 0x1e3   :  { %3020 = vst.msk [vmem:[%s5186_s3 + $0xf4] sm:$0xf] %vm2958_vm3, %v3411_v11 }

// kernel: conv_autoencoder_forward.5
= control target key start
LH: loop header
LB: loop body
LE: loop exit
PB: predicated region body
PF: predicated region fallthrough
CT: control target
= control target key end

     0   :  { %v3219_v0 = vmov 0   ;;  %vm1295_vm0 = vcmask 523264   ;;  %s4439_s1 = inlined_call_operand.vmem [shape: bf16[576,128], index: 1, kind: input, shape index: {}]   ;;  %s4440_s0 = inlined_call_operand.vmem [shape: bf16[512,576], index: 0, kind: input, shape index: {}]   ;;  %s4441_s2 = inlined_call_operand.vmem [shape: f32[1,128], index: 2, kind: input, shape index: {}]   ;;  %s4442_s3 = inlined_call_operand.vmem [shape: bf16[128,128], index: 3, kind: output, shape index: {}]  }
   0x1   :  { %1392 = vmatprep.subr.bf16.mxu0 %v3219_v0  ;;  %2846 = vmatprep.subr.bf16.mxu1 %v3219_v0  ;;  %v2959_v1 = vld [vmem:[%s4439_s1] sm:$0xff]   ;;  %v2960_v2 = vld [vmem:[%s4439_s1 + $0x8] sm:$0xff]   ;;  %v2961_v3 = vld [vmem:[%s4439_s1 + $0x10] sm:$0xff]  }
   0x2   :  { %1393 = vmatpush1.bf16.msra.mxu0 %v2959_v1  ;;  %2862 = vmatpush1.bf16.msra.mxu1 %v2959_v1  ;;  %v2962_v4 = vld [vmem:[%s4439_s1 + $0x18] sm:$0xff]   ;;  %v2963_v5 = vld [vmem:[%s4439_s1 + $0x20] sm:$0xff]   ;;  %v2964_v7 = vld [vmem:[%s4439_s1 + $0x28] sm:$0xff]  }
   0x3   :  { %1394 = vmatprep.subr.bf16.mxu0 %v3219_v0  ;;  %2847 = vmatprep.subr.bf16.mxu1 %v3219_v0  ;;  %v2977_v6 = vld [vmem:[%s4440_s0 + $0x4] ss:$20 sps:$4 sm:$0xff]   ;;  %v2965_v9 = vld [vmem:[%s4439_s1 + $0x30] sm:$0xff]   ;;  %v2968_v12 = vld [vmem:[%s4439_s1 + $0x48] sm:$0xff]  }
   0x4   :  { %v2980_v8 = vld [vmem:[%s4440_s0 + $0x144] ss:$20 sps:$4 sm:$0xff]   ;;  %1424 = vmatprep.mubr.bf16.mxu0 %v2977_v6  ;;  %v2969_v13 = vld [vmem:[%s4439_s1 + $0x50] sm:$0xff]   ;;  %v2972_v16 = vld [vmem:[%s4439_s1 + $0x68] sm:$0xff]  }
   0x5   :  { %1488 = vmatprep.mubr.bf16.mxu1 %v2980_v8  ;;  %v2966_v10 = vld [vmem:[%s4439_s1 + $0x38] sm:$0xff]   ;;  %v2967_v11 = vld [vmem:[%s4439_s1 + $0x40] sm:$0xff]   ;;  %v2973_v17 = vld [vmem:[%s4439_s1 + $0x70] sm:$0xff]  }
   0x6   :  { %1395 = vmatpush1.bf16.msra.mxu0 %v2960_v2  ;;  %2863 = vmatpush1.bf16.msra.mxu1 %v2960_v2  ;;  %v2970_v14 = vld [vmem:[%s4439_s1 + $0x58] sm:$0xff]   ;;  %v2971_v15 = vld [vmem:[%s4439_s1 + $0x60] sm:$0xff]   ;;  %v3031_v25 = vld [vmem:[%s4439_s1 + $0x108] sm:$0xff]  }
   0x7   :  { %1396 = vmatprep.subr.bf16.mxu0 %v3219_v0  ;;  %2848 = vmatprep.subr.bf16.mxu1 %v3219_v0  ;;  %v2974_v18 = vld [vmem:[%s4439_s1 + $0x78] sm:$0xff]   ;;  %v2982_v19 = vld [vmem:[%s4439_s1 + $0x100] sm:$0xff]   ;;  %v2983_v26 = vld [vmem:[%s4439_s1 + $0x88] sm:$0xff]  }
   0x8   :  { %v2975_v20 = vld [vmem:[%s4440_s0] ss:$20 sps:$4 sm:$0xff]   ;;  %v2988_v27 = vld [vmem:[%s4440_s0 + $0x28] ss:$20 sps:$4 sm:$0xff]   ;;  %v2996_v34 = vld [vmem:[%s4440_s0 + $0x50] ss:$20 sps:$4 sm:$0xff]  }
   0x9   :  { %v2978_v21 = vld [vmem:[%s4440_s0 + $0x140] ss:$20 sps:$4 sm:$0xff]   ;;  %v2989_v28 = vld [vmem:[%s4440_s0 + $0x168] ss:$20 sps:$4 sm:$0xff]   ;;  %v2997_v35 = vld [vmem:[%s4440_s0 + $0x190] ss:$20 sps:$4 sm:$0xff]  }
   0xa   :  { %1397 = vmatpush1.bf16.msra.mxu0 %v2961_v3  ;;  %2864 = vmatpush1.bf16.msra.mxu1 %v2961_v3  ;;  %v2981_v22 = vld [vmem:[%s4439_s1 + $0x80] sm:$0xff]   ;;  %v2990_v29 = vld [vmem:[%s4439_s1 + $0x90] sm:$0xff]   ;;  %v2991_v33 = vld [vmem:[%s4439_s1 + $0x98] sm:$0xff]  }
   0xb   :  { %1398 = vmatprep.subr.bf16.mxu0 %v3219_v0  ;;  %2849 = vmatprep.subr.bf16.mxu1 %v3219_v0  ;;  %v2984_v23 = vld [vmem:[%s4440_s0 + $0x2c] ss:$20 sps:$4 sm:$0xff]   ;;  %v3071_v30 = vld [vmem:[%s4439_s1 + $0x110] sm:$0xff]   ;;  %v3008_v43 = vld [vmem:[%s4440_s0 + $0xa4] ss:$20 sps:$4 sm:$0xff]  }
   0xc   :  { %v2986_v24 = vld [vmem:[%s4440_s0 + $0x16c] ss:$20 sps:$4 sm:$0xff]   ;;  %v2992_v31 = vld [vmem:[%s4440_s0 + $0x54] ss:$20 sps:$4 sm:$0xff]   ;;  %v3000_v37 = vld [vmem:[%s4440_s0 + $0x7c] ss:$20 sps:$4 sm:$0xff]  }
   0xd   :  { %v2994_v32 = vld [vmem:[%s4440_s0 + $0x194] ss:$20 sps:$4 sm:$0xff]   ;;  %v2998_v36 = vld [vmem:[%s4439_s1 + $0xa0] sm:$0xff]   ;;  %v3002_v38 = vld [vmem:[%s4440_s0 + $0x1bc] ss:$20 sps:$4 sm:$0xff]  }
   0xe   :  { %1399 = vmatpush1.bf16.msra.mxu0 %v2962_v4  ;;  %2865 = vmatpush1.bf16.msra.mxu1 %v2962_v4  ;;  %v2999_v39 = vld [vmem:[%s4439_s1 + $0xa8] sm:$0xff]   ;;  %v3006_v42 = vld [vmem:[%s4439_s1 + $0xb0] sm:$0xff]   ;;  %v3108_v44 = vld [vmem:[%s4439_s1 + $0x118] sm:$0xff]  }
   0xf   :  { %1400 = vmatprep.subr.bf16.mxu0 %v3219_v0  ;;  %2850 = vmatprep.subr.bf16.mxu1 %v3219_v0  ;;  %v3004_v40 = vld [vmem:[%s4440_s0 + $0x78] ss:$20 sps:$4 sm:$0xff]   ;;  %v3012_v47 = vld [vmem:[%s4440_s0 + $0xa0] ss:$20 sps:$4 sm:$0xff]   ;;  %v3020_v53 = vld [vmem:[%s4440_s0 + $0xc8] ss:$20 sps:$4 sm:$0xff]  }
  0x10   :  { %v3005_v41 = vld [vmem:[%s4440_s0 + $0x1b8] ss:$20 sps:$4 sm:$0xff]   ;;  %v3013_v48 = vld [vmem:[%s4440_s0 + $0x1e0] ss:$20 sps:$4 sm:$0xff]   ;;  %v3021_v54 = vld [vmem:[%s4440_s0 + $0x208] ss:$20 sps:$4 sm:$0xff]  }
  0x11   :  { %v3010_v45 = vld [vmem:[%s4440_s0 + $0x1e4] ss:$20 sps:$4 sm:$0xff]   ;;  %v3016_v50 = vld [vmem:[%s4440_s0 + $0xcc] ss:$20 sps:$4 sm:$0xff]   ;;  %v3022_v55 = vld [vmem:[%s4439_s1 + $0xd0] sm:$0xff]  }
  0x12   :  { %1401 = vmatpush1.bf16.msra.mxu0 %v2963_v5  ;;  %2866 = vmatpush1.bf16.msra.mxu1 %v2963_v5  ;;  %v3007_v46 = vld [vmem:[%s4439_s1 + $0xb8] sm:$0xff]   ;;  %v3014_v49 = vld [vmem:[%s4439_s1 + $0xc0] sm:$0xff]   ;;  %v3015_v52 = vld [vmem:[%s4439_s1 + $0xc8] sm:$0xff]  }
  0x13   :  { %1402 = vmatprep.subr.bf16.mxu0 %v3219_v0  ;;  %2851 = vmatprep.subr.bf16.mxu1 %v3219_v0  ;;  %v3018_v51 = vld [vmem:[%s4440_s0 + $0x20c] ss:$20 sps:$4 sm:$0xff]   ;;  %v3024_v56 = vld [vmem:[%s4440_s0 + $0xf4] ss:$20 sps:$4 sm:$0xff]   ;;  %v3023_v58 = vld [vmem:[%s4439_s1 + $0xd8] sm:$0xff]  }
  0x14   :  { %v3026_v57 = vld [vmem:[%s4440_s0 + $0x234] ss:$20 sps:$4 sm:$0xff]   ;;  %v3028_v59 = vld [vmem:[%s4440_s0 + $0xf0] ss:$20 sps:$4 sm:$0xff]   ;;  %v3037_v2 = vld [vmem:[%s4440_s0 + $0x118] ss:$20 sps:$4 sm:$0xff]  }
  0x15   :  { %v3029_v60 = vld [vmem:[%s4440_s0 + $0x230] ss:$20 sps:$4 sm:$0xff]   ;;  %v3032_v1 = vld [vmem:[%s4439_s1 + $0xe8] sm:$0xff]  }
  0x16   :  { %1403 = vmatpush1.bf16.msra.mxu0 %v2964_v7  ;;  %2867 = vmatpush1.bf16.msra.mxu1 %v2964_v7  ;;  %v3030_v61 = vld [vmem:[%s4439_s1 + $0xe0] sm:$0xff]   ;;  %v3033_v62 = vld [vmem:[%s4440_s0 + $0x11c] ss:$20 sps:$4 sm:$0xff]   ;;  %v3038_v3 = vld [vmem:[%s4440_s0 + $0x258] ss:$20 sps:$4 sm:$0xff]  }
  0x17   :  { %1404 = vmatprep.subr.bf16.mxu0 %v3219_v0  ;;  %2852 = vmatprep.subr.bf16.mxu1 %v3219_v0  ;;  %v3035_v63 = vld [vmem:[%s4440_s0 + $0x25c] ss:$20 sps:$4 sm:$0xff]   ;;  %v3041_v5 = vld [vmem:[%s4440_s0 + $0x284] ss:$20 sps:$4 sm:$0xff]   ;;  %v3045_v6 = vld [vmem:[%s4440_s0 + $0xc] ss:$20 sps:$4 sm:$0xff]  }
  0x18   :  { %v3039_v4 = vld [vmem:[%s4439_s1 + $0xf0] sm:$0xff]   ;;  %v3040_v7 = vld [vmem:[%s4439_s1 + $0xf8] sm:$0xff]  }
  0x19   :  { %v3043_v8 = vld [vmem:[%s4440_s0 + $0x8] ss:$20 sps:$4 sm:$0xff]  }
  0x1a   :  { %1405 = vmatpush1.bf16.msra.mxu0 %v2965_v9  ;;  %2868 = vmatpush1.bf16.msra.mxu1 %v2965_v9  ;;  %v3046_v9 = vld [vmem:[%s4440_s0 + $0x280] ss:$20 sps:$4 sm:$0xff]  }
  0x1b   :  { %1406 = vmatprep.subr.bf16.mxu0 %v3219_v0  ;;  %2853 = vmatprep.subr.bf16.mxu1 %v3219_v0 }
  0x1e   :  { %1407 = vmatpush1.bf16.msra.mxu0 %v2966_v10  ;;  %2869 = vmatpush1.bf16.msra.mxu1 %v2966_v10  ;;  %v3047_v10 = vld [vmem:[%s4440_s0 + $0x2ac] ss:$20 sps:$4 sm:$0xff]  }
  0x1f   :  { %1408 = vmatprep.subr.bf16.mxu0 %v3219_v0  ;;  %2854 = vmatprep.subr.bf16.mxu1 %v3219_v0 }
  0x22   :  { %1409 = vmatpush1.bf16.msra.mxu0 %v2967_v11  ;;  %2870 = vmatpush1.bf16.msra.mxu1 %v2967_v11  ;;  %v3049_v11 = vld [vmem:[%s4440_s0 + $0x34] ss:$20 sps:$4 sm:$0xff]  }
  0x23   :  { %1410 = vmatprep.subr.bf16.mxu0 %v3219_v0  ;;  %2855 = vmatprep.subr.bf16.mxu1 %v3219_v0 }
  0x26   :  { %1411 = vmatpush1.bf16.msra.mxu0 %v2968_v12  ;;  %2871 = vmatpush1.bf16.msra.mxu1 %v2968_v12  ;;  %v3052_v12 = vld [vmem:[%s4440_s0 + $0x30] ss:$20 sps:$4 sm:$0xff]  }
  0x27   :  { %1412 = vmatprep.subr.bf16.mxu0 %v3219_v0  ;;  %2856 = vmatprep.subr.bf16.mxu1 %v3219_v0 }
  0x2a   :  { %1413 = vmatpush1.bf16.msra.mxu0 %v2969_v13  ;;  %2872 = vmatpush1.bf16.msra.mxu1 %v2969_v13  ;;  %v3053_v13 = vld [vmem:[%s4440_s0 + $0x2d4] ss:$20 sps:$4 sm:$0xff]  }
  0x2b   :  { %1414 = vmatprep.subr.bf16.mxu0 %v3219_v0  ;;  %2857 = vmatprep.subr.bf16.mxu1 %v3219_v0 }
  0x2e   :  { %1415 = vmatpush1.bf16.msra.mxu0 %v2970_v14  ;;  %2873 = vmatpush1.bf16.msra.mxu1 %v2970_v14  ;;  %v3055_v14 = vld [vmem:[%s4440_s0 + $0x5c] ss:$20 sps:$4 sm:$0xff]  }
  0x2f   :  { %1416 = vmatprep.subr.bf16.mxu0 %v3219_v0  ;;  %2858 = vmatprep.subr.bf16.mxu1 %v3219_v0 }
  0x32   :  { %1417 = vmatpush1.bf16.msra.mxu0 %v2971_v15  ;;  %2874 = vmatpush1.bf16.msra.mxu1 %v2971_v15  ;;  %v3057_v15 = vld [vmem:[%s4440_s0 + $0x2d0] ss:$20 sps:$4 sm:$0xff]  }
  0x33   :  { %1418 = vmatprep.subr.bf16.mxu0 %v3219_v0  ;;  %2859 = vmatprep.subr.bf16.mxu1 %v3219_v0 }
  0x36   :  { %1419 = vmatpush1.bf16.msra.mxu0 %v2972_v16  ;;  %2875 = vmatpush1.bf16.msra.mxu1 %v2972_v16  ;;  %v3058_v16 = vld [vmem:[%s4440_s0 + $0x58] ss:$20 sps:$4 sm:$0xff]  }
  0x37   :  { %1420 = vmatprep.subr.bf16.mxu0 %v3219_v0  ;;  %2860 = vmatprep.subr.bf16.mxu1 %v3219_v0 }
  0x3a   :  { %1421 = vmatpush1.bf16.msra.mxu0 %v2973_v17  ;;  %2876 = vmatpush1.bf16.msra.mxu1 %v2973_v17  ;;  %v3059_v17 = vld [vmem:[%s4440_s0 + $0x2fc] ss:$20 sps:$4 sm:$0xff]  }
  0x3b   :  { %1422 = vmatprep.subr.bf16.mxu0 %v3219_v0  ;;  %2861 = vmatprep.subr.bf16.mxu1 %v3219_v0 }
  0x3e   :  { %1423 = vmatpush1.bf16.msra.mxu0 %v2974_v18  ;;  %2877 = vmatpush1.bf16.msra.mxu1 %v2974_v18  ;;  %v3061_v18 = vld [vmem:[%s4440_s0 + $0x84] ss:$20 sps:$4 sm:$0xff]  }
  0x3f   :  { %1681 = vmatprep.subr.bf16.mxu0 %v3219_v0  ;;  %2774 = vmatprep.subr.bf16.mxu1 %v2982_v19 }
  0x41   :  { %1425 = vmatmul.mubr.bf16.vlgmr.msra.gmra.mrb[0].mxu0 %v2975_v20  ;;  %1489 = vmatmul.mubr.bf16.vlgmr.msra.gmra.mrb[0].mxu1 %v2978_v21  ;;  %v3064_v20 = vld [vmem:[%s4440_s0 + $0x80] ss:$20 sps:$4 sm:$0xff]   ;;  %v3065_v21 = vld [vmem:[%s4440_s0 + $0x324] ss:$20 sps:$4 sm:$0xff]  }
  0x42   :  { %1682 = vmatpush1.bf16.msra.mxu0 %v2981_v22  ;;  %2775 = vmatpush3.bf16.msra.mxu1 %v2982_v19  ;;  %v3063_v19 = vld [vmem:[%s4440_s0 + $0x2f8] ss:$20 sps:$4 sm:$0xff]  }
  0x43   :  { %1683 = vmatprep.subr.bf16.mxu0 %v3219_v0  ;;  %1432 = vmatprep.mubr.bf16.mxu0 %v2984_v23  ;;  %v3067_v22 = vld [vmem:[%s4440_s0 + $0xac] ss:$20 sps:$4 sm:$0xff]  }
  0x44   :  { %1496 = vmatprep.mubr.bf16.mxu1 %v2986_v24  ;;  %2776 = vmatprep.subr.bf16.mxu1 %v3031_v25  ;;  %v3069_v23 = vld [vmem:[%s4440_s0 + $0x320] ss:$20 sps:$4 sm:$0xff]   ;;  %v3070_v24 = vld [vmem:[%s4440_s0 + $0xa8] ss:$20 sps:$4 sm:$0xff]  }
  0x46   :  { %1684 = vmatpush1.bf16.msra.mxu0 %v2983_v26  ;;  %2777 = vmatpush3.bf16.msra.mxu1 %v3031_v25  ;;  %v3072_v25 = vld [vmem:[%s4440_s0 + $0x34c] ss:$20 sps:$4 sm:$0xff]   ;;  %v3074_v26 = vld [vmem:[%s4440_s0 + $0xd4] ss:$20 sps:$4 sm:$0xff]  }
  0x47   :  { %1685 = vmatprep.subr.bf16.mxu0 %v3219_v0  ;;  %2778 = vmatprep.subr.bf16.mxu1 %v3071_v30 }
  0x49   :  { %1433 = vmatmul.mubr.bf16.gmra.mrb[4].mxu0 %v2988_v27  ;;  %1497 = vmatmul.mubr.bf16.gmra.mrb[4].mxu1 %v2989_v28  ;;  %v3076_v27 = vld [vmem:[%s4440_s0 + $0x348] ss:$20 sps:$4 sm:$0xff]   ;;  %v3077_v28 = vld [vmem:[%s4440_s0 + $0xd0] ss:$20 sps:$4 sm:$0xff]  }
  0x4a   :  { %1686 = vmatpush1.bf16.msra.mxu0 %v2990_v29  ;;  %1440 = vmatprep.mubr.bf16.mxu0 %v2992_v31  ;;  %v3078_v29 = vld [vmem:[%s4440_s0 + $0x374] ss:$20 sps:$4 sm:$0xff]   ;;  %v3082_v31 = vld [vmem:[%s4440_s0 + $0x370] ss:$20 sps:$4 sm:$0xff]  }
  0x4b   :  { %1687 = vmatprep.subr.bf16.mxu0 %v3219_v0  ;;  %1504 = vmatprep.mubr.bf16.mxu1 %v2994_v32  ;;  %v3083_v32 = vld [vmem:[%s4440_s0 + $0xf8] ss:$20 sps:$4 sm:$0xff]  }
  0x4c   :  { %2779 = vmatpush3.bf16.msra.mxu1 %v3071_v30  ;;  %v3080_v30 = vld [vmem:[%s4440_s0 + $0xfc] ss:$20 sps:$4 sm:$0xff]  }
  0x4d   :  { %2780 = vmatprep.subr.bf16.mxu1 %v3108_v44 }
  0x4e   :  { %1688 = vmatpush1.bf16.msra.mxu0 %v2991_v33  ;;  %v3084_v33 = vld [vmem:[%s4440_s0 + $0x39c] ss:$20 sps:$4 sm:$0xff]  }
  0x4f   :  { %1689 = vmatprep.subr.bf16.mxu0 %v3219_v0 }
  0x50   :  { %2781 = vmatpush3.bf16.msra.mxu1 %v3108_v44  ;;  %v3101_v44 = vld [vmem:[%s4440_s0 + $0x170] ss:$20 sps:$4 sm:$0xff]  }
  0x51   :  { %1441 = vmatmul.mubr.bf16.gmra.mrb[8].mxu0 %v2996_v34  ;;  %1505 = vmatmul.mubr.bf16.gmra.mrb[8].mxu1 %v2997_v35  ;;  %v3086_v34 = vld [vmem:[%s4440_s0 + $0x124] ss:$20 sps:$4 sm:$0xff]  }
  0x52   :  { %1690 = vmatpush1.bf16.msra.mxu0 %v2998_v36  ;;  %1448 = vmatprep.mubr.bf16.mxu0 %v3000_v37  ;;  %v3088_v35 = vld [vmem:[%s4440_s0 + $0x398] ss:$20 sps:$4 sm:$0xff]   ;;  %v3089_v36 = vld [vmem:[%s4440_s0 + $0x120] ss:$20 sps:$4 sm:$0xff]  }
  0x53   :  { %1691 = vmatprep.subr.bf16.mxu0 %v3219_v0  ;;  %1512 = vmatprep.mubr.bf16.mxu1 %v3002_v38  ;;  %v3090_v37 = vld [vmem:[%s4440_s0 + $0x3c4] ss:$20 sps:$4 sm:$0xff]   ;;  %v3092_v38 = vld [vmem:[%s4440_s0 + $0x14c] ss:$20 sps:$4 sm:$0xff]  }
  0x56   :  { %1692 = vmatpush1.bf16.msra.mxu0 %v2999_v39  ;;  %v3094_v39 = vld [vmem:[%s4440_s0 + $0x3c0] ss:$20 sps:$4 sm:$0xff]  }
  0x57   :  { %1693 = vmatprep.subr.bf16.mxu0 %v3219_v0 }
  0x59   :  { %1449 = vmatmul.mubr.bf16.gmra.mrb[12].mxu0 %v3004_v40  ;;  %1513 = vmatmul.mubr.bf16.gmra.mrb[12].mxu1 %v3005_v41  ;;  %v3095_v40 = vld [vmem:[%s4440_s0 + $0x148] ss:$20 sps:$4 sm:$0xff]   ;;  %v3096_v41 = vld [vmem:[%s4440_s0 + $0x3ec] ss:$20 sps:$4 sm:$0xff]  }
  0x5a   :  { %1694 = vmatpush1.bf16.msra.mxu0 %v3006_v42  ;;  %1456 = vmatprep.mubr.bf16.mxu0 %v3008_v43  ;;  %v3098_v42 = vld [vmem:[%s4440_s0 + $0x174] ss:$20 sps:$4 sm:$0xff]  }
  0x5b   :  { %1695 = vmatprep.subr.bf16.mxu0 %v3219_v0  ;;  %1520 = vmatprep.mubr.bf16.mxu1 %v3010_v45  ;;  %v3100_v43 = vld [vmem:[%s4440_s0 + $0x3e8] ss:$20 sps:$4 sm:$0xff]  }
  0x5c   :  { %v3102_v45 = vld [vmem:[%s4440_s0 + $0x414] ss:$20 sps:$4 sm:$0xff]  }
  0x5e   :  { %1696 = vmatpush1.bf16.msra.mxu0 %v3007_v46  ;;  %v3104_v46 = vld [vmem:[%s4440_s0 + $0x19c] ss:$20 sps:$4 sm:$0xff]  }
  0x5f   :  { %1697 = vmatprep.subr.bf16.mxu0 %v3219_v0 }
  0x61   :  { %1457 = vmatmul.mubr.bf16.gmra.mrb[16].mxu0 %v3012_v47  ;;  %1521 = vmatmul.mubr.bf16.gmra.mrb[16].mxu1 %v3013_v48  ;;  %v3106_v47 = vld [vmem:[%s4440_s0 + $0x410] ss:$20 sps:$4 sm:$0xff]   ;;  %v3107_v48 = vld [vmem:[%s4440_s0 + $0x198] ss:$20 sps:$4 sm:$0xff]  }
  0x62   :  { %1698 = vmatpush1.bf16.msra.mxu0 %v3014_v49  ;;  %1464 = vmatprep.mubr.bf16.mxu0 %v3016_v50  ;;  %v3109_v49 = vld [vmem:[%s4440_s0 + $0x43c] ss:$20 sps:$4 sm:$0xff]   ;;  %v3111_v50 = vld [vmem:[%s4440_s0 + $0x1c4] ss:$20 sps:$4 sm:$0xff]  }
  0x63   :  { %1699 = vmatprep.subr.bf16.mxu0 %v3219_v0  ;;  %1528 = vmatprep.mubr.bf16.mxu1 %v3018_v51  ;;  %v3113_v51 = vld [vmem:[%s4440_s0 + $0x438] ss:$20 sps:$4 sm:$0xff]  }
  0x66   :  { %1700 = vmatpush1.bf16.msra.mxu0 %v3015_v52  ;;  %v3114_v52 = vld [vmem:[%s4440_s0 + $0x1c0] ss:$20 sps:$4 sm:$0xff]  }
  0x67   :  { %1701 = vmatprep.subr.bf16.mxu0 %v3219_v0 }
  0x69   :  { %1465 = vmatmul.mubr.bf16.gmra.mrb[20].mxu0 %v3020_v53  ;;  %1529 = vmatmul.mubr.bf16.gmra.mrb[20].mxu1 %v3021_v54  ;;  %v3115_v53 = vld [vmem:[%s4440_s0 + $0x464] ss:$20 sps:$4 sm:$0xff]   ;;  %v3117_v54 = vld [vmem:[%s4440_s0 + $0x1ec] ss:$20 sps:$4 sm:$0xff]  }
  0x6a   :  { %1702 = vmatpush1.bf16.msra.mxu0 %v3022_v55  ;;  %1472 = vmatprep.mubr.bf16.mxu0 %v3024_v56  ;;  %v3119_v55 = vld [vmem:[%s4440_s0 + $0x460] ss:$20 sps:$4 sm:$0xff]   ;;  %v3120_v56 = vld [vmem:[%s4440_s0 + $0x1e8] ss:$20 sps:$4 sm:$0xff]  }
  0x6b   :  { %1703 = vmatprep.subr.bf16.mxu0 %v3219_v0  ;;  %1536 = vmatprep.mubr.bf16.mxu1 %v3026_v57  ;;  %v3121_v57 = vld [vmem:[%s4440_s0 + $0x48c] ss:$20 sps:$4 sm:$0xff]  }
  0x6e   :  { %1704 = vmatpush1.bf16.msra.mxu0 %v3023_v58  ;;  %v3123_v58 = vld [vmem:[%s4440_s0 + $0x214] ss:$20 sps:$4 sm:$0xff]  }
  0x6f   :  { %1705 = vmatprep.subr.bf16.mxu0 %v3219_v0 }
  0x71   :  { %1473 = vmatmul.mubr.bf16.gmra.mrb[24].mxu0 %v3028_v59  ;;  %1537 = vmatmul.mubr.bf16.gmra.mrb[24].mxu1 %v3029_v60  ;;  %v3125_v59 = vld [vmem:[%s4440_s0 + $0x488] ss:$20 sps:$4 sm:$0xff]   ;;  %v3126_v60 = vld [vmem:[%s4440_s0 + $0x210] ss:$20 sps:$4 sm:$0xff]  }
  0x72   :  { %1706 = vmatpush1.bf16.msra.mxu0 %v3030_v61  ;;  %1480 = vmatprep.mubr.bf16.mxu0 %v3033_v62  ;;  %v3127_v61 = vld [vmem:[%s4440_s0 + $0x4b4] ss:$20 sps:$4 sm:$0xff]   ;;  %v3129_v62 = vld [vmem:[%s4440_s0 + $0x23c] ss:$20 sps:$4 sm:$0xff]  }
  0x73   :  { %1707 = vmatprep.subr.bf16.mxu0 %v3219_v0  ;;  %1544 = vmatprep.mubr.bf16.mxu1 %v3035_v63  ;;  %v3131_v63 = vld [vmem:[%s4440_s0 + $0x4b0] ss:$20 sps:$4 sm:$0xff]  }
  0x76   :  { %1708 = vmatpush1.bf16.msra.mxu0 %v3032_v1  ;;  %v3132_v1 = vld [vmem:[%s4440_s0 + $0x238] ss:$20 sps:$4 sm:$0xff]  }
  0x77   :  { %1709 = vmatprep.subr.bf16.mxu0 %v3219_v0 }
  0x79   :  { %1481 = vmatmul.mubr.bf16.gmra.mrb[28].mxu0 %v3037_v2  ;;  %1545 = vmatmul.mubr.bf16.gmra.mrb[28].mxu1 %v3038_v3  ;;  %v3133_v2 = vld [vmem:[%s4440_s0 + $0x4dc] ss:$20 sps:$4 sm:$0xff]   ;;  %v3135_v3 = vld [vmem:[%s4440_s0 + $0x264] ss:$20 sps:$4 sm:$0xff]  }
  0x7a   :  { %1710 = vmatpush1.bf16.msra.mxu0 %v3039_v4  ;;  %1552 = vmatprep.mubr.bf16.mxu1 %v3041_v5  ;;  %v3137_v4 = vld [vmem:[%s4440_s0 + $0x4d8] ss:$20 sps:$4 sm:$0xff]   ;;  %v3138_v5 = vld [vmem:[%s4440_s0 + $0x260] ss:$20 sps:$4 sm:$0xff]  }
  0x7b   :  { %1711 = vmatprep.subr.bf16.mxu0 %v3219_v0  ;;  %1713 = vmatprep.mubr.bf16.mxu0 %v3045_v6  ;;  %v3051_v0 = vld [vmem:[%s4440_s0 + $0x2a8] ss:$20 sps:$4 sm:$0xff]   ;;  %v3139_v6 = vld [vmem:[%s4440_s0 + $0x28c] ss:$20 sps:$4 sm:$0xff]  }
  0x7e   :  { %1712 = vmatpush1.bf16.msra.mxu0 %v3040_v7  ;;  %v3141_v7 = vld [vmem:[%s4440_s0 + $0x10] ss:$20 sps:$4 sm:$0xff]  }
  0x81   :  { %1553 = vmatmul.mubr.bf16.gmra.mrb[32].mxu1 %v3046_v9  ;;  %1714 = vmatmul.mubr.bf16.vlgmr.msra.gmra.mrb[0].mxu0 %v3043_v8  ;;  %v3142_v8 = vld [vmem:[%s4440_s0 + $0x288] ss:$20 sps:$4 sm:$0xff]   ;;  %v3143_v9 = vld [vmem:[%s4440_s0 + $0x38] ss:$20 sps:$4 sm:$0xff]  }
  0x82   :  { %1560 = vmatprep.mubr.bf16.mxu1 %v3047_v10  ;;  %1721 = vmatprep.mubr.bf16.mxu0 %v3049_v11  ;;  %v3144_v10 = vld [vmem:[%s4440_s0 + $0x2b4] ss:$20 sps:$4 sm:$0xff]  }
  0x83   :  { %v3146_v11 = vld [vmem:[%s4440_s0 + $0x60] ss:$20 sps:$4 sm:$0xff]  }
  0x89   :  { %1561 = vmatmul.mubr.bf16.gmra.mrb[36].mxu1 %v3051_v0  ;;  %1722 = vmatmul.mubr.bf16.gmra.mrb[4].mxu0 %v3052_v12  ;;  %v3147_v0 = vld [vmem:[%s4440_s0 + $0x2b0] ss:$20 sps:$4 sm:$0xff]   ;;  %v3148_v12 = vld [vmem:[%s4440_s0 + $0x88] ss:$20 sps:$4 sm:$0xff]  }
  0x8a   :  { %1568 = vmatprep.mubr.bf16.mxu1 %v3053_v13  ;;  %1729 = vmatprep.mubr.bf16.mxu0 %v3055_v14  ;;  %v3149_v13 = vld [vmem:[%s4440_s0 + $0x2dc] ss:$20 sps:$4 sm:$0xff]  }
  0x8b   :  { %v3151_v14 = vld [vmem:[%s4440_s0 + $0xb0] ss:$20 sps:$4 sm:$0xff]  }
  0x91   :  { %1569 = vmatmul.mubr.bf16.gmra.mrb[40].mxu1 %v3057_v15  ;;  %1730 = vmatmul.mubr.bf16.gmra.mrb[8].mxu0 %v3058_v16  ;;  %v3152_v15 = vld [vmem:[%s4440_s0 + $0x2d8] ss:$20 sps:$4 sm:$0xff]  }
  0x92   :  { %1576 = vmatprep.mubr.bf16.mxu1 %v3059_v17  ;;  %1737 = vmatprep.mubr.bf16.mxu0 %v3061_v18  ;;  %v3153_v16 = vld [vmem:[%s4440_s0 + $0xd8] ss:$20 sps:$4 sm:$0xff]   ;;  %v3156_v18 = vld [vmem:[%s4440_s0 + $0x100] ss:$20 sps:$4 sm:$0xff]  }
  0x93   :  { %v3154_v17 = vld [vmem:[%s4440_s0 + $0x304] ss:$20 sps:$4 sm:$0xff]  }
  0x99   :  { %1577 = vmatmul.mubr.bf16.gmra.mrb[44].mxu1 %v3063_v19  ;;  %1738 = vmatmul.mubr.bf16.gmra.mrb[12].mxu0 %v3064_v20 }
  0x9a   :  { %1584 = vmatprep.mubr.bf16.mxu1 %v3065_v21  ;;  %1745 = vmatprep.mubr.bf16.mxu0 %v3067_v22  ;;  %v3157_v21 = vld [vmem:[%s4440_s0 + $0x300] ss:$20 sps:$4 sm:$0xff]   ;;  %v3158_v22 = vld [vmem:[%s4440_s0 + $0x128] ss:$20 sps:$4 sm:$0xff]  }
  0xa1   :  { %1585 = vmatmul.mubr.bf16.gmra.mrb[48].mxu1 %v3069_v23  ;;  %1746 = vmatmul.mubr.bf16.gmra.mrb[16].mxu0 %v3070_v24  ;;  %v3159_v24 = vld [vmem:[%s4440_s0 + $0x32c] ss:$20 sps:$4 sm:$0xff]  }
  0xa2   :  { %1592 = vmatprep.mubr.bf16.mxu1 %v3072_v25  ;;  %1753 = vmatprep.mubr.bf16.mxu0 %v3074_v26  ;;  %v3161_v25 = vld [vmem:[%s4440_s0 + $0x150] ss:$20 sps:$4 sm:$0xff]  }
  0xa9   :  { %1593 = vmatmul.mubr.bf16.gmra.mrb[52].mxu1 %v3076_v27  ;;  %1754 = vmatmul.mubr.bf16.gmra.mrb[20].mxu0 %v3077_v28 }
  0xaa   :  { %1600 = vmatprep.mubr.bf16.mxu1 %v3078_v29  ;;  %1761 = vmatprep.mubr.bf16.mxu0 %v3080_v30  ;;  %v3162_v29 = vld [vmem:[%s4440_s0 + $0x328] ss:$20 sps:$4 sm:$0xff]   ;;  %v3163_v30 = vld [vmem:[%s4440_s0 + $0x178] ss:$20 sps:$4 sm:$0xff]  }
  0xb1   :  { %1601 = vmatmul.mubr.bf16.gmra.mrb[56].mxu1 %v3082_v31  ;;  %1762 = vmatmul.mubr.bf16.gmra.mrb[24].mxu0 %v3083_v32  ;;  %v3164_v32 = vld [vmem:[%s4440_s0 + $0x354] ss:$20 sps:$4 sm:$0xff]  }
  0xb2   :  { %1608 = vmatprep.mubr.bf16.mxu1 %v3084_v33  ;;  %1769 = vmatprep.mubr.bf16.mxu0 %v3086_v34  ;;  %v3166_v33 = vld [vmem:[%s4440_s0 + $0x1a0] ss:$20 sps:$4 sm:$0xff]  }
  0xb9   :  { %1609 = vmatmul.mubr.bf16.gmra.mrb[60].mxu1 %v3088_v35  ;;  %1770 = vmatmul.mubr.bf16.gmra.mrb[28].mxu0 %v3089_v36 }
  0xba   :  { %1616 = vmatprep.mubr.bf16.mxu1 %v3090_v37  ;;  %1777 = vmatprep.mubr.bf16.mxu0 %v3092_v38  ;;  %v3167_v37 = vld [vmem:[%s4440_s0 + $0x350] ss:$20 sps:$4 sm:$0xff]   ;;  %v3168_v38 = vld [vmem:[%s4440_s0 + $0x1c8] ss:$20 sps:$4 sm:$0xff]  }
  0xc1   :  { %1617 = vmatmul.mubr.bf16.gmra.mrb[64].mxu1 %v3094_v39  ;;  %1778 = vmatmul.mubr.bf16.gmra.mrb[32].mxu0 %v3095_v40  ;;  %v3169_v40 = vld [vmem:[%s4440_s0 + $0x37c] ss:$20 sps:$4 sm:$0xff]  }
  0xc2   :  { %1624 = vmatprep.mubr.bf16.mxu1 %v3096_v41  ;;  %1785 = vmatprep.mubr.bf16.mxu0 %v3098_v42  ;;  %v3171_v41 = vld [vmem:[%s4440_s0 + $0x1f0] ss:$20 sps:$4 sm:$0xff]  }
  0xc9   :  { %1625 = vmatmul.mubr.bf16.gmra.mrb[68].mxu1 %v3100_v43  ;;  %1786 = vmatmul.mubr.bf16.gmra.mrb[36].mxu0 %v3101_v44 }
  0xca   :  { %1632 = vmatprep.mubr.bf16.mxu1 %v3102_v45  ;;  %1793 = vmatprep.mubr.bf16.mxu0 %v3104_v46  ;;  %v3172_v45 = vld [vmem:[%s4440_s0 + $0x378] ss:$20 sps:$4 sm:$0xff]  }
  0xcb   :  { %v3173_v46 = vld [vmem:[%s4440_s0 + $0x218] ss:$20 sps:$4 sm:$0xff]  }
  0xd1   :  { %1633 = vmatmul.mubr.bf16.gmra.mrb[72].mxu1 %v3106_v47  ;;  %1794 = vmatmul.mubr.bf16.gmra.mrb[40].mxu0 %v3107_v48  ;;  %v3174_v48 = vld [vmem:[%s4440_s0 + $0x3a4] ss:$20 sps:$4 sm:$0xff]  }
  0xd2   :  { %1640 = vmatprep.mubr.bf16.mxu1 %v3109_v49  ;;  %1801 = vmatprep.mubr.bf16.mxu0 %v3111_v50  ;;  %v3176_v49 = vld [vmem:[%s4440_s0 + $0x240] ss:$20 sps:$4 sm:$0xff]  }
  0xd9   :  { %1641 = vmatmul.mubr.bf16.gmra.mrb[76].mxu1 %v3113_v51  ;;  %1802 = vmatmul.mubr.bf16.gmra.mrb[44].mxu0 %v3114_v52 }
  0xda   :  { %1648 = vmatprep.mubr.bf16.mxu1 %v3115_v53  ;;  %1809 = vmatprep.mubr.bf16.mxu0 %v3117_v54  ;;  %v3177_v53 = vld [vmem:[%s4440_s0 + $0x3a0] ss:$20 sps:$4 sm:$0xff]   ;;  %v3178_v54 = vld [vmem:[%s4440_s0 + $0x268] ss:$20 sps:$4 sm:$0xff]  }
  0xe1   :  { %1649 = vmatmul.mubr.bf16.gmra.mrb[80].mxu1 %v3119_v55  ;;  %1810 = vmatmul.mubr.bf16.gmra.mrb[48].mxu0 %v3120_v56  ;;  %v3179_v56 = vld [vmem:[%s4440_s0 + $0x3cc] ss:$20 sps:$4 sm:$0xff]  }
  0xe2   :  { %1656 = vmatprep.mubr.bf16.mxu1 %v3121_v57  ;;  %1817 = vmatprep.mubr.bf16.mxu0 %v3123_v58  ;;  %v3181_v57 = vld [vmem:[%s4440_s0 + $0x290] ss:$20 sps:$4 sm:$0xff]  }
  0xe9   :  { %1657 = vmatmul.mubr.bf16.gmra.mrb[84].mxu1 %v3125_v59  ;;  %1818 = vmatmul.mubr.bf16.gmra.mrb[52].mxu0 %v3126_v60 }
  0xea   :  { %1664 = vmatprep.mubr.bf16.mxu1 %v3127_v61  ;;  %1825 = vmatprep.mubr.bf16.mxu0 %v3129_v62  ;;  %v3182_v61 = vld [vmem:[%s4440_s0 + $0x3c8] ss:$20 sps:$4 sm:$0xff]   ;;  %v3183_v62 = vld [vmem:[%s4440_s0 + $0x2b8] ss:$20 sps:$4 sm:$0xff]  }
  0xf1   :  { %1665 = vmatmul.mubr.bf16.gmra.mrb[88].mxu1 %v3131_v63  ;;  %1826 = vmatmul.mubr.bf16.gmra.mrb[56].mxu0 %v3132_v1  ;;  %v3184_v1 = vld [vmem:[%s4440_s0 + $0x3f4] ss:$20 sps:$4 sm:$0xff]  }
  0xf2   :  { %1672 = vmatprep.mubr.bf16.mxu1 %v3133_v2  ;;  %1833 = vmatprep.mubr.bf16.mxu0 %v3135_v3  ;;  %v3186_v2 = vld [vmem:[%s4440_s0 + $0x2e0] ss:$20 sps:$4 sm:$0xff]  }
  0xf9   :  { %1673 = vmatmul.mubr.bf16.gmra.mrb[92].mxu1 %v3137_v4  ;;  %1834 = vmatmul.mubr.bf16.gmra.mrb[60].mxu0 %v3138_v5 }
  0xfa   :  { %1841 = vmatprep.mubr.bf16.mxu0 %v3139_v6  ;;  %2782 = vmatprep.mubr.msk.bf16.mxu1 %vm1295_vm0, %v3141_v7  ;;  %v3187_v6 = vld [vmem:[%s4440_s0 + $0x3f0] ss:$20 sps:$4 sm:$0xff]   ;;  %v3188_v7 = vld [vmem:[%s4440_s0 + $0x308] ss:$20 sps:$4 sm:$0xff]  }
 0x101   :  { %1842 = vmatmul.mubr.bf16.gmra.mrb[64].mxu0 %v3142_v8  ;;  %2783 = vmatmul.mubr.msk.bf16.vlgmr.msra.gmra.mrb[96].mxu1 %vm1295_vm0, %v3143_v9  ;;  %v3189_v9 = vld [vmem:[%s4440_s0 + $0x41c] ss:$20 sps:$4 sm:$0xff]  }
 0x102   :  { %1849 = vmatprep.mubr.bf16.mxu0 %v3144_v10  ;;  %2786 = vmatprep.mubr.msk.bf16.mxu1 %vm1295_vm0, %v3146_v11  ;;  %v3191_v10 = vld [vmem:[%s4440_s0 + $0x330] ss:$20 sps:$4 sm:$0xff]  }
 0x109   :  { %1850 = vmatmul.mubr.bf16.gmra.mrb[68].mxu0 %v3147_v0  ;;  %2787 = vmatmul.mubr.msk.bf16.gmra.mrb[100].mxu1 %vm1295_vm0, %v3148_v12 }
 0x10a   :  { %1857 = vmatprep.mubr.bf16.mxu0 %v3149_v13  ;;  %2790 = vmatprep.mubr.msk.bf16.mxu1 %vm1295_vm0, %v3151_v14  ;;  %v3192_v13 = vld [vmem:[%s4440_s0 + $0x418] ss:$20 sps:$4 sm:$0xff]  }
 0x10b   :  { %v3193_v14 = vld [vmem:[%s4440_s0 + $0x358] ss:$20 sps:$4 sm:$0xff]  }
 0x111   :  { %1858 = vmatmul.mubr.bf16.gmra.mrb[72].mxu0 %v3152_v15  ;;  %2791 = vmatmul.mubr.msk.bf16.gmra.mrb[104].mxu1 %vm1295_vm0, %v3153_v16  ;;  %v3194_v16 = vld [vmem:[%s4440_s0 + $0x444] ss:$20 sps:$4 sm:$0xff]  }
 0x112   :  { %1865 = vmatprep.mubr.bf16.mxu0 %v3154_v17  ;;  %2794 = vmatprep.mubr.msk.bf16.mxu1 %vm1295_vm0, %v3156_v18  ;;  %v3196_v17 = vld [vmem:[%s4440_s0 + $0x380] ss:$20 sps:$4 sm:$0xff]  }
 0x114   :  { %v3733_v19 = vpop.f32.mrb[0].mxu1 }
 0x115   :  { %v1492_v20 = vpop.f32.mrb[1].mxu1 }
 0x116   :  { %v3741_v23 = vpop.f32.mrb[2].mxu1 }
 0x117   :  { %v1495_v26 = vpop.f32.mrb[3].mxu1 }
 0x118   :  { %v3198_v26 = vld [vmem:[%s4440_s0 + $0x3a8] ss:$20 sps:$4 sm:$0xff]  }
 0x119   :  { %1866 = vmatmul.mubr.bf16.gmra.mrb[76].mxu0 %v3157_v21  ;;  %2795 = vmatmul.mubr.msk.bf16.gmra.mrb[108].mxu1 %vm1295_vm0, %v3158_v22 }
 0x11a   :  { %1873 = vmatprep.mubr.bf16.mxu0 %v3159_v24  ;;  %2798 = vmatprep.mubr.msk.bf16.mxu1 %vm1295_vm0, %v3161_v25  ;;  %v3197_v25 = vld [vmem:[%s4440_s0 + $0x440] ss:$20 sps:$4 sm:$0xff]  }
 0x11c   :  { %v3751_v27 = vpop.f32.mrb[4].mxu1 }
 0x11d   :  { %v1500_v28 = vpop.f32.mrb[5].mxu1 }
 0x11e   :  { %v3759_v31 = vpop.f32.mrb[6].mxu1 }
 0x11f   :  { %v1503_v34 = vpop.f32.mrb[7].mxu1 }
 0x121   :  { %1874 = vmatmul.mubr.bf16.gmra.mrb[80].mxu0 %v3162_v29  ;;  %2799 = vmatmul.mubr.msk.bf16.gmra.mrb[112].mxu1 %vm1295_vm0, %v3163_v30  ;;  %v3199_v30 = vld [vmem:[%s4440_s0 + $0x46c] ss:$20 sps:$4 sm:$0xff]  }
 0x122   :  { %1881 = vmatprep.mubr.bf16.mxu0 %v3164_v32  ;;  %2802 = vmatprep.mubr.msk.bf16.mxu1 %vm1295_vm0, %v3166_v33  ;;  %v3201_v32 = vld [vmem:[%s4440_s0 + $0x3d0] ss:$20 sps:$4 sm:$0xff]  }
 0x124   :  { %v3769_v35 = vpop.f32.mrb[8].mxu1 }
 0x125   :  { %v1508_v36 = vpop.f32.mrb[9].mxu1 }
 0x126   :  { %v3777_v39 = vpop.f32.mrb[10].mxu1 }
 0x127   :  { %v1511_v42 = vpop.f32.mrb[11].mxu1 }
 0x128   :  { %v3203_v42 = vld [vmem:[%s4440_s0 + $0x3f8] ss:$20 sps:$4 sm:$0xff]  }
 0x129   :  { %1882 = vmatmul.mubr.bf16.gmra.mrb[84].mxu0 %v3167_v37  ;;  %2803 = vmatmul.mubr.msk.bf16.gmra.mrb[116].mxu1 %vm1295_vm0, %v3168_v38 }
 0x12a   :  { %1889 = vmatprep.mubr.bf16.mxu0 %v3169_v40  ;;  %2806 = vmatprep.mubr.msk.bf16.mxu1 %vm1295_vm0, %v3171_v41  ;;  %v3202_v41 = vld [vmem:[%s4440_s0 + $0x468] ss:$20 sps:$4 sm:$0xff]  }
 0x12c   :  { %v3787_v43 = vpop.f32.mrb[12].mxu1 }
 0x12d   :  { %v1516_v44 = vpop.f32.mrb[13].mxu1 }
 0x12e   :  { %v3795_v47 = vpop.f32.mrb[14].mxu1 }
 0x12f   :  { %v1519_v50 = vpop.f32.mrb[15].mxu1 }
 0x131   :  { %1890 = vmatmul.mubr.bf16.gmra.mrb[88].mxu0 %v3172_v45  ;;  %2807 = vmatmul.mubr.msk.bf16.gmra.mrb[120].mxu1 %vm1295_vm0, %v3173_v46  ;;  %v3204_v46 = vld [vmem:[%s4440_s0 + $0x494] ss:$20 sps:$4 sm:$0xff]  }
 0x132   :  { %1897 = vmatprep.mubr.bf16.mxu0 %v3174_v48  ;;  %2810 = vmatprep.mubr.msk.bf16.mxu1 %vm1295_vm0, %v3176_v49  ;;  %v3206_v48 = vld [vmem:[%s4440_s0 + $0x420] ss:$20 sps:$4 sm:$0xff]  }
 0x134   :  { %v3805_v51 = vpop.f32.mrb[16].mxu1 }
 0x135   :  { %v1524_v52 = vpop.f32.mrb[17].mxu1 }
 0x136   :  { %v3813_v55 = vpop.f32.mrb[18].mxu1 }
 0x137   :  { %v1527_v58 = vpop.f32.mrb[19].mxu1 }
 0x138   :  { %v3208_v58 = vld [vmem:[%s4440_s0 + $0x448] ss:$20 sps:$4 sm:$0xff]  }
 0x139   :  { %1898 = vmatmul.mubr.bf16.gmra.mrb[92].mxu0 %v3177_v53  ;;  %2811 = vmatmul.mubr.msk.bf16.gmra.mrb[124].mxu1 %vm1295_vm0, %v3178_v54 }
 0x13a   :  { %1905 = vmatprep.mubr.bf16.mxu0 %v3179_v56  ;;  %2814 = vmatprep.mubr.msk.bf16.mxu1 %vm1295_vm0, %v3181_v57  ;;  %v3207_v57 = vld [vmem:[%s4440_s0 + $0x490] ss:$20 sps:$4 sm:$0xff]  }
 0x13c   :  { %v3823_v59 = vpop.f32.mrb[20].mxu1 }
 0x13d   :  { %v1532_v60 = vpop.f32.mrb[21].mxu1 }
 0x13e   :  { %v3831_v63 = vpop.f32.mrb[22].mxu1 }
 0x13f   :  { %v1535_v3 = vpop.f32.mrb[23].mxu1 }
 0x141   :  { %1906 = vmatmul.mubr.bf16.gmra.mrb[96].mxu0 %v3182_v61  ;;  %2815 = vmatmul.mubr.msk.bf16.gmra.mrb[128].mxu1 %vm1295_vm0, %v3183_v62  ;;  %v3209_v62 = vld [vmem:[%s4440_s0 + $0x4bc] ss:$20 sps:$4 sm:$0xff]  }
 0x142   :  { %1913 = vmatprep.mubr.bf16.mxu0 %v3184_v1  ;;  %2818 = vmatprep.mubr.msk.bf16.mxu1 %vm1295_vm0, %v3186_v2  ;;  %v3211_v1 = vld [vmem:[%s4440_s0 + $0x470] ss:$20 sps:$4 sm:$0xff]  }
 0x144   :  { %v3841_v4 = vpop.f32.mrb[24].mxu1 }
 0x145   :  { %v1540_v5 = vpop.f32.mrb[25].mxu1 }
 0x146   :  { %v3849_v8 = vpop.f32.mrb[26].mxu1 }
 0x147   :  { %v1543_v11 = vpop.f32.mrb[27].mxu1 }
 0x148   :  { %v3213_v11 = vld [vmem:[%s4440_s0 + $0x498] ss:$20 sps:$4 sm:$0xff]  }
 0x149   :  { %1914 = vmatmul.mubr.bf16.gmra.mrb[100].mxu0 %v3187_v6  ;;  %2819 = vmatmul.mubr.msk.bf16.gmra.mrb[132].mxu1 %vm1295_vm0, %v3188_v7 }
 0x14a   :  { %1921 = vmatprep.mubr.bf16.mxu0 %v3189_v9  ;;  %2822 = vmatprep.mubr.msk.bf16.mxu1 %vm1295_vm0, %v3191_v10  ;;  %v3212_v10 = vld [vmem:[%s4440_s0 + $0x4b8] ss:$20 sps:$4 sm:$0xff]  }
 0x14c   :  { %v3859_v0 = vpop.f32.mrb[28].mxu1 }
 0x14d   :  { %v1548_v12 = vpop.f32.mrb[29].mxu1 }
 0x14e   :  { %v3867_v15 = vpop.f32.mrb[30].mxu1 }
 0x14f   :  { %v1551_v18 = vpop.f32.mrb[31].mxu1 }
 0x151   :  { %1922 = vmatmul.mubr.bf16.gmra.mrb[104].mxu0 %v3192_v13  ;;  %2823 = vmatmul.mubr.msk.bf16.gmra.mrb[136].mxu1 %vm1295_vm0, %v3193_v14  ;;  %v3214_v14 = vld [vmem:[%s4440_s0 + $0x4e4] ss:$20 sps:$4 sm:$0xff]  }
 0x152   :  { %1929 = vmatprep.mubr.bf16.mxu0 %v3194_v16  ;;  %2826 = vmatprep.mubr.msk.bf16.mxu1 %vm1295_vm0, %v3196_v17  ;;  %v3216_v16 = vld [vmem:[%s4440_s0 + $0x4c0] ss:$20 sps:$4 sm:$0xff]  }
 0x154   :  { %v3877_v20 = vpop.f32.mrb[32].mxu1  ;;  %v3879_v21 = vpop.f32.mrb[0].mxu0 }
 0x155   :  { %v1556_v22 = vpop.f32.mrb[33].mxu1  ;;  %v1717_v24 = vpop.f32.mrb[1].mxu0 }
 0x156   :  { %v3887_v28 = vpop.f32.mrb[34].mxu1  ;;  %v3889_v29 = vpop.f32.mrb[2].mxu0 }
 0x157   :  { %v1559_v33 = vpop.f32.mrb[35].mxu1  ;;  %v1720_v34 = vpop.f32.mrb[3].mxu0 }
 0x159   :  { %1930 = vmatmul.mubr.bf16.gmra.mrb[108].mxu0 %v3197_v25  ;;  %2827 = vmatmul.mubr.msk.bf16.gmra.mrb[140].mxu1 %vm1295_vm0, %v3198_v26 }
 0x15a   :  { %1937 = vmatprep.mubr.bf16.mxu0 %v3199_v30  ;;  %2830 = vmatprep.mubr.msk.bf16.mxu1 %vm1295_vm0, %v3201_v32  ;;  %v3217_v30 = vld [vmem:[%s4440_s0 + $0x4e0] ss:$20 sps:$4 sm:$0xff]   ;;  %v3218_v32 = vld [vmem:[%s4440_s0 + $0x4e8] ss:$20 sps:$4 sm:$0xff]  }
 0x15c   :  { %v3899_v36 = vpop.f32.mrb[36].mxu1  ;;  %v3901_v37 = vpop.f32.mrb[4].mxu0 }
 0x15d   :  { %v1564_v38 = vpop.f32.mrb[37].mxu1  ;;  %v1725_v40 = vpop.f32.mrb[5].mxu0 }
 0x15e   :  { %v3909_v44 = vpop.f32.mrb[38].mxu1  ;;  %v3911_v45 = vpop.f32.mrb[6].mxu0 }
 0x15f   :  { %v1567_v49 = vpop.f32.mrb[39].mxu1  ;;  %v1728_v50 = vpop.f32.mrb[7].mxu0 }
 0x161   :  { %1938 = vmatmul.mubr.bf16.gmra.mrb[112].mxu0 %v3202_v41  ;;  %2831 = vmatmul.mubr.msk.bf16.gmra.mrb[144].mxu1 %vm1295_vm0, %v3203_v42 }
 0x162   :  { %1945 = vmatprep.mubr.bf16.mxu0 %v3204_v46  ;;  %2834 = vmatprep.mubr.msk.bf16.mxu1 %vm1295_vm0, %v3206_v48 }
 0x164   :  { %v3921_v52 = vpop.f32.mrb[40].mxu1  ;;  %v3923_v53 = vpop.f32.mrb[8].mxu0 }
 0x165   :  { %v1572_v54 = vpop.f32.mrb[41].mxu1  ;;  %v1733_v56 = vpop.f32.mrb[9].mxu0 }
 0x166   :  { %v3931_v60 = vpop.f32.mrb[42].mxu1  ;;  %v3933_v61 = vpop.f32.mrb[10].mxu0 }
 0x167   :  { %v1575_v2 = vpop.f32.mrb[43].mxu1  ;;  %v1736_v3 = vpop.f32.mrb[11].mxu0 }
 0x169   :  { %1946 = vmatmul.mubr.bf16.gmra.mrb[116].mxu0 %v3207_v57  ;;  %2835 = vmatmul.mubr.msk.bf16.gmra.mrb[148].mxu1 %vm1295_vm0, %v3208_v58 }
 0x16a   :  { %1953 = vmatprep.mubr.bf16.mxu0 %v3209_v62  ;;  %2838 = vmatprep.mubr.msk.bf16.mxu1 %vm1295_vm0, %v3211_v1 }
 0x16c   :  { %v3943_v5 = vpop.f32.mrb[44].mxu1  ;;  %v3945_v6 = vpop.f32.mrb[12].mxu0 }
 0x16d   :  { %v1580_v7 = vpop.f32.mrb[45].mxu1  ;;  %v1741_v9 = vpop.f32.mrb[13].mxu0 }
 0x16e   :  { %v3953_v12 = vpop.f32.mrb[46].mxu1  ;;  %v3955_v13 = vpop.f32.mrb[14].mxu0 }
 0x16f   :  { %v1583_v17 = vpop.f32.mrb[47].mxu1  ;;  %v1744_v18 = vpop.f32.mrb[15].mxu0 }
 0x171   :  { %1954 = vmatmul.mubr.bf16.gmra.mrb[120].mxu0 %v3212_v10  ;;  %2839 = vmatmul.mubr.msk.bf16.gmra.mrb[152].mxu1 %vm1295_vm0, %v3213_v11 }
 0x172   :  { %1961 = vmatprep.mubr.bf16.mxu0 %v3214_v14  ;;  %2842 = vmatprep.mubr.msk.bf16.mxu1 %vm1295_vm0, %v3216_v16 }
 0x174   :  { %v3965_v22 = vpop.f32.mrb[48].mxu1  ;;  %v3967_v24 = vpop.f32.mrb[16].mxu0 }
 0x175   :  { %v1588_v25 = vpop.f32.mrb[49].mxu1  ;;  %v1749_v26 = vpop.f32.mrb[17].mxu0 }
 0x176   :  { %v3975_v33 = vpop.f32.mrb[50].mxu1  ;;  %v3977_v34 = vpop.f32.mrb[18].mxu0 }
 0x177   :  { %v1591_v38 = vpop.f32.mrb[51].mxu1  ;;  %v1752_v40 = vpop.f32.mrb[19].mxu0 }
 0x179   :  { %1962 = vmatmul.mubr.bf16.gmra.mrb[124].mxu0 %v3217_v30  ;;  %2843 = vmatmul.mubr.msk.bf16.gmra.mrb[156].mxu1 %vm1295_vm0, %v3218_v32 }
 0x17c   :  { %v3980_v41 = vpop.f32.mrb[52].mxu1  ;;  %v3982_v42 = vpop.f32.mrb[20].mxu0 }
 0x17d   :  { %v1596_v46 = vpop.f32.mrb[53].mxu1  ;;  %v1757_v48 = vpop.f32.mrb[21].mxu0 }
 0x17e   :  { %v3984_v49 = vpop.f32.mrb[54].mxu1  ;;  %v3986_v50 = vpop.f32.mrb[22].mxu0 }
 0x17f   :  { %v1599_v54 = vpop.f32.mrb[55].mxu1  ;;  %v1760_v56 = vpop.f32.mrb[23].mxu0 }
 0x184   :  { %v3988_v57 = vpop.f32.mrb[56].mxu1  ;;  %v3990_v58 = vpop.f32.mrb[24].mxu0 }
 0x185   :  { %v1604_v62 = vpop.f32.mrb[57].mxu1  ;;  %v1765_v1 = vpop.f32.mrb[25].mxu0 }
 0x186   :  { %v3992_v2 = vpop.f32.mrb[58].mxu1  ;;  %v3994_v3 = vpop.f32.mrb[26].mxu0 }
 0x187   :  { %v1607_v7 = vpop.f32.mrb[59].mxu1  ;;  %v1768_v9 = vpop.f32.mrb[27].mxu0 }
 0x18c   :  { %v3996_v10 = vpop.f32.mrb[60].mxu1  ;;  %v3998_v11 = vpop.f32.mrb[28].mxu0 }
 0x18d   :  { %v1612_v14 = vpop.f32.mrb[61].mxu1  ;;  %v1773_v16 = vpop.f32.mrb[29].mxu0 }
 0x18e   :  { %v4000_v17 = vpop.f32.mrb[62].mxu1  ;;  %v4002_v18 = vpop.f32.mrb[30].mxu0 }
 0x18f   :  { %v1615_v25 = vpop.f32.mrb[63].mxu1  ;;  %v1776_v26 = vpop.f32.mrb[31].mxu0 }
 0x194   :  { %v4004_v30 = vpop.f32.mrb[64].mxu1  ;;  %v1779_v32 = vpop.f32.mrb[32].mxu0 }
 0x195   :  { %v4007_v38 = vadd.f32 %v1779_v32, %v3733_v19  ;;  %v1620_v40 = vpop.f32.mrb[65].mxu1  ;;  %v1781_v46 = vpop.f32.mrb[33].mxu0 }
 0x196   :  { %v4009_v48 = vpop.f32.mrb[66].mxu1  ;;  %v1782_v54 = vpop.f32.mrb[34].mxu0 }
 0x197   :  { %v4012_v56 = vadd.f32 %v1782_v54, %v3741_v23  ;;  %v1623_v62 = vpop.f32.mrb[67].mxu1  ;;  %v1784_v1 = vpop.f32.mrb[35].mxu0 }
 0x19c   :  { %v4014_v7 = vpop.f32.mrb[68].mxu1  ;;  %v1787_v9 = vpop.f32.mrb[36].mxu0 }
 0x19d   :  { %4451 = vst [vmem:[#allocation2_spill] sm:$0xff] %v4014_v7  ;;  %v4017_v14 = vadd.f32 %v1787_v9, %v3751_v27  ;;  %v1628_v16 = vpop.f32.mrb[69].mxu1  ;;  %v1789_v25 = vpop.f32.mrb[37].mxu0 }
 0x19e   :  { %v4019_v19 = vpop.f32.mrb[70].mxu1  ;;  %v1790_v26 = vpop.f32.mrb[38].mxu0 }
 0x19f   :  { %4452 = vst [vmem:[#allocation3_spill] sm:$0xff] %v4019_v19  ;;  %v4022_v32 = vadd.f32 %v1790_v26, %v3759_v31  ;;  %v1631_v40 = vpop.f32.mrb[71].mxu1  ;;  %v1792_v46 = vpop.f32.mrb[39].mxu0 }
 0x1a4   :  { %v4024_v23 = vpop.f32.mrb[72].mxu1  ;;  %v1795_v54 = vpop.f32.mrb[40].mxu0 }
 0x1a5   :  { %4453 = vst [vmem:[#allocation4_spill] sm:$0xff] %v4024_v23  ;;  %v4027_v62 = vadd.f32 %v1795_v54, %v3769_v35  ;;  %v1636_v1 = vpop.f32.mrb[73].mxu1  ;;  %v1797_v7 = vpop.f32.mrb[41].mxu0 }
 0x1a6   :  { %v4029_v27 = vpop.f32.mrb[74].mxu1  ;;  %v1798_v9 = vpop.f32.mrb[42].mxu0 }
 0x1a7   :  { %4454 = vst [vmem:[#allocation5_spill] sm:$0xff] %v4029_v27  ;;  %v4032_v16 = vadd.f32 %v1798_v9, %v3777_v39  ;;  %v1639_v25 = vpop.f32.mrb[75].mxu1  ;;  %v1800_v19 = vpop.f32.mrb[43].mxu0 }
 0x1ac   :  { %v4034_v31 = vpop.f32.mrb[76].mxu1  ;;  %v1803_v26 = vpop.f32.mrb[44].mxu0 }
 0x1ad   :  { %4455 = vst [vmem:[#allocation6_spill] sm:$0xff] %v4034_v31  ;;  %v4037_v40 = vadd.f32 %v1803_v26, %v3787_v43  ;;  %v1644_v46 = vpop.f32.mrb[77].mxu1  ;;  %v1805_v23 = vpop.f32.mrb[45].mxu0 }
 0x1ae   :  { %v4039_v35 = vpop.f32.mrb[78].mxu1  ;;  %v1806_v54 = vpop.f32.mrb[46].mxu0 }
 0x1af   :  { %4456 = vst [vmem:[#allocation7_spill] sm:$0xff] %v4039_v35  ;;  %v4042_v7 = vadd.f32 %v1806_v54, %v3795_v47  ;;  %v1647_v1 = vpop.f32.mrb[79].mxu1  ;;  %v1808_v27 = vpop.f32.mrb[47].mxu0 }
 0x1b4   :  { %v4044_v39 = vpop.f32.mrb[80].mxu1  ;;  %v1811_v9 = vpop.f32.mrb[48].mxu0 }
 0x1b5   :  { %4457 = vst [vmem:[#allocation8_spill] sm:$0xff] %v4044_v39  ;;  %v4047_v19 = vadd.f32 %v1811_v9, %v3805_v51  ;;  %v1652_v25 = vpop.f32.mrb[81].mxu1  ;;  %v1813_v31 = vpop.f32.mrb[49].mxu0 }
 0x1b6   :  { %v4049_v43 = vpop.f32.mrb[82].mxu1  ;;  %v1814_v26 = vpop.f32.mrb[50].mxu0 }
 0x1b7   :  { %4458 = vst [vmem:[#allocation9_spill] sm:$0xff] %v4049_v43  ;;  %v4052_v23 = vadd.f32 %v1814_v26, %v3813_v55  ;;  %v1655_v46 = vpop.f32.mrb[83].mxu1  ;;  %v1816_v35 = vpop.f32.mrb[51].mxu0 }
 0x1bc   :  { %v4054_v47 = vpop.f32.mrb[84].mxu1  ;;  %v1819_v54 = vpop.f32.mrb[52].mxu0 }
 0x1bd   :  { %4459 = vst [vmem:[#allocation10_spill] sm:$0xff] %v4054_v47  ;;  %v4057_v27 = vadd.f32 %v1819_v54, %v3823_v59  ;;  %v1660_v1 = vpop.f32.mrb[85].mxu1  ;;  %v1821_v39 = vpop.f32.mrb[53].mxu0 }
 0x1be   :  { %v4059_v51 = vpop.f32.mrb[86].mxu1  ;;  %v1822_v9 = vpop.f32.mrb[54].mxu0 }
 0x1bf   :  { %4460 = vst [vmem:[#allocation11_spill] sm:$0xff] %v4059_v51  ;;  %v4062_v31 = vadd.f32 %v1822_v9, %v3831_v63  ;;  %v1663_v25 = vpop.f32.mrb[87].mxu1  ;;  %v1824_v43 = vpop.f32.mrb[55].mxu0 }
 0x1c4   :  { %v4064_v55 = vpop.f32.mrb[88].mxu1  ;;  %v1827_v26 = vpop.f32.mrb[56].mxu0 }
 0x1c5   :  { %4461 = vst [vmem:[#allocation12_spill] sm:$0xff] %v4064_v55  ;;  %v4067_v35 = vadd.f32 %v1827_v26, %v3841_v4  ;;  %v1668_v46 = vpop.f32.mrb[89].mxu1  ;;  %v1829_v47 = vpop.f32.mrb[57].mxu0 }
 0x1c6   :  { %v4069_v59 = vpop.f32.mrb[90].mxu1  ;;  %v1830_v54 = vpop.f32.mrb[58].mxu0 }
 0x1c7   :  { %4462 = vst [vmem:[#allocation13_spill] sm:$0xff] %v4069_v59  ;;  %v4072_v39 = vadd.f32 %v1830_v54, %v3849_v8  ;;  %v1671_v1 = vpop.f32.mrb[91].mxu1  ;;  %v1832_v51 = vpop.f32.mrb[59].mxu0 }
 0x1cc   :  { %v4074_v63 = vpop.f32.mrb[92].mxu1  ;;  %v1835_v9 = vpop.f32.mrb[60].mxu0 }
 0x1cd   :  { %v4077_v43 = vadd.f32 %v1835_v9, %v3859_v0  ;;  %v1676_v25 = vpop.f32.mrb[93].mxu1  ;;  %v1837_v55 = vpop.f32.mrb[61].mxu0 }
 0x1ce   :  { %v4079_v4 = vpop.f32.mrb[94].mxu1  ;;  %v1838_v26 = vpop.f32.mrb[62].mxu0 }
 0x1cf   :  { %4463 = vst [vmem:[#allocation14_spill] sm:$0xff] %v4079_v4  ;;  %v4082_v47 = vadd.f32 %v1838_v26, %v3867_v15  ;;  %v1679_v46 = vpop.f32.mrb[95].mxu1  ;;  %v1840_v59 = vpop.f32.mrb[63].mxu0 }
 0x1d4   :  { %v1843_v8 = vpop.f32.mrb[64].mxu0  ;;  %v2784_v54 = vpop.f32.mrb[96].mxu1 }
 0x1d5   :  { %v4085_v51 = vadd.f32 %v1843_v8, %v3877_v20  ;;  %v4088_v1 = vadd.f32 %v2784_v54, %v3901_v37  ;;  %v1845_v0 = vpop.f32.mrb[65].mxu0  ;;  %v2004_v9 = vpop.f32.mrb[97].mxu1 }
 0x1d6   :  { %v4091_v55 = vadd.f32 %v2004_v9, %v3879_v21  ;;  %v1846_v25 = vpop.f32.mrb[66].mxu0  ;;  %v2785_v4 = vpop.f32.mrb[98].mxu1 }
 0x1d7   :  { %v4094_v15 = vadd.f32 %v1846_v25, %v3887_v28  ;;  %v4097_v59 = vadd.f32 %v2785_v4, %v3911_v45  ;;  %v1848_v26 = vpop.f32.mrb[67].mxu0  ;;  %v2007_v46 = vpop.f32.mrb[99].mxu1 }
 0x1d8   :  { %v4100_v20 = vadd.f32 %v2007_v46, %v3889_v29 }
 0x1dc   :  { %v1851_v37 = vpop.f32.mrb[68].mxu0  ;;  %v2788_v8 = vpop.f32.mrb[100].mxu1 }
 0x1dd   :  { %v4103_v54 = vadd.f32 %v1851_v37, %v3899_v36  ;;  %v4106_v21 = vadd.f32 %v2788_v8, %v3945_v6  ;;  %v1853_v0 = vpop.f32.mrb[69].mxu0  ;;  %v2020_v9 = vpop.f32.mrb[101].mxu1 }
 0x1de   :  { %v4109_v28 = vadd.f32 %v2020_v9, %v3923_v53  ;;  %v1854_v45 = vpop.f32.mrb[70].mxu0  ;;  %v2789_v4 = vpop.f32.mrb[102].mxu1 }
 0x1df   :  { %v4112_v25 = vadd.f32 %v1854_v45, %v3909_v44  ;;  %v4115_v29 = vadd.f32 %v2789_v4, %v3955_v13  ;;  %v1856_v26 = vpop.f32.mrb[71].mxu0  ;;  %v2023_v46 = vpop.f32.mrb[103].mxu1 }
 0x1e0   :  { %v4118_v36 = vadd.f32 %v2023_v46, %v3933_v61 }
 0x1e4   :  { %v1859_v6 = vpop.f32.mrb[72].mxu0  ;;  %v2792_v37 = vpop.f32.mrb[104].mxu1 }
 0x1e5   :  { %v4121_v8 = vadd.f32 %v1859_v6, %v3921_v52  ;;  %v4124_v53 = vadd.f32 %v2792_v37, %v3982_v42  ;;  %v1861_v0 = vpop.f32.mrb[73].mxu0  ;;  %v2036_v9 = vpop.f32.mrb[105].mxu1 }
 0x1e6   :  { %v4127_v44 = vadd.f32 %v2036_v9, %v3967_v24  ;;  %v1862_v13 = vpop.f32.mrb[74].mxu0  ;;  %v2793_v45 = vpop.f32.mrb[106].mxu1 }
 0x1e7   :  { %v4130_v4 = vadd.f32 %v1862_v13, %v3931_v60  ;;  %v4133_v61 = vadd.f32 %v2793_v45, %v3986_v50  ;;  %v1864_v26 = vpop.f32.mrb[75].mxu0  ;;  %v2039_v46 = vpop.f32.mrb[107].mxu1 }
 0x1e8   :  { %v4136_v52 = vadd.f32 %v2039_v46, %v3977_v34 }
 0x1ec   :  { %v1867_v42 = vpop.f32.mrb[76].mxu0  ;;  %v2796_v6 = vpop.f32.mrb[108].mxu1 }
 0x1ed   :  { %v4139_v37 = vadd.f32 %v1867_v42, %v3943_v5  ;;  %v4142_v24 = vadd.f32 %v2796_v6, %v3998_v11  ;;  %v1869_v0 = vpop.f32.mrb[77].mxu0  ;;  %v2052_v9 = vpop.f32.mrb[109].mxu1 }
 0x1ee   :  { %v4145_v60 = vadd.f32 %v2052_v9, %v3990_v58  ;;  %v1870_v50 = vpop.f32.mrb[78].mxu0  ;;  %v2797_v13 = vpop.f32.mrb[110].mxu1 }
 0x1ef   :  { %4464 = vst [vmem:[#allocation15_spill] sm:$0xff] %v4142_v24  ;;  %v4148_v45 = vadd.f32 %v1870_v50, %v3953_v12  ;;  %v4151_v34 = vadd.f32 %v2797_v13, %v4002_v18  ;;  %v1872_v26 = vpop.f32.mrb[79].mxu0  ;;  %v2055_v46 = vpop.f32.mrb[111].mxu1 }
 0x1f0   :  { %4465 = vst [vmem:[#allocation16_spill] sm:$0xff] %v4145_v60  ;;  %v4154_v5 = vadd.f32 %v2055_v46, %v3994_v3 }
 0x1f1   :  { %4466 = vst [vmem:[#allocation17_spill] sm:$0xff] %v4151_v34 }
 0x1f2   :  { %4467 = vst [vmem:[#allocation18_spill] sm:$0xff] %v4154_v5 }
 0x1f4   :  { %v1875_v11 = vpop.f32.mrb[80].mxu0  ;;  %v2800_v42 = vpop.f32.mrb[112].mxu1 }
 0x1f5   :  { %v4157_v6 = vadd.f32 %v1875_v11, %v3965_v22  ;;  %v4160_v58 = vadd.f32 %v2800_v42, %v4017_v14  ;;  %v1877_v0 = vpop.f32.mrb[81].mxu0  ;;  %v2068_v9 = vpop.f32.mrb[113].mxu1 }
 0x1f6   :  { %v4163_v12 = vadd.f32 %v2068_v9, %v4007_v38  ;;  %v1878_v18 = vpop.f32.mrb[82].mxu0  ;;  %v2801_v50 = vpop.f32.mrb[114].mxu1 }
 0x1f7   :  { %v4168_v3 = vadd.f32 %v1878_v18, %v3975_v33  ;;  %v4171_v26 = vadd.f32 %v2801_v50, %v4022_v32  ;;  %v1880_v22 = vpop.f32.mrb[83].mxu0  ;;  %v2071_v46 = vpop.f32.mrb[115].mxu1 }
 0x1f8   :  { %v4176_v11 = vadd.f32 %v2071_v46, %v4012_v56 }
 0x1fc   :  { %v1883_v0 = vpop.f32.mrb[84].mxu0  ;;  %v2804_v33 = vpop.f32.mrb[116].mxu1 }
 0x1fd   :  { %v4183_v9 = vadd.f32 %v1883_v0, %v3980_v41  ;;  %v4186_v32 = vadd.f32 %v2804_v33, %v4037_v40  ;;  %v1885_v18 = vpop.f32.mrb[85].mxu0  ;;  %v2084_v50 = vpop.f32.mrb[117].mxu1 }
 0x1fe   :  { %v4189_v22 = vadd.f32 %v2084_v50, %v4027_v62  ;;  %v1886_v56 = vpop.f32.mrb[86].mxu0  ;;  %v2805_v46 = vpop.f32.mrb[118].mxu1 }
 0x1ff   :  { %v4194_v42 = vadd.f32 %v1886_v56, %v3984_v49  ;;  %v4197_v14 = vadd.f32 %v2805_v46, %v4042_v7  ;;  %v1888_v41 = vpop.f32.mrb[87].mxu0  ;;  %v2087_v0 = vpop.f32.mrb[119].mxu1 }
 0x200   :  { %v4202_v33 = vadd.f32 %v2087_v0, %v4032_v16 }
 0x204   :  { %v1891_v50 = vpop.f32.mrb[88].mxu0  ;;  %v2808_v49 = vpop.f32.mrb[120].mxu1 }
 0x205   :  { %v4209_v56 = vadd.f32 %v1891_v50, %v3988_v57  ;;  %v4212_v7 = vadd.f32 %v2808_v49, %v4057_v27  ;;  %v1893_v46 = vpop.f32.mrb[89].mxu0  ;;  %v2100_v41 = vpop.f32.mrb[121].mxu1 }
 0x206   :  { %v4215_v40 = vadd.f32 %v2100_v41, %v4047_v19  ;;  %v1894_v16 = vpop.f32.mrb[90].mxu0  ;;  %v2809_v0 = vpop.f32.mrb[122].mxu1 }
 0x207   :  { %v4220_v18 = vadd.f32 %v1894_v16, %v3992_v2  ;;  %v4223_v38 = vadd.f32 %v2809_v0, %v4062_v31  ;;  %v1896_v57 = vpop.f32.mrb[91].mxu0  ;;  %v2103_v50 = vpop.f32.mrb[123].mxu1 }
 0x208   :  { %v4228_v49 = vadd.f32 %v2103_v50, %v4052_v23 }
 0x20c   :  { %v1899_v41 = vpop.f32.mrb[92].mxu0  ;;  %v2812_v2 = vpop.f32.mrb[124].mxu1 }
 0x20d   :  { %v1900_v16 = vadd.f32 %v1899_v41, %v3996_v10  ;;  %v4236_v31 = vadd.f32 %v2812_v2, %v4077_v43  ;;  %v1901_v0 = vpop.f32.mrb[93].mxu0  ;;  %v2116_v57 = vpop.f32.mrb[125].mxu1 }
 0x20e   :  { %v4239_v27 = vadd.f32 %v2116_v57, %v4067_v35  ;;  %v1902_v23 = vpop.f32.mrb[94].mxu0  ;;  %v2813_v50 = vpop.f32.mrb[126].mxu1 }
 0x20f   :  { %4468 = vst [vmem:[#allocation19_spill] sm:$0xff] %v4236_v31  ;;  %v1903_v62 = vadd.f32 %v1902_v23, %v4000_v17  ;;  %v4245_v46 = vadd.f32 %v2813_v50, %v4082_v47  ;;  %v1904_v13 = vpop.f32.mrb[95].mxu0  ;;  %v2119_v10 = vpop.f32.mrb[127].mxu1 }
 0x210   :  { %4469 = vst [vmem:[#allocation20_spill] sm:$0xff] %v4239_v27  ;;  %v4250_v41 = vadd.f32 %v2119_v10, %v4072_v39 }
 0x211   :  { %4470 = vst [vmem:[#allocation21_spill] sm:$0xff] %v4245_v46 }
 0x212   :  { %4471 = vst [vmem:[#allocation22_spill] sm:$0xff] %v4250_v41 }
 0x214   :  { %v1907_v0 = vpop.f32.mrb[96].mxu0  ;;  %v2816_v57 = vpop.f32.mrb[128].mxu1 }
 0x215   :  { %v1908_v17 = vadd.f32 %v1907_v0, %v4004_v30  ;;  %v4258_v47 = vadd.f32 %v2816_v57, %v4103_v54  ;;  %v1909_v13 = vpop.f32.mrb[97].mxu0  ;;  %v2132_v23 = vpop.f32.mrb[129].mxu1  ;;  %v4472_v57 = vld [vmem:[#allocation2_spill] sm:$0xff] }
 0x216   :  { %v4261_v50 = vadd.f32 %v2132_v23, %v4085_v51  ;;  %v1910_v39 = vpop.f32.mrb[98].mxu0  ;;  %v2817_v10 = vpop.f32.mrb[130].mxu1 }
 0x217   :  { %v4264_v19 = vadd.f32 %v1910_v39, %v4009_v48  ;;  %v4267_v35 = vadd.f32 %v2817_v10, %v4112_v25  ;;  %v1912_v2 = vpop.f32.mrb[99].mxu0  ;;  %v2135_v43 = vpop.f32.mrb[131].mxu1  ;;  %v4473_v10 = vld [vmem:[#allocation3_spill] sm:$0xff] }
 0x218   :  { %v4270_v30 = vadd.f32 %v2135_v43, %v4094_v15 }
 0x21c   :  { %v1915_v54 = vpop.f32.mrb[100].mxu0  ;;  %v2820_v0 = vpop.f32.mrb[132].mxu1 }
 0x21d   :  { %v1916_v13 = vadd.f32 %v1915_v54, %v4472_v57  ;;  %v4274_v51 = vadd.f32 %v2820_v0, %v4139_v37  ;;  %v1917_v23 = vpop.f32.mrb[101].mxu0  ;;  %v2148_v46 = vpop.f32.mrb[133].mxu1  ;;  %v4474_v0 = vld [vmem:[#allocation4_spill] sm:$0xff] }
 0x21e   :  { %v4277_v48 = vadd.f32 %v2148_v46, %v4121_v8  ;;  %v1918_v39 = vpop.f32.mrb[102].mxu0  ;;  %v2821_v25 = vpop.f32.mrb[134].mxu1 }
 0x21f   :  { %v1919_v2 = vadd.f32 %v1918_v39, %v4473_v10  ;;  %v4281_v34 = vadd.f32 %v2821_v25, %v4148_v45  ;;  %v1920_v15 = vpop.f32.mrb[103].mxu0  ;;  %v2151_v43 = vpop.f32.mrb[135].mxu1  ;;  %v4475_v25 = vld [vmem:[#allocation5_spill] sm:$0xff] }
 0x220   :  { %v4284_v41 = vadd.f32 %v2151_v43, %v4130_v4 }
 0x224   :  { %v1923_v54 = vpop.f32.mrb[104].mxu0  ;;  %v2824_v37 = vpop.f32.mrb[136].mxu1 }
 0x225   :  { %v1924_v57 = vadd.f32 %v1923_v54, %v4474_v0  ;;  %v4288_v23 = vadd.f32 %v2824_v37, %v4183_v9  ;;  %v1925_v8 = vpop.f32.mrb[105].mxu0  ;;  %v2164_v46 = vpop.f32.mrb[137].mxu1  ;;  %v4476_v0 = vld [vmem:[#allocation6_spill] sm:$0xff] }
 0x226   :  { %v4291_v5 = vadd.f32 %v2164_v46, %v4157_v6  ;;  %v1926_v39 = vpop.f32.mrb[106].mxu0  ;;  %v2825_v45 = vpop.f32.mrb[138].mxu1 }
 0x227   :  { %v4294_v10 = vadd.f32 %v1926_v39, %v4475_v25  ;;  %v4297_v4 = vadd.f32 %v2825_v45, %v4194_v42  ;;  %v1928_v15 = vpop.f32.mrb[107].mxu0  ;;  %v2167_v43 = vpop.f32.mrb[139].mxu1  ;;  %v4479_v42 = vld [vmem:[#allocation7_spill] sm:$0xff] }
 0x228   :  { %v4300_v54 = vadd.f32 %v2167_v43, %v4168_v3 }
 0x22c   :  { %v1931_v9 = vpop.f32.mrb[108].mxu0  ;;  %v2828_v37 = vpop.f32.mrb[140].mxu1 }
 0x22d   :  { %v1932_v8 = vadd.f32 %v1931_v9, %v4476_v0  ;;  %v4303_v31 = vadd.f32 %v2828_v37, %v1900_v16  ;;  %v1933_v6 = vpop.f32.mrb[109].mxu0  ;;  %v2180_v46 = vpop.f32.mrb[141].mxu1  ;;  %v4480_v16 = vld [vmem:[#allocation8_spill] sm:$0xff] }
 0x22e   :  { %v4306_v24 = vadd.f32 %v2180_v46, %v4209_v56  ;;  %v1934_v39 = vpop.f32.mrb[110].mxu0  ;;  %v2829_v25 = vpop.f32.mrb[142].mxu1 }
 0x22f   :  { %4477 = vst [vmem:[#allocation2_spill] sm:$0xff] %v4303_v31  ;;  %v1935_v45 = vadd.f32 %v1934_v39, %v4479_v42  ;;  %v4309_v15 = vadd.f32 %v2829_v25, %v1903_v62  ;;  %v1936_v27 = vpop.f32.mrb[111].mxu0  ;;  %v2183_v3 = vpop.f32.mrb[143].mxu1  ;;  %v4481_v62 = vld [vmem:[#allocation9_spill] sm:$0xff] }
 0x230   :  { %4478 = vst [vmem:[#allocation3_spill] sm:$0xff] %v4306_v24  ;;  %v4312_v43 = vadd.f32 %v2183_v3, %v4220_v18  ;;  %v4324_v3 = vld [vmem:[%s4441_s2] ss:$0 sm:$0xff] }
 0x234   :  { %v1939_v60 = vpop.f32.mrb[112].mxu0  ;;  %v2832_v9 = vpop.f32.mrb[144].mxu1 }
 0x235   :  { %v4315_v37 = vadd.f32 %v1939_v60, %v4480_v16  ;;  %v2205_v0 = vadd.f32 %v2832_v9, %v1916_v13  ;;  %v1941_v6 = vpop.f32.mrb[113].mxu0  ;;  %v2196_v56 = vpop.f32.mrb[145].mxu1 }
 0x236   :  { %v2197_v46 = vadd.f32 %v2196_v56, %v1908_v17  ;;  %v1942_v31 = vpop.f32.mrb[114].mxu0  ;;  %v2833_v24 = vpop.f32.mrb[146].mxu1  ;;  %v4482_v17 = vmax.f32 %v4088_v1, %v4160_v58  ;;  %v4485_v1 = vmax.f32 %v4100_v20, %v4176_v11  ;;  %v4487_v20 = vld [vmem:[#allocation11_spill] sm:$0xff] }
 0x237   :  { %v2277_v39 = vmax.f32 %v4258_v47, %v2205_v0  ;;  %v4319_v25 = vadd.f32 %v1942_v31, %v4481_v62  ;;  %v2208_v27 = vadd.f32 %v2833_v24, %v1919_v2  ;;  %v1944_v42 = vpop.f32.mrb[115].mxu0  ;;  %v2199_v18 = vpop.f32.mrb[147].mxu1  ;;  %v4483_v24 = vmax.f32 %v4091_v55, %v4163_v12  ;;  %v4486_v55 = vld [vmem:[#allocation10_spill] sm:$0xff] }
 0x238   :  { %v2275_v60 = vmax.f32 %v4261_v50, %v2197_v46  ;;  %v2200_v13 = vadd.f32 %v2199_v18, %v4264_v19  ;;  %v4484_v0 = vmax.f32 %v4097_v59, %v4171_v26 }
 0x239   :  { %v2293_v9 = vmax.f32 %v4482_v17, %v2277_v39  ;;  %v2278_v47 = vmax.f32 %v4267_v35, %v2208_v27 }
 0x23a   :  { %v2291_v31 = vmax.f32 %v4483_v24, %v2275_v60  ;;  %v2276_v2 = vmax.f32 %v4270_v30, %v2200_v13 }
 0x23b   :  { %v2316_v16 = vadd.f32 %v4324_v3, %v2293_v9  ;;  %v2294_v50 = vmax.f32 %v4484_v0, %v2278_v47 }
 0x23c   :  { %v2314_v19 = vadd.f32 %v4324_v3, %v2291_v31  ;;  %v2292_v58 = vmax.f32 %v4485_v1, %v2276_v2  ;;  %v1947_v6 = vpop.f32.mrb[116].mxu0  ;;  %v2836_v35 = vpop.f32.mrb[148].mxu1 }
 0x23d   :  { %v2317_v56 = vadd.f32 %v4324_v3, %v2294_v50  ;;  %v1948_v12 = vadd.f32 %v1947_v6, %v4486_v55  ;;  %v2221_v46 = vadd.f32 %v2836_v35, %v1932_v8  ;;  %v1949_v30 = vpop.f32.mrb[117].mxu0  ;;  %v2212_v39 = vpop.f32.mrb[149].mxu1  ;;  %v2332_v62 = vmax.f32 %v2316_v16, 0.0 }
 0x23e   :  { %v2315_v27 = vadd.f32 %v4324_v3, %v2292_v58  ;;  %v2213_v59 = vadd.f32 %v2212_v39, %v1924_v57  ;;  %v1950_v26 = vpop.f32.mrb[118].mxu0  ;;  %v2837_v42 = vpop.f32.mrb[150].mxu1  ;;  %v2330_v47 = vmax.f32 %v2314_v19, 0.0  ;;  %v4488_v57 = vmax.f32 %v4106_v21, %v4186_v32  ;;  %v4492_v58 = vld [vmem:[#allocation12_spill] sm:$0xff] }
 0x23f   :  { %v2333_v18 = vmax.f32 %v2317_v56, 0.0  ;;  %v2281_v60 = vmax.f32 %v4274_v51, %v2221_v46  ;;  %v1951_v11 = vadd.f32 %v1950_v26, %v4487_v20  ;;  %v2224_v13 = vadd.f32 %v2837_v42, %v1935_v45  ;;  %v1952_v17 = vpop.f32.mrb[119].mxu0  ;;  %v2215_v9 = vpop.f32.mrb[151].mxu1 }
 0x240   :  { %v2331_v24 = vmax.f32 %v2315_v27, 0.0  ;;  %v2279_v8 = vmax.f32 %v4277_v48, %v2213_v59  ;;  %v2216_v31 = vadd.f32 %v2215_v9, %v4294_v10  ;;  %v4489_v51 = vmax.f32 %v4109_v28, %v4189_v22 }
 0x241   :  { %v2699_v2 = vpack.c.bf16 %v2333_v18, %v2332_v62  ;;  %v2297_v16 = vmax.f32 %v4488_v57, %v2281_v60  ;;  %v2282_v0 = vmax.f32 %v4281_v34, %v2224_v13  ;;  %v4490_v10 = vmax.f32 %v4115_v29, %v4197_v14 }
 0x242   :  { %v2694_v50 = vpack.c.bf16 %v2331_v24, %v2330_v47  ;;  %v2295_v45 = vmax.f32 %v4489_v51, %v2279_v8  ;;  %v2280_v1 = vmax.f32 %v4284_v41, %v2216_v31  ;;  %v4491_v28 = vmax.f32 %v4118_v36, %v4202_v33  ;;  %v4493_v33 = vld [vmem:[#allocation13_spill] sm:$0xff] }
 0x243   :  { %2731 = vst [vmem:[%s4442_s3 + $0x8] sm:$0xff] %v2699_v2   ;;  %v2320_v48 = vadd.f32 %v4324_v3, %v2297_v16  ;;  %v2298_v21 = vmax.f32 %v4490_v10, %v2282_v0 }
 0x244   :  { %2695 = vst [vmem:[%s4442_s3] sm:$0xff] %v2694_v50   ;;  %v2318_v34 = vadd.f32 %v4324_v3, %v2295_v45  ;;  %v2296_v32 = vmax.f32 %v4491_v28, %v2280_v1  ;;  %v1955_v22 = vpop.f32.mrb[120].mxu0  ;;  %v2840_v41 = vpop.f32.mrb[152].mxu1  ;;  %v4498_v1 = vld [vmem:[#allocation14_spill] sm:$0xff] }
 0x245   :  { %v2321_v19 = vadd.f32 %v4324_v3, %v2298_v21  ;;  %v1956_v6 = vadd.f32 %v1955_v22, %v4492_v58  ;;  %v2237_v35 = vadd.f32 %v2840_v41, %v1948_v12  ;;  %v1957_v56 = vpop.f32.mrb[121].mxu0  ;;  %v2228_v29 = vpop.f32.mrb[153].mxu1  ;;  %v2336_v14 = vmax.f32 %v2320_v48, 0.0  ;;  %v4500_v22 = vld [vmem:[#allocation2_spill] sm:$0xff] }
 0x246   :  { %v2319_v55 = vadd.f32 %v4324_v3, %v2296_v32  ;;  %v2229_v46 = vadd.f32 %v2228_v29, %v4315_v37  ;;  %v1958_v30 = vpop.f32.mrb[122].mxu0  ;;  %v2841_v39 = vpop.f32.mrb[154].mxu1  ;;  %v2334_v18 = vmax.f32 %v2318_v34, 0.0  ;;  %v4494_v37 = vmax.f32 %v4124_v53, %v4212_v7  ;;  %v4499_v34 = vld [vmem:[#allocation3_spill] sm:$0xff] }
 0x247   :  { %v2337_v62 = vmax.f32 %v2321_v19, 0.0  ;;  %v2285_v36 = vmax.f32 %v4288_v23, %v2237_v35  ;;  %v1959_v27 = vadd.f32 %v1958_v30, %v4493_v33  ;;  %v2240_v59 = vadd.f32 %v2841_v39, %v1951_v11  ;;  %v1960_v26 = vpop.f32.mrb[123].mxu0  ;;  %v2231_v42 = vpop.f32.mrb[155].mxu1  ;;  %v4502_v35 = vld [vmem:[#allocation20_spill] sm:$0xff]  ;;  %v4507_v33 = vld [vmem:[#allocation18_spill] sm:$0xff] }
 0x248   :  { %v2335_v60 = vmax.f32 %v2319_v55, 0.0  ;;  %v2283_v12 = vmax.f32 %v4291_v5, %v2229_v46  ;;  %v2232_v20 = vadd.f32 %v2231_v42, %v4319_v25  ;;  %v4495_v23 = vmax.f32 %v4127_v44, %v4215_v40  ;;  %v4504_v55 = vld [vmem:[#allocation15_spill] sm:$0xff]  ;;  %v4510_v42 = vld [vmem:[#allocation17_spill] sm:$0xff] }
 0x249   :  { %v2709_v13 = vpack.c.bf16 %v2337_v62, %v2336_v14  ;;  %v2301_v17 = vmax.f32 %v4494_v37, %v2285_v36  ;;  %v2286_v9 = vmax.f32 %v4297_v4, %v2240_v59  ;;  %v4496_v25 = vmax.f32 %v4133_v61, %v4223_v38  ;;  %v4505_v46 = vld [vmem:[#allocation19_spill] sm:$0xff] }
 0x24a   :  { %v2704_v47 = vpack.c.bf16 %v2335_v60, %v2334_v18  ;;  %v2299_v11 = vmax.f32 %v4495_v23, %v2283_v12  ;;  %v2284_v24 = vmax.f32 %v4300_v54, %v2232_v20  ;;  %v4497_v44 = vmax.f32 %v4136_v52, %v4228_v49  ;;  %v4511_v18 = vld [vmem:[#allocation21_spill] sm:$0xff] }
 0x24b   :  { %2733 = vst [vmem:[%s4442_s3 + $0x18] sm:$0xff] %v2709_v13   ;;  %v2324_v5 = vadd.f32 %v4324_v3, %v2301_v17  ;;  %v2302_v53 = vmax.f32 %v4496_v25, %v2286_v9  ;;  %v4506_v30 = vmax.f32 %v4504_v55, %v4505_v46  ;;  %v4512_v60 = vmax.f32 %v4510_v42, %v4511_v18 }
 0x24c   :  { %2732 = vst [vmem:[%s4442_s3 + $0x10] sm:$0xff] %v2704_v47   ;;  %v2322_v7 = vadd.f32 %v4324_v3, %v2299_v11  ;;  %v2300_v40 = vmax.f32 %v4497_v44, %v2284_v24  ;;  %v1963_v4 = vpop.f32.mrb[124].mxu0  ;;  %v2844_v54 = vpop.f32.mrb[156].mxu1 }
 0x24d   :  { %v2325_v8 = vadd.f32 %v4324_v3, %v2302_v53  ;;  %v1964_v31 = vadd.f32 %v1963_v4, %v4074_v63  ;;  %v1965_v2 = vpop.f32.mrb[125].mxu0  ;;  %v2244_v57 = vpop.f32.mrb[157].mxu1  ;;  %v2340_v50 = vmax.f32 %v2324_v5, 0.0 }
 0x24e   :  { %v2323_v61 = vadd.f32 %v4324_v3, %v2300_v40  ;;  %v2245_v38 = vadd.f32 %v2244_v57, %v1956_v6  ;;  %v1966_v16 = vpop.f32.mrb[126].mxu0  ;;  %v2845_v0 = vpop.f32.mrb[158].mxu1  ;;  %v2338_v10 = vmax.f32 %v2322_v7, 0.0  ;;  %v4501_v6 = vld [vmem:[#allocation16_spill] sm:$0xff] }
 0x24f   :  { %v2341_v51 = vmax.f32 %v2325_v8, 0.0  ;;  %v2253_v45 = vadd.f32 %v2844_v54, %v1964_v31  ;;  %v1967_v48 = vadd.f32 %v1966_v16, %v4498_v1  ;;  %v1968_v52 = vpop.f32.mrb[127].mxu0  ;;  %v2247_v49 = vpop.f32.mrb[159].mxu1  ;;  %v4503_v56 = vmax.f32 %v4501_v6, %v4502_v35 }
 0x250   :  { %v2339_v21 = vmax.f32 %v2323_v61, 0.0  ;;  %v2287_v28 = vmax.f32 %v4499_v34, %v2245_v38  ;;  %v2248_v32 = vadd.f32 %v2247_v49, %v1959_v27  ;;  %v4508_v27 = vld [vmem:[#allocation22_spill] sm:$0xff] }
 0x251   :  { %v2719_v63 = vpack.c.bf16 %v2341_v51, %v2340_v50  ;;  %v2289_v41 = vmax.f32 %v4500_v22, %v2253_v45  ;;  %v2256_v19 = vadd.f32 %v2845_v0, %v1967_v48  ;;  %v4509_v59 = vmax.f32 %v4507_v33, %v4508_v27 }
 0x252   :  { %v2714_v58 = vpack.c.bf16 %v2339_v21, %v2338_v10  ;;  %v2303_v29 = vmax.f32 %v4503_v56, %v2287_v28  ;;  %v2288_v14 = vmax.f32 %v4312_v43, %v2248_v32 }
 0x253   :  { %2735 = vst [vmem:[%s4442_s3 + $0x28] sm:$0xff] %v2719_v63   ;;  %v2305_v39 = vmax.f32 %v4506_v30, %v2289_v41  ;;  %v2290_v62 = vmax.f32 %v4309_v15, %v2256_v19 }
 0x254   :  { %2734 = vst [vmem:[%s4442_s3 + $0x20] sm:$0xff] %v2714_v58   ;;  %v2326_v36 = vadd.f32 %v4324_v3, %v2303_v29  ;;  %v2304_v43 = vmax.f32 %v4509_v59, %v2288_v14 }
 0x255   :  { %v2328_v26 = vadd.f32 %v4324_v3, %v2305_v39  ;;  %v2306_v12 = vmax.f32 %v4512_v60, %v2290_v62 }
 0x256   :  { %v2327_v20 = vadd.f32 %v4324_v3, %v2304_v43  ;;  %v2342_v13 = vmax.f32 %v2326_v36, 0.0 }
 0x257   :  { %v2329_v15 = vadd.f32 %v4324_v3, %v2306_v12  ;;  %v2344_v17 = vmax.f32 %v2328_v26, 0.0 }
 0x258   :  { %v2343_v37 = vmax.f32 %v2327_v20, 0.0 }
 0x259   :  { %v2345_v9 = vmax.f32 %v2329_v15, 0.0 }
 0x25a   :  { %v2724_v47 = vpack.c.bf16 %v2343_v37, %v2342_v13 }
 0x25b   :  { %v2729_v23 = vpack.c.bf16 %v2345_v9, %v2344_v17 }
 0x25c   :  { %2736 = vst [vmem:[%s4442_s3 + $0x30] sm:$0xff] %v2724_v47  }
 0x25d   :  { %2737 = vst [vmem:[%s4442_s3 + $0x38] sm:$0xff] %v2729_v23  }

// kernel: conv_autoencoder_forward.6
= control target key start
LH: loop header
LB: loop body
LE: loop exit
PB: predicated region body
PF: predicated region fallthrough
CT: control target
= control target key end

     0   :  { %s3657_s1 = inlined_call_operand.vmem [shape: bf16[1152,256], index: 1, kind: input, shape index: {}]   ;;  %s3658_s0 = inlined_call_operand.vmem [shape: bf16[128,1152], index: 0, kind: input, shape index: {}]   ;;  %s3659_s2 = inlined_call_operand.vmem [shape: f32[1,256], index: 2, kind: input, shape index: {}]   ;;  %s3660_s3 = inlined_call_operand.vmem [shape: bf16[32,256], index: 3, kind: output, shape index: {}]  }
   0x1   :  { %v2361_v0 = vld [vmem:[%s3657_s1 + $0x4] ss:$8 sps:$4 sm:$0xff]   ;;  %v2365_v2 = vld [vmem:[%s3657_s1] ss:$8 sps:$4 sm:$0xff]   ;;  %v2367_v4 = vld [vmem:[%s3657_s1 + $0x14] ss:$8 sps:$4 sm:$0xff]  }
   0x2   :  { %v2363_v1 = vld [vmem:[%s3657_s1 + $0x204] ss:$8 sps:$4 sm:$0xff]   ;;  %1327 = vmatprep.subr.bf16.mxu1 %v2361_v0  ;;  %v2366_v3 = vld [vmem:[%s3657_s1 + $0x200] ss:$8 sps:$4 sm:$0xff]   ;;  %v2369_v5 = vld [vmem:[%s3657_s1 + $0x214] ss:$8 sps:$4 sm:$0xff]  }
   0x3   :  { %1553 = vmatprep.subr.bf16.mxu0 %v2363_v1  ;;  %1328 = vmatpush1.bf16.msra.mxu1 %v2365_v2  ;;  %v2371_v6 = vld [vmem:[%s3657_s1 + $0x10] ss:$8 sps:$4 sm:$0xff]   ;;  %v2373_v8 = vld [vmem:[%s3657_s1 + $0x24] ss:$8 sps:$4 sm:$0xff]   ;;  %v2377_v10 = vld [vmem:[%s3657_s1 + $0x20] ss:$8 sps:$4 sm:$0xff]  }
   0x4   :  { %1554 = vmatpush1.bf16.msra.mxu0 %v2366_v3  ;;  %1329 = vmatprep.subr.bf16.mxu1 %v2367_v4  ;;  %v2372_v7 = vld [vmem:[%s3657_s1 + $0x210] ss:$8 sps:$4 sm:$0xff]   ;;  %v2375_v9 = vld [vmem:[%s3657_s1 + $0x224] ss:$8 sps:$4 sm:$0xff]   ;;  %v2378_v11 = vld [vmem:[%s3657_s1 + $0x220] ss:$8 sps:$4 sm:$0xff]  }
   0x5   :  { %1555 = vmatprep.subr.bf16.mxu0 %v2369_v5  ;;  %v2379_v12 = vld [vmem:[%s3657_s1 + $0x34] ss:$8 sps:$4 sm:$0xff]   ;;  %v2383_v14 = vld [vmem:[%s3657_s1 + $0x30] ss:$8 sps:$4 sm:$0xff]   ;;  %v2385_v16 = vld [vmem:[%s3657_s1 + $0x44] ss:$8 sps:$4 sm:$0xff]  }
   0x6   :  { %v2381_v13 = vld [vmem:[%s3657_s1 + $0x234] ss:$8 sps:$4 sm:$0xff]   ;;  %v2384_v15 = vld [vmem:[%s3657_s1 + $0x230] ss:$8 sps:$4 sm:$0xff]   ;;  %v2387_v17 = vld [vmem:[%s3657_s1 + $0x244] ss:$8 sps:$4 sm:$0xff]  }
   0x7   :  { %1330 = vmatpush1.bf16.msra.mxu1 %v2371_v6  ;;  %v2389_v18 = vld [vmem:[%s3657_s1 + $0x40] ss:$8 sps:$4 sm:$0xff]   ;;  %v2391_v20 = vld [vmem:[%s3657_s1 + $0x54] ss:$8 sps:$4 sm:$0xff]   ;;  %v2395_v22 = vld [vmem:[%s3657_s1 + $0x50] ss:$8 sps:$4 sm:$0xff]  }
   0x8   :  { %1556 = vmatpush1.bf16.msra.mxu0 %v2372_v7  ;;  %1331 = vmatprep.subr.bf16.mxu1 %v2373_v8  ;;  %v2390_v19 = vld [vmem:[%s3657_s1 + $0x240] ss:$8 sps:$4 sm:$0xff]   ;;  %v2393_v21 = vld [vmem:[%s3657_s1 + $0x254] ss:$8 sps:$4 sm:$0xff]   ;;  %v2396_v23 = vld [vmem:[%s3657_s1 + $0x250] ss:$8 sps:$4 sm:$0xff]  }
   0x9   :  { %1557 = vmatprep.subr.bf16.mxu0 %v2375_v9  ;;  %v2397_v24 = vld [vmem:[%s3657_s1 + $0x64] ss:$8 sps:$4 sm:$0xff]   ;;  %v2401_v26 = vld [vmem:[%s3657_s1 + $0x60] ss:$8 sps:$4 sm:$0xff]   ;;  %v2403_v28 = vld [vmem:[%s3657_s1 + $0x74] ss:$8 sps:$4 sm:$0xff]  }
   0xa   :  { %v2399_v25 = vld [vmem:[%s3657_s1 + $0x264] ss:$8 sps:$4 sm:$0xff]   ;;  %v2402_v27 = vld [vmem:[%s3657_s1 + $0x260] ss:$8 sps:$4 sm:$0xff]   ;;  %v2405_v29 = vld [vmem:[%s3657_s1 + $0x274] ss:$8 sps:$4 sm:$0xff]  }
   0xb   :  { %1332 = vmatpush1.bf16.msra.mxu1 %v2377_v10  ;;  %v2407_v30 = vld [vmem:[%s3657_s1 + $0x70] ss:$8 sps:$4 sm:$0xff]   ;;  %v2409_v32 = vld [vmem:[%s3657_s1 + $0x84] ss:$8 sps:$4 sm:$0xff]   ;;  %v2413_v34 = vld [vmem:[%s3657_s1 + $0x80] ss:$8 sps:$4 sm:$0xff]  }
   0xc   :  { %1558 = vmatpush1.bf16.msra.mxu0 %v2378_v11  ;;  %1333 = vmatprep.subr.bf16.mxu1 %v2379_v12  ;;  %v2408_v31 = vld [vmem:[%s3657_s1 + $0x270] ss:$8 sps:$4 sm:$0xff]   ;;  %v2411_v33 = vld [vmem:[%s3657_s1 + $0x284] ss:$8 sps:$4 sm:$0xff]   ;;  %v2414_v35 = vld [vmem:[%s3657_s1 + $0x280] ss:$8 sps:$4 sm:$0xff]  }
   0xd   :  { %1559 = vmatprep.subr.bf16.mxu0 %v2381_v13  ;;  %v2415_v36 = vld [vmem:[%s3657_s1 + $0x94] ss:$8 sps:$4 sm:$0xff]   ;;  %v2419_v38 = vld [vmem:[%s3657_s1 + $0x90] ss:$8 sps:$4 sm:$0xff]   ;;  %v2421_v40 = vld [vmem:[%s3657_s1 + $0xa4] ss:$8 sps:$4 sm:$0xff]  }
   0xe   :  { %v2417_v37 = vld [vmem:[%s3657_s1 + $0x294] ss:$8 sps:$4 sm:$0xff]   ;;  %v2420_v39 = vld [vmem:[%s3657_s1 + $0x290] ss:$8 sps:$4 sm:$0xff]   ;;  %v2423_v41 = vld [vmem:[%s3657_s1 + $0x2a4] ss:$8 sps:$4 sm:$0xff]  }
   0xf   :  { %1334 = vmatpush1.bf16.msra.mxu1 %v2383_v14  ;;  %v2425_v42 = vld [vmem:[%s3657_s1 + $0xa0] ss:$8 sps:$4 sm:$0xff]   ;;  %v2427_v44 = vld [vmem:[%s3657_s1 + $0xb4] ss:$8 sps:$4 sm:$0xff]   ;;  %v2431_v46 = vld [vmem:[%s3657_s1 + $0xb0] ss:$8 sps:$4 sm:$0xff]  }
  0x10   :  { %1560 = vmatpush1.bf16.msra.mxu0 %v2384_v15  ;;  %1335 = vmatprep.subr.bf16.mxu1 %v2385_v16  ;;  %v2426_v43 = vld [vmem:[%s3657_s1 + $0x2a0] ss:$8 sps:$4 sm:$0xff]   ;;  %v2429_v45 = vld [vmem:[%s3657_s1 + $0x2b4] ss:$8 sps:$4 sm:$0xff]   ;;  %v2432_v47 = vld [vmem:[%s3657_s1 + $0x2b0] ss:$8 sps:$4 sm:$0xff]  }
  0x11   :  { %1561 = vmatprep.subr.bf16.mxu0 %v2387_v17  ;;  %v2433_v48 = vld [vmem:[%s3657_s1 + $0xc4] ss:$8 sps:$4 sm:$0xff]   ;;  %v2462_v51 = vld [vmem:[%s3658_s0 + $0x14] ss:$36 sps:$4 sm:$0xff]   ;;  %v2437_v52 = vld [vmem:[%s3657_s1 + $0xc0] ss:$8 sps:$4 sm:$0xff]  }
  0x12   :  { %v2459_v49 = vld [vmem:[%s3658_s0 + $0x4] ss:$36 sps:$4 sm:$0xff]   ;;  %1585 = vmatprep.mubr.bf16.mxu0 %v2462_v51  ;;  %v2439_v54 = vld [vmem:[%s3657_s1 + $0xd4] ss:$8 sps:$4 sm:$0xff]   ;;  %v2443_v56 = vld [vmem:[%s3657_s1 + $0xd0] ss:$8 sps:$4 sm:$0xff]  }
  0x13   :  { %1336 = vmatpush1.bf16.msra.mxu1 %v2389_v18  ;;  %v2435_v50 = vld [vmem:[%s3657_s1 + $0x2c4] ss:$8 sps:$4 sm:$0xff]   ;;  %1359 = vmatprep.mubr.bf16.mxu1 %v2459_v49  ;;  %v2438_v53 = vld [vmem:[%s3657_s1 + $0x2c0] ss:$8 sps:$4 sm:$0xff]   ;;  %v2441_v55 = vld [vmem:[%s3657_s1 + $0x2d4] ss:$8 sps:$4 sm:$0xff]  }
  0x14   :  { %1562 = vmatpush1.bf16.msra.mxu0 %v2390_v19  ;;  %1337 = vmatprep.subr.bf16.mxu1 %v2391_v20  ;;  %v2444_v57 = vld [vmem:[%s3657_s1 + $0x2d0] ss:$8 sps:$4 sm:$0xff]   ;;  %v2445_v58 = vld [vmem:[%s3657_s1 + $0xe4] ss:$8 sps:$4 sm:$0xff]   ;;  %v2449_v60 = vld [vmem:[%s3657_s1 + $0xe0] ss:$8 sps:$4 sm:$0xff]  }
  0x15   :  { %1563 = vmatprep.subr.bf16.mxu0 %v2393_v21  ;;  %v2447_v59 = vld [vmem:[%s3657_s1 + $0x2e4] ss:$8 sps:$4 sm:$0xff]   ;;  %v2450_v61 = vld [vmem:[%s3657_s1 + $0x2e0] ss:$8 sps:$4 sm:$0xff]   ;;  %v2451_v62 = vld [vmem:[%s3657_s1 + $0xf4] ss:$8 sps:$4 sm:$0xff]  }
  0x16   :  { %v2453_v63 = vld [vmem:[%s3657_s1 + $0x2f4] ss:$8 sps:$4 sm:$0xff]   ;;  %v2455_v0 = vld [vmem:[%s3657_s1 + $0xf0] ss:$8 sps:$4 sm:$0xff]   ;;  %v2465_v2 = vld [vmem:[%s3657_s1 + $0x104] ss:$8 sps:$4 sm:$0xff]  }
  0x17   :  { %1338 = vmatpush1.bf16.msra.mxu1 %v2395_v22  ;;  %v2456_v1 = vld [vmem:[%s3657_s1 + $0x2f0] ss:$8 sps:$4 sm:$0xff]   ;;  %v2906_v3 = vld [vmem:[%s3657_s1 + $0x304] ss:$8 sps:$4 sm:$0xff]   ;;  %v2463_v6 = vld [vmem:[%s3657_s1 + $0x100] ss:$8 sps:$4 sm:$0xff]  }
  0x18   :  { %1564 = vmatpush1.bf16.msra.mxu0 %v2396_v23  ;;  %1339 = vmatprep.subr.bf16.mxu1 %v2397_v24  ;;  %v2457_v4 = vld [vmem:[%s3658_s0] ss:$36 sps:$4 sm:$0xff]   ;;  %v2460_v5 = vld [vmem:[%s3658_s0 + $0x10] ss:$36 sps:$4 sm:$0xff]   ;;  %v2479_v16 = vld [vmem:[%s3658_s0 + $0x48] ss:$36 sps:$4 sm:$0xff]  }
  0x19   :  { %1565 = vmatprep.subr.bf16.mxu0 %v2399_v25  ;;  %v2920_v7 = vld [vmem:[%s3657_s1 + $0x300] ss:$8 sps:$4 sm:$0xff]   ;;  %v2471_v8 = vld [vmem:[%s3657_s1 + $0x114] ss:$8 sps:$4 sm:$0xff]   ;;  %v2475_v10 = vld [vmem:[%s3658_s0 + $0x4c] ss:$36 sps:$4 sm:$0xff]  }
  0x1a   :  { %v2929_v9 = vld [vmem:[%s3657_s1 + $0x314] ss:$8 sps:$4 sm:$0xff]   ;;  %v2469_v12 = vld [vmem:[%s3657_s1 + $0x110] ss:$8 sps:$4 sm:$0xff]   ;;  %v2482_v14 = vld [vmem:[%s3657_s1 + $0x124] ss:$8 sps:$4 sm:$0xff]  }
  0x1b   :  { %1340 = vmatpush1.bf16.msra.mxu1 %v2401_v26  ;;  %v2477_v11 = vld [vmem:[%s3658_s0 + $0x5c] ss:$36 sps:$4 sm:$0xff]   ;;  %v2944_v13 = vld [vmem:[%s3657_s1 + $0x310] ss:$8 sps:$4 sm:$0xff]   ;;  %v2953_v15 = vld [vmem:[%s3657_s1 + $0x324] ss:$8 sps:$4 sm:$0xff]  }
  0x1c   :  { %1566 = vmatpush1.bf16.msra.mxu0 %v2402_v27  ;;  %1341 = vmatprep.subr.bf16.mxu1 %v2403_v28  ;;  %v2480_v17 = vld [vmem:[%s3657_s1 + $0x120] ss:$8 sps:$4 sm:$0xff]   ;;  %v2483_v18 = vld [vmem:[%s3658_s0 + $0x58] ss:$36 sps:$4 sm:$0xff]   ;;  %v2500_v26 = vld [vmem:[%s3657_s1 + $0x144] ss:$8 sps:$4 sm:$0xff]  }
  0x1d   :  { %1567 = vmatprep.subr.bf16.mxu0 %v2405_v29  ;;  %v2967_v19 = vld [vmem:[%s3657_s1 + $0x320] ss:$8 sps:$4 sm:$0xff]   ;;  %v2489_v20 = vld [vmem:[%s3657_s1 + $0x134] ss:$8 sps:$4 sm:$0xff]   ;;  %v2487_v24 = vld [vmem:[%s3657_s1 + $0x130] ss:$8 sps:$4 sm:$0xff]  }
  0x1e   :  { %v2977_v21 = vld [vmem:[%s3657_s1 + $0x334] ss:$8 sps:$4 sm:$0xff]   ;;  %v2495_v23 = vld [vmem:[%s3658_s0 + $0xa4] ss:$36 sps:$4 sm:$0xff]   ;;  %v2992_v25 = vld [vmem:[%s3657_s1 + $0x330] ss:$8 sps:$4 sm:$0xff]  }
  0x1f   :  { %1342 = vmatpush1.bf16.msra.mxu1 %v2407_v30  ;;  %v2493_v22 = vld [vmem:[%s3658_s0 + $0x94] ss:$36 sps:$4 sm:$0xff]   ;;  %v3001_v27 = vld [vmem:[%s3657_s1 + $0x344] ss:$8 sps:$4 sm:$0xff]   ;;  %v2498_v29 = vld [vmem:[%s3657_s1 + $0x140] ss:$8 sps:$4 sm:$0xff]  }
  0x20   :  { %1568 = vmatpush1.bf16.msra.mxu0 %v2408_v31  ;;  %1343 = vmatprep.subr.bf16.mxu1 %v2409_v32  ;;  %v2497_v28 = vld [vmem:[%s3658_s0 + $0x90] ss:$36 sps:$4 sm:$0xff]   ;;  %v2501_v30 = vld [vmem:[%s3658_s0 + $0xa0] ss:$36 sps:$4 sm:$0xff]  }
  0x21   :  { %1569 = vmatprep.subr.bf16.mxu0 %v2411_v33  ;;  %v3015_v31 = vld [vmem:[%s3657_s1 + $0x340] ss:$8 sps:$4 sm:$0xff]   ;;  %v2507_v32 = vld [vmem:[%s3657_s1 + $0x154] ss:$8 sps:$4 sm:$0xff]   ;;  %v3088_v49 = vld [vmem:[%s3657_s1 + $0x370] ss:$8 sps:$4 sm:$0xff]  }
  0x22   :  { %v3025_v33 = vld [vmem:[%s3657_s1 + $0x354] ss:$8 sps:$4 sm:$0xff]   ;;  %v3097_v51 = vld [vmem:[%s3657_s1 + $0x384] ss:$8 sps:$4 sm:$0xff]  }
  0x23   :  { %1344 = vmatpush1.bf16.msra.mxu1 %v2413_v34  ;;  %v2511_v34 = vld [vmem:[%s3658_s0 + $0xdc] ss:$36 sps:$4 sm:$0xff]  }
  0x24   :  { %1570 = vmatpush1.bf16.msra.mxu0 %v2414_v35  ;;  %1345 = vmatprep.subr.bf16.mxu1 %v2415_v36  ;;  %v2513_v35 = vld [vmem:[%s3658_s0 + $0xec] ss:$36 sps:$4 sm:$0xff]  }
  0x25   :  { %1571 = vmatprep.subr.bf16.mxu0 %v2417_v37  ;;  %v2505_v36 = vld [vmem:[%s3657_s1 + $0x150] ss:$8 sps:$4 sm:$0xff]  }
  0x26   :  { %v3040_v37 = vld [vmem:[%s3657_s1 + $0x350] ss:$8 sps:$4 sm:$0xff]  }
  0x27   :  { %1346 = vmatpush1.bf16.msra.mxu1 %v2419_v38  ;;  %v2518_v38 = vld [vmem:[%s3657_s1 + $0x164] ss:$8 sps:$4 sm:$0xff]  }
  0x28   :  { %1572 = vmatpush1.bf16.msra.mxu0 %v2420_v39  ;;  %1347 = vmatprep.subr.bf16.mxu1 %v2421_v40  ;;  %v3049_v39 = vld [vmem:[%s3657_s1 + $0x364] ss:$8 sps:$4 sm:$0xff]   ;;  %v2515_v40 = vld [vmem:[%s3658_s0 + $0xd8] ss:$36 sps:$4 sm:$0xff]  }
  0x29   :  { %1573 = vmatprep.subr.bf16.mxu0 %v2423_v41  ;;  %v2516_v41 = vld [vmem:[%s3657_s1 + $0x160] ss:$8 sps:$4 sm:$0xff]  }
  0x2b   :  { %1348 = vmatpush1.bf16.msra.mxu1 %v2425_v42  ;;  %v2519_v42 = vld [vmem:[%s3658_s0 + $0xe8] ss:$36 sps:$4 sm:$0xff]  }
  0x2c   :  { %1574 = vmatpush1.bf16.msra.mxu0 %v2426_v43  ;;  %1349 = vmatprep.subr.bf16.mxu1 %v2427_v44  ;;  %v3063_v43 = vld [vmem:[%s3657_s1 + $0x360] ss:$8 sps:$4 sm:$0xff]   ;;  %v2525_v44 = vld [vmem:[%s3657_s1 + $0x174] ss:$8 sps:$4 sm:$0xff]  }
  0x2d   :  { %1575 = vmatprep.subr.bf16.mxu0 %v2429_v45  ;;  %v3073_v45 = vld [vmem:[%s3657_s1 + $0x374] ss:$8 sps:$4 sm:$0xff]  }
  0x2f   :  { %1350 = vmatpush1.bf16.msra.mxu1 %v2431_v46  ;;  %v2529_v46 = vld [vmem:[%s3658_s0 + $0x124] ss:$36 sps:$4 sm:$0xff]  }
  0x30   :  { %1576 = vmatpush1.bf16.msra.mxu0 %v2432_v47  ;;  %1351 = vmatprep.subr.bf16.mxu1 %v2433_v48  ;;  %v2531_v47 = vld [vmem:[%s3658_s0 + $0x134] ss:$36 sps:$4 sm:$0xff]  }
  0x31   :  { %1577 = vmatprep.subr.bf16.mxu0 %v2435_v50  ;;  %v2523_v48 = vld [vmem:[%s3657_s1 + $0x170] ss:$8 sps:$4 sm:$0xff]   ;;  %v2536_v50 = vld [vmem:[%s3657_s1 + $0x184] ss:$8 sps:$4 sm:$0xff]  }
  0x33   :  { %1352 = vmatpush1.bf16.msra.mxu1 %v2437_v52  ;;  %v2533_v52 = vld [vmem:[%s3658_s0 + $0x120] ss:$36 sps:$4 sm:$0xff]  }
  0x34   :  { %1578 = vmatpush1.bf16.msra.mxu0 %v2438_v53  ;;  %1353 = vmatprep.subr.bf16.mxu1 %v2439_v54  ;;  %v2534_v53 = vld [vmem:[%s3657_s1 + $0x180] ss:$8 sps:$4 sm:$0xff]   ;;  %v2537_v54 = vld [vmem:[%s3658_s0 + $0x130] ss:$36 sps:$4 sm:$0xff]  }
  0x35   :  { %1579 = vmatprep.subr.bf16.mxu0 %v2441_v55  ;;  %v3111_v55 = vld [vmem:[%s3657_s1 + $0x380] ss:$8 sps:$4 sm:$0xff]  }
  0x37   :  { %1354 = vmatpush1.bf16.msra.mxu1 %v2443_v56  ;;  %v2543_v56 = vld [vmem:[%s3657_s1 + $0x194] ss:$8 sps:$4 sm:$0xff]  }
  0x38   :  { %1580 = vmatpush1.bf16.msra.mxu0 %v2444_v57  ;;  %1355 = vmatprep.subr.bf16.mxu1 %v2445_v58  ;;  %v3121_v57 = vld [vmem:[%s3657_s1 + $0x394] ss:$8 sps:$4 sm:$0xff]   ;;  %v2547_v58 = vld [vmem:[%s3658_s0 + $0x16c] ss:$36 sps:$4 sm:$0xff]  }
  0x39   :  { %1581 = vmatprep.subr.bf16.mxu0 %v2447_v59  ;;  %v2549_v59 = vld [vmem:[%s3658_s0 + $0x17c] ss:$36 sps:$4 sm:$0xff]  }
  0x3b   :  { %1356 = vmatpush1.bf16.msra.mxu1 %v2449_v60  ;;  %v2541_v60 = vld [vmem:[%s3657_s1 + $0x190] ss:$8 sps:$4 sm:$0xff]  }
  0x3c   :  { %1582 = vmatpush1.bf16.msra.mxu0 %v2450_v61  ;;  %1357 = vmatprep.subr.bf16.mxu1 %v2451_v62  ;;  %v3136_v61 = vld [vmem:[%s3657_s1 + $0x390] ss:$8 sps:$4 sm:$0xff]   ;;  %v2554_v62 = vld [vmem:[%s3657_s1 + $0x1a4] ss:$8 sps:$4 sm:$0xff]  }
  0x3d   :  { %1583 = vmatprep.subr.bf16.mxu0 %v2453_v63  ;;  %v3145_v63 = vld [vmem:[%s3657_s1 + $0x3a4] ss:$8 sps:$4 sm:$0xff]  }
  0x3f   :  { %1358 = vmatpush1.bf16.msra.mxu1 %v2455_v0  ;;  %v2551_v0 = vld [vmem:[%s3658_s0 + $0x168] ss:$36 sps:$4 sm:$0xff]  }
  0x40   :  { %1584 = vmatpush1.bf16.msra.mxu0 %v2456_v1  ;;  %1440 = vmatprep.subr.bf16.mxu1 %v2465_v2  ;;  %v2552_v1 = vld [vmem:[%s3657_s1 + $0x1a0] ss:$8 sps:$4 sm:$0xff]   ;;  %v2555_v2 = vld [vmem:[%s3658_s0 + $0x178] ss:$36 sps:$4 sm:$0xff]  }
  0x41   :  { %1666 = vmatprep.subr.bf16.mxu0 %v2906_v3 }
  0x42   :  { %1360 = vmatmul.mubr.bf16.vlgmr.msra.gmra.mrb[0].mxu1 %v2457_v4  ;;  %v3159_v4 = vld [vmem:[%s3657_s1 + $0x3a0] ss:$8 sps:$4 sm:$0xff]  }
  0x43   :  { %1586 = vmatmul.mubr.bf16.vlgmr.msra.gmra.mrb[0].mxu0 %v2460_v5  ;;  %1441 = vmatpush1.bf16.msra.mxu1 %v2463_v6  ;;  %v2561_v5 = vld [vmem:[%s3657_s1 + $0x1b4] ss:$8 sps:$4 sm:$0xff]  }
  0x44   :  { %1667 = vmatpush1.bf16.msra.mxu0 %v2920_v7  ;;  %1442 = vmatprep.subr.bf16.mxu1 %v2471_v8  ;;  %v3169_v6 = vld [vmem:[%s3657_s1 + $0x3b4] ss:$8 sps:$4 sm:$0xff]  }
  0x45   :  { %1668 = vmatprep.subr.bf16.mxu0 %v2929_v9  ;;  %1369 = vmatprep.mubr.bf16.mxu1 %v2475_v10  ;;  %v2565_v8 = vld [vmem:[%s3658_s0 + $0x1b4] ss:$36 sps:$4 sm:$0xff]   ;;  %v2567_v10 = vld [vmem:[%s3658_s0 + $0x1c4] ss:$36 sps:$4 sm:$0xff]  }
  0x46   :  { %1595 = vmatprep.mubr.bf16.mxu0 %v2477_v11  ;;  %v2559_v11 = vld [vmem:[%s3657_s1 + $0x1b0] ss:$8 sps:$4 sm:$0xff]  }
  0x47   :  { %1443 = vmatpush1.bf16.msra.mxu1 %v2469_v12  ;;  %v3183_v12 = vld [vmem:[%s3657_s1 + $0x3b0] ss:$8 sps:$4 sm:$0xff]  }
  0x48   :  { %1669 = vmatpush1.bf16.msra.mxu0 %v2944_v13  ;;  %1444 = vmatprep.subr.bf16.mxu1 %v2482_v14  ;;  %v2572_v14 = vld [vmem:[%s3657_s1 + $0x1c4] ss:$8 sps:$4 sm:$0xff]  }
  0x49   :  { %1670 = vmatprep.subr.bf16.mxu0 %v2953_v15 }
  0x4a   :  { %1370 = vmatmul.mubr.bf16.gmra.mrb[4].mxu1 %v2479_v16  ;;  %v3193_v16 = vld [vmem:[%s3657_s1 + $0x3c4] ss:$8 sps:$4 sm:$0xff]  }
  0x4b   :  { %1596 = vmatmul.mubr.bf16.gmra.mrb[4].mxu0 %v2483_v18  ;;  %1445 = vmatpush1.bf16.msra.mxu1 %v2480_v17  ;;  %v2569_v17 = vld [vmem:[%s3658_s0 + $0x1b0] ss:$36 sps:$4 sm:$0xff]   ;;  %v2570_v18 = vld [vmem:[%s3657_s1 + $0x1c0] ss:$8 sps:$4 sm:$0xff]  }
  0x4c   :  { %1671 = vmatpush1.bf16.msra.mxu0 %v2967_v19  ;;  %1446 = vmatprep.subr.bf16.mxu1 %v2489_v20  ;;  %v2573_v20 = vld [vmem:[%s3658_s0 + $0x1c0] ss:$36 sps:$4 sm:$0xff]  }
  0x4d   :  { %1672 = vmatprep.subr.bf16.mxu0 %v2977_v21  ;;  %1379 = vmatprep.mubr.bf16.mxu1 %v2493_v22  ;;  %v3207_v22 = vld [vmem:[%s3657_s1 + $0x3c0] ss:$8 sps:$4 sm:$0xff]  }
  0x4e   :  { %1605 = vmatprep.mubr.bf16.mxu0 %v2495_v23  ;;  %v2579_v23 = vld [vmem:[%s3657_s1 + $0x1d4] ss:$8 sps:$4 sm:$0xff]  }
  0x4f   :  { %1447 = vmatpush1.bf16.msra.mxu1 %v2487_v24  ;;  %v3217_v24 = vld [vmem:[%s3657_s1 + $0x3d4] ss:$8 sps:$4 sm:$0xff]  }
  0x50   :  { %1673 = vmatpush1.bf16.msra.mxu0 %v2992_v25  ;;  %1448 = vmatprep.subr.bf16.mxu1 %v2500_v26  ;;  %v2583_v26 = vld [vmem:[%s3658_s0 + $0x1fc] ss:$36 sps:$4 sm:$0xff]  }
  0x51   :  { %1674 = vmatprep.subr.bf16.mxu0 %v3001_v27 }
  0x52   :  { %1380 = vmatmul.mubr.bf16.gmra.mrb[8].mxu1 %v2497_v28  ;;  %v2585_v28 = vld [vmem:[%s3658_s0 + $0x20c] ss:$36 sps:$4 sm:$0xff]  }
  0x53   :  { %1606 = vmatmul.mubr.bf16.gmra.mrb[8].mxu0 %v2501_v30  ;;  %1449 = vmatpush1.bf16.msra.mxu1 %v2498_v29  ;;  %v2577_v29 = vld [vmem:[%s3657_s1 + $0x1d0] ss:$8 sps:$4 sm:$0xff]  }
  0x54   :  { %1675 = vmatpush1.bf16.msra.mxu0 %v3015_v31  ;;  %1450 = vmatprep.subr.bf16.mxu1 %v2507_v32  ;;  %v3231_v30 = vld [vmem:[%s3657_s1 + $0x3d0] ss:$8 sps:$4 sm:$0xff]   ;;  %v2590_v32 = vld [vmem:[%s3657_s1 + $0x1e4] ss:$8 sps:$4 sm:$0xff]  }
  0x55   :  { %1676 = vmatprep.subr.bf16.mxu0 %v3025_v33  ;;  %1389 = vmatprep.mubr.bf16.mxu1 %v2511_v34  ;;  %v3241_v34 = vld [vmem:[%s3657_s1 + $0x3e4] ss:$8 sps:$4 sm:$0xff]  }
  0x56   :  { %1615 = vmatprep.mubr.bf16.mxu0 %v2513_v35  ;;  %v2587_v35 = vld [vmem:[%s3658_s0 + $0x1f8] ss:$36 sps:$4 sm:$0xff]  }
  0x57   :  { %1451 = vmatpush1.bf16.msra.mxu1 %v2505_v36  ;;  %v2588_v36 = vld [vmem:[%s3657_s1 + $0x1e0] ss:$8 sps:$4 sm:$0xff]  }
  0x58   :  { %1677 = vmatpush1.bf16.msra.mxu0 %v3040_v37  ;;  %1452 = vmatprep.subr.bf16.mxu1 %v2518_v38  ;;  %v2591_v38 = vld [vmem:[%s3658_s0 + $0x208] ss:$36 sps:$4 sm:$0xff]  }
  0x59   :  { %1678 = vmatprep.subr.bf16.mxu0 %v3049_v39 }
  0x5a   :  { %1390 = vmatmul.mubr.bf16.gmra.mrb[12].mxu1 %v2515_v40  ;;  %v3255_v40 = vld [vmem:[%s3657_s1 + $0x3e0] ss:$8 sps:$4 sm:$0xff]  }
  0x5b   :  { %1616 = vmatmul.mubr.bf16.gmra.mrb[12].mxu0 %v2519_v42  ;;  %1453 = vmatpush1.bf16.msra.mxu1 %v2516_v41  ;;  %v2597_v41 = vld [vmem:[%s3657_s1 + $0x1f4] ss:$8 sps:$4 sm:$0xff]  }
  0x5c   :  { %1679 = vmatpush1.bf16.msra.mxu0 %v3063_v43  ;;  %1454 = vmatprep.subr.bf16.mxu1 %v2525_v44  ;;  %v3265_v42 = vld [vmem:[%s3657_s1 + $0x3f4] ss:$8 sps:$4 sm:$0xff]   ;;  %v2603_v44 = vld [vmem:[%s3658_s0 + $0xc] ss:$36 sps:$4 sm:$0xff]  }
  0x5d   :  { %1680 = vmatprep.subr.bf16.mxu0 %v3073_v45  ;;  %1399 = vmatprep.mubr.bf16.mxu1 %v2529_v46  ;;  %v2606_v46 = vld [vmem:[%s3658_s0 + $0x1c] ss:$36 sps:$4 sm:$0xff]  }
  0x5e   :  { %1625 = vmatprep.mubr.bf16.mxu0 %v2531_v47  ;;  %v2595_v47 = vld [vmem:[%s3657_s1 + $0x1f0] ss:$8 sps:$4 sm:$0xff]  }
  0x5f   :  { %1455 = vmatpush1.bf16.msra.mxu1 %v2523_v48  ;;  %v3280_v48 = vld [vmem:[%s3657_s1 + $0x3f0] ss:$8 sps:$4 sm:$0xff]  }
  0x60   :  { %1681 = vmatpush1.bf16.msra.mxu0 %v3088_v49  ;;  %1456 = vmatprep.subr.bf16.mxu1 %v2536_v50  ;;  %v2609_v50 = vld [vmem:[%s3657_s1 + $0x404] ss:$8 sps:$4 sm:$0xff]  }
  0x61   :  { %1682 = vmatprep.subr.bf16.mxu0 %v3097_v51 }
  0x62   :  { %1400 = vmatmul.mubr.bf16.gmra.mrb[16].mxu1 %v2533_v52  ;;  %v2601_v52 = vld [vmem:[%s3658_s0 + $0x8] ss:$36 sps:$4 sm:$0xff]  }
  0x63   :  { %1626 = vmatmul.mubr.bf16.gmra.mrb[16].mxu0 %v2537_v54  ;;  %1457 = vmatpush1.bf16.msra.mxu1 %v2534_v53  ;;  %v2604_v53 = vld [vmem:[%s3658_s0 + $0x18] ss:$36 sps:$4 sm:$0xff]   ;;  %v2607_v54 = vld [vmem:[%s3657_s1 + $0x400] ss:$8 sps:$4 sm:$0xff]  }
  0x64   :  { %1683 = vmatpush1.bf16.msra.mxu0 %v3111_v55  ;;  %1458 = vmatprep.subr.bf16.mxu1 %v2543_v56  ;;  %v2612_v56 = vld [vmem:[%s3657_s1 + $0x414] ss:$8 sps:$4 sm:$0xff]  }
  0x65   :  { %1684 = vmatprep.subr.bf16.mxu0 %v3121_v57  ;;  %1409 = vmatprep.mubr.bf16.mxu1 %v2547_v58  ;;  %v2613_v58 = vld [vmem:[%s3658_s0 + $0x54] ss:$36 sps:$4 sm:$0xff]  }
  0x66   :  { %1635 = vmatprep.mubr.bf16.mxu0 %v2549_v59  ;;  %v2615_v59 = vld [vmem:[%s3658_s0 + $0x64] ss:$36 sps:$4 sm:$0xff]  }
  0x67   :  { %1459 = vmatpush1.bf16.msra.mxu1 %v2541_v60  ;;  %v2610_v60 = vld [vmem:[%s3657_s1 + $0x410] ss:$8 sps:$4 sm:$0xff]  }
  0x68   :  { %1685 = vmatpush1.bf16.msra.mxu0 %v3136_v61  ;;  %1460 = vmatprep.subr.bf16.mxu1 %v2554_v62  ;;  %v2617_v62 = vld [vmem:[%s3658_s0 + $0x50] ss:$36 sps:$4 sm:$0xff]  }
  0x69   :  { %1686 = vmatprep.subr.bf16.mxu0 %v3145_v63 }
  0x6a   :  { %1410 = vmatmul.mubr.bf16.gmra.mrb[20].mxu1 %v2551_v0  ;;  %v2624_v0 = vld [vmem:[%s3657_s1 + $0x434] ss:$8 sps:$4 sm:$0xff]  }
  0x6b   :  { %1636 = vmatmul.mubr.bf16.gmra.mrb[20].mxu0 %v2555_v2  ;;  %1461 = vmatpush1.bf16.msra.mxu1 %v2552_v1  ;;  %v2625_v1 = vld [vmem:[%s3658_s0 + $0x9c] ss:$36 sps:$4 sm:$0xff]   ;;  %v2633_v2 = vld [vmem:[%s3657_s1 + $0x444] ss:$8 sps:$4 sm:$0xff]  }
  0x6c   :  { %1687 = vmatpush1.bf16.msra.mxu0 %v3159_v4  ;;  %1462 = vmatprep.subr.bf16.mxu1 %v2561_v5  ;;  %v2629_v5 = vld [vmem:[%s3658_s0 + $0x98] ss:$36 sps:$4 sm:$0xff]  }
  0x6d   :  { %1688 = vmatprep.subr.bf16.mxu0 %v3169_v6  ;;  %1419 = vmatprep.mubr.bf16.mxu1 %v2565_v8  ;;  %v2636_v8 = vld [vmem:[%s3657_s1 + $0x454] ss:$8 sps:$4 sm:$0xff]  }
  0x6e   :  { %1645 = vmatprep.mubr.bf16.mxu0 %v2567_v10  ;;  %v2637_v10 = vld [vmem:[%s3658_s0 + $0xe4] ss:$36 sps:$4 sm:$0xff]  }
  0x6f   :  { %1463 = vmatpush1.bf16.msra.mxu1 %v2559_v11  ;;  %v2645_v11 = vld [vmem:[%s3657_s1 + $0x464] ss:$8 sps:$4 sm:$0xff]  }
  0x70   :  { %1689 = vmatpush1.bf16.msra.mxu0 %v3183_v12  ;;  %1464 = vmatprep.subr.bf16.mxu1 %v2572_v14  ;;  %v2641_v14 = vld [vmem:[%s3658_s0 + $0xe0] ss:$36 sps:$4 sm:$0xff]  }
  0x71   :  { %1690 = vmatprep.subr.bf16.mxu0 %v3193_v16 }
  0x72   :  { %1420 = vmatmul.mubr.bf16.gmra.mrb[24].mxu1 %v2569_v17  ;;  %v2648_v17 = vld [vmem:[%s3657_s1 + $0x474] ss:$8 sps:$4 sm:$0xff]  }
  0x73   :  { %1646 = vmatmul.mubr.bf16.gmra.mrb[24].mxu0 %v2573_v20  ;;  %1465 = vmatpush1.bf16.msra.mxu1 %v2570_v18  ;;  %v2649_v18 = vld [vmem:[%s3658_s0 + $0x12c] ss:$36 sps:$4 sm:$0xff]  }
  0x74   :  { %1691 = vmatpush1.bf16.msra.mxu0 %v3207_v22  ;;  %1466 = vmatprep.subr.bf16.mxu1 %v2579_v23  ;;  %v2651_v20 = vld [vmem:[%s3658_s0 + $0x128] ss:$36 sps:$4 sm:$0xff]  }
  0x75   :  { %1692 = vmatprep.subr.bf16.mxu0 %v3217_v24  ;;  %1429 = vmatprep.mubr.bf16.mxu1 %v2583_v26  ;;  %v2656_v23 = vld [vmem:[%s3658_s0 + $0x68] ss:$36 sps:$4 sm:$0xff]  }
  0x76   :  { %1655 = vmatprep.mubr.bf16.mxu0 %v2585_v28  ;;  %v2672_v26 = vld [vmem:[%s3658_s0 + $0x188] ss:$36 sps:$4 sm:$0xff]  }
  0x77   :  { %1467 = vmatpush1.bf16.msra.mxu1 %v2577_v29  ;;  %v2673_v28 = vld [vmem:[%s3658_s0 + $0x1cc] ss:$36 sps:$4 sm:$0xff]  }
  0x78   :  { %1693 = vmatpush1.bf16.msra.mxu0 %v3231_v30  ;;  %1468 = vmatprep.subr.bf16.mxu1 %v2590_v32  ;;  %v2675_v29 = vld [vmem:[%s3658_s0 + $0x1c8] ss:$36 sps:$4 sm:$0xff]   ;;  %v2677_v32 = vld [vmem:[%s3658_s0 + $0x214] ss:$36 sps:$4 sm:$0xff]  }
  0x79   :  { %1694 = vmatprep.subr.bf16.mxu0 %v3241_v34 }
  0x7a   :  { %1430 = vmatmul.mubr.bf16.gmra.mrb[28].mxu1 %v2587_v35  ;;  %v2680_v35 = vld [vmem:[%s3658_s0 + $0x218] ss:$36 sps:$4 sm:$0xff]  }
  0x7b   :  { %1656 = vmatmul.mubr.bf16.gmra.mrb[28].mxu0 %v2591_v38  ;;  %1469 = vmatpush1.bf16.msra.mxu1 %v2588_v36 }
  0x7c   :  { %1695 = vmatpush1.bf16.msra.mxu0 %v3255_v40  ;;  %1470 = vmatprep.subr.bf16.mxu1 %v2597_v41 }
  0x7d   :  { %1696 = vmatprep.subr.bf16.mxu0 %v3265_v42  ;;  %1472 = vmatprep.mubr.bf16.mxu1 %v2603_v44 }
  0x7e   :  { %1698 = vmatprep.mubr.bf16.mxu0 %v2606_v46 }
  0x7f   :  { %1471 = vmatpush1.bf16.msra.mxu1 %v2595_v47 }
  0x80   :  { %1697 = vmatpush1.bf16.msra.mxu0 %v3280_v48  ;;  %2200 = vmatprep.subr.bf16.mxu1 %v2906_v3  ;;  %v2621_v3 = vld [vmem:[%s3657_s1 + $0x424] ss:$8 sps:$4 sm:$0xff]  }
  0x81   :  { %1779 = vmatprep.subr.bf16.mxu0 %v2609_v50 }
  0x82   :  { %1473 = vmatmul.mubr.bf16.vlgmr.msra.gmra.mrb[0].mxu1 %v2601_v52 }
  0x83   :  { %1699 = vmatmul.mubr.bf16.vlgmr.msra.gmra.mrb[0].mxu0 %v2604_v53  ;;  %2216 = vmatpush1.bf16.msra.mxu1 %v2920_v7  ;;  %v2618_v7 = vld [vmem:[%s3658_s0 + $0x60] ss:$36 sps:$4 sm:$0xff]  }
  0x84   :  { %1780 = vmatpush1.bf16.msra.mxu0 %v2607_v54  ;;  %2201 = vmatprep.subr.bf16.mxu1 %v2929_v9  ;;  %v2619_v9 = vld [vmem:[%s3657_s1 + $0x420] ss:$8 sps:$4 sm:$0xff]  }
  0x85   :  { %1781 = vmatprep.subr.bf16.mxu0 %v2612_v56  ;;  %1482 = vmatprep.mubr.bf16.mxu1 %v2613_v58 }
  0x86   :  { %1708 = vmatprep.mubr.bf16.mxu0 %v2615_v59 }
  0x87   :  { %2217 = vmatpush1.bf16.msra.mxu1 %v2944_v13  ;;  %v2627_v13 = vld [vmem:[%s3658_s0 + $0xac] ss:$36 sps:$4 sm:$0xff]  }
  0x88   :  { %1782 = vmatpush1.bf16.msra.mxu0 %v2610_v60  ;;  %2202 = vmatprep.subr.bf16.mxu1 %v2953_v15  ;;  %v2622_v15 = vld [vmem:[%s3657_s1 + $0x430] ss:$8 sps:$4 sm:$0xff]  }
  0x89   :  { %1783 = vmatprep.subr.bf16.mxu0 %v2621_v3 }
  0x8a   :  { %1483 = vmatmul.mubr.bf16.gmra.mrb[4].mxu1 %v2617_v62 }
  0x8b   :  { %1709 = vmatmul.mubr.bf16.gmra.mrb[4].mxu0 %v2618_v7  ;;  %2218 = vmatpush1.bf16.msra.mxu1 %v2967_v19  ;;  %v2630_v19 = vld [vmem:[%s3658_s0 + $0xa8] ss:$36 sps:$4 sm:$0xff]  }
  0x8c   :  { %1784 = vmatpush1.bf16.msra.mxu0 %v2619_v9  ;;  %2203 = vmatprep.subr.bf16.mxu1 %v2977_v21  ;;  %v2631_v21 = vld [vmem:[%s3657_s1 + $0x440] ss:$8 sps:$4 sm:$0xff]  }
  0x8d   :  { %1785 = vmatprep.subr.bf16.mxu0 %v2624_v0  ;;  %1492 = vmatprep.mubr.bf16.mxu1 %v2625_v1 }
  0x8e   :  { %1718 = vmatprep.mubr.bf16.mxu0 %v2627_v13 }
  0x8f   :  { %2219 = vmatpush1.bf16.msra.mxu1 %v2992_v25  ;;  %v2639_v25 = vld [vmem:[%s3658_s0 + $0xf4] ss:$36 sps:$4 sm:$0xff]  }
  0x90   :  { %1786 = vmatpush1.bf16.msra.mxu0 %v2622_v15  ;;  %2204 = vmatprep.subr.bf16.mxu1 %v3001_v27  ;;  %v2634_v27 = vld [vmem:[%s3657_s1 + $0x450] ss:$8 sps:$4 sm:$0xff]  }
  0x91   :  { %1787 = vmatprep.subr.bf16.mxu0 %v2633_v2 }
  0x92   :  { %1493 = vmatmul.mubr.bf16.gmra.mrb[8].mxu1 %v2629_v5 }
  0x93   :  { %1719 = vmatmul.mubr.bf16.gmra.mrb[8].mxu0 %v2630_v19  ;;  %2220 = vmatpush1.bf16.msra.mxu1 %v3015_v31  ;;  %v2642_v31 = vld [vmem:[%s3658_s0 + $0xf0] ss:$36 sps:$4 sm:$0xff]  }
  0x94   :  { %1788 = vmatpush1.bf16.msra.mxu0 %v2631_v21  ;;  %2205 = vmatprep.subr.bf16.mxu1 %v3025_v33  ;;  %v2643_v33 = vld [vmem:[%s3657_s1 + $0x460] ss:$8 sps:$4 sm:$0xff]  }
  0x95   :  { %1789 = vmatprep.subr.bf16.mxu0 %v2636_v8  ;;  %1502 = vmatprep.mubr.bf16.mxu1 %v2637_v10 }
  0x96   :  { %1728 = vmatprep.mubr.bf16.mxu0 %v2639_v25 }
  0x97   :  { %2221 = vmatpush1.bf16.msra.mxu1 %v3040_v37  ;;  %v2646_v37 = vld [vmem:[%s3657_s1 + $0x470] ss:$8 sps:$4 sm:$0xff]  }
  0x98   :  { %1790 = vmatpush1.bf16.msra.mxu0 %v2634_v27  ;;  %2206 = vmatprep.subr.bf16.mxu1 %v3049_v39  ;;  %v2681_v39 = vmov 0  }
  0x99   :  { %1791 = vmatprep.subr.bf16.mxu0 %v2645_v11 }
  0x9a   :  { %1503 = vmatmul.mubr.bf16.gmra.mrb[12].mxu1 %v2641_v14 }
  0x9b   :  { %1729 = vmatmul.mubr.bf16.gmra.mrb[12].mxu0 %v2642_v31  ;;  %2222 = vmatpush1.bf16.msra.mxu1 %v3063_v43  ;;  %v2652_v43 = vld [vmem:[%s3658_s0 + $0x20] ss:$36 sps:$4 sm:$0xff]  }
  0x9c   :  { %1792 = vmatpush1.bf16.msra.mxu0 %v2643_v33  ;;  %2207 = vmatprep.subr.bf16.mxu1 %v3073_v45  ;;  %v2653_v45 = vld [vmem:[%s3658_s0 + $0x174] ss:$36 sps:$4 sm:$0xff]  }
  0x9d   :  { %1793 = vmatprep.subr.bf16.mxu0 %v2648_v17  ;;  %1512 = vmatprep.mubr.bf16.mxu1 %v2649_v18 }
  0x9e   :  { %1811 = vmatprep.mubr.bf16.mxu0 %v2681_v39 }
  0x9f   :  { %2223 = vmatpush1.bf16.msra.mxu1 %v3088_v49  ;;  %v2655_v49 = vld [vmem:[%s3658_s0 + $0x170] ss:$36 sps:$4 sm:$0xff]  }
  0xa0   :  { %1794 = vmatpush1.bf16.msra.mxu0 %v2646_v37  ;;  %2208 = vmatprep.subr.bf16.mxu1 %v3097_v51  ;;  %v2657_v51 = vld [vmem:[%s3658_s0 + $0x1bc] ss:$36 sps:$4 sm:$0xff]  }
  0xa2   :  { %1513 = vmatmul.mubr.bf16.gmra.mrb[16].mxu1 %v2651_v20 }
  0xa3   :  { %1812 = vmatmul.mubr.bf16.vlgmr.msra.gmra.mrb[0].mxu0 %v2652_v43  ;;  %2224 = vmatpush1.bf16.msra.mxu1 %v3111_v55  ;;  %v2659_v55 = vld [vmem:[%s3658_s0 + $0x1b8] ss:$36 sps:$4 sm:$0xff]  }
  0xa4   :  { %1522 = vmatprep.mubr.bf16.mxu1 %v2653_v45  ;;  %2209 = vmatprep.subr.bf16.mxu1 %v3121_v57  ;;  %v2660_v57 = vld [vmem:[%s3658_s0 + $0xb0] ss:$36 sps:$4 sm:$0xff]  }
  0xa5   :  { %1821 = vmatprep.mubr.bf16.mxu0 %v2681_v39 }
  0xa7   :  { %2225 = vmatpush1.bf16.msra.mxu1 %v3136_v61  ;;  %v2661_v61 = vld [vmem:[%s3658_s0 + $0x204] ss:$36 sps:$4 sm:$0xff]  }
  0xa8   :  { %2210 = vmatprep.subr.bf16.mxu1 %v3145_v63  ;;  %v2663_v63 = vld [vmem:[%s3658_s0 + $0x200] ss:$36 sps:$4 sm:$0xff]  }
  0xaa   :  { %1523 = vmatmul.mubr.bf16.gmra.mrb[20].mxu1 %v2655_v49 }
  0xab   :  { %1822 = vmatmul.mubr.bf16.gmra.mrb[4].mxu0 %v2656_v23  ;;  %2226 = vmatpush1.bf16.msra.mxu1 %v3159_v4  ;;  %v2664_v4 = vld [vmem:[%s3658_s0 + $0xf8] ss:$36 sps:$4 sm:$0xff]  }
  0xac   :  { %1532 = vmatprep.mubr.bf16.mxu1 %v2657_v51  ;;  %2211 = vmatprep.subr.bf16.mxu1 %v3169_v6  ;;  %v2667_v6 = vld [vmem:[%s3658_s0 + $0x13c] ss:$36 sps:$4 sm:$0xff]  }
  0xad   :  { %1831 = vmatprep.mubr.bf16.mxu0 %v2681_v39 }
  0xaf   :  { %2227 = vmatpush1.bf16.msra.mxu1 %v3183_v12  ;;  %v2665_v12 = vld [vmem:[%s3658_s0 + $0x138] ss:$36 sps:$4 sm:$0xff]  }
  0xb0   :  { %2212 = vmatprep.subr.bf16.mxu1 %v3193_v16  ;;  %v2668_v16 = vld [vmem:[%s3658_s0 + $0x140] ss:$36 sps:$4 sm:$0xff]  }
  0xb2   :  { %1533 = vmatmul.mubr.bf16.gmra.mrb[24].mxu1 %v2659_v55 }
  0xb3   :  { %1832 = vmatmul.mubr.bf16.gmra.mrb[8].mxu0 %v2660_v57  ;;  %2228 = vmatpush1.bf16.msra.mxu1 %v3207_v22  ;;  %v2669_v22 = vld [vmem:[%s3658_s0 + $0x184] ss:$36 sps:$4 sm:$0xff]  }
  0xb4   :  { %1542 = vmatprep.mubr.bf16.mxu1 %v2661_v61  ;;  %2213 = vmatprep.subr.bf16.mxu1 %v3217_v24  ;;  %v2671_v24 = vld [vmem:[%s3658_s0 + $0x180] ss:$36 sps:$4 sm:$0xff]  }
  0xb5   :  { %1841 = vmatprep.mubr.bf16.mxu0 %v2681_v39 }
  0xb7   :  { %2229 = vmatpush1.bf16.msra.mxu1 %v3231_v30  ;;  %v2676_v30 = vld [vmem:[%s3658_s0 + $0x1d0] ss:$36 sps:$4 sm:$0xff]  }
  0xb8   :  { %2214 = vmatprep.subr.bf16.mxu1 %v3241_v34  ;;  %v2679_v34 = vld [vmem:[%s3658_s0 + $0x210] ss:$36 sps:$4 sm:$0xff]  }
  0xba   :  { %1543 = vmatmul.mubr.bf16.gmra.mrb[28].mxu1 %v2663_v63 }
  0xbb   :  { %1842 = vmatmul.mubr.bf16.gmra.mrb[12].mxu0 %v2664_v4  ;;  %2230 = vmatpush1.bf16.msra.mxu1 %v3255_v40 }
  0xbc   :  { %1738 = vmatprep.mubr.bf16.mxu1 %v2667_v6  ;;  %2215 = vmatprep.subr.bf16.mxu1 %v3265_v42 }
  0xbd   :  { %1851 = vmatprep.mubr.bf16.mxu0 %v2681_v39 }
  0xbf   :  { %2231 = vmatpush1.bf16.msra.mxu1 %v3280_v48 }
  0xc2   :  { %1739 = vmatmul.mubr.bf16.vlgmr.msra.gmra.mrb[32].mxu1 %v2665_v12 }
  0xc3   :  { %1852 = vmatmul.mubr.bf16.gmra.mrb[32].mxu0 %v2668_v16  ;;  %1748 = vmatprep.mubr.bf16.mxu1 %v2669_v22 }
  0xc4   :  { %1861 = vmatprep.mubr.bf16.mxu0 %v2681_v39 }
  0xca   :  { %1749 = vmatmul.mubr.bf16.gmra.mrb[36].mxu1 %v2671_v24 }
  0xcb   :  { %1862 = vmatmul.mubr.bf16.gmra.mrb[36].mxu0 %v2672_v26  ;;  %1758 = vmatprep.mubr.bf16.mxu1 %v2673_v28 }
  0xcc   :  { %1871 = vmatprep.mubr.bf16.mxu0 %v2681_v39 }
  0xd2   :  { %1759 = vmatmul.mubr.bf16.gmra.mrb[40].mxu1 %v2675_v29 }
  0xd3   :  { %1872 = vmatmul.mubr.bf16.gmra.mrb[40].mxu0 %v2676_v30  ;;  %1768 = vmatprep.mubr.bf16.mxu1 %v2677_v32 }
  0xd4   :  { %1881 = vmatprep.mubr.bf16.mxu0 %v2681_v39 }
  0xda   :  { %1769 = vmatmul.mubr.bf16.gmra.mrb[44].mxu1 %v2679_v34 }
  0xdb   :  { %1882 = vmatmul.mubr.bf16.gmra.mrb[44].mxu0 %v2680_v35 }
 0x136   :  { %v1627_v36 = vpop.f32.mrb[16].mxu0 }
 0x137   :  { %v1629_v38 = vpop.f32.mrb[17].mxu0 }
 0x138   :  { %v1631_v40 = vpop.f32.mrb[18].mxu0 }
 0x139   :  { %v1633_v41 = vpop.f32.mrb[19].mxu0 }
 0x13e   :  { %v1637_v42 = vpop.f32.mrb[20].mxu0 }
 0x13f   :  { %v1639_v44 = vpop.f32.mrb[21].mxu0 }
 0x140   :  { %v1641_v46 = vpop.f32.mrb[22].mxu0 }
 0x141   :  { %v1643_v47 = vpop.f32.mrb[23].mxu0 }
 0x146   :  { %v1647_v48 = vpop.f32.mrb[24].mxu0 }
 0x147   :  { %v1649_v50 = vpop.f32.mrb[25].mxu0 }
 0x148   :  { %v3486_v52 = vpop.f32.mrb[26].mxu0 }
 0x149   :  { %v3488_v53 = vpop.f32.mrb[27].mxu0 }
 0x14e   :  { %v3490_v54 = vpop.f32.mrb[28].mxu0 }
 0x14f   :  { %v3492_v56 = vpop.f32.mrb[29].mxu0 }
 0x150   :  { %v3494_v58 = vpop.f32.mrb[30].mxu0 }
 0x151   :  { %v3496_v59 = vpop.f32.mrb[31].mxu0 }
 0x155   :  { %v1474_v60 = vpop.f32.mrb[0].mxu1 }
 0x156   :  { %v1476_v3 = vpop.f32.mrb[1].mxu1 }
 0x157   :  { %v1478_v62 = vpop.f32.mrb[2].mxu1 }
 0x158   :  { %v1480_v7 = vpop.f32.mrb[3].mxu1 }
 0x15d   :  { %v1484_v9 = vpop.f32.mrb[4].mxu1 }
 0x15e   :  { %v1486_v0 = vpop.f32.mrb[5].mxu1 }
 0x15f   :  { %v1488_v1 = vpop.f32.mrb[6].mxu1 }
 0x160   :  { %v1490_v13 = vpop.f32.mrb[7].mxu1 }
 0x165   :  { %v1494_v15 = vpop.f32.mrb[8].mxu1 }
 0x166   :  { %v1496_v2 = vpop.f32.mrb[9].mxu1 }
 0x167   :  { %v1498_v5 = vpop.f32.mrb[10].mxu1 }
 0x168   :  { %v1500_v19 = vpop.f32.mrb[11].mxu1 }
 0x16d   :  { %v1504_v21 = vpop.f32.mrb[12].mxu1 }
 0x16e   :  { %v1506_v8 = vpop.f32.mrb[13].mxu1 }
 0x16f   :  { %v3498_v10 = vpop.f32.mrb[14].mxu1 }
 0x170   :  { %v3500_v25 = vpop.f32.mrb[15].mxu1 }
 0x175   :  { %v1514_v27 = vpop.f32.mrb[16].mxu1 }
 0x176   :  { %v1813_v11 = vpop.f32.mrb[0].mxu0  ;;  %v3502_v14 = vadd.f32 %v1627_v36, %v1514_v27  ;;  %v1516_v33 = vpop.f32.mrb[17].mxu1 }
 0x177   :  { %v3504_v31 = vadd.f32 %v1813_v11, %v1474_v60  ;;  %v1815_v17 = vpop.f32.mrb[1].mxu0  ;;  %v3506_v18 = vadd.f32 %v1629_v38, %v1516_v33  ;;  %v1518_v39 = vpop.f32.mrb[18].mxu1 }
 0x178   :  { %v3508_v37 = vadd.f32 %v1815_v17, %v1476_v3  ;;  %v1817_v20 = vpop.f32.mrb[2].mxu0  ;;  %v3510_v43 = vadd.f32 %v1631_v40, %v1518_v39  ;;  %v1520_v49 = vpop.f32.mrb[19].mxu1 }
 0x179   :  { %v3512_v45 = vadd.f32 %v1817_v20, %v1478_v62  ;;  %v1819_v23 = vpop.f32.mrb[3].mxu0  ;;  %v3514_v51 = vadd.f32 %v1633_v41, %v1520_v49 }
 0x17a   :  { %v3516_v55 = vadd.f32 %v1819_v23, %v1480_v7 }
 0x17d   :  { %v1524_v57 = vpop.f32.mrb[20].mxu1 }
 0x17e   :  { %v1823_v61 = vpop.f32.mrb[4].mxu0  ;;  %v3518_v63 = vadd.f32 %v1637_v42, %v1524_v57  ;;  %v1526_v6 = vpop.f32.mrb[21].mxu1 }
 0x17f   :  { %v3520_v4 = vadd.f32 %v1823_v61, %v1484_v9  ;;  %v1825_v12 = vpop.f32.mrb[5].mxu0  ;;  %v3522_v16 = vadd.f32 %v1639_v44, %v1526_v6  ;;  %v1528_v24 = vpop.f32.mrb[22].mxu1 }
 0x180   :  { %v3524_v22 = vadd.f32 %v1825_v12, %v1486_v0  ;;  %v1827_v26 = vpop.f32.mrb[6].mxu0  ;;  %v3526_v28 = vadd.f32 %v1641_v46, %v1528_v24  ;;  %v1530_v30 = vpop.f32.mrb[23].mxu1 }
 0x181   :  { %v3528_v29 = vadd.f32 %v1827_v26, %v1488_v1  ;;  %v1829_v32 = vpop.f32.mrb[7].mxu0  ;;  %v3530_v34 = vadd.f32 %v1643_v47, %v1530_v30 }
 0x182   :  { %v3532_v35 = vadd.f32 %v1829_v32, %v1490_v13 }
 0x185   :  { %v1534_v36 = vpop.f32.mrb[24].mxu1 }
 0x186   :  { %v1833_v38 = vpop.f32.mrb[8].mxu0  ;;  %v3534_v40 = vadd.f32 %v1647_v48, %v1534_v36  ;;  %v1536_v42 = vpop.f32.mrb[25].mxu1 }
 0x187   :  { %v3536_v41 = vadd.f32 %v1833_v38, %v1494_v15  ;;  %v1835_v44 = vpop.f32.mrb[9].mxu0  ;;  %v3538_v60 = vadd.f32 %v1649_v50, %v1536_v42  ;;  %v1538_v3 = vpop.f32.mrb[26].mxu1 }
 0x188   :  { %v3540_v46 = vadd.f32 %v1835_v44, %v1496_v2  ;;  %v1837_v62 = vpop.f32.mrb[10].mxu0  ;;  %v3545_v7 = vadd.f32 %v3486_v52, %v1538_v3  ;;  %v1540_v48 = vpop.f32.mrb[27].mxu1 }
 0x189   :  { %v1892_v47 = vmax.f32 %v3504_v31, %v3536_v41  ;;  %v3547_v9 = vadd.f32 %v1837_v62, %v1498_v5  ;;  %v1839_v0 = vpop.f32.mrb[11].mxu0  ;;  %v3552_v50 = vadd.f32 %v3488_v53, %v1540_v48 }
 0x18a   :  { %v1893_v1 = vmax.f32 %v3508_v37, %v3540_v46  ;;  %v3554_v13 = vadd.f32 %v1839_v0, %v1500_v19 }
 0x18b   :  { %v1894_v15 = vmax.f32 %v3512_v45, %v3547_v9 }
 0x18c   :  { %v1895_v2 = vmax.f32 %v3516_v55, %v3554_v13 }
 0x18d   :  { %v1544_v52 = vpop.f32.mrb[28].mxu1 }
 0x18e   :  { %v1843_v27 = vpop.f32.mrb[12].mxu0  ;;  %v3561_v5 = vadd.f32 %v3490_v54, %v1544_v52  ;;  %v1546_v33 = vpop.f32.mrb[29].mxu1 }
 0x18f   :  { %v3563_v11 = vadd.f32 %v1843_v27, %v1504_v21  ;;  %v1845_v17 = vpop.f32.mrb[13].mxu0  ;;  %v3566_v53 = vadd.f32 %v3492_v56, %v1546_v33  ;;  %v1548_v39 = vpop.f32.mrb[30].mxu1 }
 0x190   :  { %v3568_v19 = vadd.f32 %v1845_v17, %v1506_v8  ;;  %v1847_v20 = vpop.f32.mrb[14].mxu0  ;;  %v3573_v23 = vadd.f32 %v3494_v58, %v1548_v39  ;;  %v1550_v21 = vpop.f32.mrb[31].mxu1  ;;  %v1918_v39 = vlaneseq }
 0x191   :  { %v1896_v49 = vmax.f32 %v3520_v4, %v3563_v11  ;;  %v3576_v54 = vadd.f32 %v1847_v20, %v3498_v10  ;;  %v1849_v57 = vpop.f32.mrb[15].mxu0  ;;  %v3581_v56 = vadd.f32 %v3496_v59, %v1550_v21 }
 0x192   :  { %v1897_v61 = vmax.f32 %v3524_v22, %v3568_v19  ;;  %v3584_v8 = vadd.f32 %v1849_v57, %v3500_v25 }
 0x193   :  { %v1898_v6 = vmax.f32 %v3528_v29, %v3576_v54 }
 0x194   :  { %v1899_v58 = vmax.f32 %v3532_v35, %v3584_v8 }
 0x195   :  { %v1740_v12 = vpop.f32.mrb[32].mxu1 }
 0x196   :  { %v1853_v10 = vpop.f32.mrb[32].mxu0  ;;  %v2249_v24 = vadd.f32 %v3502_v14, %v1740_v12  ;;  %v1742_v26 = vpop.f32.mrb[33].mxu1 }
 0x197   :  { %v1855_v30 = vpop.f32.mrb[33].mxu0  ;;  %v2252_v32 = vadd.f32 %v3506_v18, %v1742_v26  ;;  %v1744_v36 = vpop.f32.mrb[34].mxu1 }
 0x198   :  { %v1857_v59 = vpop.f32.mrb[34].mxu0  ;;  %v2250_v38 = vadd.f32 %v2249_v24, %v1853_v10  ;;  %v2255_v25 = vadd.f32 %v3510_v43, %v1744_v36  ;;  %v1746_v42 = vpop.f32.mrb[35].mxu1 }
 0x199   :  { %v1859_v44 = vpop.f32.mrb[35].mxu0  ;;  %v2253_v3 = vadd.f32 %v2252_v32, %v1855_v30  ;;  %v2258_v62 = vadd.f32 %v3514_v51, %v1746_v42 }
 0x19a   :  { %v2256_v48 = vadd.f32 %v2255_v25, %v1857_v59 }
 0x19b   :  { %v2259_v0 = vadd.f32 %v2258_v62, %v1859_v44 }
 0x19d   :  { %v1750_v52 = vpop.f32.mrb[36].mxu1 }
 0x19e   :  { %v1863_v27 = vpop.f32.mrb[36].mxu0  ;;  %v2261_v14 = vadd.f32 %v3518_v63, %v1750_v52  ;;  %v1752_v33 = vpop.f32.mrb[37].mxu1  ;;  %v1919_v63 = vshrl.u32 %v1918_v39, 7 }
 0x19f   :  { %v1865_v17 = vpop.f32.mrb[37].mxu0  ;;  %v2264_v18 = vadd.f32 %v3522_v16, %v1752_v33  ;;  %v1754_v20 = vpop.f32.mrb[38].mxu1 }
 0x1a0   :  { %v1867_v21 = vpop.f32.mrb[38].mxu0  ;;  %v3596_v57 = vadd.f32 %v2261_v14, %v1863_v27  ;;  %v2267_v43 = vadd.f32 %v3526_v28, %v1754_v20  ;;  %v1756_v12 = vpop.f32.mrb[39].mxu1  ;;  %v1920_v59 = vsub.s32 0, %v1919_v63  ;;  %v1916_v28 = vld [vmem:[%s3659_s2] sm:$0x3]  ;;  %v1924_v62 = vsub.s32 1, %v1919_v63 }
 0x1a1   :  { %v1869_v10 = vpop.f32.mrb[39].mxu0  ;;  %v3599_v51 = vadd.f32 %v2264_v18, %v1865_v17  ;;  %v2270_v24 = vadd.f32 %v3530_v34, %v1756_v12 }
 0x1a2   :  { %v3602_v26 = vadd.f32 %v2267_v43, %v1867_v21  ;;  %v1921_v20 = vrot.slane %v1916_v28, %v1920_v59  ;;  %v1925_v12 = vrot.slane %v1916_v28, %v1924_v62 }
 0x1a3   :  { %v3604_v30 = vadd.f32 %v2270_v24, %v1869_v10 }
 0x1a5   :  { %v1760_v32 = vpop.f32.mrb[40].mxu1 }
 0x1a6   :  { %v1873_v36 = vpop.f32.mrb[40].mxu0  ;;  %v2273_v16 = vadd.f32 %v3534_v40, %v1760_v32  ;;  %v1762_v25 = vpop.f32.mrb[41].mxu1 }
 0x1a7   :  { %v1875_v42 = vpop.f32.mrb[41].mxu0  ;;  %v2276_v44 = vadd.f32 %v3538_v60, %v1762_v25  ;;  %v1764_v34 = vpop.f32.mrb[42].mxu1 }
 0x1a8   :  { %v1877_v52 = vpop.f32.mrb[42].mxu0  ;;  %v2274_v27 = vadd.f32 %v2273_v16, %v1873_v36  ;;  %v2279_v14 = vadd.f32 %v3545_v7, %v1764_v34  ;;  %v1766_v33 = vpop.f32.mrb[43].mxu1 }
 0x1a9   :  { %v1879_v17 = vpop.f32.mrb[43].mxu0  ;;  %v2277_v39 = vadd.f32 %v2276_v44, %v1875_v42  ;;  %v2282_v40 = vadd.f32 %v3552_v50, %v1766_v33 }
 0x1aa   :  { %v1900_v18 = vmax.f32 %v2250_v38, %v2274_v27  ;;  %v2280_v21 = vadd.f32 %v2279_v14, %v1877_v52 }
 0x1ab   :  { %v1901_v43 = vmax.f32 %v2253_v3, %v2277_v39  ;;  %v2283_v10 = vadd.f32 %v2282_v40, %v1879_v17 }
 0x1ac   :  { %v1908_v60 = vmax.f32 %v1892_v47, %v1900_v18  ;;  %v1902_v24 = vmax.f32 %v2256_v48, %v2280_v21 }
 0x1ad   :  { %v1909_v7 = vmax.f32 %v1893_v1, %v1901_v43  ;;  %v1903_v63 = vmax.f32 %v2259_v0, %v2283_v10  ;;  %v1770_v32 = vpop.f32.mrb[44].mxu1 }
 0x1ae   :  { %v1883_v36 = vpop.f32.mrb[44].mxu0  ;;  %v1928_v16 = vadd.f32 %v1921_v20, %v1908_v60  ;;  %v1910_v50 = vmax.f32 %v1894_v15, %v1902_v24  ;;  %v2285_v38 = vadd.f32 %v3561_v5, %v1770_v32  ;;  %v1772_v3 = vpop.f32.mrb[45].mxu1 }
 0x1af   :  { %v1885_v59 = vpop.f32.mrb[45].mxu0  ;;  %v1929_v25 = vadd.f32 %v1925_v12, %v1909_v7  ;;  %v1911_v31 = vmax.f32 %v1895_v2, %v1903_v63  ;;  %v2288_v37 = vadd.f32 %v3566_v53, %v1772_v3  ;;  %v1774_v41 = vpop.f32.mrb[46].mxu1 }
 0x1b0   :  { %v1887_v46 = vpop.f32.mrb[46].mxu0  ;;  %v1936_v47 = vmax.f32 %v1928_v16, 0.0  ;;  %v1930_v1 = vadd.f32 %v1921_v20, %v1910_v50  ;;  %v2286_v48 = vadd.f32 %v2285_v38, %v1883_v36  ;;  %v2291_v0 = vadd.f32 %v3573_v23, %v1774_v41  ;;  %v1776_v45 = vpop.f32.mrb[47].mxu1 }
 0x1b1   :  { %v1889_v9 = vpop.f32.mrb[47].mxu0  ;;  %v1937_v15 = vmax.f32 %v1929_v25, 0.0  ;;  %v1931_v5 = vadd.f32 %v1925_v12, %v1911_v31  ;;  %v2289_v42 = vadd.f32 %v2288_v37, %v1885_v59  ;;  %v2294_v28 = vadd.f32 %v3581_v56, %v1776_v45 }
 0x1b2   :  { %v1938_v44 = vmax.f32 %v1930_v1, 0.0  ;;  %v1904_v55 = vmax.f32 %v3596_v57, %v2286_v48  ;;  %v2292_v13 = vadd.f32 %v2291_v0, %v1887_v46 }
 0x1b3   :  { %v2196_v2 = vpack.c.bf16 %v1937_v15, %v1936_v47  ;;  %v1939_v53 = vmax.f32 %v1931_v5, 0.0  ;;  %v1905_v62 = vmax.f32 %v3599_v51, %v2289_v42  ;;  %v2295_v34 = vadd.f32 %v2294_v28, %v1889_v9 }
 0x1b4   :  { %v1912_v23 = vmax.f32 %v1896_v49, %v1904_v55  ;;  %v1906_v52 = vmax.f32 %v3602_v26, %v2292_v13 }
 0x1b5   :  { %1968 = vst [vmem:[%s3660_s3] sm:$0xff] %v2196_v2  ;;  %v2197_v56 = vpack.c.bf16 %v1939_v53, %v1938_v44  ;;  %v1913_v57 = vmax.f32 %v1897_v61, %v1905_v62  ;;  %v1907_v27 = vmax.f32 %v3604_v30, %v2295_v34 }
 0x1b6   :  { %v1932_v14 = vadd.f32 %v1921_v20, %v1912_v23  ;;  %v1914_v51 = vmax.f32 %v1898_v6, %v1906_v52 }
 0x1b7   :  { %1969 = vst [vmem:[%s3660_s3 + $0x8] sm:$0xff] %v2197_v56  ;;  %v1933_v4 = vadd.f32 %v1925_v12, %v1913_v57  ;;  %v1915_v11 = vmax.f32 %v1899_v58, %v1907_v27 }
 0x1b8   :  { %v1940_v49 = vmax.f32 %v1932_v14, 0.0  ;;  %v1934_v26 = vadd.f32 %v1921_v20, %v1914_v51 }
 0x1b9   :  { %v1941_v22 = vmax.f32 %v1933_v4, 0.0  ;;  %v1935_v19 = vadd.f32 %v1925_v12, %v1915_v11 }
 0x1ba   :  { %v1942_v61 = vmax.f32 %v1934_v26, 0.0 }
 0x1bb   :  { %v2198_v30 = vpack.c.bf16 %v1941_v22, %v1940_v49  ;;  %v1943_v33 = vmax.f32 %v1935_v19, 0.0 }
 0x1bd   :  { %1970 = vst [vmem:[%s3660_s3 + $0x10] sm:$0xff] %v2198_v30  ;;  %v2199_v29 = vpack.c.bf16 %v1943_v33, %v1942_v61 }
 0x1bf   :  { %1971 = vst [vmem:[%s3660_s3 + $0x18] sm:$0xff] %v2199_v29 }

// kernel: conv_autoencoder_forward.7
= control target key start
LH: loop header
LB: loop body
LE: loop exit
PB: predicated region body
PF: predicated region fallthrough
CT: control target
= control target key end

     0   :  { %s14970_s1 = inlined_call_operand.vmem [shape: bf16[2304,512], index: 1, kind: input, shape index: {}]   ;;  %s14971_s0 = inlined_call_operand.vmem [shape: bf16[32,2304], index: 0, kind: input, shape index: {}]   ;;  %s14972_s3 = inlined_call_operand.vmem [shape: bf16[512,1024], index: 3, kind: input, shape index: {}]   ;;  %s14973_s2 = inlined_call_operand.vmem [shape: f32[1,512], index: 2, kind: input, shape index: {}]   ;;  %s14974_s5 = inlined_call_operand.vmem [shape: bf16[256,512], index: 5, kind: input, shape index: {}]   ;;  %s14975_s4 = inlined_call_operand.vmem [shape: f32[1,1024], index: 4, kind: input, shape index: {}]   ;;  %s14976_s7 = inlined_call_operand.vmem [shape: bf16[128,512], index: 7, kind: input, shape index: {}]   ;;  %s14977_s6 = inlined_call_operand.vmem [shape: f32[1,512], index: 6, kind: input, shape index: {}]   ;;  %s14978_s9 = inlined_call_operand.vmem [shape: bf16[128,128], index: 9, kind: input, shape index: {}]   ;;  %s14979_s8 = inlined_call_operand.vmem [shape: f32[1,512], index: 8, kind: input, shape index: {}]   ;;  %s14980_s10 = inlined_call_operand.vmem [shape: f32[1,128], index: 10, kind: input, shape index: {}]   ;;  %s14981_s11 = inlined_call_operand.vmem [shape: f32[512,128], index: 11, kind: output, shape index: {}]  }
   0x1   :  { %v9931_v0 = vld [vmem:[%s14970_s1 + $0x4] ss:$16 sps:$4 sm:$0xff]   ;;  %v9935_v2 = vld [vmem:[%s14970_s1] ss:$16 sps:$4 sm:$0xff]  }
   0x2   :  { %v9933_v1 = vld [vmem:[%s14970_s1 + $0x204] ss:$16 sps:$4 sm:$0xff]   ;;  %3711 = vmatprep.subr.bf16.mxu1 %v9931_v0  ;;  %v9936_v3 = vld [vmem:[%s14970_s1 + $0x200] ss:$16 sps:$4 sm:$0xff]  }
   0x3   :  { %3764 = vmatprep.subr.bf16.mxu0 %v9933_v1  ;;  %v9937_v4 = vld [vmem:[%s14970_s1 + $0x24] ss:$16 sps:$4 sm:$0xff]   ;;  %3712 = vmatpush1.bf16.msra.mxu1 %v9935_v2  ;;  %v9941_v6 = vld [vmem:[%s14970_s1 + $0x20] ss:$16 sps:$4 sm:$0xff]  }
   0x4   :  { %3765 = vmatpush1.bf16.msra.mxu0 %v9936_v3  ;;  %v9939_v5 = vld [vmem:[%s14970_s1 + $0x224] ss:$16 sps:$4 sm:$0xff]   ;;  %3713 = vmatprep.subr.bf16.mxu1 %v9937_v4  ;;  %v9942_v7 = vld [vmem:[%s14970_s1 + $0x220] ss:$16 sps:$4 sm:$0xff]   ;;  %v10038_v3 = vld [vmem:[%s14970_s1 + $0xc] ss:$16 sps:$4 sm:$0xff]  }
   0x5   :  { %3766 = vmatprep.subr.bf16.mxu0 %v9939_v5  ;;  %v9943_v8 = vld [vmem:[%s14970_s1 + $0x44] ss:$16 sps:$4 sm:$0xff]   ;;  %v9947_v10 = vld [vmem:[%s14970_s1 + $0x40] ss:$16 sps:$4 sm:$0xff]  }
   0x6   :  { %v9945_v9 = vld [vmem:[%s14970_s1 + $0x244] ss:$16 sps:$4 sm:$0xff]   ;;  %v9948_v11 = vld [vmem:[%s14970_s1 + $0x240] ss:$16 sps:$4 sm:$0xff]  }
   0x7   :  { %3714 = vmatpush1.bf16.msra.mxu1 %v9941_v6  ;;  %v9949_v12 = vld [vmem:[%s14970_s1 + $0x64] ss:$16 sps:$4 sm:$0xff]   ;;  %v9953_v14 = vld [vmem:[%s14970_s1 + $0x60] ss:$16 sps:$4 sm:$0xff]  }
   0x8   :  { %3767 = vmatpush1.bf16.msra.mxu0 %v9942_v7  ;;  %3715 = vmatprep.subr.bf16.mxu1 %v9943_v8  ;;  %v9951_v13 = vld [vmem:[%s14970_s1 + $0x264] ss:$16 sps:$4 sm:$0xff]   ;;  %v9954_v15 = vld [vmem:[%s14970_s1 + $0x260] ss:$16 sps:$4 sm:$0xff]   ;;  %v10036_v7 = vld [vmem:[%s14970_s1 + $0x8] ss:$16 sps:$4 sm:$0xff]  }
   0x9   :  { %3768 = vmatprep.subr.bf16.mxu0 %v9945_v9  ;;  %v9955_v16 = vld [vmem:[%s14970_s1 + $0x84] ss:$16 sps:$4 sm:$0xff]   ;;  %v9959_v18 = vld [vmem:[%s14970_s1 + $0x80] ss:$16 sps:$4 sm:$0xff]   ;;  %v10044_v9 = vld [vmem:[%s14970_s1 + $0x2c] ss:$16 sps:$4 sm:$0xff]  }
   0xa   :  { %v9957_v17 = vld [vmem:[%s14970_s1 + $0x284] ss:$16 sps:$4 sm:$0xff]   ;;  %v9960_v19 = vld [vmem:[%s14970_s1 + $0x280] ss:$16 sps:$4 sm:$0xff]  }
   0xb   :  { %3716 = vmatpush1.bf16.msra.mxu1 %v9947_v10  ;;  %v9961_v20 = vld [vmem:[%s14970_s1 + $0xa4] ss:$16 sps:$4 sm:$0xff]   ;;  %v9965_v22 = vld [vmem:[%s14970_s1 + $0xa0] ss:$16 sps:$4 sm:$0xff]  }
   0xc   :  { %3769 = vmatpush1.bf16.msra.mxu0 %v9948_v11  ;;  %3717 = vmatprep.subr.bf16.mxu1 %v9949_v12  ;;  %v9963_v21 = vld [vmem:[%s14970_s1 + $0x2a4] ss:$16 sps:$4 sm:$0xff]   ;;  %v9966_v23 = vld [vmem:[%s14970_s1 + $0x2a0] ss:$16 sps:$4 sm:$0xff]   ;;  %v10042_v11 = vld [vmem:[%s14970_s1 + $0x28] ss:$16 sps:$4 sm:$0xff]  }
   0xd   :  { %3770 = vmatprep.subr.bf16.mxu0 %v9951_v13  ;;  %v9967_v24 = vld [vmem:[%s14970_s1 + $0xc4] ss:$16 sps:$4 sm:$0xff]   ;;  %v9971_v26 = vld [vmem:[%s14970_s1 + $0xc0] ss:$16 sps:$4 sm:$0xff]   ;;  %v10050_v13 = vld [vmem:[%s14970_s1 + $0x4c] ss:$16 sps:$4 sm:$0xff]  }
   0xe   :  { %v9969_v25 = vld [vmem:[%s14970_s1 + $0x2c4] ss:$16 sps:$4 sm:$0xff]   ;;  %v9972_v27 = vld [vmem:[%s14970_s1 + $0x2c0] ss:$16 sps:$4 sm:$0xff]  }
   0xf   :  { %3718 = vmatpush1.bf16.msra.mxu1 %v9953_v14  ;;  %v9973_v28 = vld [vmem:[%s14970_s1 + $0xe4] ss:$16 sps:$4 sm:$0xff]   ;;  %v9977_v30 = vld [vmem:[%s14970_s1 + $0xe0] ss:$16 sps:$4 sm:$0xff]  }
  0x10   :  { %3771 = vmatpush1.bf16.msra.mxu0 %v9954_v15  ;;  %3719 = vmatprep.subr.bf16.mxu1 %v9955_v16  ;;  %v9975_v29 = vld [vmem:[%s14970_s1 + $0x2e4] ss:$16 sps:$4 sm:$0xff]   ;;  %v9978_v31 = vld [vmem:[%s14970_s1 + $0x2e0] ss:$16 sps:$4 sm:$0xff]   ;;  %v10048_v15 = vld [vmem:[%s14970_s1 + $0x48] ss:$16 sps:$4 sm:$0xff]  }
  0x11   :  { %3772 = vmatprep.subr.bf16.mxu0 %v9957_v17  ;;  %v9979_v32 = vld [vmem:[%s14970_s1 + $0x104] ss:$16 sps:$4 sm:$0xff]   ;;  %v9983_v34 = vld [vmem:[%s14970_s1 + $0x100] ss:$16 sps:$4 sm:$0xff]   ;;  %v10056_v17 = vld [vmem:[%s14970_s1 + $0x6c] ss:$16 sps:$4 sm:$0xff]  }
  0x12   :  { %v9981_v33 = vld [vmem:[%s14970_s1 + $0x304] ss:$16 sps:$4 sm:$0xff]   ;;  %v9984_v35 = vld [vmem:[%s14970_s1 + $0x300] ss:$16 sps:$4 sm:$0xff]  }
  0x13   :  { %3720 = vmatpush1.bf16.msra.mxu1 %v9959_v18  ;;  %v9985_v36 = vld [vmem:[%s14970_s1 + $0x124] ss:$16 sps:$4 sm:$0xff]   ;;  %v9989_v38 = vld [vmem:[%s14970_s1 + $0x120] ss:$16 sps:$4 sm:$0xff]  }
  0x14   :  { %3773 = vmatpush1.bf16.msra.mxu0 %v9960_v19  ;;  %3721 = vmatprep.subr.bf16.mxu1 %v9961_v20  ;;  %v9987_v37 = vld [vmem:[%s14970_s1 + $0x324] ss:$16 sps:$4 sm:$0xff]   ;;  %v9990_v39 = vld [vmem:[%s14970_s1 + $0x320] ss:$16 sps:$4 sm:$0xff]   ;;  %v10054_v19 = vld [vmem:[%s14970_s1 + $0x68] ss:$16 sps:$4 sm:$0xff]  }
  0x15   :  { %3774 = vmatprep.subr.bf16.mxu0 %v9963_v21  ;;  %v9991_v40 = vld [vmem:[%s14970_s1 + $0x144] ss:$16 sps:$4 sm:$0xff]   ;;  %v9995_v42 = vld [vmem:[%s14970_s1 + $0x140] ss:$16 sps:$4 sm:$0xff]   ;;  %v10062_v21 = vld [vmem:[%s14970_s1 + $0x8c] ss:$16 sps:$4 sm:$0xff]  }
  0x16   :  { %v9993_v41 = vld [vmem:[%s14970_s1 + $0x344] ss:$16 sps:$4 sm:$0xff]   ;;  %v9996_v43 = vld [vmem:[%s14970_s1 + $0x340] ss:$16 sps:$4 sm:$0xff]  }
  0x17   :  { %3722 = vmatpush1.bf16.msra.mxu1 %v9965_v22  ;;  %v9997_v44 = vld [vmem:[%s14970_s1 + $0x164] ss:$16 sps:$4 sm:$0xff]   ;;  %v10001_v46 = vld [vmem:[%s14970_s1 + $0x160] ss:$16 sps:$4 sm:$0xff]  }
  0x18   :  { %3775 = vmatpush1.bf16.msra.mxu0 %v9966_v23  ;;  %3723 = vmatprep.subr.bf16.mxu1 %v9967_v24  ;;  %v9999_v45 = vld [vmem:[%s14970_s1 + $0x364] ss:$16 sps:$4 sm:$0xff]   ;;  %v10002_v47 = vld [vmem:[%s14970_s1 + $0x360] ss:$16 sps:$4 sm:$0xff]   ;;  %v10060_v23 = vld [vmem:[%s14970_s1 + $0x88] ss:$16 sps:$4 sm:$0xff]  }
  0x19   :  { %3776 = vmatprep.subr.bf16.mxu0 %v9969_v25  ;;  %v10003_v48 = vld [vmem:[%s14970_s1 + $0x184] ss:$16 sps:$4 sm:$0xff]   ;;  %v10007_v52 = vld [vmem:[%s14970_s1 + $0x180] ss:$16 sps:$4 sm:$0xff]   ;;  %v10068_v25 = vld [vmem:[%s14970_s1 + $0xac] ss:$16 sps:$4 sm:$0xff]  }
  0x1a   :  { %v11473_v49 = vld [vmem:[%s14971_s0 + $0x4] ss:$72 sps:$4 sm:$0xff]   ;;  %v10008_v53 = vld [vmem:[%s14970_s1 + $0x380] ss:$16 sps:$4 sm:$0xff]  }
  0x1b   :  { %3724 = vmatpush1.bf16.msra.mxu1 %v9971_v26  ;;  %v10005_v50 = vld [vmem:[%s14970_s1 + $0x384] ss:$16 sps:$4 sm:$0xff]   ;;  %3743 = vmatprep.mubr.bf16.mxu1 %v11473_v49  ;;  %v10013_v56 = vld [vmem:[%s14970_s1 + $0x1a0] ss:$16 sps:$4 sm:$0xff]  }
  0x1c   :  { %3777 = vmatpush1.bf16.msra.mxu0 %v9972_v27  ;;  %3725 = vmatprep.subr.bf16.mxu1 %v9973_v28  ;;  %v11481_v51 = vld [vmem:[%s14971_s0 + $0xc] ss:$72 sps:$4 sm:$0xff]   ;;  %v10014_v57 = vld [vmem:[%s14970_s1 + $0x3a0] ss:$16 sps:$4 sm:$0xff]   ;;  %v10066_v27 = vld [vmem:[%s14970_s1 + $0xa8] ss:$16 sps:$4 sm:$0xff]  }
  0x1d   :  { %3778 = vmatprep.subr.bf16.mxu0 %v9975_v29  ;;  %3796 = vmatprep.mubr.bf16.mxu0 %v11481_v51  ;;  %v10009_v54 = vld [vmem:[%s14970_s1 + $0x1a4] ss:$16 sps:$4 sm:$0xff]   ;;  %v10019_v60 = vld [vmem:[%s14970_s1 + $0x1c0] ss:$16 sps:$4 sm:$0xff]  }
  0x1e   :  { %v10011_v55 = vld [vmem:[%s14970_s1 + $0x3a4] ss:$16 sps:$4 sm:$0xff]   ;;  %v10020_v61 = vld [vmem:[%s14970_s1 + $0x3c0] ss:$16 sps:$4 sm:$0xff]  }
  0x1f   :  { %3726 = vmatpush1.bf16.msra.mxu1 %v9977_v30  ;;  %v10015_v58 = vld [vmem:[%s14970_s1 + $0x1c4] ss:$16 sps:$4 sm:$0xff]   ;;  %v10025_v0 = vld [vmem:[%s14970_s1 + $0x1e0] ss:$16 sps:$4 sm:$0xff]  }
  0x20   :  { %3779 = vmatpush1.bf16.msra.mxu0 %v9978_v31  ;;  %3727 = vmatprep.subr.bf16.mxu1 %v9979_v32  ;;  %v10017_v59 = vld [vmem:[%s14970_s1 + $0x3c4] ss:$16 sps:$4 sm:$0xff]   ;;  %v10026_v1 = vld [vmem:[%s14970_s1 + $0x3e0] ss:$16 sps:$4 sm:$0xff]   ;;  %v10074_v32 = vld [vmem:[%s14970_s1 + $0xcc] ss:$16 sps:$4 sm:$0xff]  }
  0x21   :  { %3780 = vmatprep.subr.bf16.mxu0 %v9981_v33  ;;  %v10021_v62 = vld [vmem:[%s14970_s1 + $0x1e4] ss:$16 sps:$4 sm:$0xff]   ;;  %v11536_v4 = vld [vmem:[%s14971_s0] ss:$72 sps:$4 sm:$0xff]   ;;  %v11622_v30 = vld [vmem:[%s14971_s0 + $0x90] ss:$72 sps:$4 sm:$0xff]  }
  0x22   :  { %v10023_v63 = vld [vmem:[%s14970_s1 + $0x3e4] ss:$16 sps:$4 sm:$0xff]   ;;  %v11541_v5 = vld [vmem:[%s14971_s0 + $0x8] ss:$72 sps:$4 sm:$0xff]  }
  0x23   :  { %3728 = vmatpush1.bf16.msra.mxu1 %v9983_v34  ;;  %v10035_v2 = vld [vmem:[%s14970_s1 + $0x404] ss:$16 sps:$4 sm:$0xff]   ;;  %v10033_v6 = vld [vmem:[%s14970_s1 + $0x400] ss:$16 sps:$4 sm:$0xff]   ;;  %v10072_v34 = vld [vmem:[%s14970_s1 + $0xc8] ss:$16 sps:$4 sm:$0xff]  }
  0x24   :  { %3781 = vmatpush1.bf16.msra.mxu0 %v9984_v35  ;;  %3729 = vmatprep.subr.bf16.mxu1 %v9985_v36  ;;  %v10041_v8 = vld [vmem:[%s14970_s1 + $0x424] ss:$16 sps:$4 sm:$0xff]   ;;  %v10039_v10 = vld [vmem:[%s14970_s1 + $0x420] ss:$16 sps:$4 sm:$0xff]  }
  0x25   :  { %3782 = vmatprep.subr.bf16.mxu0 %v9987_v37  ;;  %v10047_v12 = vld [vmem:[%s14970_s1 + $0x444] ss:$16 sps:$4 sm:$0xff]   ;;  %v10045_v14 = vld [vmem:[%s14970_s1 + $0x440] ss:$16 sps:$4 sm:$0xff]   ;;  %v10080_v37 = vld [vmem:[%s14970_s1 + $0xec] ss:$16 sps:$4 sm:$0xff]  }
  0x26   :  { %v10053_v16 = vld [vmem:[%s14970_s1 + $0x464] ss:$16 sps:$4 sm:$0xff]   ;;  %v10051_v18 = vld [vmem:[%s14970_s1 + $0x460] ss:$16 sps:$4 sm:$0xff]  }
  0x27   :  { %3730 = vmatpush1.bf16.msra.mxu1 %v9989_v38  ;;  %v10059_v20 = vld [vmem:[%s14970_s1 + $0x484] ss:$16 sps:$4 sm:$0xff]   ;;  %v10057_v22 = vld [vmem:[%s14970_s1 + $0x480] ss:$16 sps:$4 sm:$0xff]  }
  0x28   :  { %3783 = vmatpush1.bf16.msra.mxu0 %v9990_v39  ;;  %3731 = vmatprep.subr.bf16.mxu1 %v9991_v40  ;;  %v10065_v24 = vld [vmem:[%s14970_s1 + $0x4a4] ss:$16 sps:$4 sm:$0xff]   ;;  %v10063_v26 = vld [vmem:[%s14970_s1 + $0x4a0] ss:$16 sps:$4 sm:$0xff]   ;;  %v10078_v39 = vld [vmem:[%s14970_s1 + $0xe8] ss:$16 sps:$4 sm:$0xff]  }
  0x29   :  { %3784 = vmatprep.subr.bf16.mxu0 %v9993_v41  ;;  %v10071_v28 = vld [vmem:[%s14970_s1 + $0x4c4] ss:$16 sps:$4 sm:$0xff]   ;;  %v10069_v33 = vld [vmem:[%s14970_s1 + $0x4c0] ss:$16 sps:$4 sm:$0xff]  }
  0x2a   :  { %v11617_v29 = vld [vmem:[%s14971_s0 + $0x94] ss:$72 sps:$4 sm:$0xff]   ;;  %v11644_v35 = vld [vmem:[%s14971_s0 + $0x98] ss:$72 sps:$4 sm:$0xff]  }
  0x2b   :  { %3732 = vmatpush1.bf16.msra.mxu1 %v9995_v42  ;;  %v11627_v31 = vld [vmem:[%s14971_s0 + $0x9c] ss:$72 sps:$4 sm:$0xff]   ;;  %v10075_v38 = vld [vmem:[%s14970_s1 + $0x4e0] ss:$16 sps:$4 sm:$0xff]  }
  0x2c   :  { %3785 = vmatpush1.bf16.msra.mxu0 %v9996_v43  ;;  %3733 = vmatprep.subr.bf16.mxu1 %v9997_v44  ;;  %v10077_v36 = vld [vmem:[%s14970_s1 + $0x4e4] ss:$16 sps:$4 sm:$0xff]   ;;  %v10086_v42 = vld [vmem:[%s14970_s1 + $0x10c] ss:$16 sps:$4 sm:$0xff]   ;;  %v10081_v43 = vld [vmem:[%s14970_s1 + $0x500] ss:$16 sps:$4 sm:$0xff]  }
  0x2d   :  { %3786 = vmatprep.subr.bf16.mxu0 %v9999_v45  ;;  %v11663_v40 = vld [vmem:[%s14971_s0 + $0x14] ss:$72 sps:$4 sm:$0xff]   ;;  %v10084_v44 = vld [vmem:[%s14970_s1 + $0x108] ss:$16 sps:$4 sm:$0xff]  }
  0x2e   :  { %v10083_v41 = vld [vmem:[%s14970_s1 + $0x504] ss:$16 sps:$4 sm:$0xff]  }
  0x2f   :  { %3734 = vmatpush1.bf16.msra.mxu1 %v10001_v46  ;;  %v10089_v45 = vld [vmem:[%s14970_s1 + $0x524] ss:$16 sps:$4 sm:$0xff]   ;;  %v10092_v46 = vld [vmem:[%s14970_s1 + $0x12c] ss:$16 sps:$4 sm:$0xff]  }
  0x30   :  { %3787 = vmatpush1.bf16.msra.mxu0 %v10002_v47  ;;  %3735 = vmatprep.subr.bf16.mxu1 %v10003_v48  ;;  %v10087_v47 = vld [vmem:[%s14970_s1 + $0x520] ss:$16 sps:$4 sm:$0xff]   ;;  %v10090_v48 = vld [vmem:[%s14970_s1 + $0x128] ss:$16 sps:$4 sm:$0xff]  }
  0x31   :  { %3788 = vmatprep.subr.bf16.mxu0 %v10005_v50  ;;  %v10098_v50 = vld [vmem:[%s14970_s1 + $0x14c] ss:$16 sps:$4 sm:$0xff]  }
  0x33   :  { %3736 = vmatpush1.bf16.msra.mxu1 %v10007_v52  ;;  %v10093_v52 = vld [vmem:[%s14970_s1 + $0x540] ss:$16 sps:$4 sm:$0xff]  }
  0x34   :  { %3789 = vmatpush1.bf16.msra.mxu0 %v10008_v53  ;;  %3737 = vmatprep.subr.bf16.mxu1 %v10009_v54  ;;  %v10096_v53 = vld [vmem:[%s14970_s1 + $0x148] ss:$16 sps:$4 sm:$0xff]   ;;  %v10101_v54 = vld [vmem:[%s14970_s1 + $0x564] ss:$16 sps:$4 sm:$0xff]  }
  0x35   :  { %3790 = vmatprep.subr.bf16.mxu0 %v10011_v55  ;;  %v10104_v55 = vld [vmem:[%s14970_s1 + $0x16c] ss:$16 sps:$4 sm:$0xff]  }
  0x37   :  { %3738 = vmatpush1.bf16.msra.mxu1 %v10013_v56  ;;  %v10099_v56 = vld [vmem:[%s14970_s1 + $0x560] ss:$16 sps:$4 sm:$0xff]  }
  0x38   :  { %3791 = vmatpush1.bf16.msra.mxu0 %v10014_v57  ;;  %3739 = vmatprep.subr.bf16.mxu1 %v10015_v58  ;;  %v10102_v57 = vld [vmem:[%s14970_s1 + $0x168] ss:$16 sps:$4 sm:$0xff]   ;;  %v10107_v58 = vld [vmem:[%s14970_s1 + $0x584] ss:$16 sps:$4 sm:$0xff]  }
  0x39   :  { %3792 = vmatprep.subr.bf16.mxu0 %v10017_v59  ;;  %v10110_v59 = vld [vmem:[%s14970_s1 + $0x18c] ss:$16 sps:$4 sm:$0xff]  }
  0x3b   :  { %3740 = vmatpush1.bf16.msra.mxu1 %v10019_v60  ;;  %v10105_v60 = vld [vmem:[%s14970_s1 + $0x580] ss:$16 sps:$4 sm:$0xff]  }
  0x3c   :  { %3793 = vmatpush1.bf16.msra.mxu0 %v10020_v61  ;;  %3741 = vmatprep.subr.bf16.mxu1 %v10021_v62  ;;  %v10108_v61 = vld [vmem:[%s14970_s1 + $0x188] ss:$16 sps:$4 sm:$0xff]   ;;  %v10113_v62 = vld [vmem:[%s14970_s1 + $0x5a4] ss:$16 sps:$4 sm:$0xff]  }
  0x3d   :  { %3794 = vmatprep.subr.bf16.mxu0 %v10023_v63  ;;  %v10116_v63 = vld [vmem:[%s14970_s1 + $0x1ac] ss:$16 sps:$4 sm:$0xff]  }
  0x3f   :  { %3742 = vmatpush1.bf16.msra.mxu1 %v10025_v0  ;;  %v10111_v0 = vld [vmem:[%s14970_s1 + $0x5a0] ss:$16 sps:$4 sm:$0xff]  }
  0x40   :  { %3795 = vmatpush1.bf16.msra.mxu0 %v10026_v1  ;;  %4188 = vmatprep.subr.bf16.mxu1 %v10038_v3  ;;  %v10114_v1 = vld [vmem:[%s14970_s1 + $0x1a8] ss:$16 sps:$4 sm:$0xff]   ;;  %v10127_v3 = vld [vmem:[%s14970_s1 + $0x1cc] ss:$16 sps:$4 sm:$0xff]  }
  0x41   :  { %3817 = vmatprep.subr.bf16.mxu0 %v10035_v2  ;;  %v10124_v2 = vld [vmem:[%s14970_s1 + $0x5c4] ss:$16 sps:$4 sm:$0xff]  }
  0x42   :  { %3744 = vmatmul.mubr.bf16.vlgmr.msra.gmra.mrb[0].mxu1 %v11536_v4 }
  0x43   :  { %3797 = vmatmul.mubr.bf16.vlgmr.msra.gmra.mrb[0].mxu0 %v11541_v5  ;;  %4189 = vmatpush1.bf16.msra.mxu1 %v10036_v7  ;;  %v10125_v7 = vld [vmem:[%s14970_s1 + $0x1c8] ss:$16 sps:$4 sm:$0xff]  }
  0x44   :  { %3818 = vmatpush1.bf16.msra.mxu0 %v10033_v6  ;;  %4190 = vmatprep.subr.bf16.mxu1 %v10044_v9  ;;  %v10122_v6 = vld [vmem:[%s14970_s1 + $0x5c0] ss:$16 sps:$4 sm:$0xff]   ;;  %v10134_v9 = vld [vmem:[%s14970_s1 + $0x1ec] ss:$16 sps:$4 sm:$0xff]  }
  0x45   :  { %3819 = vmatprep.subr.bf16.mxu0 %v10041_v8  ;;  %3753 = vmatprep.mubr.bf16.mxu1 %v11617_v29  ;;  %v10131_v8 = vld [vmem:[%s14970_s1 + $0x5e4] ss:$16 sps:$4 sm:$0xff]  }
  0x46   :  { %3806 = vmatprep.mubr.bf16.mxu0 %v11627_v31 }
  0x47   :  { %4191 = vmatpush1.bf16.msra.mxu1 %v10042_v11  ;;  %v10132_v11 = vld [vmem:[%s14970_s1 + $0x1e8] ss:$16 sps:$4 sm:$0xff]  }
  0x48   :  { %3820 = vmatpush1.bf16.msra.mxu0 %v10039_v10  ;;  %4192 = vmatprep.subr.bf16.mxu1 %v10050_v13  ;;  %v10129_v10 = vld [vmem:[%s14970_s1 + $0x5e0] ss:$16 sps:$4 sm:$0xff]   ;;  %v10143_v13 = vld [vmem:[%s14970_s1 + $0x20c] ss:$16 sps:$4 sm:$0xff]  }
  0x49   :  { %3821 = vmatprep.subr.bf16.mxu0 %v10047_v12  ;;  %v10140_v12 = vld [vmem:[%s14970_s1 + $0x604] ss:$16 sps:$4 sm:$0xff]  }
  0x4a   :  { %3754 = vmatmul.mubr.bf16.gmra.mrb[4].mxu1 %v11622_v30 }
  0x4b   :  { %4193 = vmatpush1.bf16.msra.mxu1 %v10048_v15  ;;  %3807 = vmatmul.mubr.bf16.gmra.mrb[4].mxu0 %v11644_v35  ;;  %v10138_v15 = vld [vmem:[%s14970_s1 + $0x600] ss:$16 sps:$4 sm:$0xff]  }
  0x4c   :  { %3822 = vmatpush1.bf16.msra.mxu0 %v10045_v14  ;;  %4194 = vmatprep.subr.bf16.mxu1 %v10056_v17  ;;  %v11771_v14 = vld [vmem:[%s14971_s0 + $0x10] ss:$72 sps:$4 sm:$0xff]   ;;  %v10146_v17 = vld [vmem:[%s14970_s1 + $0x624] ss:$16 sps:$4 sm:$0xff]  }
  0x4d   :  { %3823 = vmatprep.subr.bf16.mxu0 %v10053_v16  ;;  %4220 = vmatprep.mubr.bf16.mxu1 %v11473_v49  ;;  %v10095_v49 = vld [vmem:[%s14970_s1 + $0x544] ss:$16 sps:$4 sm:$0xff]   ;;  %v10141_v16 = vld [vmem:[%s14970_s1 + $0x208] ss:$16 sps:$4 sm:$0xff]  }
  0x4e   :  { %3849 = vmatprep.mubr.bf16.mxu0 %v11663_v40 }
  0x4f   :  { %4195 = vmatpush1.bf16.msra.mxu1 %v10054_v19  ;;  %v11788_v19 = vld [vmem:[%s14971_s0 + $0xa4] ss:$72 sps:$4 sm:$0xff]  }
  0x50   :  { %3824 = vmatpush1.bf16.msra.mxu0 %v10051_v18  ;;  %4196 = vmatprep.subr.bf16.mxu1 %v10062_v21  ;;  %v10149_v18 = vld [vmem:[%s14970_s1 + $0x22c] ss:$16 sps:$4 sm:$0xff]   ;;  %v10147_v21 = vld [vmem:[%s14970_s1 + $0x228] ss:$16 sps:$4 sm:$0xff]  }
  0x51   :  { %3825 = vmatprep.subr.bf16.mxu0 %v10059_v20  ;;  %v10144_v20 = vld [vmem:[%s14970_s1 + $0x620] ss:$16 sps:$4 sm:$0xff]  }
  0x53   :  { %4197 = vmatpush1.bf16.msra.mxu1 %v10060_v23  ;;  %v10150_v23 = vld [vmem:[%s14970_s1 + $0x640] ss:$16 sps:$4 sm:$0xff]  }
  0x54   :  { %3826 = vmatpush1.bf16.msra.mxu0 %v10057_v22  ;;  %4198 = vmatprep.subr.bf16.mxu1 %v10068_v25  ;;  %v10152_v22 = vld [vmem:[%s14970_s1 + $0x644] ss:$16 sps:$4 sm:$0xff]   ;;  %v11815_v25 = vld [vmem:[%s14971_s0 + $0xa0] ss:$72 sps:$4 sm:$0xff]  }
  0x55   :  { %3827 = vmatprep.subr.bf16.mxu0 %v10065_v24  ;;  %v10153_v24 = vld [vmem:[%s14970_s1 + $0x248] ss:$16 sps:$4 sm:$0xff]  }
  0x57   :  { %4199 = vmatpush1.bf16.msra.mxu1 %v10066_v27  ;;  %v10161_v27 = vld [vmem:[%s14970_s1 + $0x26c] ss:$16 sps:$4 sm:$0xff]  }
  0x58   :  { %3828 = vmatpush1.bf16.msra.mxu0 %v10063_v26  ;;  %4200 = vmatprep.subr.bf16.mxu1 %v10074_v32  ;;  %v10158_v26 = vld [vmem:[%s14970_s1 + $0x664] ss:$16 sps:$4 sm:$0xff]   ;;  %v10159_v32 = vld [vmem:[%s14970_s1 + $0x268] ss:$16 sps:$4 sm:$0xff]  }
  0x59   :  { %3829 = vmatprep.subr.bf16.mxu0 %v10071_v28  ;;  %v11826_v28 = vld [vmem:[%s14971_s0 + $0x1c] ss:$72 sps:$4 sm:$0xff]  }
  0x5b   :  { %4201 = vmatpush1.bf16.msra.mxu1 %v10072_v34  ;;  %v10167_v34 = vld [vmem:[%s14970_s1 + $0x28c] ss:$16 sps:$4 sm:$0xff]  }
  0x5c   :  { %3830 = vmatpush1.bf16.msra.mxu0 %v10069_v33  ;;  %4202 = vmatprep.subr.bf16.mxu1 %v10080_v37  ;;  %v10164_v33 = vld [vmem:[%s14970_s1 + $0x684] ss:$16 sps:$4 sm:$0xff]  }
  0x5d   :  { %3831 = vmatprep.subr.bf16.mxu0 %v10077_v36  ;;  %v10165_v36 = vld [vmem:[%s14970_s1 + $0x288] ss:$16 sps:$4 sm:$0xff]   ;;  %v10170_v37 = vld [vmem:[%s14970_s1 + $0x6a4] ss:$16 sps:$4 sm:$0xff]  }
  0x5f   :  { %4203 = vmatpush1.bf16.msra.mxu1 %v10078_v39  ;;  %v10171_v39 = vld [vmem:[%s14970_s1 + $0x2a8] ss:$16 sps:$4 sm:$0xff]  }
  0x60   :  { %3832 = vmatpush1.bf16.msra.mxu0 %v10075_v38  ;;  %4204 = vmatprep.subr.bf16.mxu1 %v10086_v42  ;;  %v10168_v38 = vld [vmem:[%s14970_s1 + $0x6a0] ss:$16 sps:$4 sm:$0xff]   ;;  %v10179_v42 = vld [vmem:[%s14970_s1 + $0x2cc] ss:$16 sps:$4 sm:$0xff]  }
  0x61   :  { %3833 = vmatprep.subr.bf16.mxu0 %v10083_v41  ;;  %v10176_v41 = vld [vmem:[%s14970_s1 + $0x6c4] ss:$16 sps:$4 sm:$0xff]  }
  0x63   :  { %4205 = vmatpush1.bf16.msra.mxu1 %v10084_v44  ;;  %v10177_v44 = vld [vmem:[%s14970_s1 + $0x2c8] ss:$16 sps:$4 sm:$0xff]  }
  0x64   :  { %3834 = vmatpush1.bf16.msra.mxu0 %v10081_v43  ;;  %4206 = vmatprep.subr.bf16.mxu1 %v10092_v46  ;;  %v10174_v43 = vld [vmem:[%s14970_s1 + $0x6c0] ss:$16 sps:$4 sm:$0xff]   ;;  %v10185_v46 = vld [vmem:[%s14970_s1 + $0x2ec] ss:$16 sps:$4 sm:$0xff]  }
  0x65   :  { %3835 = vmatprep.subr.bf16.mxu0 %v10089_v45  ;;  %v10182_v45 = vld [vmem:[%s14970_s1 + $0x6e4] ss:$16 sps:$4 sm:$0xff]  }
  0x67   :  { %4207 = vmatpush1.bf16.msra.mxu1 %v10090_v48  ;;  %v10183_v48 = vld [vmem:[%s14970_s1 + $0x2e8] ss:$16 sps:$4 sm:$0xff]  }
  0x68   :  { %3836 = vmatpush1.bf16.msra.mxu0 %v10087_v47  ;;  %4208 = vmatprep.subr.bf16.mxu1 %v10098_v50  ;;  %v10180_v47 = vld [vmem:[%s14970_s1 + $0x6e0] ss:$16 sps:$4 sm:$0xff]   ;;  %v10191_v50 = vld [vmem:[%s14970_s1 + $0x30c] ss:$16 sps:$4 sm:$0xff]  }
  0x69   :  { %3837 = vmatprep.subr.bf16.mxu0 %v10095_v49  ;;  %v10188_v49 = vld [vmem:[%s14970_s1 + $0x704] ss:$16 sps:$4 sm:$0xff]  }
  0x6b   :  { %4209 = vmatpush1.bf16.msra.mxu1 %v10096_v53  ;;  %v10189_v53 = vld [vmem:[%s14970_s1 + $0x308] ss:$16 sps:$4 sm:$0xff]  }
  0x6c   :  { %3838 = vmatpush1.bf16.msra.mxu0 %v10093_v52  ;;  %4210 = vmatprep.subr.bf16.mxu1 %v10104_v55  ;;  %v10186_v52 = vld [vmem:[%s14970_s1 + $0x700] ss:$16 sps:$4 sm:$0xff]   ;;  %v10197_v55 = vld [vmem:[%s14970_s1 + $0x32c] ss:$16 sps:$4 sm:$0xff]  }
  0x6d   :  { %3839 = vmatprep.subr.bf16.mxu0 %v10101_v54  ;;  %v10194_v54 = vld [vmem:[%s14970_s1 + $0x724] ss:$16 sps:$4 sm:$0xff]  }
  0x6f   :  { %4211 = vmatpush1.bf16.msra.mxu1 %v10102_v57  ;;  %v10195_v57 = vld [vmem:[%s14970_s1 + $0x328] ss:$16 sps:$4 sm:$0xff]  }
  0x70   :  { %3840 = vmatpush1.bf16.msra.mxu0 %v10099_v56  ;;  %4212 = vmatprep.subr.bf16.mxu1 %v10110_v59  ;;  %v10192_v56 = vld [vmem:[%s14970_s1 + $0x720] ss:$16 sps:$4 sm:$0xff]   ;;  %v10203_v59 = vld [vmem:[%s14970_s1 + $0x34c] ss:$16 sps:$4 sm:$0xff]  }
  0x71   :  { %3841 = vmatprep.subr.bf16.mxu0 %v10107_v58  ;;  %v10200_v58 = vld [vmem:[%s14970_s1 + $0x744] ss:$16 sps:$4 sm:$0xff]  }
  0x73   :  { %4213 = vmatpush1.bf16.msra.mxu1 %v10108_v61  ;;  %v10201_v61 = vld [vmem:[%s14970_s1 + $0x348] ss:$16 sps:$4 sm:$0xff]  }
  0x74   :  { %3842 = vmatpush1.bf16.msra.mxu0 %v10105_v60  ;;  %4214 = vmatprep.subr.bf16.mxu1 %v10116_v63  ;;  %v10198_v60 = vld [vmem:[%s14970_s1 + $0x740] ss:$16 sps:$4 sm:$0xff]   ;;  %v10209_v63 = vld [vmem:[%s14970_s1 + $0x36c] ss:$16 sps:$4 sm:$0xff]  }
  0x75   :  { %3843 = vmatprep.subr.bf16.mxu0 %v10113_v62  ;;  %v10206_v62 = vld [vmem:[%s14970_s1 + $0x764] ss:$16 sps:$4 sm:$0xff]  }
  0x77   :  { %4215 = vmatpush1.bf16.msra.mxu1 %v10114_v1  ;;  %v10207_v1 = vld [vmem:[%s14970_s1 + $0x368] ss:$16 sps:$4 sm:$0xff]  }
  0x78   :  { %3844 = vmatpush1.bf16.msra.mxu0 %v10111_v0  ;;  %4216 = vmatprep.subr.bf16.mxu1 %v10127_v3  ;;  %v10204_v0 = vld [vmem:[%s14970_s1 + $0x760] ss:$16 sps:$4 sm:$0xff]   ;;  %v10215_v3 = vld [vmem:[%s14970_s1 + $0x38c] ss:$16 sps:$4 sm:$0xff]  }
  0x79   :  { %3845 = vmatprep.subr.bf16.mxu0 %v10124_v2  ;;  %v10212_v2 = vld [vmem:[%s14970_s1 + $0x784] ss:$16 sps:$4 sm:$0xff]  }
  0x7b   :  { %4217 = vmatpush1.bf16.msra.mxu1 %v10125_v7  ;;  %v10213_v7 = vld [vmem:[%s14970_s1 + $0x388] ss:$16 sps:$4 sm:$0xff]  }
  0x7c   :  { %3846 = vmatpush1.bf16.msra.mxu0 %v10122_v6  ;;  %4218 = vmatprep.subr.bf16.mxu1 %v10134_v9  ;;  %v10210_v6 = vld [vmem:[%s14970_s1 + $0x780] ss:$16 sps:$4 sm:$0xff]   ;;  %v10221_v9 = vld [vmem:[%s14970_s1 + $0x3ac] ss:$16 sps:$4 sm:$0xff]  }
  0x7d   :  { %3847 = vmatprep.subr.bf16.mxu0 %v10131_v8  ;;  %v10218_v8 = vld [vmem:[%s14970_s1 + $0x7a4] ss:$16 sps:$4 sm:$0xff]  }
  0x7f   :  { %4219 = vmatpush1.bf16.msra.mxu1 %v10132_v11  ;;  %v10219_v11 = vld [vmem:[%s14970_s1 + $0x3a8] ss:$16 sps:$4 sm:$0xff]  }
  0x80   :  { %3848 = vmatpush1.bf16.msra.mxu0 %v10129_v10  ;;  %4241 = vmatprep.subr.bf16.mxu1 %v10143_v13  ;;  %v10216_v10 = vld [vmem:[%s14970_s1 + $0x7a0] ss:$16 sps:$4 sm:$0xff]   ;;  %v10229_v13 = vld [vmem:[%s14970_s1 + $0x3cc] ss:$16 sps:$4 sm:$0xff]  }
  0x81   :  { %3870 = vmatprep.subr.bf16.mxu0 %v10140_v12  ;;  %v10226_v12 = vld [vmem:[%s14970_s1 + $0x7c4] ss:$16 sps:$4 sm:$0xff]  }
  0x82   :  { %4221 = vmatmul.mubr.bf16.vlgmr.msra.gmra.mrb[8].mxu1 %v11536_v4  ;;  %v10155_v4 = vld [vmem:[%s14970_s1 + $0x24c] ss:$16 sps:$4 sm:$0xff]  }
  0x83   :  { %3850 = vmatmul.mubr.bf16.vlgmr.msra.gmra.mrb[0].mxu0 %v11771_v14  ;;  %4242 = vmatpush1.bf16.msra.mxu1 %v10141_v16  ;;  %v10227_v16 = vld [vmem:[%s14970_s1 + $0x3c8] ss:$16 sps:$4 sm:$0xff]  }
  0x84   :  { %3871 = vmatpush1.bf16.msra.mxu0 %v10138_v15  ;;  %4243 = vmatprep.subr.bf16.mxu1 %v10149_v18  ;;  %v10224_v15 = vld [vmem:[%s14970_s1 + $0x7c0] ss:$16 sps:$4 sm:$0xff]   ;;  %v10236_v18 = vld [vmem:[%s14970_s1 + $0x3ec] ss:$16 sps:$4 sm:$0xff]  }
  0x85   :  { %3872 = vmatprep.subr.bf16.mxu0 %v10146_v17  ;;  %3859 = vmatprep.mubr.bf16.mxu0 %v11788_v19  ;;  %v10233_v17 = vld [vmem:[%s14970_s1 + $0x7e4] ss:$16 sps:$4 sm:$0xff]  }
  0x86   :  { %4230 = vmatprep.mubr.bf16.mxu1 %v11617_v29  ;;  %v10156_v29 = vld [vmem:[%s14970_s1 + $0x660] ss:$16 sps:$4 sm:$0xff]  }
  0x87   :  { %4244 = vmatpush1.bf16.msra.mxu1 %v10147_v21  ;;  %v10234_v21 = vld [vmem:[%s14970_s1 + $0x3e8] ss:$16 sps:$4 sm:$0xff]  }
  0x88   :  { %3873 = vmatpush1.bf16.msra.mxu0 %v10144_v20  ;;  %4245 = vmatprep.subr.bf16.mxu1 %v10155_v4  ;;  %v10231_v20 = vld [vmem:[%s14970_s1 + $0x7e0] ss:$16 sps:$4 sm:$0xff]   ;;  %v10245_v4 = vld [vmem:[%s14970_s1 + $0x40c] ss:$16 sps:$4 sm:$0xff]  }
  0x89   :  { %3874 = vmatprep.subr.bf16.mxu0 %v10152_v22  ;;  %v10242_v22 = vld [vmem:[%s14970_s1 + $0x804] ss:$16 sps:$4 sm:$0xff]  }
  0x8a   :  { %4231 = vmatmul.mubr.bf16.gmra.mrb[12].mxu1 %v11622_v30  ;;  %v10162_v30 = vld [vmem:[%s14970_s1 + $0x680] ss:$16 sps:$4 sm:$0xff]  }
  0x8b   :  { %3860 = vmatmul.mubr.bf16.gmra.mrb[4].mxu0 %v11815_v25  ;;  %4246 = vmatpush1.bf16.msra.mxu1 %v10153_v24  ;;  %v10240_v24 = vld [vmem:[%s14970_s1 + $0x800] ss:$16 sps:$4 sm:$0xff]  }
  0x8c   :  { %3875 = vmatpush1.bf16.msra.mxu0 %v10150_v23  ;;  %4247 = vmatprep.subr.bf16.mxu1 %v10161_v27  ;;  %v11991_v23 = vld [vmem:[%s14971_s0 + $0x18] ss:$72 sps:$4 sm:$0xff]   ;;  %v10248_v27 = vld [vmem:[%s14970_s1 + $0x824] ss:$16 sps:$4 sm:$0xff]  }
  0x8d   :  { %3876 = vmatprep.subr.bf16.mxu0 %v10158_v26  ;;  %3902 = vmatprep.mubr.bf16.mxu0 %v11826_v28  ;;  %v10243_v26 = vld [vmem:[%s14970_s1 + $0x408] ss:$16 sps:$4 sm:$0xff]  }
  0x8e   :  { %4273 = vmatprep.mubr.bf16.mxu1 %v11481_v51  ;;  %v10173_v51 = vld [vmem:[%s14970_s1 + $0x2ac] ss:$16 sps:$4 sm:$0xff]  }
  0x8f   :  { %4248 = vmatpush1.bf16.msra.mxu1 %v10159_v32  ;;  %v12008_v32 = vld [vmem:[%s14971_s0 + $0xac] ss:$72 sps:$4 sm:$0xff]  }
  0x90   :  { %3877 = vmatpush1.bf16.msra.mxu0 %v10156_v29  ;;  %4249 = vmatprep.subr.bf16.mxu1 %v10167_v34  ;;  %v10251_v29 = vld [vmem:[%s14970_s1 + $0x42c] ss:$16 sps:$4 sm:$0xff]   ;;  %v10249_v34 = vld [vmem:[%s14970_s1 + $0x428] ss:$16 sps:$4 sm:$0xff]  }
  0x91   :  { %3878 = vmatprep.subr.bf16.mxu0 %v10164_v33  ;;  %v10246_v33 = vld [vmem:[%s14970_s1 + $0x820] ss:$16 sps:$4 sm:$0xff]  }
  0x93   :  { %4250 = vmatpush1.bf16.msra.mxu1 %v10165_v36  ;;  %v10252_v36 = vld [vmem:[%s14970_s1 + $0x840] ss:$16 sps:$4 sm:$0xff]  }
  0x94   :  { %3879 = vmatpush1.bf16.msra.mxu0 %v10162_v30  ;;  %4251 = vmatprep.subr.bf16.mxu1 %v10173_v51  ;;  %v10254_v30 = vld [vmem:[%s14970_s1 + $0x844] ss:$16 sps:$4 sm:$0xff]   ;;  %v12035_v51 = vld [vmem:[%s14971_s0 + $0xa8] ss:$72 sps:$4 sm:$0xff]  }
  0x95   :  { %3880 = vmatprep.subr.bf16.mxu0 %v10170_v37  ;;  %v10255_v37 = vld [vmem:[%s14970_s1 + $0x448] ss:$16 sps:$4 sm:$0xff]  }
  0x97   :  { %4252 = vmatpush1.bf16.msra.mxu1 %v10171_v39  ;;  %v12046_v39 = vld [vmem:[%s14971_s0 + $0x24] ss:$72 sps:$4 sm:$0xff]  }
  0x98   :  { %3881 = vmatpush1.bf16.msra.mxu0 %v10168_v38  ;;  %4253 = vmatprep.subr.bf16.mxu1 %v10179_v42  ;;  %v10260_v38 = vld [vmem:[%s14970_s1 + $0x864] ss:$16 sps:$4 sm:$0xff]   ;;  %v10261_v42 = vld [vmem:[%s14970_s1 + $0x468] ss:$16 sps:$4 sm:$0xff]  }
  0x99   :  { %3882 = vmatprep.subr.bf16.mxu0 %v10176_v41  ;;  %v10258_v41 = vld [vmem:[%s14970_s1 + $0x860] ss:$16 sps:$4 sm:$0xff]  }
  0x9b   :  { %4254 = vmatpush1.bf16.msra.mxu1 %v10177_v44  ;;  %v10269_v44 = vld [vmem:[%s14970_s1 + $0x48c] ss:$16 sps:$4 sm:$0xff]  }
  0x9c   :  { %3883 = vmatpush1.bf16.msra.mxu0 %v10174_v43  ;;  %4255 = vmatprep.subr.bf16.mxu1 %v10185_v46  ;;  %v10266_v43 = vld [vmem:[%s14970_s1 + $0x884] ss:$16 sps:$4 sm:$0xff]  }
  0x9d   :  { %3884 = vmatprep.subr.bf16.mxu0 %v10182_v45  ;;  %v10267_v45 = vld [vmem:[%s14970_s1 + $0x488] ss:$16 sps:$4 sm:$0xff]   ;;  %v10272_v46 = vld [vmem:[%s14970_s1 + $0x8a4] ss:$16 sps:$4 sm:$0xff]  }
  0x9f   :  { %4256 = vmatpush1.bf16.msra.mxu1 %v10183_v48  ;;  %v10273_v48 = vld [vmem:[%s14970_s1 + $0x4a8] ss:$16 sps:$4 sm:$0xff]  }
  0xa0   :  { %3885 = vmatpush1.bf16.msra.mxu0 %v10180_v47  ;;  %4257 = vmatprep.subr.bf16.mxu1 %v10191_v50  ;;  %v10270_v47 = vld [vmem:[%s14970_s1 + $0x8a0] ss:$16 sps:$4 sm:$0xff]   ;;  %v10281_v50 = vld [vmem:[%s14970_s1 + $0x4cc] ss:$16 sps:$4 sm:$0xff]  }
  0xa1   :  { %3886 = vmatprep.subr.bf16.mxu0 %v10188_v49  ;;  %v10278_v49 = vld [vmem:[%s14970_s1 + $0x8c4] ss:$16 sps:$4 sm:$0xff]  }
  0xa3   :  { %4258 = vmatpush1.bf16.msra.mxu1 %v10189_v53  ;;  %v10279_v53 = vld [vmem:[%s14970_s1 + $0x4c8] ss:$16 sps:$4 sm:$0xff]  }
  0xa4   :  { %3887 = vmatpush1.bf16.msra.mxu0 %v10186_v52  ;;  %4259 = vmatprep.subr.bf16.mxu1 %v10197_v55  ;;  %v10276_v52 = vld [vmem:[%s14970_s1 + $0x8c0] ss:$16 sps:$4 sm:$0xff]   ;;  %v10287_v55 = vld [vmem:[%s14970_s1 + $0x4ec] ss:$16 sps:$4 sm:$0xff]  }
  0xa5   :  { %3888 = vmatprep.subr.bf16.mxu0 %v10194_v54  ;;  %v10284_v54 = vld [vmem:[%s14970_s1 + $0x8e4] ss:$16 sps:$4 sm:$0xff]  }
  0xa7   :  { %4260 = vmatpush1.bf16.msra.mxu1 %v10195_v57  ;;  %v10285_v57 = vld [vmem:[%s14970_s1 + $0x4e8] ss:$16 sps:$4 sm:$0xff]  }
  0xa8   :  { %3889 = vmatpush1.bf16.msra.mxu0 %v10192_v56  ;;  %4261 = vmatprep.subr.bf16.mxu1 %v10203_v59  ;;  %v10282_v56 = vld [vmem:[%s14970_s1 + $0x8e0] ss:$16 sps:$4 sm:$0xff]   ;;  %v10293_v59 = vld [vmem:[%s14970_s1 + $0x50c] ss:$16 sps:$4 sm:$0xff]  }
  0xa9   :  { %3890 = vmatprep.subr.bf16.mxu0 %v10200_v58  ;;  %v10290_v58 = vld [vmem:[%s14970_s1 + $0x904] ss:$16 sps:$4 sm:$0xff]  }
  0xab   :  { %4262 = vmatpush1.bf16.msra.mxu1 %v10201_v61  ;;  %v10291_v61 = vld [vmem:[%s14970_s1 + $0x508] ss:$16 sps:$4 sm:$0xff]  }
  0xac   :  { %3891 = vmatpush1.bf16.msra.mxu0 %v10198_v60  ;;  %4263 = vmatprep.subr.bf16.mxu1 %v10209_v63  ;;  %v10288_v60 = vld [vmem:[%s14970_s1 + $0x900] ss:$16 sps:$4 sm:$0xff]   ;;  %v10299_v63 = vld [vmem:[%s14970_s1 + $0x52c] ss:$16 sps:$4 sm:$0xff]  }
  0xad   :  { %3892 = vmatprep.subr.bf16.mxu0 %v10206_v62  ;;  %v10296_v62 = vld [vmem:[%s14970_s1 + $0x924] ss:$16 sps:$4 sm:$0xff]  }
  0xaf   :  { %4264 = vmatpush1.bf16.msra.mxu1 %v10207_v1  ;;  %v10297_v1 = vld [vmem:[%s14970_s1 + $0x528] ss:$16 sps:$4 sm:$0xff]  }
  0xb0   :  { %3893 = vmatpush1.bf16.msra.mxu0 %v10204_v0  ;;  %4265 = vmatprep.subr.bf16.mxu1 %v10215_v3  ;;  %v10294_v0 = vld [vmem:[%s14970_s1 + $0x920] ss:$16 sps:$4 sm:$0xff]   ;;  %v10305_v3 = vld [vmem:[%s14970_s1 + $0x54c] ss:$16 sps:$4 sm:$0xff]  }
  0xb1   :  { %3894 = vmatprep.subr.bf16.mxu0 %v10212_v2  ;;  %v10302_v2 = vld [vmem:[%s14970_s1 + $0x944] ss:$16 sps:$4 sm:$0xff]  }
  0xb3   :  { %4266 = vmatpush1.bf16.msra.mxu1 %v10213_v7  ;;  %v10303_v7 = vld [vmem:[%s14970_s1 + $0x548] ss:$16 sps:$4 sm:$0xff]  }
  0xb4   :  { %3895 = vmatpush1.bf16.msra.mxu0 %v10210_v6  ;;  %4267 = vmatprep.subr.bf16.mxu1 %v10221_v9  ;;  %v10300_v6 = vld [vmem:[%s14970_s1 + $0x940] ss:$16 sps:$4 sm:$0xff]   ;;  %v10311_v9 = vld [vmem:[%s14970_s1 + $0x56c] ss:$16 sps:$4 sm:$0xff]  }
  0xb5   :  { %3896 = vmatprep.subr.bf16.mxu0 %v10218_v8  ;;  %v10308_v8 = vld [vmem:[%s14970_s1 + $0x964] ss:$16 sps:$4 sm:$0xff]  }
  0xb7   :  { %4268 = vmatpush1.bf16.msra.mxu1 %v10219_v11  ;;  %v10309_v11 = vld [vmem:[%s14970_s1 + $0x568] ss:$16 sps:$4 sm:$0xff]  }
  0xb8   :  { %3897 = vmatpush1.bf16.msra.mxu0 %v10216_v10  ;;  %4269 = vmatprep.subr.bf16.mxu1 %v10229_v13  ;;  %v10306_v10 = vld [vmem:[%s14970_s1 + $0x960] ss:$16 sps:$4 sm:$0xff]   ;;  %v10317_v13 = vld [vmem:[%s14970_s1 + $0x58c] ss:$16 sps:$4 sm:$0xff]  }
  0xb9   :  { %3898 = vmatprep.subr.bf16.mxu0 %v10226_v12  ;;  %v10314_v12 = vld [vmem:[%s14970_s1 + $0x984] ss:$16 sps:$4 sm:$0xff]  }
  0xbb   :  { %4270 = vmatpush1.bf16.msra.mxu1 %v10227_v16  ;;  %v10315_v16 = vld [vmem:[%s14970_s1 + $0x588] ss:$16 sps:$4 sm:$0xff]  }
  0xbc   :  { %3899 = vmatpush1.bf16.msra.mxu0 %v10224_v15  ;;  %4271 = vmatprep.subr.bf16.mxu1 %v10236_v18  ;;  %v10312_v15 = vld [vmem:[%s14970_s1 + $0x980] ss:$16 sps:$4 sm:$0xff]   ;;  %v10323_v18 = vld [vmem:[%s14970_s1 + $0x5ac] ss:$16 sps:$4 sm:$0xff]  }
  0xbd   :  { %3900 = vmatprep.subr.bf16.mxu0 %v10233_v17  ;;  %v10320_v17 = vld [vmem:[%s14970_s1 + $0x9a4] ss:$16 sps:$4 sm:$0xff]  }
  0xbf   :  { %4272 = vmatpush1.bf16.msra.mxu1 %v10234_v21  ;;  %v10321_v21 = vld [vmem:[%s14970_s1 + $0x5a8] ss:$16 sps:$4 sm:$0xff]  }
  0xc0   :  { %3901 = vmatpush1.bf16.msra.mxu0 %v10231_v20  ;;  %4294 = vmatprep.subr.bf16.mxu1 %v10245_v4  ;;  %v10318_v20 = vld [vmem:[%s14970_s1 + $0x9a0] ss:$16 sps:$4 sm:$0xff]   ;;  %v10331_v4 = vld [vmem:[%s14970_s1 + $0x5cc] ss:$16 sps:$4 sm:$0xff]  }
  0xc1   :  { %3923 = vmatprep.subr.bf16.mxu0 %v10242_v22  ;;  %v10328_v22 = vld [vmem:[%s14970_s1 + $0x9c4] ss:$16 sps:$4 sm:$0xff]  }
  0xc2   :  { %4274 = vmatmul.mubr.bf16.vlgmr.msra.gmra.mrb[8].mxu1 %v11541_v5  ;;  %v10257_v5 = vld [vmem:[%s14970_s1 + $0x44c] ss:$16 sps:$4 sm:$0xff]  }
  0xc3   :  { %3903 = vmatmul.mubr.bf16.vlgmr.msra.gmra.mrb[0].mxu0 %v11991_v23  ;;  %4295 = vmatpush1.bf16.msra.mxu1 %v10243_v26  ;;  %v10329_v26 = vld [vmem:[%s14970_s1 + $0x5c8] ss:$16 sps:$4 sm:$0xff]  }
  0xc4   :  { %3924 = vmatpush1.bf16.msra.mxu0 %v10240_v24  ;;  %4296 = vmatprep.subr.bf16.mxu1 %v10251_v29  ;;  %v10326_v24 = vld [vmem:[%s14970_s1 + $0x9c0] ss:$16 sps:$4 sm:$0xff]   ;;  %v10338_v29 = vld [vmem:[%s14970_s1 + $0x5ec] ss:$16 sps:$4 sm:$0xff]  }
  0xc5   :  { %3925 = vmatprep.subr.bf16.mxu0 %v10248_v27  ;;  %3912 = vmatprep.mubr.bf16.mxu0 %v12008_v32  ;;  %v10335_v27 = vld [vmem:[%s14970_s1 + $0x9e4] ss:$16 sps:$4 sm:$0xff]  }
  0xc6   :  { %4283 = vmatprep.mubr.bf16.mxu1 %v11627_v31  ;;  %v10263_v31 = vld [vmem:[%s14970_s1 + $0x46c] ss:$16 sps:$4 sm:$0xff]  }
  0xc7   :  { %4297 = vmatpush1.bf16.msra.mxu1 %v10249_v34  ;;  %v10336_v34 = vld [vmem:[%s14970_s1 + $0x5e8] ss:$16 sps:$4 sm:$0xff]  }
  0xc8   :  { %3926 = vmatpush1.bf16.msra.mxu0 %v10246_v33  ;;  %4298 = vmatprep.subr.bf16.mxu1 %v10257_v5  ;;  %v10333_v33 = vld [vmem:[%s14970_s1 + $0x9e0] ss:$16 sps:$4 sm:$0xff]   ;;  %v10347_v5 = vld [vmem:[%s14970_s1 + $0x60c] ss:$16 sps:$4 sm:$0xff]  }
  0xc9   :  { %3927 = vmatprep.subr.bf16.mxu0 %v10254_v30  ;;  %v10344_v30 = vld [vmem:[%s14970_s1 + $0xa04] ss:$16 sps:$4 sm:$0xff]  }
  0xca   :  { %4284 = vmatmul.mubr.bf16.gmra.mrb[12].mxu1 %v11644_v35  ;;  %v10264_v35 = vld [vmem:[%s14970_s1 + $0x880] ss:$16 sps:$4 sm:$0xff]  }
  0xcb   :  { %3913 = vmatmul.mubr.bf16.gmra.mrb[4].mxu0 %v12035_v51  ;;  %4299 = vmatpush1.bf16.msra.mxu1 %v10255_v37  ;;  %v10342_v37 = vld [vmem:[%s14970_s1 + $0xa00] ss:$16 sps:$4 sm:$0xff]  }
  0xcc   :  { %3928 = vmatpush1.bf16.msra.mxu0 %v10252_v36  ;;  %4300 = vmatprep.subr.bf16.mxu1 %v10263_v31  ;;  %v10339_v36 = vld [vmem:[%s14971_s0 + $0x20] ss:$72 sps:$4 sm:$0xff]   ;;  %v10350_v31 = vld [vmem:[%s14970_s1 + $0xa24] ss:$16 sps:$4 sm:$0xff]  }
  0xcd   :  { %3929 = vmatprep.subr.bf16.mxu0 %v10260_v38  ;;  %3955 = vmatprep.mubr.bf16.mxu0 %v12046_v39  ;;  %v10345_v38 = vld [vmem:[%s14970_s1 + $0x608] ss:$16 sps:$4 sm:$0xff]  }
  0xce   :  { %4326 = vmatprep.mubr.bf16.mxu1 %v11663_v40  ;;  %v10275_v40 = vld [vmem:[%s14970_s1 + $0x4ac] ss:$16 sps:$4 sm:$0xff]  }
  0xcf   :  { %4301 = vmatpush1.bf16.msra.mxu1 %v10261_v42  ;;  %v10426_v42 = vld [vmem:[%s14971_s0 + $0xb4] ss:$72 sps:$4 sm:$0xff]  }
  0xd0   :  { %3930 = vmatpush1.bf16.msra.mxu0 %v10258_v41  ;;  %4302 = vmatprep.subr.bf16.mxu1 %v10269_v44  ;;  %v10353_v41 = vld [vmem:[%s14970_s1 + $0x62c] ss:$16 sps:$4 sm:$0xff]   ;;  %v10351_v44 = vld [vmem:[%s14970_s1 + $0x628] ss:$16 sps:$4 sm:$0xff]  }
  0xd1   :  { %3931 = vmatprep.subr.bf16.mxu0 %v10266_v43  ;;  %v10348_v43 = vld [vmem:[%s14970_s1 + $0xa20] ss:$16 sps:$4 sm:$0xff]  }
  0xd3   :  { %4303 = vmatpush1.bf16.msra.mxu1 %v10267_v45  ;;  %v10354_v45 = vld [vmem:[%s14970_s1 + $0xa40] ss:$16 sps:$4 sm:$0xff]  }
  0xd4   :  { %3932 = vmatpush1.bf16.msra.mxu0 %v10264_v35  ;;  %4304 = vmatprep.subr.bf16.mxu1 %v10275_v40  ;;  %v10356_v35 = vld [vmem:[%s14970_s1 + $0xa44] ss:$16 sps:$4 sm:$0xff]   ;;  %v10434_v40 = vld [vmem:[%s14971_s0 + $0xb0] ss:$72 sps:$4 sm:$0xff]  }
  0xd5   :  { %3933 = vmatprep.subr.bf16.mxu0 %v10272_v46  ;;  %v10357_v46 = vld [vmem:[%s14970_s1 + $0x648] ss:$16 sps:$4 sm:$0xff]  }
  0xd7   :  { %4305 = vmatpush1.bf16.msra.mxu1 %v10273_v48  ;;  %v10443_v48 = vld [vmem:[%s14971_s0 + $0x2c] ss:$72 sps:$4 sm:$0xff]  }
  0xd8   :  { %3934 = vmatpush1.bf16.msra.mxu0 %v10270_v47  ;;  %4306 = vmatprep.subr.bf16.mxu1 %v10281_v50  ;;  %v10362_v47 = vld [vmem:[%s14970_s1 + $0xa64] ss:$16 sps:$4 sm:$0xff]   ;;  %v10363_v50 = vld [vmem:[%s14970_s1 + $0x668] ss:$16 sps:$4 sm:$0xff]  }
  0xd9   :  { %3935 = vmatprep.subr.bf16.mxu0 %v10278_v49  ;;  %v10360_v49 = vld [vmem:[%s14970_s1 + $0xa60] ss:$16 sps:$4 sm:$0xff]  }
  0xdb   :  { %4307 = vmatpush1.bf16.msra.mxu1 %v10279_v53  ;;  %v10371_v53 = vld [vmem:[%s14970_s1 + $0x68c] ss:$16 sps:$4 sm:$0xff]  }
  0xdc   :  { %3936 = vmatpush1.bf16.msra.mxu0 %v10276_v52  ;;  %4308 = vmatprep.subr.bf16.mxu1 %v10287_v55  ;;  %v10368_v52 = vld [vmem:[%s14970_s1 + $0xa84] ss:$16 sps:$4 sm:$0xff]  }
  0xdd   :  { %3937 = vmatprep.subr.bf16.mxu0 %v10284_v54  ;;  %v10369_v54 = vld [vmem:[%s14970_s1 + $0x688] ss:$16 sps:$4 sm:$0xff]   ;;  %v10374_v55 = vld [vmem:[%s14970_s1 + $0xaa4] ss:$16 sps:$4 sm:$0xff]  }
  0xdf   :  { %4309 = vmatpush1.bf16.msra.mxu1 %v10285_v57  ;;  %v10375_v57 = vld [vmem:[%s14970_s1 + $0x6a8] ss:$16 sps:$4 sm:$0xff]  }
  0xe0   :  { %3938 = vmatpush1.bf16.msra.mxu0 %v10282_v56  ;;  %4310 = vmatprep.subr.bf16.mxu1 %v10293_v59  ;;  %v10372_v56 = vld [vmem:[%s14970_s1 + $0xaa0] ss:$16 sps:$4 sm:$0xff]   ;;  %v10383_v59 = vld [vmem:[%s14970_s1 + $0x6cc] ss:$16 sps:$4 sm:$0xff]  }
  0xe1   :  { %3939 = vmatprep.subr.bf16.mxu0 %v10290_v58  ;;  %v10380_v58 = vld [vmem:[%s14970_s1 + $0xac4] ss:$16 sps:$4 sm:$0xff]  }
  0xe3   :  { %4311 = vmatpush1.bf16.msra.mxu1 %v10291_v61 }
  0xe4   :  { %3940 = vmatpush1.bf16.msra.mxu0 %v10288_v60  ;;  %4312 = vmatprep.subr.bf16.mxu1 %v10299_v63  ;;  %v10381_v63 = vld [vmem:[%s14970_s1 + $0x6c8] ss:$16 sps:$4 sm:$0xff]  }
  0xe5   :  { %3941 = vmatprep.subr.bf16.mxu0 %v10296_v62  ;;  %v10378_v62 = vld [vmem:[%s14970_s1 + $0xac0] ss:$16 sps:$4 sm:$0xff]  }
  0xe7   :  { %4313 = vmatpush1.bf16.msra.mxu1 %v10297_v1  ;;  %v10386_v1 = vld [vmem:[%s14970_s1 + $0xae4] ss:$16 sps:$4 sm:$0xff]  }
  0xe8   :  { %3942 = vmatpush1.bf16.msra.mxu0 %v10294_v0  ;;  %4314 = vmatprep.subr.bf16.mxu1 %v10305_v3  ;;  %v10389_v3 = vld [vmem:[%s14970_s1 + $0x6ec] ss:$16 sps:$4 sm:$0xff]  }
  0xe9   :  { %3943 = vmatprep.subr.bf16.mxu0 %v10302_v2 }
  0xeb   :  { %4315 = vmatpush1.bf16.msra.mxu1 %v10303_v7  ;;  %v10387_v7 = vld [vmem:[%s14970_s1 + $0x6e8] ss:$16 sps:$4 sm:$0xff]  }
  0xec   :  { %3944 = vmatpush1.bf16.msra.mxu0 %v10300_v6  ;;  %4316 = vmatprep.subr.bf16.mxu1 %v10311_v9  ;;  %v10384_v6 = vld [vmem:[%s14970_s1 + $0xae0] ss:$16 sps:$4 sm:$0xff]   ;;  %v10395_v9 = vld [vmem:[%s14970_s1 + $0x70c] ss:$16 sps:$4 sm:$0xff]  }
  0xed   :  { %3945 = vmatprep.subr.bf16.mxu0 %v10308_v8  ;;  %v10392_v8 = vld [vmem:[%s14970_s1 + $0xb04] ss:$16 sps:$4 sm:$0xff]  }
  0xef   :  { %4317 = vmatpush1.bf16.msra.mxu1 %v10309_v11  ;;  %v10393_v11 = vld [vmem:[%s14970_s1 + $0x708] ss:$16 sps:$4 sm:$0xff]  }
  0xf0   :  { %3946 = vmatpush1.bf16.msra.mxu0 %v10306_v10  ;;  %4318 = vmatprep.subr.bf16.mxu1 %v10317_v13  ;;  %v10390_v10 = vld [vmem:[%s14970_s1 + $0xb00] ss:$16 sps:$4 sm:$0xff]   ;;  %v10401_v13 = vld [vmem:[%s14970_s1 + $0x72c] ss:$16 sps:$4 sm:$0xff]  }
  0xf1   :  { %3947 = vmatprep.subr.bf16.mxu0 %v10314_v12  ;;  %v10398_v12 = vld [vmem:[%s14970_s1 + $0xb24] ss:$16 sps:$4 sm:$0xff]  }
  0xf3   :  { %4319 = vmatpush1.bf16.msra.mxu1 %v10315_v16  ;;  %v10399_v16 = vld [vmem:[%s14970_s1 + $0x728] ss:$16 sps:$4 sm:$0xff]  }
  0xf4   :  { %3948 = vmatpush1.bf16.msra.mxu0 %v10312_v15  ;;  %4320 = vmatprep.subr.bf16.mxu1 %v10323_v18  ;;  %v10396_v15 = vld [vmem:[%s14970_s1 + $0xb20] ss:$16 sps:$4 sm:$0xff]   ;;  %v10407_v18 = vld [vmem:[%s14970_s1 + $0x74c] ss:$16 sps:$4 sm:$0xff]  }
  0xf5   :  { %3949 = vmatprep.subr.bf16.mxu0 %v10320_v17  ;;  %v10404_v17 = vld [vmem:[%s14970_s1 + $0xb44] ss:$16 sps:$4 sm:$0xff]  }
  0xf7   :  { %4321 = vmatpush1.bf16.msra.mxu1 %v10321_v21  ;;  %v10405_v21 = vld [vmem:[%s14970_s1 + $0x748] ss:$16 sps:$4 sm:$0xff]  }
  0xf8   :  { %3950 = vmatpush1.bf16.msra.mxu0 %v10318_v20  ;;  %4322 = vmatprep.subr.bf16.mxu1 %v10331_v4  ;;  %v10402_v20 = vld [vmem:[%s14970_s1 + $0xb40] ss:$16 sps:$4 sm:$0xff]   ;;  %v10413_v4 = vld [vmem:[%s14970_s1 + $0x76c] ss:$16 sps:$4 sm:$0xff]  }
  0xf9   :  { %3951 = vmatprep.subr.bf16.mxu0 %v10328_v22  ;;  %v10410_v22 = vld [vmem:[%s14970_s1 + $0xb64] ss:$16 sps:$4 sm:$0xff]  }
  0xfb   :  { %4323 = vmatpush1.bf16.msra.mxu1 %v10329_v26  ;;  %v10408_v26 = vld [vmem:[%s14970_s1 + $0xb60] ss:$16 sps:$4 sm:$0xff]  }
  0xfc   :  { %3952 = vmatpush1.bf16.msra.mxu0 %v10326_v24  ;;  %4324 = vmatprep.subr.bf16.mxu1 %v10338_v29 }
  0xfd   :  { %3953 = vmatprep.subr.bf16.mxu0 %v10335_v27  ;;  %v10411_v27 = vld [vmem:[%s14970_s1 + $0x768] ss:$16 sps:$4 sm:$0xff]  }
  0xff   :  { %4325 = vmatpush1.bf16.msra.mxu1 %v10336_v34 }
 0x100   :  { %3954 = vmatpush1.bf16.msra.mxu0 %v10333_v33  ;;  %4347 = vmatprep.subr.bf16.mxu1 %v10347_v5  ;;  %v10416_v33 = vld [vmem:[%s14970_s1 + $0xb84] ss:$16 sps:$4 sm:$0xff]  }
 0x101   :  { %3976 = vmatprep.subr.bf16.mxu0 %v10344_v30  ;;  %v10419_v30 = vld [vmem:[%s14970_s1 + $0x78c] ss:$16 sps:$4 sm:$0xff]  }
 0x102   :  { %4327 = vmatmul.mubr.bf16.vlgmr.msra.gmra.mrb[8].mxu1 %v11771_v14  ;;  %v10359_v14 = vld [vmem:[%s14970_s1 + $0x64c] ss:$16 sps:$4 sm:$0xff]  }
 0x103   :  { %3956 = vmatmul.mubr.bf16.vlgmr.msra.gmra.mrb[0].mxu0 %v10339_v36  ;;  %4348 = vmatpush1.bf16.msra.mxu1 %v10345_v38  ;;  %v10414_v36 = vld [vmem:[%s14970_s1 + $0xb80] ss:$16 sps:$4 sm:$0xff]   ;;  %v10422_v38 = vld [vmem:[%s14970_s1 + $0xba4] ss:$16 sps:$4 sm:$0xff]  }
 0x104   :  { %3977 = vmatpush1.bf16.msra.mxu0 %v10342_v37  ;;  %4349 = vmatprep.subr.bf16.mxu1 %v10353_v41  ;;  %v10417_v37 = vld [vmem:[%s14970_s1 + $0x788] ss:$16 sps:$4 sm:$0xff]   ;;  %v10420_v41 = vld [vmem:[%s14970_s1 + $0xba0] ss:$16 sps:$4 sm:$0xff]  }
 0x105   :  { %3978 = vmatprep.subr.bf16.mxu0 %v10350_v31  ;;  %3965 = vmatprep.mubr.bf16.mxu0 %v10426_v42  ;;  %v10425_v31 = vld [vmem:[%s14970_s1 + $0x7ac] ss:$16 sps:$4 sm:$0xff]   ;;  %v10423_v42 = vld [vmem:[%s14970_s1 + $0x7a8] ss:$16 sps:$4 sm:$0xff]  }
 0x106   :  { %4336 = vmatprep.mubr.bf16.mxu1 %v11788_v19  ;;  %v10365_v19 = vld [vmem:[%s14970_s1 + $0x66c] ss:$16 sps:$4 sm:$0xff]  }
 0x107   :  { %4350 = vmatpush1.bf16.msra.mxu1 %v10351_v44  ;;  %v10433_v44 = vld [vmem:[%s14970_s1 + $0x7cc] ss:$16 sps:$4 sm:$0xff]  }
 0x108   :  { %3979 = vmatpush1.bf16.msra.mxu0 %v10348_v43  ;;  %4351 = vmatprep.subr.bf16.mxu1 %v10359_v14  ;;  %v10430_v43 = vld [vmem:[%s14970_s1 + $0xbc4] ss:$16 sps:$4 sm:$0xff]   ;;  %v10431_v14 = vld [vmem:[%s14970_s1 + $0x7c8] ss:$16 sps:$4 sm:$0xff]  }
 0x109   :  { %3980 = vmatprep.subr.bf16.mxu0 %v10356_v35  ;;  %v10428_v35 = vld [vmem:[%s14970_s1 + $0xbc0] ss:$16 sps:$4 sm:$0xff]  }
 0x10a   :  { %4337 = vmatmul.mubr.bf16.gmra.mrb[12].mxu1 %v11815_v25  ;;  %v10366_v25 = vld [vmem:[%s14970_s1 + $0xa80] ss:$16 sps:$4 sm:$0xff]  }
 0x10b   :  { %3966 = vmatmul.mubr.bf16.gmra.mrb[4].mxu0 %v10434_v40  ;;  %4352 = vmatpush1.bf16.msra.mxu1 %v10357_v46  ;;  %v10440_v46 = vld [vmem:[%s14970_s1 + $0x7ec] ss:$16 sps:$4 sm:$0xff]   ;;  %v10435_v40 = vld [vmem:[%s14970_s1 + $0xbe0] ss:$16 sps:$4 sm:$0xff]  }
 0x10c   :  { %3981 = vmatpush1.bf16.msra.mxu0 %v10354_v45  ;;  %4353 = vmatprep.subr.bf16.mxu1 %v10365_v19  ;;  %v10437_v45 = vld [vmem:[%s14970_s1 + $0xbe4] ss:$16 sps:$4 sm:$0xff]   ;;  %v12429_v19 = vld [vmem:[%s14971_s0 + $0x28] ss:$72 sps:$4 sm:$0xff]  }
 0x10d   :  { %3982 = vmatprep.subr.bf16.mxu0 %v10362_v47  ;;  %4008 = vmatprep.mubr.bf16.mxu0 %v10443_v48  ;;  %v10438_v47 = vld [vmem:[%s14970_s1 + $0x7e8] ss:$16 sps:$4 sm:$0xff]   ;;  %v10446_v48 = vld [vmem:[%s14970_s1 + $0xc04] ss:$16 sps:$4 sm:$0xff]  }
 0x10e   :  { %4379 = vmatprep.mubr.bf16.mxu1 %v11826_v28  ;;  %v10377_v28 = vld [vmem:[%s14970_s1 + $0x6ac] ss:$16 sps:$4 sm:$0xff]  }
 0x10f   :  { %4354 = vmatpush1.bf16.msra.mxu1 %v10363_v50  ;;  %v10444_v50 = vld [vmem:[%s14970_s1 + $0xc00] ss:$16 sps:$4 sm:$0xff]  }
 0x110   :  { %3983 = vmatpush1.bf16.msra.mxu0 %v10360_v49  ;;  %4355 = vmatprep.subr.bf16.mxu1 %v10371_v53  ;;  %v10449_v49 = vld [vmem:[%s14970_s1 + $0x80c] ss:$16 sps:$4 sm:$0xff]   ;;  %v10452_v53 = vld [vmem:[%s14970_s1 + $0xc24] ss:$16 sps:$4 sm:$0xff]  }
 0x111   :  { %3984 = vmatprep.subr.bf16.mxu0 %v10368_v52  ;;  %v10447_v52 = vld [vmem:[%s14970_s1 + $0x808] ss:$16 sps:$4 sm:$0xff]  }
 0x113   :  { %4356 = vmatpush1.bf16.msra.mxu1 %v10369_v54  ;;  %v12452_v54 = vld [vmem:[%s14971_s0 + $0xbc] ss:$72 sps:$4 sm:$0xff]  }
 0x114   :  { %3985 = vmatpush1.bf16.msra.mxu0 %v10366_v25  ;;  %4357 = vmatprep.subr.bf16.mxu1 %v10377_v28  ;;  %v10455_v25 = vld [vmem:[%s14970_s1 + $0x82c] ss:$16 sps:$4 sm:$0xff]   ;;  %v10453_v28 = vld [vmem:[%s14970_s1 + $0x828] ss:$16 sps:$4 sm:$0xff]  }
 0x115   :  { %3986 = vmatprep.subr.bf16.mxu0 %v10374_v55  ;;  %v12296_v60 = vpop.f32.mrb[0].mxu1  ;;  %v10450_v55 = vld [vmem:[%s14970_s1 + $0xc20] ss:$16 sps:$4 sm:$0xff]  }
 0x116   :  { %v12298_v61 = vpop.f32.mrb[1].mxu1 }
 0x117   :  { %v12306_v0 = vpop.f32.mrb[2].mxu1  ;;  %4358 = vmatpush1.bf16.msra.mxu1 %v10375_v57  ;;  %v10461_v57 = vld [vmem:[%s14970_s1 + $0x84c] ss:$16 sps:$4 sm:$0xff]  }
 0x118   :  { %3987 = vmatpush1.bf16.msra.mxu0 %v10372_v56  ;;  %v12311_v2 = vpop.f32.mrb[3].mxu1  ;;  %4359 = vmatprep.subr.bf16.mxu1 %v10383_v59  ;;  %v10458_v56 = vld [vmem:[%s14970_s1 + $0xc44] ss:$16 sps:$4 sm:$0xff]   ;;  %v10459_v59 = vld [vmem:[%s14970_s1 + $0x848] ss:$16 sps:$4 sm:$0xff]  }
 0x119   :  { %3988 = vmatprep.subr.bf16.mxu0 %v10380_v58  ;;  %v10456_v58 = vld [vmem:[%s14970_s1 + $0xc40] ss:$16 sps:$4 sm:$0xff]  }
 0x11b   :  { %4360 = vmatpush1.bf16.msra.mxu1 %v10381_v63  ;;  %v10467_v63 = vld [vmem:[%s14970_s1 + $0x86c] ss:$16 sps:$4 sm:$0xff]  }
 0x11c   :  { %3989 = vmatpush1.bf16.msra.mxu0 %v10378_v62  ;;  %4361 = vmatprep.subr.bf16.mxu1 %v10389_v3  ;;  %v10464_v62 = vld [vmem:[%s14970_s1 + $0xc64] ss:$16 sps:$4 sm:$0xff]   ;;  %v10465_v3 = vld [vmem:[%s14970_s1 + $0x868] ss:$16 sps:$4 sm:$0xff]  }
 0x11d   :  { %3990 = vmatprep.subr.bf16.mxu0 %v10386_v1  ;;  %v12364_v24 = vpop.f32.mrb[4].mxu1  ;;  %v10462_v1 = vld [vmem:[%s14970_s1 + $0xc60] ss:$16 sps:$4 sm:$0xff]  }
 0x11e   :  { %v12372_v29 = vpop.f32.mrb[5].mxu1 }
 0x11f   :  { %4362 = vmatpush1.bf16.msra.mxu1 %v10387_v7  ;;  %v12377_v34 = vpop.f32.mrb[6].mxu1  ;;  %v10468_v7 = vld [vmem:[%s14970_s1 + $0xc80] ss:$16 sps:$4 sm:$0xff]  }
 0x120   :  { %3991 = vmatpush1.bf16.msra.mxu0 %v10384_v6  ;;  %4363 = vmatprep.subr.bf16.mxu1 %v10395_v9  ;;  %v12382_v5 = vpop.f32.mrb[7].mxu1  ;;  %v10470_v6 = vld [vmem:[%s14970_s1 + $0xc84] ss:$16 sps:$4 sm:$0xff]  }
 0x121   :  { %3992 = vmatprep.subr.bf16.mxu0 %v10392_v8  ;;  %v10471_v8 = vld [vmem:[%s14970_s1 + $0x888] ss:$16 sps:$4 sm:$0xff]   ;;  %v10476_v9 = vld [vmem:[%s14970_s1 + $0xca4] ss:$16 sps:$4 sm:$0xff]  }
 0x123   :  { %4364 = vmatpush1.bf16.msra.mxu1 %v10393_v11  ;;  %v10477_v11 = vld [vmem:[%s14970_s1 + $0x8a8] ss:$16 sps:$4 sm:$0xff]  }
 0x124   :  { %3993 = vmatpush1.bf16.msra.mxu0 %v10390_v10  ;;  %4365 = vmatprep.subr.bf16.mxu1 %v10401_v13  ;;  %v10474_v10 = vld [vmem:[%s14970_s1 + $0xca0] ss:$16 sps:$4 sm:$0xff]   ;;  %v10485_v13 = vld [vmem:[%s14970_s1 + $0x8cc] ss:$16 sps:$4 sm:$0xff]  }
 0x125   :  { %3994 = vmatprep.subr.bf16.mxu0 %v10398_v12  ;;  %v10482_v12 = vld [vmem:[%s14970_s1 + $0xcc4] ss:$16 sps:$4 sm:$0xff]  }
 0x127   :  { %4366 = vmatpush1.bf16.msra.mxu1 %v10399_v16  ;;  %v10483_v16 = vld [vmem:[%s14970_s1 + $0x8c8] ss:$16 sps:$4 sm:$0xff]  }
 0x128   :  { %3995 = vmatpush1.bf16.msra.mxu0 %v10396_v15  ;;  %4367 = vmatprep.subr.bf16.mxu1 %v10407_v18  ;;  %v10480_v15 = vld [vmem:[%s14970_s1 + $0xcc0] ss:$16 sps:$4 sm:$0xff]   ;;  %v10491_v18 = vld [vmem:[%s14970_s1 + $0x8ec] ss:$16 sps:$4 sm:$0xff]  }
 0x129   :  { %3996 = vmatprep.subr.bf16.mxu0 %v10404_v17  ;;  %v10488_v17 = vld [vmem:[%s14970_s1 + $0xce4] ss:$16 sps:$4 sm:$0xff]  }
 0x12b   :  { %4368 = vmatpush1.bf16.msra.mxu1 %v10405_v21  ;;  %v10489_v21 = vld [vmem:[%s14970_s1 + $0x8e8] ss:$16 sps:$4 sm:$0xff]  }
 0x12c   :  { %3997 = vmatpush1.bf16.msra.mxu0 %v10402_v20  ;;  %4369 = vmatprep.subr.bf16.mxu1 %v10413_v4  ;;  %v10486_v20 = vld [vmem:[%s14970_s1 + $0xce0] ss:$16 sps:$4 sm:$0xff]   ;;  %v10497_v4 = vld [vmem:[%s14970_s1 + $0x90c] ss:$16 sps:$4 sm:$0xff]  }
 0x12d   :  { %3998 = vmatprep.subr.bf16.mxu0 %v10410_v22  ;;  %v10494_v22 = vld [vmem:[%s14970_s1 + $0xd04] ss:$16 sps:$4 sm:$0xff]  }
 0x12f   :  { %4370 = vmatpush1.bf16.msra.mxu1 %v10411_v27  ;;  %v10495_v27 = vld [vmem:[%s14970_s1 + $0x908] ss:$16 sps:$4 sm:$0xff]  }
 0x130   :  { %3999 = vmatpush1.bf16.msra.mxu0 %v10408_v26  ;;  %4371 = vmatprep.subr.bf16.mxu1 %v10419_v30  ;;  %v10492_v26 = vld [vmem:[%s14970_s1 + $0xd00] ss:$16 sps:$4 sm:$0xff]   ;;  %v10503_v30 = vld [vmem:[%s14970_s1 + $0x92c] ss:$16 sps:$4 sm:$0xff]  }
 0x131   :  { %4000 = vmatprep.subr.bf16.mxu0 %v10416_v33  ;;  %v10500_v33 = vld [vmem:[%s14970_s1 + $0xd24] ss:$16 sps:$4 sm:$0xff]  }
 0x133   :  { %4372 = vmatpush1.bf16.msra.mxu1 %v10417_v37  ;;  %v10501_v37 = vld [vmem:[%s14970_s1 + $0x928] ss:$16 sps:$4 sm:$0xff]  }
 0x134   :  { %4001 = vmatpush1.bf16.msra.mxu0 %v10414_v36  ;;  %4373 = vmatprep.subr.bf16.mxu1 %v10425_v31  ;;  %v10498_v36 = vld [vmem:[%s14970_s1 + $0xd20] ss:$16 sps:$4 sm:$0xff]   ;;  %v10509_v31 = vld [vmem:[%s14970_s1 + $0x94c] ss:$16 sps:$4 sm:$0xff]  }
 0x135   :  { %4002 = vmatprep.subr.bf16.mxu0 %v10422_v38  ;;  %v10506_v38 = vld [vmem:[%s14970_s1 + $0xd44] ss:$16 sps:$4 sm:$0xff]  }
 0x137   :  { %4374 = vmatpush1.bf16.msra.mxu1 %v10423_v42  ;;  %v10507_v42 = vld [vmem:[%s14970_s1 + $0x948] ss:$16 sps:$4 sm:$0xff]  }
 0x138   :  { %4003 = vmatpush1.bf16.msra.mxu0 %v10420_v41  ;;  %4375 = vmatprep.subr.bf16.mxu1 %v10433_v44  ;;  %v10504_v41 = vld [vmem:[%s14970_s1 + $0xd40] ss:$16 sps:$4 sm:$0xff]   ;;  %v10515_v44 = vld [vmem:[%s14970_s1 + $0x96c] ss:$16 sps:$4 sm:$0xff]  }
 0x139   :  { %4004 = vmatprep.subr.bf16.mxu0 %v10430_v43  ;;  %v10512_v43 = vld [vmem:[%s14970_s1 + $0xd64] ss:$16 sps:$4 sm:$0xff]  }
 0x13b   :  { %4376 = vmatpush1.bf16.msra.mxu1 %v10431_v14  ;;  %v10513_v14 = vld [vmem:[%s14970_s1 + $0x968] ss:$16 sps:$4 sm:$0xff]  }
 0x13c   :  { %4005 = vmatpush1.bf16.msra.mxu0 %v10428_v35  ;;  %4377 = vmatprep.subr.bf16.mxu1 %v10440_v46  ;;  %v10510_v35 = vld [vmem:[%s14970_s1 + $0xd60] ss:$16 sps:$4 sm:$0xff]   ;;  %v10521_v46 = vld [vmem:[%s14970_s1 + $0x98c] ss:$16 sps:$4 sm:$0xff]  }
 0x13d   :  { %4006 = vmatprep.subr.bf16.mxu0 %v10437_v45  ;;  %v10518_v45 = vld [vmem:[%s14970_s1 + $0xd84] ss:$16 sps:$4 sm:$0xff]  }
 0x13f   :  { %4378 = vmatpush1.bf16.msra.mxu1 %v10438_v47  ;;  %v10519_v47 = vld [vmem:[%s14970_s1 + $0x988] ss:$16 sps:$4 sm:$0xff]  }
 0x140   :  { %4007 = vmatpush1.bf16.msra.mxu0 %v10435_v40  ;;  %4400 = vmatprep.subr.bf16.mxu1 %v10449_v49  ;;  %v10516_v40 = vld [vmem:[%s14970_s1 + $0xd80] ss:$16 sps:$4 sm:$0xff]   ;;  %v10527_v49 = vld [vmem:[%s14970_s1 + $0x9ac] ss:$16 sps:$4 sm:$0xff]  }
 0x141   :  { %4029 = vmatprep.subr.bf16.mxu0 %v10446_v48  ;;  %v10524_v48 = vld [vmem:[%s14970_s1 + $0xda4] ss:$16 sps:$4 sm:$0xff]  }
 0x142   :  { %4380 = vmatmul.mubr.bf16.vlgmr.msra.gmra.mrb[8].mxu1 %v11991_v23  ;;  %v12471_v23 = vld [vmem:[%s14971_s0 + $0xb8] ss:$72 sps:$4 sm:$0xff]  }
 0x143   :  { %4009 = vmatmul.mubr.bf16.vlgmr.msra.gmra.mrb[0].mxu0 %v12429_v19  ;;  %4401 = vmatpush1.bf16.msra.mxu1 %v10447_v52  ;;  %v10525_v52 = vld [vmem:[%s14970_s1 + $0x9a8] ss:$16 sps:$4 sm:$0xff]  }
 0x144   :  { %4030 = vmatpush1.bf16.msra.mxu0 %v10444_v50  ;;  %4402 = vmatprep.subr.bf16.mxu1 %v10455_v25  ;;  %v10522_v50 = vld [vmem:[%s14970_s1 + $0xda0] ss:$16 sps:$4 sm:$0xff]   ;;  %v10535_v25 = vld [vmem:[%s14970_s1 + $0x9cc] ss:$16 sps:$4 sm:$0xff]  }
 0x145   :  { %4031 = vmatprep.subr.bf16.mxu0 %v10452_v53  ;;  %4018 = vmatprep.mubr.bf16.mxu0 %v12452_v54  ;;  %v10532_v53 = vld [vmem:[%s14970_s1 + $0xdc4] ss:$16 sps:$4 sm:$0xff]  }
 0x146   :  { %4389 = vmatprep.mubr.bf16.mxu1 %v12008_v32  ;;  %v12490_v32 = vld [vmem:[%s14971_s0 + $0x34] ss:$72 sps:$4 sm:$0xff]  }
 0x147   :  { %4403 = vmatpush1.bf16.msra.mxu1 %v10453_v28  ;;  %v10533_v28 = vld [vmem:[%s14970_s1 + $0x9c8] ss:$16 sps:$4 sm:$0xff]  }
 0x148   :  { %4032 = vmatpush1.bf16.msra.mxu0 %v10450_v55  ;;  %4404 = vmatprep.subr.bf16.mxu1 %v10461_v57  ;;  %v10530_v55 = vld [vmem:[%s14970_s1 + $0xdc0] ss:$16 sps:$4 sm:$0xff]   ;;  %v10542_v57 = vld [vmem:[%s14970_s1 + $0x9ec] ss:$16 sps:$4 sm:$0xff]  }
 0x149   :  { %4033 = vmatprep.subr.bf16.mxu0 %v10458_v56  ;;  %v10539_v56 = vld [vmem:[%s14970_s1 + $0xde4] ss:$16 sps:$4 sm:$0xff]  }
 0x14a   :  { %4390 = vmatmul.mubr.bf16.gmra.mrb[12].mxu1 %v12035_v51  ;;  %v10473_v51 = vld [vmem:[%s14970_s1 + $0x88c] ss:$16 sps:$4 sm:$0xff]  }
 0x14b   :  { %4019 = vmatmul.mubr.bf16.gmra.mrb[4].mxu0 %v12471_v23  ;;  %4405 = vmatpush1.bf16.msra.mxu1 %v10459_v59  ;;  %v10540_v59 = vld [vmem:[%s14970_s1 + $0x9e8] ss:$16 sps:$4 sm:$0xff]  }
 0x14c   :  { %4034 = vmatpush1.bf16.msra.mxu0 %v10456_v58  ;;  %4406 = vmatprep.subr.bf16.mxu1 %v10467_v63  ;;  %v10537_v58 = vld [vmem:[%s14970_s1 + $0xde0] ss:$16 sps:$4 sm:$0xff]   ;;  %v10548_v63 = vld [vmem:[%s14970_s1 + $0xe04] ss:$16 sps:$4 sm:$0xff]  }
 0x14d   :  { %4035 = vmatprep.subr.bf16.mxu0 %v10464_v62  ;;  %4061 = vmatprep.mubr.bf16.mxu0 %v12490_v32  ;;  %v12649_v62 = vld [vmem:[%s14971_s0 + $0x30] ss:$72 sps:$4 sm:$0xff]  }
 0x14e   :  { %4432 = vmatprep.mubr.bf16.mxu1 %v12046_v39  ;;  %v10479_v39 = vld [vmem:[%s14970_s1 + $0x8ac] ss:$16 sps:$4 sm:$0xff]  }
 0x14f   :  { %4407 = vmatpush1.bf16.msra.mxu1 %v10465_v3  ;;  %v10546_v3 = vld [vmem:[%s14970_s1 + $0xe00] ss:$16 sps:$4 sm:$0xff]  }
 0x150   :  { %4036 = vmatpush1.bf16.msra.mxu0 %v10462_v1  ;;  %4408 = vmatprep.subr.bf16.mxu1 %v10473_v51  ;;  %v10551_v1 = vld [vmem:[%s14970_s1 + $0xa0c] ss:$16 sps:$4 sm:$0xff]   ;;  %v10554_v51 = vld [vmem:[%s14970_s1 + $0xe24] ss:$16 sps:$4 sm:$0xff]  }
 0x151   :  { %4037 = vmatprep.subr.bf16.mxu0 %v10470_v6  ;;  %v10549_v6 = vld [vmem:[%s14970_s1 + $0xa08] ss:$16 sps:$4 sm:$0xff]  }
 0x153   :  { %4409 = vmatpush1.bf16.msra.mxu1 %v10471_v8  ;;  %v12672_v8 = vld [vmem:[%s14971_s0 + $0xc4] ss:$72 sps:$4 sm:$0xff]  }
 0x154   :  { %4038 = vmatpush1.bf16.msra.mxu0 %v10468_v7  ;;  %4410 = vmatprep.subr.bf16.mxu1 %v10479_v39  ;;  %v10557_v7 = vld [vmem:[%s14970_s1 + $0xa2c] ss:$16 sps:$4 sm:$0xff]   ;;  %v10552_v39 = vld [vmem:[%s14970_s1 + $0xe20] ss:$16 sps:$4 sm:$0xff]  }
 0x155   :  { %4039 = vmatprep.subr.bf16.mxu0 %v10476_v9  ;;  %v11257_v9 = vld [vmem:[%s14971_s0 + $0x20] ss:$72 sps:$4 sm:$0xff]  }
 0x157   :  { %4411 = vmatpush1.bf16.msra.mxu1 %v10477_v11  ;;  %v10560_v11 = vld [vmem:[%s14970_s1 + $0xe44] ss:$16 sps:$4 sm:$0xff]  }
 0x158   :  { %4040 = vmatpush1.bf16.msra.mxu0 %v10474_v10  ;;  %4412 = vmatprep.subr.bf16.mxu1 %v10485_v13  ;;  %v10555_v10 = vld [vmem:[%s14970_s1 + $0xa28] ss:$16 sps:$4 sm:$0xff]   ;;  %v11258_v13 = vld [vmem:[%s14971_s0 + $0xb4] ss:$72 sps:$4 sm:$0xff]  }
 0x159   :  { %4041 = vmatprep.subr.bf16.mxu0 %v10482_v12  ;;  %v10563_v12 = vld [vmem:[%s14970_s1 + $0xa4c] ss:$16 sps:$4 sm:$0xff]  }
 0x15b   :  { %4413 = vmatpush1.bf16.msra.mxu1 %v10483_v16  ;;  %v10558_v16 = vld [vmem:[%s14970_s1 + $0xe40] ss:$16 sps:$4 sm:$0xff]  }
 0x15c   :  { %4042 = vmatpush1.bf16.msra.mxu0 %v10480_v15  ;;  %4414 = vmatprep.subr.bf16.mxu1 %v10491_v18  ;;  %v12697_v15 = vld [vmem:[%s14971_s0 + $0xc0] ss:$72 sps:$4 sm:$0xff]   ;;  %v10566_v18 = vld [vmem:[%s14970_s1 + $0xe64] ss:$16 sps:$4 sm:$0xff]  }
 0x15d   :  { %4043 = vmatprep.subr.bf16.mxu0 %v10488_v17  ;;  %v10561_v17 = vld [vmem:[%s14970_s1 + $0xa48] ss:$16 sps:$4 sm:$0xff]  }
 0x15f   :  { %4415 = vmatpush1.bf16.msra.mxu1 %v10489_v21  ;;  %v12714_v21 = vld [vmem:[%s14971_s0 + $0x3c] ss:$72 sps:$4 sm:$0xff]  }
 0x160   :  { %4044 = vmatpush1.bf16.msra.mxu0 %v10486_v20  ;;  %4416 = vmatprep.subr.bf16.mxu1 %v10497_v4  ;;  %v10569_v20 = vld [vmem:[%s14970_s1 + $0xa6c] ss:$16 sps:$4 sm:$0xff]   ;;  %v10564_v4 = vld [vmem:[%s14970_s1 + $0xe60] ss:$16 sps:$4 sm:$0xff]  }
 0x161   :  { %4045 = vmatprep.subr.bf16.mxu0 %v10494_v22  ;;  %v11259_v22 = vld [vmem:[%s14971_s0 + $0xb0] ss:$72 sps:$4 sm:$0xff]  }
 0x163   :  { %4417 = vmatpush1.bf16.msra.mxu1 %v10495_v27  ;;  %v10572_v27 = vld [vmem:[%s14970_s1 + $0xe84] ss:$16 sps:$4 sm:$0xff]  }
 0x164   :  { %4046 = vmatpush1.bf16.msra.mxu0 %v10492_v26  ;;  %4418 = vmatprep.subr.bf16.mxu1 %v10503_v30  ;;  %v10567_v26 = vld [vmem:[%s14970_s1 + $0xa68] ss:$16 sps:$4 sm:$0xff]   ;;  %v11260_v30 = vld [vmem:[%s14971_s0 + $0x2c] ss:$72 sps:$4 sm:$0xff]  }
 0x165   :  { %4047 = vmatprep.subr.bf16.mxu0 %v10500_v33  ;;  %v10575_v33 = vld [vmem:[%s14970_s1 + $0xa8c] ss:$16 sps:$4 sm:$0xff]  }
 0x167   :  { %4419 = vmatpush1.bf16.msra.mxu1 %v10501_v37  ;;  %v10573_v37 = vld [vmem:[%s14970_s1 + $0xa88] ss:$16 sps:$4 sm:$0xff]  }
 0x168   :  { %4048 = vmatpush1.bf16.msra.mxu0 %v10498_v36  ;;  %4420 = vmatprep.subr.bf16.mxu1 %v10509_v31  ;;  %v10570_v36 = vld [vmem:[%s14970_s1 + $0xe80] ss:$16 sps:$4 sm:$0xff]   ;;  %v10581_v31 = vld [vmem:[%s14970_s1 + $0xaac] ss:$16 sps:$4 sm:$0xff]  }
 0x169   :  { %4049 = vmatprep.subr.bf16.mxu0 %v10506_v38  ;;  %v10578_v38 = vld [vmem:[%s14970_s1 + $0xea4] ss:$16 sps:$4 sm:$0xff]  }
 0x16b   :  { %4421 = vmatpush1.bf16.msra.mxu1 %v10507_v42  ;;  %v10579_v42 = vld [vmem:[%s14970_s1 + $0xaa8] ss:$16 sps:$4 sm:$0xff]  }
 0x16c   :  { %4050 = vmatpush1.bf16.msra.mxu0 %v10504_v41  ;;  %4422 = vmatprep.subr.bf16.mxu1 %v10515_v44  ;;  %v10576_v41 = vld [vmem:[%s14970_s1 + $0xea0] ss:$16 sps:$4 sm:$0xff]   ;;  %v10587_v44 = vld [vmem:[%s14970_s1 + $0xacc] ss:$16 sps:$4 sm:$0xff]  }
 0x16d   :  { %4051 = vmatprep.subr.bf16.mxu0 %v10512_v43  ;;  %v10584_v43 = vld [vmem:[%s14970_s1 + $0xec4] ss:$16 sps:$4 sm:$0xff]  }
 0x16f   :  { %4423 = vmatpush1.bf16.msra.mxu1 %v10513_v14  ;;  %v10585_v14 = vld [vmem:[%s14970_s1 + $0xac8] ss:$16 sps:$4 sm:$0xff]  }
 0x170   :  { %4052 = vmatpush1.bf16.msra.mxu0 %v10510_v35  ;;  %4424 = vmatprep.subr.bf16.mxu1 %v10521_v46  ;;  %v10582_v35 = vld [vmem:[%s14970_s1 + $0xec0] ss:$16 sps:$4 sm:$0xff]   ;;  %v10593_v46 = vld [vmem:[%s14970_s1 + $0xaec] ss:$16 sps:$4 sm:$0xff]  }
 0x171   :  { %4053 = vmatprep.subr.bf16.mxu0 %v10518_v45  ;;  %v10590_v45 = vld [vmem:[%s14970_s1 + $0xee4] ss:$16 sps:$4 sm:$0xff]  }
 0x173   :  { %4425 = vmatpush1.bf16.msra.mxu1 %v10519_v47  ;;  %v10591_v47 = vld [vmem:[%s14970_s1 + $0xae8] ss:$16 sps:$4 sm:$0xff]  }
 0x174   :  { %4054 = vmatpush1.bf16.msra.mxu0 %v10516_v40  ;;  %4426 = vmatprep.subr.bf16.mxu1 %v10527_v49  ;;  %v10588_v40 = vld [vmem:[%s14970_s1 + $0xee0] ss:$16 sps:$4 sm:$0xff]   ;;  %v10599_v49 = vld [vmem:[%s14970_s1 + $0xb0c] ss:$16 sps:$4 sm:$0xff]  }
 0x175   :  { %4055 = vmatprep.subr.bf16.mxu0 %v10524_v48  ;;  %v10596_v48 = vld [vmem:[%s14970_s1 + $0xf04] ss:$16 sps:$4 sm:$0xff]  }
 0x177   :  { %4427 = vmatpush1.bf16.msra.mxu1 %v10525_v52  ;;  %v10597_v52 = vld [vmem:[%s14970_s1 + $0xb08] ss:$16 sps:$4 sm:$0xff]  }
 0x178   :  { %4056 = vmatpush1.bf16.msra.mxu0 %v10522_v50  ;;  %4428 = vmatprep.subr.bf16.mxu1 %v10535_v25  ;;  %v10594_v50 = vld [vmem:[%s14970_s1 + $0xf00] ss:$16 sps:$4 sm:$0xff]   ;;  %v10605_v25 = vld [vmem:[%s14970_s1 + $0xb2c] ss:$16 sps:$4 sm:$0xff]  }
 0x179   :  { %4057 = vmatprep.subr.bf16.mxu0 %v10532_v53  ;;  %v10602_v53 = vld [vmem:[%s14970_s1 + $0xf24] ss:$16 sps:$4 sm:$0xff]  }
 0x17b   :  { %4429 = vmatpush1.bf16.msra.mxu1 %v10533_v28  ;;  %v10603_v28 = vld [vmem:[%s14970_s1 + $0xb28] ss:$16 sps:$4 sm:$0xff]  }
 0x17c   :  { %4058 = vmatpush1.bf16.msra.mxu0 %v10530_v55  ;;  %4430 = vmatprep.subr.bf16.mxu1 %v10542_v57  ;;  %v10600_v55 = vld [vmem:[%s14970_s1 + $0xf20] ss:$16 sps:$4 sm:$0xff]   ;;  %v10611_v57 = vld [vmem:[%s14970_s1 + $0xb4c] ss:$16 sps:$4 sm:$0xff]  }
 0x17d   :  { %4059 = vmatprep.subr.bf16.mxu0 %v10539_v56  ;;  %v10608_v56 = vld [vmem:[%s14970_s1 + $0xf44] ss:$16 sps:$4 sm:$0xff]  }
 0x17f   :  { %4431 = vmatpush1.bf16.msra.mxu1 %v10540_v59  ;;  %v10609_v59 = vld [vmem:[%s14970_s1 + $0xb48] ss:$16 sps:$4 sm:$0xff]  }
 0x180   :  { %4060 = vmatpush1.bf16.msra.mxu0 %v10537_v58  ;;  %4453 = vmatprep.subr.bf16.mxu1 %v10551_v1  ;;  %v10606_v58 = vld [vmem:[%s14970_s1 + $0xf40] ss:$16 sps:$4 sm:$0xff]   ;;  %v10617_v1 = vld [vmem:[%s14970_s1 + $0xb6c] ss:$16 sps:$4 sm:$0xff]  }
 0x181   :  { %4082 = vmatprep.subr.bf16.mxu0 %v10548_v63  ;;  %v10614_v63 = vld [vmem:[%s14970_s1 + $0xf64] ss:$16 sps:$4 sm:$0xff]  }
 0x182   :  { %4433 = vmatmul.mubr.bf16.vlgmr.msra.gmra.mrb[8].mxu1 %v11257_v9  ;;  %v10618_v9 = vld [vmem:[%s14970_s1 + $0xf80] ss:$16 sps:$4 sm:$0xff]  }
 0x183   :  { %4062 = vmatmul.mubr.bf16.vlgmr.msra.gmra.mrb[0].mxu0 %v12649_v62  ;;  %4454 = vmatpush1.bf16.msra.mxu1 %v10549_v6  ;;  %v10615_v6 = vld [vmem:[%s14970_s1 + $0xb68] ss:$16 sps:$4 sm:$0xff]  }
 0x184   :  { %4083 = vmatpush1.bf16.msra.mxu0 %v10546_v3  ;;  %4455 = vmatprep.subr.bf16.mxu1 %v10557_v7  ;;  %v10612_v3 = vld [vmem:[%s14970_s1 + $0xf60] ss:$16 sps:$4 sm:$0xff]   ;;  %v10623_v7 = vld [vmem:[%s14970_s1 + $0xb8c] ss:$16 sps:$4 sm:$0xff]  }
 0x185   :  { %4084 = vmatprep.subr.bf16.mxu0 %v10554_v51  ;;  %4071 = vmatprep.mubr.bf16.mxu0 %v12672_v8  ;;  %v10620_v51 = vld [vmem:[%s14970_s1 + $0xf84] ss:$16 sps:$4 sm:$0xff]  }
 0x186   :  { %4442 = vmatprep.mubr.bf16.mxu1 %v11258_v13  ;;  %v10627_v13 = vld [vmem:[%s14970_s1 + $0xba8] ss:$16 sps:$4 sm:$0xff]  }
 0x187   :  { %4456 = vmatpush1.bf16.msra.mxu1 %v10555_v10  ;;  %v10626_v10 = vld [vmem:[%s14970_s1 + $0xfa4] ss:$16 sps:$4 sm:$0xff]  }
 0x188   :  { %4085 = vmatpush1.bf16.msra.mxu0 %v10552_v39  ;;  %4457 = vmatprep.subr.bf16.mxu1 %v10563_v12  ;;  %v10621_v39 = vld [vmem:[%s14970_s1 + $0xb88] ss:$16 sps:$4 sm:$0xff]   ;;  %v10624_v12 = vld [vmem:[%s14970_s1 + $0xfa0] ss:$16 sps:$4 sm:$0xff]  }
 0x189   :  { %4086 = vmatprep.subr.bf16.mxu0 %v10560_v11  ;;  %v10629_v11 = vld [vmem:[%s14970_s1 + $0xbac] ss:$16 sps:$4 sm:$0xff]  }
 0x18a   :  { %4443 = vmatmul.mubr.bf16.gmra.mrb[12].mxu1 %v11259_v22  ;;  %v10641_v22 = vld [vmem:[%s14970_s1 + $0xfe4] ss:$16 sps:$4 sm:$0xff]  }
 0x18b   :  { %4072 = vmatmul.mubr.bf16.gmra.mrb[4].mxu0 %v12697_v15  ;;  %4458 = vmatpush1.bf16.msra.mxu1 %v10561_v17  ;;  %v10637_v17 = vld [vmem:[%s14970_s1 + $0xbcc] ss:$16 sps:$4 sm:$0xff]  }
 0x18c   :  { %4087 = vmatpush1.bf16.msra.mxu0 %v10558_v16  ;;  %4459 = vmatprep.subr.bf16.mxu1 %v10569_v20  ;;  %v10634_v16 = vld [vmem:[%s14970_s1 + $0xfc4] ss:$16 sps:$4 sm:$0xff]   ;;  %v10635_v20 = vld [vmem:[%s14970_s1 + $0xbc8] ss:$16 sps:$4 sm:$0xff]  }
 0x18d   :  { %4088 = vmatprep.subr.bf16.mxu0 %v10566_v18  ;;  %4114 = vmatprep.mubr.bf16.mxu0 %v12714_v21  ;;  %v10632_v18 = vld [vmem:[%s14970_s1 + $0xfc0] ss:$16 sps:$4 sm:$0xff]  }
 0x18e   :  { %4485 = vmatprep.mubr.bf16.mxu1 %v11260_v30  ;;  %v10653_v30 = vld [vmem:[%s14970_s1 + $0xc0c] ss:$16 sps:$4 sm:$0xff]  }
 0x18f   :  { %4460 = vmatpush1.bf16.msra.mxu1 %v10567_v26  ;;  %v10639_v26 = vld [vmem:[%s14970_s1 + $0xfe0] ss:$16 sps:$4 sm:$0xff]  }
 0x190   :  { %4089 = vmatpush1.bf16.msra.mxu0 %v10564_v4  ;;  %4461 = vmatprep.subr.bf16.mxu1 %v10575_v33  ;;  %v10644_v4 = vld [vmem:[%s14970_s1 + $0xbec] ss:$16 sps:$4 sm:$0xff]   ;;  %v10650_v33 = vld [vmem:[%s14970_s1 + $0x1004] ss:$16 sps:$4 sm:$0xff]  }
 0x191   :  { %4090 = vmatprep.subr.bf16.mxu0 %v10572_v27  ;;  %v10642_v27 = vld [vmem:[%s14970_s1 + $0xbe8] ss:$16 sps:$4 sm:$0xff]  }
 0x193   :  { %4462 = vmatpush1.bf16.msra.mxu1 %v10573_v37  ;;  %v10648_v37 = vld [vmem:[%s14970_s1 + $0x1000] ss:$16 sps:$4 sm:$0xff]  }
 0x194   :  { %4091 = vmatpush1.bf16.msra.mxu0 %v10570_v36  ;;  %4463 = vmatprep.subr.bf16.mxu1 %v10581_v31  ;;  %v12883_v36 = vld [vmem:[%s14971_s0 + $0x38] ss:$72 sps:$4 sm:$0xff]   ;;  %v10656_v31 = vld [vmem:[%s14970_s1 + $0x1024] ss:$16 sps:$4 sm:$0xff]  }
 0x195   :  { %4092 = vmatprep.subr.bf16.mxu0 %v10578_v38  ;;  %v10651_v38 = vld [vmem:[%s14970_s1 + $0xc08] ss:$16 sps:$4 sm:$0xff]  }
 0x197   :  { %4464 = vmatpush1.bf16.msra.mxu1 %v10579_v42  ;;  %v12900_v42 = vld [vmem:[%s14971_s0 + $0xcc] ss:$72 sps:$4 sm:$0xff]  }
 0x198   :  { %4093 = vmatpush1.bf16.msra.mxu0 %v10576_v41  ;;  %4465 = vmatprep.subr.bf16.mxu1 %v10587_v44  ;;  %v10659_v41 = vld [vmem:[%s14970_s1 + $0xc2c] ss:$16 sps:$4 sm:$0xff]   ;;  %v10657_v44 = vld [vmem:[%s14970_s1 + $0xc28] ss:$16 sps:$4 sm:$0xff]  }
 0x199   :  { %4094 = vmatprep.subr.bf16.mxu0 %v10584_v43  ;;  %v10654_v43 = vld [vmem:[%s14970_s1 + $0x1020] ss:$16 sps:$4 sm:$0xff]  }
 0x19b   :  { %4466 = vmatpush1.bf16.msra.mxu1 %v10585_v14  ;;  %v12921_v14 = vld [vmem:[%s14971_s0 + $0xc8] ss:$72 sps:$4 sm:$0xff]  }
 0x19c   :  { %4095 = vmatpush1.bf16.msra.mxu0 %v10582_v35  ;;  %4467 = vmatprep.subr.bf16.mxu1 %v10593_v46  ;;  %v10662_v35 = vld [vmem:[%s14970_s1 + $0x1044] ss:$16 sps:$4 sm:$0xff]   ;;  %v10663_v46 = vld [vmem:[%s14970_s1 + $0xc48] ss:$16 sps:$4 sm:$0xff]  }
 0x19d   :  { %4096 = vmatprep.subr.bf16.mxu0 %v10590_v45  ;;  %v10660_v45 = vld [vmem:[%s14970_s1 + $0x1040] ss:$16 sps:$4 sm:$0xff]  }
 0x19f   :  { %4468 = vmatpush1.bf16.msra.mxu1 %v10591_v47  ;;  %v12938_v47 = vld [vmem:[%s14971_s0 + $0x44] ss:$72 sps:$4 sm:$0xff]  }
 0x1a0   :  { %4097 = vmatpush1.bf16.msra.mxu0 %v10588_v40  ;;  %4469 = vmatprep.subr.bf16.mxu1 %v10599_v49  ;;  %v10671_v40 = vld [vmem:[%s14970_s1 + $0xc6c] ss:$16 sps:$4 sm:$0xff]   ;;  %v10669_v49 = vld [vmem:[%s14970_s1 + $0xc68] ss:$16 sps:$4 sm:$0xff]  }
 0x1a1   :  { %4098 = vmatprep.subr.bf16.mxu0 %v10596_v48  ;;  %v10666_v48 = vld [vmem:[%s14970_s1 + $0x1060] ss:$16 sps:$4 sm:$0xff]  }
 0x1a3   :  { %4470 = vmatpush1.bf16.msra.mxu1 %v10597_v52  ;;  %v10672_v52 = vld [vmem:[%s14970_s1 + $0x1080] ss:$16 sps:$4 sm:$0xff]  }
 0x1a4   :  { %4099 = vmatpush1.bf16.msra.mxu0 %v10594_v50  ;;  %4471 = vmatprep.subr.bf16.mxu1 %v10605_v25  ;;  %v10674_v50 = vld [vmem:[%s14970_s1 + $0x1084] ss:$16 sps:$4 sm:$0xff]  }
 0x1a5   :  { %4100 = vmatprep.subr.bf16.mxu0 %v10602_v53  ;;  %v10675_v53 = vld [vmem:[%s14970_s1 + $0xc88] ss:$16 sps:$4 sm:$0xff]   ;;  %v10680_v25 = vld [vmem:[%s14970_s1 + $0x10a4] ss:$16 sps:$4 sm:$0xff]  }
 0x1a7   :  { %4472 = vmatpush1.bf16.msra.mxu1 %v10603_v28  ;;  %v10681_v28 = vld [vmem:[%s14970_s1 + $0xca8] ss:$16 sps:$4 sm:$0xff]  }
 0x1a8   :  { %4101 = vmatpush1.bf16.msra.mxu0 %v10600_v55  ;;  %4473 = vmatprep.subr.bf16.mxu1 %v10611_v57  ;;  %v10678_v55 = vld [vmem:[%s14970_s1 + $0x10a0] ss:$16 sps:$4 sm:$0xff]   ;;  %v10689_v57 = vld [vmem:[%s14970_s1 + $0xccc] ss:$16 sps:$4 sm:$0xff]  }
 0x1a9   :  { %4102 = vmatprep.subr.bf16.mxu0 %v10608_v56  ;;  %v10686_v56 = vld [vmem:[%s14970_s1 + $0x10c4] ss:$16 sps:$4 sm:$0xff]  }
 0x1ab   :  { %4474 = vmatpush1.bf16.msra.mxu1 %v10609_v59  ;;  %v10687_v59 = vld [vmem:[%s14970_s1 + $0xcc8] ss:$16 sps:$4 sm:$0xff]  }
 0x1ac   :  { %4103 = vmatpush1.bf16.msra.mxu0 %v10606_v58  ;;  %4475 = vmatprep.subr.bf16.mxu1 %v10617_v1  ;;  %v10684_v58 = vld [vmem:[%s14970_s1 + $0x10c0] ss:$16 sps:$4 sm:$0xff]   ;;  %v10695_v1 = vld [vmem:[%s14970_s1 + $0xcec] ss:$16 sps:$4 sm:$0xff]  }
 0x1ad   :  { %4104 = vmatprep.subr.bf16.mxu0 %v10614_v63  ;;  %v10692_v63 = vld [vmem:[%s14970_s1 + $0x10e4] ss:$16 sps:$4 sm:$0xff]  }
 0x1af   :  { %4476 = vmatpush1.bf16.msra.mxu1 %v10615_v6  ;;  %v10693_v6 = vld [vmem:[%s14970_s1 + $0xce8] ss:$16 sps:$4 sm:$0xff]  }
 0x1b0   :  { %4105 = vmatpush1.bf16.msra.mxu0 %v10612_v3  ;;  %4477 = vmatprep.subr.bf16.mxu1 %v10623_v7  ;;  %v10690_v3 = vld [vmem:[%s14970_s1 + $0x10e0] ss:$16 sps:$4 sm:$0xff]   ;;  %v10701_v7 = vld [vmem:[%s14970_s1 + $0xd0c] ss:$16 sps:$4 sm:$0xff]  }
 0x1b1   :  { %4106 = vmatprep.subr.bf16.mxu0 %v10620_v51  ;;  %v10698_v51 = vld [vmem:[%s14970_s1 + $0x1104] ss:$16 sps:$4 sm:$0xff]  }
 0x1b3   :  { %4478 = vmatpush1.bf16.msra.mxu1 %v10621_v39  ;;  %v10699_v39 = vld [vmem:[%s14970_s1 + $0xd08] ss:$16 sps:$4 sm:$0xff]  }
 0x1b4   :  { %4107 = vmatpush1.bf16.msra.mxu0 %v10618_v9  ;;  %4479 = vmatprep.subr.bf16.mxu1 %v10629_v11  ;;  %v10696_v9 = vld [vmem:[%s14970_s1 + $0x1100] ss:$16 sps:$4 sm:$0xff]   ;;  %v10707_v11 = vld [vmem:[%s14970_s1 + $0xd2c] ss:$16 sps:$4 sm:$0xff]  }
 0x1b5   :  { %4108 = vmatprep.subr.bf16.mxu0 %v10626_v10  ;;  %v10704_v10 = vld [vmem:[%s14970_s1 + $0x1124] ss:$16 sps:$4 sm:$0xff]  }
 0x1b7   :  { %4480 = vmatpush1.bf16.msra.mxu1 %v10627_v13  ;;  %v10705_v13 = vld [vmem:[%s14970_s1 + $0xd28] ss:$16 sps:$4 sm:$0xff]  }
 0x1b8   :  { %4109 = vmatpush1.bf16.msra.mxu0 %v10624_v12  ;;  %4481 = vmatprep.subr.bf16.mxu1 %v10637_v17  ;;  %v10702_v12 = vld [vmem:[%s14970_s1 + $0x1120] ss:$16 sps:$4 sm:$0xff]   ;;  %v10713_v17 = vld [vmem:[%s14970_s1 + $0xd4c] ss:$16 sps:$4 sm:$0xff]  }
 0x1b9   :  { %4110 = vmatprep.subr.bf16.mxu0 %v10634_v16  ;;  %v10710_v16 = vld [vmem:[%s14970_s1 + $0x1144] ss:$16 sps:$4 sm:$0xff]  }
 0x1bb   :  { %4482 = vmatpush1.bf16.msra.mxu1 %v10635_v20  ;;  %v10711_v20 = vld [vmem:[%s14970_s1 + $0xd48] ss:$16 sps:$4 sm:$0xff]  }
 0x1bc   :  { %4111 = vmatpush1.bf16.msra.mxu0 %v10632_v18  ;;  %4483 = vmatprep.subr.bf16.mxu1 %v10644_v4  ;;  %v10708_v18 = vld [vmem:[%s14970_s1 + $0x1140] ss:$16 sps:$4 sm:$0xff]   ;;  %v10719_v4 = vld [vmem:[%s14970_s1 + $0xd6c] ss:$16 sps:$4 sm:$0xff]  }
 0x1bd   :  { %4112 = vmatprep.subr.bf16.mxu0 %v10641_v22  ;;  %v10716_v22 = vld [vmem:[%s14970_s1 + $0x1164] ss:$16 sps:$4 sm:$0xff]  }
 0x1bf   :  { %4484 = vmatpush1.bf16.msra.mxu1 %v10642_v27  ;;  %v10717_v27 = vld [vmem:[%s14970_s1 + $0xd68] ss:$16 sps:$4 sm:$0xff]  }
 0x1c0   :  { %4113 = vmatpush1.bf16.msra.mxu0 %v10639_v26  ;;  %4506 = vmatprep.subr.bf16.mxu1 %v10653_v30  ;;  %v10714_v26 = vld [vmem:[%s14970_s1 + $0x1160] ss:$16 sps:$4 sm:$0xff]   ;;  %v10725_v30 = vld [vmem:[%s14970_s1 + $0xd8c] ss:$16 sps:$4 sm:$0xff]  }
 0x1c1   :  { %4135 = vmatprep.subr.bf16.mxu0 %v10650_v33  ;;  %v10722_v33 = vld [vmem:[%s14970_s1 + $0x1184] ss:$16 sps:$4 sm:$0xff]  }
 0x1c2   :  { %4486 = vmatmul.mubr.bf16.vlgmr.msra.gmra.mrb[8].mxu1 %v12429_v19  ;;  %v10665_v19 = vld [vmem:[%s14970_s1 + $0xc4c] ss:$16 sps:$4 sm:$0xff]  }
 0x1c3   :  { %4115 = vmatmul.mubr.bf16.vlgmr.msra.gmra.mrb[0].mxu0 %v12883_v36  ;;  %4507 = vmatpush1.bf16.msra.mxu1 %v10651_v38  ;;  %v10723_v38 = vld [vmem:[%s14970_s1 + $0xd88] ss:$16 sps:$4 sm:$0xff]  }
 0x1c4   :  { %4136 = vmatpush1.bf16.msra.mxu0 %v10648_v37  ;;  %4508 = vmatprep.subr.bf16.mxu1 %v10659_v41  ;;  %v10720_v37 = vld [vmem:[%s14970_s1 + $0x1180] ss:$16 sps:$4 sm:$0xff]   ;;  %v10731_v41 = vld [vmem:[%s14970_s1 + $0xdac] ss:$16 sps:$4 sm:$0xff]  }
 0x1c5   :  { %4137 = vmatprep.subr.bf16.mxu0 %v10656_v31  ;;  %4124 = vmatprep.mubr.bf16.mxu0 %v12900_v42  ;;  %v10728_v31 = vld [vmem:[%s14970_s1 + $0x11a4] ss:$16 sps:$4 sm:$0xff]  }
 0x1c6   :  { %4495 = vmatprep.mubr.bf16.mxu1 %v12452_v54  ;;  %v10668_v54 = vld [vmem:[%s14970_s1 + $0x1064] ss:$16 sps:$4 sm:$0xff]  }
 0x1c7   :  { %4509 = vmatpush1.bf16.msra.mxu1 %v10657_v44  ;;  %v10729_v44 = vld [vmem:[%s14970_s1 + $0xda8] ss:$16 sps:$4 sm:$0xff]  }
 0x1c8   :  { %4138 = vmatpush1.bf16.msra.mxu0 %v10654_v43  ;;  %4510 = vmatprep.subr.bf16.mxu1 %v10665_v19  ;;  %v10726_v43 = vld [vmem:[%s14970_s1 + $0x11a0] ss:$16 sps:$4 sm:$0xff]   ;;  %v10740_v19 = vld [vmem:[%s14970_s1 + $0xdcc] ss:$16 sps:$4 sm:$0xff]  }
 0x1c9   :  { %4139 = vmatprep.subr.bf16.mxu0 %v10662_v35  ;;  %v10737_v35 = vld [vmem:[%s14970_s1 + $0x11c4] ss:$16 sps:$4 sm:$0xff]  }
 0x1ca   :  { %4496 = vmatmul.mubr.bf16.gmra.mrb[12].mxu1 %v12471_v23  ;;  %v10677_v23 = vld [vmem:[%s14970_s1 + $0xc8c] ss:$16 sps:$4 sm:$0xff]  }
 0x1cb   :  { %4125 = vmatmul.mubr.bf16.gmra.mrb[4].mxu0 %v12921_v14  ;;  %4511 = vmatpush1.bf16.msra.mxu1 %v10663_v46  ;;  %v10738_v46 = vld [vmem:[%s14970_s1 + $0xdc8] ss:$16 sps:$4 sm:$0xff]  }
 0x1cc   :  { %4140 = vmatpush1.bf16.msra.mxu0 %v10660_v45  ;;  %4512 = vmatprep.subr.bf16.mxu1 %v10671_v40  ;;  %v10735_v45 = vld [vmem:[%s14970_s1 + $0x11c0] ss:$16 sps:$4 sm:$0xff]   ;;  %v10746_v40 = vld [vmem:[%s14970_s1 + $0xdec] ss:$16 sps:$4 sm:$0xff]  }
 0x1cd   :  { %4141 = vmatprep.subr.bf16.mxu0 %v10668_v54  ;;  %4167 = vmatprep.mubr.bf16.mxu0 %v12938_v47  ;;  %v10743_v54 = vld [vmem:[%s14970_s1 + $0x11e4] ss:$16 sps:$4 sm:$0xff]  }
 0x1ce   :  { %4538 = vmatprep.mubr.bf16.mxu1 %v12490_v32  ;;  %v10683_v32 = vld [vmem:[%s14970_s1 + $0xcac] ss:$16 sps:$4 sm:$0xff]  }
 0x1cf   :  { %4513 = vmatpush1.bf16.msra.mxu1 %v10669_v49  ;;  %v10744_v49 = vld [vmem:[%s14970_s1 + $0xde8] ss:$16 sps:$4 sm:$0xff]  }
 0x1d0   :  { %4142 = vmatpush1.bf16.msra.mxu0 %v10666_v48  ;;  %4514 = vmatprep.subr.bf16.mxu1 %v10677_v23  ;;  %v10741_v48 = vld [vmem:[%s14970_s1 + $0x11e0] ss:$16 sps:$4 sm:$0xff]  }
 0x1d1   :  { %4143 = vmatprep.subr.bf16.mxu0 %v10674_v50  ;;  %v10752_v50 = vld [vmem:[%s14970_s1 + $0xe0c] ss:$16 sps:$4 sm:$0xff]   ;;  %v13100_v23 = vld [vmem:[%s14971_s0 + $0x40] ss:$72 sps:$4 sm:$0xff]  }
 0x1d3   :  { %4515 = vmatpush1.bf16.msra.mxu1 %v10675_v53  ;;  %v13108_v53 = vld [vmem:[%s14971_s0 + $0xd4] ss:$72 sps:$4 sm:$0xff]  }
 0x1d4   :  { %4144 = vmatpush1.bf16.msra.mxu0 %v10672_v52  ;;  %4516 = vmatprep.subr.bf16.mxu1 %v10683_v32  ;;  %v10750_v52 = vld [vmem:[%s14970_s1 + $0xe08] ss:$16 sps:$4 sm:$0xff]  }
 0x1d5   :  { %4145 = vmatprep.subr.bf16.mxu0 %v10680_v25  ;;  %v10755_v25 = vld [vmem:[%s14970_s1 + $0xe2c] ss:$16 sps:$4 sm:$0xff]   ;;  %v10753_v32 = vld [vmem:[%s14970_s1 + $0xe28] ss:$16 sps:$4 sm:$0xff]  }
 0x1d7   :  { %4517 = vmatpush1.bf16.msra.mxu1 %v10681_v28  ;;  %v13126_v28 = vld [vmem:[%s14971_s0 + $0xd0] ss:$72 sps:$4 sm:$0xff]  }
 0x1d8   :  { %4146 = vmatpush1.bf16.msra.mxu0 %v10678_v55  ;;  %4518 = vmatprep.subr.bf16.mxu1 %v10689_v57  ;;  %v10761_v55 = vld [vmem:[%s14970_s1 + $0xe4c] ss:$16 sps:$4 sm:$0xff]   ;;  %v4711_v57 = vld [vmem:[%s14972_s3] sm:$0xff] }
 0x1d9   :  { %4147 = vmatprep.subr.bf16.mxu0 %v10686_v56  ;;  %v10764_v56 = vld [vmem:[%s14970_s1 + $0xe6c] ss:$16 sps:$4 sm:$0xff]  }
 0x1db   :  { %4519 = vmatpush1.bf16.msra.mxu1 %v10687_v59 }
 0x1dc   :  { %4148 = vmatpush1.bf16.msra.mxu0 %v10684_v58  ;;  %4520 = vmatprep.subr.bf16.mxu1 %v10695_v1  ;;  %v4715_v58 = vld [vmem:[%s14972_s3 + $0x20] sm:$0xff] }
 0x1dd   :  { %4149 = vmatprep.subr.bf16.mxu0 %v10692_v63  ;;  %v9297_v59 = vcombine.low %v4711_v57, %v4715_v58  ;;  %v9298_v63 = vcombine.high %v4711_v57, %v4715_v58  ;;  %v4719_v1 = vld [vmem:[%s14972_s3 + $0x40] sm:$0xff] }
 0x1de   :  { %v4783_v58 = vld [vmem:[%s14972_s3 + $0x240] sm:$0xff] }
 0x1df   :  { %4521 = vmatpush1.bf16.msra.mxu1 %v10693_v6  ;;  %v4727_v6 = vld [vmem:[%s14972_s3 + $0x80] sm:$0xff] }
 0x1e0   :  { %4150 = vmatpush1.bf16.msra.mxu0 %v10690_v3  ;;  %4522 = vmatprep.subr.bf16.mxu1 %v10701_v7  ;;  %v10765_v7 = vld [vmem:[%s14970_s1 + $0xe88] ss:$16 sps:$4 sm:$0xff]  }
 0x1e1   :  { %4151 = vmatprep.subr.bf16.mxu0 %v10698_v51  ;;  %v4731_v51 = vld [vmem:[%s14972_s3 + $0xa0] sm:$0xff] }
 0x1e3   :  { %4523 = vmatpush1.bf16.msra.mxu1 %v10699_v39  ;;  %v10770_v39 = vld [vmem:[%s14970_s1 + $0xeac] ss:$16 sps:$4 sm:$0xff]  }
 0x1e4   :  { %4152 = vmatpush1.bf16.msra.mxu0 %v10696_v9  ;;  %4524 = vmatprep.subr.bf16.mxu1 %v10707_v11  ;;  %v4735_v11 = vld [vmem:[%s14972_s3 + $0xc0] sm:$0xff] }
 0x1e5   :  { %4153 = vmatprep.subr.bf16.mxu0 %v10704_v10  ;;  %v9314_v10 = vcombine.high %v4727_v6, %v4731_v51 }
 0x1e7   :  { %4525 = vmatpush1.bf16.msra.mxu1 %v10705_v13  ;;  %v10768_v13 = vld [vmem:[%s14970_s1 + $0xea8] ss:$16 sps:$4 sm:$0xff]  }
 0x1e8   :  { %4154 = vmatpush1.bf16.msra.mxu0 %v10702_v12  ;;  %4526 = vmatprep.subr.bf16.mxu1 %v10713_v17  ;;  %v4739_v12 = vld [vmem:[%s14972_s3 + $0xe0] sm:$0xff]  ;;  %v10773_v17 = vld [vmem:[%s14970_s1 + $0xecc] ss:$16 sps:$4 sm:$0xff]  }
 0x1e9   :  { %4155 = vmatprep.subr.bf16.mxu0 %v10710_v16  ;;  %v9313_v16 = vcombine.low %v4727_v6, %v4731_v51  ;;  %v10794_v51 = vld [vmem:[%s14970_s1 + $0xfac] ss:$16 sps:$4 sm:$0xff]  }
 0x1eb   :  { %4527 = vmatpush1.bf16.msra.mxu1 %v10711_v20  ;;  %v4743_v20 = vld [vmem:[%s14972_s3 + $0x100] sm:$0xff] }
 0x1ec   :  { %4156 = vmatpush1.bf16.msra.mxu0 %v10708_v18  ;;  %4528 = vmatprep.subr.bf16.mxu1 %v10719_v4  ;;  %v9322_v18 = vcombine.high %v4735_v11, %v4739_v12  ;;  %v10771_v4 = vld [vmem:[%s14970_s1 + $0xec8] ss:$16 sps:$4 sm:$0xff]  }
 0x1ed   :  { %4157 = vmatprep.subr.bf16.mxu0 %v10716_v22  ;;  %v4747_v22 = vld [vmem:[%s14972_s3 + $0x120] sm:$0xff] }
 0x1ef   :  { %4529 = vmatpush1.bf16.msra.mxu1 %v10717_v27  ;;  %v10776_v27 = vld [vmem:[%s14970_s1 + $0xeec] ss:$16 sps:$4 sm:$0xff]  }
 0x1f0   :  { %4158 = vmatpush1.bf16.msra.mxu0 %v10714_v26  ;;  %4530 = vmatprep.subr.bf16.mxu1 %v10725_v30  ;;  %v9321_v26 = vcombine.low %v4735_v11, %v4739_v12  ;;  %v4751_v30 = vld [vmem:[%s14972_s3 + $0x140] sm:$0xff]  ;;  %v10798_v11 = vld [vmem:[%s14970_s1 + $0xfe8] ss:$16 sps:$4 sm:$0xff]   ;;  %v10803_v12 = vld [vmem:[%s14970_s1 + $0x100c] ss:$16 sps:$4 sm:$0xff]  }
 0x1f1   :  { %4159 = vmatprep.subr.bf16.mxu0 %v10722_v33  ;;  %v9330_v33 = vcombine.high %v4743_v20, %v4747_v22 }
 0x1f3   :  { %4531 = vmatpush1.bf16.msra.mxu1 %v10723_v38  ;;  %v10774_v38 = vld [vmem:[%s14970_s1 + $0xee8] ss:$16 sps:$4 sm:$0xff]  }
 0x1f4   :  { %4160 = vmatpush1.bf16.msra.mxu0 %v10720_v37  ;;  %4532 = vmatprep.subr.bf16.mxu1 %v10731_v41  ;;  %v4755_v37 = vld [vmem:[%s14972_s3 + $0x160] sm:$0xff]  ;;  %v10779_v41 = vld [vmem:[%s14970_s1 + $0xf0c] ss:$16 sps:$4 sm:$0xff]  }
 0x1f5   :  { %4161 = vmatprep.subr.bf16.mxu0 %v10728_v31  ;;  %v9329_v31 = vcombine.low %v4743_v20, %v4747_v22  ;;  %v10807_v20 = vld [vmem:[%s14970_s1 + $0x1048] ss:$16 sps:$4 sm:$0xff]   ;;  %v10815_v22 = vld [vmem:[%s14970_s1 + $0x108c] ss:$16 sps:$4 sm:$0xff]  }
 0x1f7   :  { %4533 = vmatpush1.bf16.msra.mxu1 %v10729_v44  ;;  %v4759_v44 = vld [vmem:[%s14972_s3 + $0x180] sm:$0xff] }
 0x1f8   :  { %4162 = vmatpush1.bf16.msra.mxu0 %v10726_v43  ;;  %4534 = vmatprep.subr.bf16.mxu1 %v10740_v19  ;;  %v9338_v43 = vcombine.high %v4751_v30, %v4755_v37  ;;  %v10777_v19 = vld [vmem:[%s14970_s1 + $0xf08] ss:$16 sps:$4 sm:$0xff]  }
 0x1f9   :  { %4163 = vmatprep.subr.bf16.mxu0 %v10737_v35  ;;  %v4763_v35 = vld [vmem:[%s14972_s3 + $0x1a0] sm:$0xff] }
 0x1fb   :  { %4535 = vmatpush1.bf16.msra.mxu1 %v10738_v46  ;;  %v10782_v46 = vld [vmem:[%s14970_s1 + $0xf2c] ss:$16 sps:$4 sm:$0xff]  }
 0x1fc   :  { %4164 = vmatpush1.bf16.msra.mxu0 %v10735_v45  ;;  %4536 = vmatprep.subr.bf16.mxu1 %v10746_v40  ;;  %v9337_v45 = vcombine.low %v4751_v30, %v4755_v37  ;;  %v4767_v40 = vld [vmem:[%s14972_s3 + $0x1c0] sm:$0xff] }
 0x1fd   :  { %4165 = vmatprep.subr.bf16.mxu0 %v10743_v54  ;;  %v9346_v54 = vcombine.high %v4759_v44, %v4763_v35 }
 0x1ff   :  { %4537 = vmatpush1.bf16.msra.mxu1 %v10744_v49  ;;  %v10780_v49 = vld [vmem:[%s14970_s1 + $0xf28] ss:$16 sps:$4 sm:$0xff]  }
 0x200   :  { %4166 = vmatpush1.bf16.msra.mxu0 %v10741_v48  ;;  %4559 = vmatprep.subr.bf16.mxu1 %v10752_v50  ;;  %v4771_v48 = vld [vmem:[%s14972_s3 + $0x1e0] sm:$0xff]  ;;  %v9345_v50 = vcombine.low %v4759_v44, %v4763_v35 }
 0x201   :  { %6289 = vmatprep.subr.bf16.mxu0 %v9298_v63 }
 0x202   :  { %4539 = vmatmul.mubr.bf16.vlgmr.msra.gmra.mrb[8].mxu1 %v12649_v62  ;;  %v10759_v62 = vld [vmem:[%s14970_s1 + $0xe48] ss:$16 sps:$4 sm:$0xff]  }
 0x203   :  { %4168 = vmatmul.mubr.bf16.vlgmr.msra.gmra.mrb[0].mxu0 %v13100_v23  ;;  %4560 = vmatpush1.bf16.msra.mxu1 %v10750_v52  ;;  %v10785_v52 = vld [vmem:[%s14970_s1 + $0xf4c] ss:$16 sps:$4 sm:$0xff]  }
 0x204   :  { %4177 = vmatprep.mubr.bf16.mxu0 %v13108_v53  ;;  %4561 = vmatprep.subr.bf16.mxu1 %v10755_v25  ;;  %v9354_v25 = vcombine.high %v4767_v40, %v4771_v48 }
 0x205   :  { %4548 = vmatprep.mubr.bf16.mxu1 %v12672_v8  ;;  %v10762_v8 = vld [vmem:[%s14970_s1 + $0xe68] ss:$16 sps:$4 sm:$0xff]   ;;  %6290 = vmatpush1.bf16.msra.mxu0 %v9297_v59 }
 0x206   :  { %v10786_v59 = vld [vmem:[%s14970_s1 + $0xf68] ss:$16 sps:$4 sm:$0xff]  }
 0x207   :  { %4562 = vmatpush1.bf16.msra.mxu1 %v10753_v32  ;;  %v4775_v32 = vld [vmem:[%s14972_s3 + $0x200] sm:$0xff] }
 0x208   :  { %4563 = vmatprep.subr.bf16.mxu1 %v10761_v55  ;;  %v4779_v55 = vld [vmem:[%s14972_s3 + $0x220] sm:$0xff] }
 0x209   :  { %v9362_v57 = vcombine.high %v4775_v32, %v4779_v55  ;;  %v9361_v63 = vcombine.low %v4775_v32, %v4779_v55 }
 0x20a   :  { %4549 = vmatmul.mubr.bf16.gmra.mrb[12].mxu1 %v12697_v15  ;;  %v10767_v15 = vld [vmem:[%s14970_s1 + $0xe8c] ss:$16 sps:$4 sm:$0xff]  }
 0x20b   :  { %4178 = vmatmul.mubr.bf16.gmra.mrb[4].mxu0 %v13126_v28  ;;  %4564 = vmatpush1.bf16.msra.mxu1 %v10759_v62  ;;  %v10783_v62 = vld [vmem:[%s14970_s1 + $0xf48] ss:$16 sps:$4 sm:$0xff]  }
 0x20c   :  { %4591 = vmatprep.mubr.bf16.mxu1 %v12714_v21  ;;  %4565 = vmatprep.subr.bf16.mxu1 %v10764_v56  ;;  %v4723_v21 = vld [vmem:[%s14972_s3 + $0x60] sm:$0xff]  ;;  %v9353_v56 = vcombine.low %v4767_v40, %v4771_v48 }
 0x20d   :  { %v9306_v3 = vcombine.high %v4719_v1, %v4723_v21  ;;  %v9305_v9 = vcombine.low %v4719_v1, %v4723_v21  ;;  %v10791_v1 = vld [vmem:[%s14970_s1 + $0xf8c] ss:$16 sps:$4 sm:$0xff]  }
 0x20f   :  { %4566 = vmatpush1.bf16.msra.mxu1 %v10762_v8  ;;  %6291 = vmatprep.subr.bf16.mxu0 %v9306_v3  ;;  %v10788_v8 = vld [vmem:[%s14970_s1 + $0xf6c] ss:$16 sps:$4 sm:$0xff]   ;;  %v10789_v3 = vld [vmem:[%s14970_s1 + $0xf88] ss:$16 sps:$4 sm:$0xff]  }
 0x210   :  { %4567 = vmatprep.subr.bf16.mxu1 %v10767_v15  ;;  %6292 = vmatpush1.bf16.msra.mxu0 %v9305_v9  ;;  %v4787_v15 = vld [vmem:[%s14972_s3 + $0x260] sm:$0xff]  ;;  %v10797_v9 = vld [vmem:[%s14970_s1 + $0xfcc] ss:$16 sps:$4 sm:$0xff]  }
 0x211   :  { %6293 = vmatprep.subr.bf16.mxu0 %v9314_v10  ;;  %v9370_v21 = vcombine.high %v4783_v58, %v4787_v15  ;;  %v9369_v6 = vcombine.low %v4783_v58, %v4787_v15  ;;  %v10800_v10 = vld [vmem:[%s14970_s1 + $0xfec] ss:$16 sps:$4 sm:$0xff]  }
 0x213   :  { %4568 = vmatpush1.bf16.msra.mxu1 %v10765_v7  ;;  %v10792_v7 = vld [vmem:[%s14970_s1 + $0xfa8] ss:$16 sps:$4 sm:$0xff]  }
 0x214   :  { %4569 = vmatprep.subr.bf16.mxu1 %v10770_v39  ;;  %6294 = vmatpush1.bf16.msra.mxu0 %v9313_v16  ;;  %v10795_v39 = vld [vmem:[%s14970_s1 + $0xfc8] ss:$16 sps:$4 sm:$0xff]   ;;  %v10806_v16 = vld [vmem:[%s14970_s1 + $0x102c] ss:$16 sps:$4 sm:$0xff]  }
 0x215   :  { %6295 = vmatprep.subr.bf16.mxu0 %v9322_v18  ;;  %v10809_v18 = vld [vmem:[%s14970_s1 + $0x104c] ss:$16 sps:$4 sm:$0xff]  }
 0x217   :  { %4570 = vmatpush1.bf16.msra.mxu1 %v10768_v13  ;;  %v10801_v13 = vld [vmem:[%s14970_s1 + $0x1008] ss:$16 sps:$4 sm:$0xff]  }
 0x218   :  { %4571 = vmatprep.subr.bf16.mxu1 %v10773_v17  ;;  %6296 = vmatpush1.bf16.msra.mxu0 %v9321_v26  ;;  %v10804_v17 = vld [vmem:[%s14970_s1 + $0x1028] ss:$16 sps:$4 sm:$0xff]   ;;  %v4791_v26 = vld [vmem:[%s14972_s3 + $0x280] sm:$0xff] }
 0x219   :  { %6297 = vmatprep.subr.bf16.mxu0 %v9330_v33  ;;  %v10821_v33 = vld [vmem:[%s14970_s1 + $0x10cc] ss:$16 sps:$4 sm:$0xff]  }
 0x21b   :  { %4572 = vmatpush1.bf16.msra.mxu1 %v10771_v4  ;;  %v10813_v4 = vld [vmem:[%s14970_s1 + $0x1088] ss:$16 sps:$4 sm:$0xff]  }
 0x21c   :  { %4573 = vmatprep.subr.bf16.mxu1 %v10776_v27  ;;  %6298 = vmatpush1.bf16.msra.mxu0 %v9329_v31  ;;  %v4795_v27 = vld [vmem:[%s14972_s3 + $0x2a0] sm:$0xff] }
 0x21d   :  { %6299 = vmatprep.subr.bf16.mxu0 %v9338_v43  ;;  %v9378_v30 = vcombine.high %v4791_v26, %v4795_v27  ;;  %v9377_v37 = vcombine.low %v4791_v26, %v4795_v27  ;;  %v4799_v31 = vld [vmem:[%s14972_s3 + $0x2c0] sm:$0xff]  ;;  %v10824_v43 = vld [vmem:[%s14970_s1 + $0x10ec] ss:$16 sps:$4 sm:$0xff]  }
 0x21f   :  { %4574 = vmatpush1.bf16.msra.mxu1 %v10774_v38  ;;  %v10819_v38 = vld [vmem:[%s14970_s1 + $0x10c8] ss:$16 sps:$4 sm:$0xff]  }
 0x220   :  { %4575 = vmatprep.subr.bf16.mxu1 %v10779_v41  ;;  %6300 = vmatpush1.bf16.msra.mxu0 %v9337_v45  ;;  %v4803_v41 = vld [vmem:[%s14972_s3 + $0x2e0] sm:$0xff] }
 0x221   :  { %6301 = vmatprep.subr.bf16.mxu0 %v9346_v54  ;;  %v9386_v44 = vcombine.high %v4799_v31, %v4803_v41  ;;  %v9385_v35 = vcombine.low %v4799_v31, %v4803_v41  ;;  %v4807_v45 = vld [vmem:[%s14972_s3 + $0x300] sm:$0xff]  ;;  %v10827_v54 = vld [vmem:[%s14970_s1 + $0x110c] ss:$16 sps:$4 sm:$0xff]  }
 0x222   :  { %v4736_v31 = vld [vmem:[%s14972_s3 + $0xc8] sm:$0xff] }
 0x223   :  { %4576 = vmatpush1.bf16.msra.mxu1 %v10777_v19  ;;  %v10822_v19 = vld [vmem:[%s14970_s1 + $0x10e8] ss:$16 sps:$4 sm:$0xff]  }
 0x224   :  { %4577 = vmatprep.subr.bf16.mxu1 %v10782_v46  ;;  %6302 = vmatpush1.bf16.msra.mxu0 %v9345_v50  ;;  %v4811_v46 = vld [vmem:[%s14972_s3 + $0x320] sm:$0xff]  ;;  %v4740_v41 = vld [vmem:[%s14972_s3 + $0xe8] sm:$0xff] }
 0x225   :  { %6303 = vmatprep.subr.bf16.mxu0 %v9354_v25  ;;  %v9394_v40 = vcombine.high %v4807_v45, %v4811_v46  ;;  %v9393_v48 = vcombine.low %v4807_v45, %v4811_v46  ;;  %v4815_v50 = vld [vmem:[%s14972_s3 + $0x340] sm:$0xff]  ;;  %v10830_v25 = vld [vmem:[%s14970_s1 + $0x112c] ss:$16 sps:$4 sm:$0xff]  }
 0x226   :  { %v4752_v45 = vld [vmem:[%s14972_s3 + $0x148] sm:$0xff] }
 0x227   :  { %4578 = vmatpush1.bf16.msra.mxu1 %v10780_v49  ;;  %v10825_v49 = vld [vmem:[%s14970_s1 + $0x1108] ss:$16 sps:$4 sm:$0xff]  }
 0x228   :  { %4579 = vmatprep.subr.bf16.mxu1 %v10785_v52  ;;  %6304 = vmatpush1.bf16.msra.mxu0 %v9353_v56  ;;  %v4819_v52 = vld [vmem:[%s14972_s3 + $0x360] sm:$0xff]  ;;  %v4756_v46 = vld [vmem:[%s14972_s3 + $0x168] sm:$0xff] }
 0x229   :  { %6305 = vmatprep.subr.bf16.mxu0 %v9362_v57  ;;  %v9402_v32 = vcombine.high %v4815_v50, %v4819_v52  ;;  %v9401_v55 = vcombine.low %v4815_v50, %v4819_v52  ;;  %v4823_v56 = vld [vmem:[%s14972_s3 + $0x380] sm:$0xff]  ;;  %v10833_v57 = vld [vmem:[%s14970_s1 + $0x114c] ss:$16 sps:$4 sm:$0xff]  }
 0x22a   :  { %v4768_v52 = vld [vmem:[%s14972_s3 + $0x1c8] sm:$0xff] }
 0x22b   :  { %4580 = vmatpush1.bf16.msra.mxu1 %v10783_v62  ;;  %v10828_v62 = vld [vmem:[%s14970_s1 + $0x1128] ss:$16 sps:$4 sm:$0xff]  }
 0x22c   :  { %4581 = vmatprep.subr.bf16.mxu1 %v10788_v8  ;;  %6306 = vmatpush1.bf16.msra.mxu0 %v9361_v63  ;;  %v4827_v8 = vld [vmem:[%s14972_s3 + $0x3a0] sm:$0xff] }
 0x22d   :  { %6307 = vmatprep.subr.bf16.mxu0 %v9370_v21  ;;  %v9410_v58 = vcombine.high %v4823_v56, %v4827_v8  ;;  %v9409_v15 = vcombine.low %v4823_v56, %v4827_v8  ;;  %v4831_v63 = vld [vmem:[%s14972_s3 + $0x3c0] sm:$0xff]  ;;  %v10836_v21 = vld [vmem:[%s14970_s1 + $0x116c] ss:$16 sps:$4 sm:$0xff]  }
 0x22e   :  { %v4780_v56 = vld [vmem:[%s14972_s3 + $0x228] sm:$0xff] }
 0x22f   :  { %4582 = vmatpush1.bf16.msra.mxu1 %v10786_v59  ;;  %v10831_v59 = vld [vmem:[%s14970_s1 + $0x1148] ss:$16 sps:$4 sm:$0xff]  }
 0x230   :  { %4583 = vmatprep.subr.bf16.mxu1 %v10791_v1  ;;  %6308 = vmatpush1.bf16.msra.mxu0 %v9369_v6  ;;  %v4835_v1 = vld [vmem:[%s14972_s3 + $0x3e0] sm:$0xff] }
 0x231   :  { %6309 = vmatprep.subr.bf16.mxu0 %v9378_v30  ;;  %v9417_v6 = vcombine.low %v4831_v63, %v4835_v1  ;;  %v4732_v30 = vld [vmem:[%s14972_s3 + $0xa8] sm:$0xff] }
 0x233   :  { %4584 = vmatpush1.bf16.msra.mxu1 %v10789_v3  ;;  %v9418_v3 = vcombine.high %v4831_v63, %v4835_v1  ;;  %v4792_v1 = vld [vmem:[%s14972_s3 + $0x288] sm:$0xff] }
 0x234   :  { %4585 = vmatprep.subr.bf16.mxu1 %v10794_v51  ;;  %6310 = vmatpush1.bf16.msra.mxu0 %v9377_v37  ;;  %v10834_v51 = vld [vmem:[%s14970_s1 + $0x1168] ss:$16 sps:$4 sm:$0xff]  }
 0x235   :  { %6311 = vmatprep.subr.bf16.mxu0 %v9386_v44  ;;  %v9324_v44 = vcombine.high %v4736_v31, %v4740_v41 }
 0x237   :  { %4586 = vmatpush1.bf16.msra.mxu1 %v10792_v7  ;;  %v10839_v7 = vld [vmem:[%s14970_s1 + $0x118c] ss:$16 sps:$4 sm:$0xff]  }
 0x238   :  { %4587 = vmatprep.subr.bf16.mxu1 %v10797_v9  ;;  %6312 = vmatpush1.bf16.msra.mxu0 %v9385_v35  ;;  %v13390_v9 = vld [vmem:[%s14972_s3 + $0x400] sm:$0xff]  ;;  %v9323_v35 = vcombine.low %v4736_v31, %v4740_v41  ;;  %v13529_v31 = vld [vmem:[%s14972_s3 + $0x428] sm:$0xff] }
 0x239   :  { %6313 = vmatprep.subr.bf16.mxu0 %v9394_v40  ;;  %v9340_v40 = vcombine.high %v4752_v45, %v4756_v46 }
 0x23b   :  { %4588 = vmatpush1.bf16.msra.mxu1 %v10795_v39  ;;  %v13395_v39 = vld [vmem:[%s14972_s3 + $0x420] sm:$0xff] }
 0x23c   :  { %4589 = vmatprep.subr.bf16.mxu1 %v10800_v10  ;;  %6314 = vmatpush1.bf16.msra.mxu0 %v9393_v48  ;;  %v10837_v10 = vld [vmem:[%s14970_s1 + $0x1188] ss:$16 sps:$4 sm:$0xff]  }
 0x23d   :  { %6315 = vmatprep.subr.bf16.mxu0 %v9402_v32  ;;  %v4764_v48 = vld [vmem:[%s14972_s3 + $0x1a8] sm:$0xff] }
 0x23f   :  { %4590 = vmatpush1.bf16.msra.mxu1 %v10798_v11  ;;  %v9425_v11 = vcombine.low %v13390_v9, %v13395_v39 }
 0x240   :  { %4612 = vmatprep.subr.bf16.mxu1 %v10803_v12  ;;  %6316 = vmatpush1.bf16.msra.mxu0 %v9401_v55  ;;  %v9426_v12 = vcombine.high %v13390_v9, %v13395_v39  ;;  %v4864_v9 = vld [vmem:[%s14972_s3 + $0x4c8] sm:$0xff] }
 0x241   :  { %6317 = vmatprep.subr.bf16.mxu0 %v9410_v58  ;;  %v4784_v58 = vld [vmem:[%s14972_s3 + $0x248] sm:$0xff] }
 0x242   :  { %4592 = vmatmul.mubr.bf16.vlgmr.msra.gmra.mrb[8].mxu1 %v12883_v36  ;;  %v10812_v36 = vld [vmem:[%s14970_s1 + $0x106c] ss:$16 sps:$4 sm:$0xff]  }
 0x243   :  { %4613 = vmatpush1.bf16.msra.mxu1 %v10801_v13  ;;  %4601 = vmatprep.mubr.bf16.mxu1 %v12900_v42  ;;  %v10810_v42 = vld [vmem:[%s14970_s1 + $0x1068] ss:$16 sps:$4 sm:$0xff]   ;;  %v10842_v13 = vld [vmem:[%s14970_s1 + $0x11ac] ss:$16 sps:$4 sm:$0xff]  }
 0x244   :  { %4614 = vmatprep.subr.bf16.mxu1 %v10806_v16  ;;  %6318 = vmatpush1.bf16.msra.mxu0 %v9409_v15  ;;  %v10840_v16 = vld [vmem:[%s14970_s1 + $0x11a8] ss:$16 sps:$4 sm:$0xff]  }
 0x245   :  { %6319 = vmatprep.subr.bf16.mxu0 %v9418_v3  ;;  %v4788_v15 = vld [vmem:[%s14972_s3 + $0x268] sm:$0xff] }
 0x246   :  { %v9372_v63 = vcombine.high %v4784_v58, %v4788_v15  ;;  %v9371_v3 = vcombine.low %v4784_v58, %v4788_v15  ;;  %v4868_v39 = vld [vmem:[%s14972_s3 + $0x4e8] sm:$0xff] }
 0x247   :  { %4615 = vmatpush1.bf16.msra.mxu1 %v10804_v17  ;;  %v10845_v17 = vld [vmem:[%s14970_s1 + $0x11cc] ss:$16 sps:$4 sm:$0xff]  }
 0x248   :  { %4616 = vmatprep.subr.bf16.mxu1 %v10809_v18  ;;  %6320 = vmatpush1.bf16.msra.mxu0 %v9417_v6  ;;  %v10843_v18 = vld [vmem:[%s14970_s1 + $0x11c8] ss:$16 sps:$4 sm:$0xff]  }
 0x249   :  { %6330 = vmatprep.subr.bf16.mxu0 %v9426_v12 }
 0x24a   :  { %4602 = vmatmul.mubr.bf16.gmra.mrb[12].mxu1 %v12921_v14  ;;  %v10818_v14 = vld [vmem:[%s14970_s1 + $0x10ac] ss:$16 sps:$4 sm:$0xff]  }
 0x24b   :  { %4617 = vmatpush1.bf16.msra.mxu1 %v10807_v20  ;;  %4644 = vmatprep.mubr.bf16.mxu1 %v12938_v47  ;;  %v10816_v47 = vld [vmem:[%s14970_s1 + $0x10a8] ss:$16 sps:$4 sm:$0xff]   ;;  %v10848_v20 = vld [vmem:[%s14970_s1 + $0x11ec] ss:$16 sps:$4 sm:$0xff]  }
 0x24c   :  { %4618 = vmatprep.subr.bf16.mxu1 %v10812_v36  ;;  %v4712_v36 = vld [vmem:[%s14972_s3 + $0x8] sm:$0xff] }
 0x24f   :  { %4619 = vmatpush1.bf16.msra.mxu1 %v10810_v42  ;;  %v4716_v42 = vld [vmem:[%s14972_s3 + $0x28] sm:$0xff] }
 0x250   :  { %4620 = vmatprep.subr.bf16.mxu1 %v10815_v22  ;;  %v10846_v22 = vld [vmem:[%s14970_s1 + $0x11e8] ss:$16 sps:$4 sm:$0xff]   ;;  %v9299_v26 = vcombine.low %v4712_v36, %v4716_v42 }
 0x253   :  { %4621 = vmatpush1.bf16.msra.mxu1 %v10813_v4  ;;  %v9300_v4 = vcombine.high %v4712_v36, %v4716_v42  ;;  %v4820_v36 = vld [vmem:[%s14972_s3 + $0x368] sm:$0xff] }
 0x254   :  { %4622 = vmatprep.subr.bf16.mxu1 %v10818_v14  ;;  %v4720_v14 = vld [vmem:[%s14972_s3 + $0x48] sm:$0xff] }
 0x257   :  { %4623 = vmatpush1.bf16.msra.mxu1 %v10816_v47  ;;  %v4724_v47 = vld [vmem:[%s14972_s3 + $0x68] sm:$0xff] }
 0x258   :  { %4624 = vmatprep.subr.bf16.mxu1 %v10821_v33  ;;  %v9308_v27 = vcombine.high %v4720_v14, %v4724_v47  ;;  %v4728_v33 = vld [vmem:[%s14972_s3 + $0x88] sm:$0xff]  ;;  %v9307_v37 = vcombine.low %v4720_v14, %v4724_v47 }
 0x259   :  { %v4828_v14 = vld [vmem:[%s14972_s3 + $0x3a8] sm:$0xff] }
 0x25b   :  { %4625 = vmatpush1.bf16.msra.mxu1 %v10819_v38  ;;  %v9316_v38 = vcombine.high %v4728_v33, %v4732_v30 }
 0x25c   :  { %4626 = vmatprep.subr.bf16.mxu1 %v10824_v43  ;;  %v9315_v43 = vcombine.low %v4728_v33, %v4732_v30  ;;  %v4836_v33 = vld [vmem:[%s14972_s3 + $0x3e8] sm:$0xff] }
 0x25f   :  { %4627 = vmatpush1.bf16.msra.mxu1 %v10822_v19 }
 0x260   :  { %4628 = vmatprep.subr.bf16.mxu1 %v10827_v54 }
 0x263   :  { %4629 = vmatpush1.bf16.msra.mxu1 %v10825_v49  ;;  %v9339_v49 = vcombine.low %v4752_v45, %v4756_v46 }
 0x264   :  { %4630 = vmatprep.subr.bf16.mxu1 %v10830_v25  ;;  %v4772_v25 = vld [vmem:[%s14972_s3 + $0x1e8] sm:$0xff] }
 0x265   :  { %v9356_v55 = vcombine.high %v4768_v52, %v4772_v25  ;;  %v9355_v8 = vcombine.low %v4768_v52, %v4772_v25 }
 0x267   :  { %4631 = vmatpush1.bf16.msra.mxu1 %v10828_v62  ;;  %v4776_v62 = vld [vmem:[%s14972_s3 + $0x208] sm:$0xff] }
 0x268   :  { %4632 = vmatprep.subr.bf16.mxu1 %v10833_v57  ;;  %v9364_v57 = vcombine.high %v4776_v62, %v4780_v56 }
 0x26b   :  { %4633 = vmatpush1.bf16.msra.mxu1 %v10831_v59  ;;  %v9363_v59 = vcombine.low %v4776_v62, %v4780_v56 }
 0x26c   :  { %4634 = vmatprep.subr.bf16.mxu1 %v10836_v21  ;;  %v4796_v21 = vld [vmem:[%s14972_s3 + $0x2a8] sm:$0xff] }
 0x26d   :  { %v9380_v6 = vcombine.high %v4792_v1, %v4796_v21 }
 0x26f   :  { %4635 = vmatpush1.bf16.msra.mxu1 %v10834_v51  ;;  %v4800_v51 = vld [vmem:[%s14972_s3 + $0x2c8] sm:$0xff] }
 0x270   :  { %4636 = vmatprep.subr.bf16.mxu1 %v10839_v7  ;;  %v4804_v7 = vld [vmem:[%s14972_s3 + $0x2e8] sm:$0xff] }
 0x271   :  { %v9388_v12 = vcombine.high %v4800_v51, %v4804_v7 }
 0x273   :  { %4637 = vmatpush1.bf16.msra.mxu1 %v10837_v10  ;;  %v9379_v10 = vcombine.low %v4792_v1, %v4796_v21  ;;  %v4847_v1 = vld [vmem:[%s14972_s3 + $0x440] sm:$0xff]  ;;  %v13567_v21 = vld [vmem:[%s14972_s3 + $0x10] sm:$0xff] }
 0x274   :  { %4638 = vmatprep.subr.bf16.mxu1 %v10842_v13  ;;  %v4808_v13 = vld [vmem:[%s14972_s3 + $0x308] sm:$0xff] }
 0x277   :  { %4639 = vmatpush1.bf16.msra.mxu1 %v10840_v16  ;;  %v4812_v16 = vld [vmem:[%s14972_s3 + $0x328] sm:$0xff] }
 0x278   :  { %4640 = vmatprep.subr.bf16.mxu1 %v10845_v17  ;;  %v9387_v17 = vcombine.low %v4800_v51, %v4804_v7  ;;  %v9395_v42 = vcombine.low %v4808_v13, %v4812_v16  ;;  %v4848_v7 = vld [vmem:[%s14972_s3 + $0x448] sm:$0xff] }
 0x27b   :  { %4641 = vmatpush1.bf16.msra.mxu1 %v10843_v18  ;;  %v9396_v18 = vcombine.high %v4808_v13, %v4812_v16 }
 0x27c   :  { %4642 = vmatprep.subr.bf16.mxu1 %v10848_v20  ;;  %v4816_v20 = vld [vmem:[%s14972_s3 + $0x348] sm:$0xff] }
 0x27d   :  { %v9403_v47 = vcombine.low %v4816_v20, %v4820_v36 }
 0x27f   :  { %4643 = vmatpush1.bf16.msra.mxu1 %v10846_v22  ;;  %v9404_v22 = vcombine.high %v4816_v20, %v4820_v36 }
 0x280   :  { %6371 = vmatprep.subr.bf16.mxu1 %v9300_v4  ;;  %v4824_v4 = vld [vmem:[%s14972_s3 + $0x388] sm:$0xff] }
 0x281   :  { %v9411_v30 = vcombine.low %v4824_v4, %v4828_v14 }
 0x282   :  { %4645 = vmatmul.mubr.bf16.vlgmr.msra.gmra.mrb[8].mxu1 %v13100_v23  ;;  %v4744_v23 = vld [vmem:[%s14972_s3 + $0x108] sm:$0xff] }
 0x283   :  { %4654 = vmatprep.mubr.bf16.mxu1 %v13108_v53  ;;  %6372 = vmatpush1.bf16.msra.mxu1 %v9299_v26  ;;  %v4748_v53 = vld [vmem:[%s14972_s3 + $0x128] sm:$0xff]  ;;  %v9412_v26 = vcombine.high %v4824_v4, %v4828_v14  ;;  %v4859_v4 = vld [vmem:[%s14972_s3 + $0x4a0] sm:$0xff] }
 0x284   :  { %6373 = vmatprep.subr.bf16.mxu1 %v9308_v27  ;;  %v9332_v19 = vcombine.high %v4744_v23, %v4748_v53  ;;  %v9331_v54 = vcombine.low %v4744_v23, %v4748_v53  ;;  %v4832_v27 = vld [vmem:[%s14972_s3 + $0x3c8] sm:$0xff] }
 0x285   :  { %v9419_v41 = vcombine.low %v4832_v27, %v4836_v33  ;;  %v4856_v14 = vld [vmem:[%s14972_s3 + $0x488] sm:$0xff] }
 0x287   :  { %6374 = vmatpush1.bf16.msra.mxu1 %v9307_v37  ;;  %v9420_v37 = vcombine.high %v4832_v27, %v4836_v33 }
 0x288   :  { %6375 = vmatprep.subr.bf16.mxu1 %v9316_v38  ;;  %v13524_v38 = vld [vmem:[%s14972_s3 + $0x408] sm:$0xff] }
 0x28a   :  { %4655 = vmatmul.mubr.bf16.gmra.mrb[12].mxu1 %v13126_v28  ;;  %v4760_v28 = vld [vmem:[%s14972_s3 + $0x188] sm:$0xff] }
 0x28b   :  { %6376 = vmatpush1.bf16.msra.mxu1 %v9315_v43  ;;  %v9348_v50 = vcombine.high %v4760_v28, %v4764_v48  ;;  %v9347_v32 = vcombine.low %v4760_v28, %v4764_v48  ;;  %v9428_v43 = vcombine.high %v13524_v38, %v13529_v31 }
 0x28c   :  { %6377 = vmatprep.subr.bf16.mxu1 %v9324_v44 }
 0x28f   :  { %6378 = vmatpush1.bf16.msra.mxu1 %v9323_v35  ;;  %v4679_v35 = vlaneseq }
 0x290   :  { %6379 = vmatprep.subr.bf16.mxu1 %v9332_v19 }
 0x291   :  { %v13537_v48 = vshrl.u32 %v4679_v35, 7  ;;  %v4876_v35 = vld [vmem:[%s14972_s3 + $0x528] sm:$0xff] }
 0x293   :  { %6380 = vmatpush1.bf16.msra.mxu1 %v9331_v54 }
 0x294   :  { %6381 = vmatprep.subr.bf16.mxu1 %v9340_v40 }
 0x297   :  { %6382 = vmatpush1.bf16.msra.mxu1 %v9339_v49 }
 0x298   :  { %6383 = vmatprep.subr.bf16.mxu1 %v9348_v50 }
 0x29b   :  { %6384 = vmatpush1.bf16.msra.mxu1 %v9347_v32 }
 0x29c   :  { %6385 = vmatprep.subr.bf16.mxu1 %v9356_v55 }
 0x29f   :  { %6386 = vmatpush1.bf16.msra.mxu1 %v9355_v8 }
 0x2a0   :  { %6387 = vmatprep.subr.bf16.mxu1 %v9364_v57 }
 0x2a3   :  { %6388 = vmatpush1.bf16.msra.mxu1 %v9363_v59 }
 0x2a4   :  { %6389 = vmatprep.subr.bf16.mxu1 %v9372_v63 }
 0x2a7   :  { %6390 = vmatpush1.bf16.msra.mxu1 %v9371_v3  ;;  %v13572_v3 = vld [vmem:[%s14972_s3 + $0x30] sm:$0xff] }
 0x2a8   :  { %6391 = vmatprep.subr.bf16.mxu1 %v9380_v6  ;;  %v13577_v6 = vld [vmem:[%s14972_s3 + $0x18] sm:$0xff]  ;;  %v9301_v13 = vcombine.low %v13567_v21, %v13572_v3 }
 0x2ab   :  { %6392 = vmatpush1.bf16.msra.mxu1 %v9379_v10  ;;  %v4852_v10 = vld [vmem:[%s14972_s3 + $0x468] sm:$0xff] }
 0x2ac   :  { %6393 = vmatprep.subr.bf16.mxu1 %v9388_v12  ;;  %v13588_v12 = vld [vmem:[%s14972_s3 + $0x38] sm:$0xff]  ;;  %v9435_v27 = vcombine.low %v4848_v7, %v4852_v10 }
 0x2ad   :  { %v9303_v16 = vcombine.low %v13577_v6, %v13588_v12 }
 0x2af   :  { %6394 = vmatpush1.bf16.msra.mxu1 %v9387_v17 }
 0x2b0   :  { %6395 = vmatprep.subr.bf16.mxu1 %v9396_v18  ;;  %v9427_v18 = vcombine.low %v13524_v38, %v13529_v31  ;;  %v4867_v38 = vld [vmem:[%s14972_s3 + $0x4e0] sm:$0xff] }
 0x2b3   :  { %6396 = vmatpush1.bf16.msra.mxu1 %v9395_v42  ;;  %v9436_v42 = vcombine.high %v4848_v7, %v4852_v10  ;;  %v4903_v10 = vld [vmem:[%s14972_s3 + $0x600] sm:$0xff] }
 0x2b4   :  { %6397 = vmatprep.subr.bf16.mxu1 %v9404_v22  ;;  %v4855_v22 = vld [vmem:[%s14972_s3 + $0x480] sm:$0xff] }
 0x2b5   :  { %v9442_v33 = vcombine.high %v4855_v22, %v4859_v4 }
 0x2b7   :  { %6398 = vmatpush1.bf16.msra.mxu1 %v9403_v47  ;;  %v4860_v47 = vld [vmem:[%s14972_s3 + $0x4a8] sm:$0xff] }
 0x2b8   :  { %6399 = vmatprep.subr.bf16.mxu1 %v9412_v26  ;;  %v9443_v31 = vcombine.low %v4856_v14, %v4860_v47 }
 0x2bb   :  { %6400 = vmatpush1.bf16.msra.mxu1 %v9411_v30  ;;  %v9444_v30 = vcombine.high %v4856_v14, %v4860_v47 }
 0x2bc   :  { %6401 = vmatprep.subr.bf16.mxu1 %v9420_v37  ;;  %v4863_v37 = vld [vmem:[%s14972_s3 + $0x4c0] sm:$0xff] }
 0x2bf   :  { %6402 = vmatpush1.bf16.msra.mxu1 %v9419_v41  ;;  %v9450_v41 = vcombine.high %v4863_v37, %v4867_v38 }
 0x2c0   :  { %6412 = vmatprep.subr.bf16.mxu1 %v9428_v43  ;;  %v9452_v43 = vcombine.high %v4864_v9, %v4868_v39 }
 0x2d6   :  { %v4169_v44 = vpop.f32.mrb[0].mxu0 }
 0x2d7   :  { %v9778_v23 = vadd.f32 %v4169_v44, %v12296_v60  ;;  %v4171_v53 = vpop.f32.mrb[1].mxu0  ;;  %v13541_v60 = vsub.s32 0, %v13537_v48  ;;  %v4871_v44 = vld [vmem:[%s14972_s3 + $0x500] sm:$0xff] }
 0x2d8   :  { %v9779_v19 = vadd.f32 %v4171_v53, %v12298_v61  ;;  %v4173_v45 = vpop.f32.mrb[2].mxu0  ;;  %v4872_v53 = vld [vmem:[%s14972_s3 + $0x508] sm:$0xff] }
 0x2d9   :  { %v9780_v46 = vadd.f32 %v4173_v45, %v12306_v0  ;;  %v4175_v54 = vpop.f32.mrb[3].mxu0  ;;  %v13547_v0 = vld [vmem:[%s14973_s2] sm:$0xf]  ;;  %v9451_v45 = vcombine.low %v4864_v9, %v4868_v39 }
 0x2da   :  { %v9781_v40 = vadd.f32 %v4175_v54, %v12311_v2  ;;  %v13550_v2 = vsub.s32 1, %v13537_v48  ;;  %v4682_v8 = vrot.slane %v13547_v0, %v13541_v60  ;;  %v9460_v54 = vcombine.high %v4872_v53, %v4876_v35 }
 0x2db   :  { %v4665_v28 = vmax.f32 %v9778_v23, %v9780_v46  ;;  %v4875_v23 = vld [vmem:[%s14972_s3 + $0x520] sm:$0xff] }
 0x2dc   :  { %v4666_v49 = vmax.f32 %v9779_v19, %v9781_v40  ;;  %v9449_v19 = vcombine.low %v4863_v37, %v4867_v38  ;;  %v9458_v46 = vcombine.high %v4871_v44, %v4875_v23  ;;  %v4879_v40 = vld [vmem:[%s14972_s3 + $0x540] sm:$0xff] }
 0x2de   :  { %v4179_v50 = vpop.f32.mrb[4].mxu0 }
 0x2df   :  { %v9782_v52 = vadd.f32 %v4179_v50, %v12364_v24  ;;  %v4181_v25 = vpop.f32.mrb[5].mxu0  ;;  %v4884_v50 = vld [vmem:[%s14972_s3 + $0x568] sm:$0xff] }
 0x2e0   :  { %v9783_v32 = vadd.f32 %v4181_v25, %v12372_v29  ;;  %v4183_v61 = vpop.f32.mrb[6].mxu0  ;;  %v4686_v29 = vrot.slane %v13547_v0, %v13550_v2  ;;  %v9459_v25 = vcombine.low %v4872_v53, %v4876_v35 }
 0x2e1   :  { %v9784_v55 = vadd.f32 %v4183_v61, %v12377_v34  ;;  %v4185_v62 = vpop.f32.mrb[7].mxu0  ;;  %v4851_v34 = vld [vmem:[%s14972_s3 + $0x460] sm:$0xff] }
 0x2e2   :  { %v9785_v24 = vadd.f32 %v4185_v62, %v12382_v5  ;;  %v9434_v36 = vcombine.high %v4847_v1, %v4851_v34  ;;  %v9433_v26 = vcombine.low %v4847_v1, %v4851_v34  ;;  %v4891_v62 = vld [vmem:[%s14972_s3 + $0x5a0] sm:$0xff]  ;;  %v4900_v1 = vld [vmem:[%s14972_s3 + $0x5e8] sm:$0xff] }
 0x2e3   :  { %v4669_v56 = vmax.f32 %v9782_v52, %v9784_v55  ;;  %v9457_v52 = vcombine.low %v4871_v44, %v4875_v23  ;;  %v4887_v55 = vld [vmem:[%s14972_s3 + $0x580] sm:$0xff] }
 0x2e4   :  { %v4670_v57 = vmax.f32 %v9783_v32, %v9785_v24  ;;  %v4888_v24 = vld [vmem:[%s14972_s3 + $0x588] sm:$0xff]  ;;  %v9473_v34 = vcombine.low %v4887_v55, %v4891_v62 }
 0x2e5   :  { %v4673_v58 = vmax.f32 %v4665_v28, %v4669_v56  ;;  %v4883_v28 = vld [vmem:[%s14972_s3 + $0x560] sm:$0xff]  ;;  %v4892_v56 = vld [vmem:[%s14972_s3 + $0x5a8] sm:$0xff] }
 0x2e6   :  { %v4674_v15 = vmax.f32 %v4666_v49, %v4670_v57  ;;  %v4880_v49 = vld [vmem:[%s14972_s3 + $0x548] sm:$0xff]  ;;  %v9466_v32 = vcombine.high %v4879_v40, %v4883_v28 }
 0x2e7   :  { %v4699_v59 = vadd.f32 %v4682_v8, %v4673_v58  ;;  %v9468_v61 = vcombine.high %v4880_v49, %v4884_v50  ;;  %v9465_v8 = vcombine.low %v4879_v40, %v4883_v28  ;;  %v9467_v57 = vcombine.low %v4880_v49, %v4884_v50 }
 0x2e8   :  { %v4700_v63 = vadd.f32 %v4686_v29, %v4674_v15  ;;  %v9474_v29 = vcombine.high %v4887_v55, %v4891_v62  ;;  %v9476_v58 = vcombine.high %v4888_v24, %v4892_v56  ;;  %v4895_v15 = vld [vmem:[%s14972_s3 + $0x5c0] sm:$0xff] }
 0x2e9   :  { %v4703_v5 = vmax.f32 %v4699_v59, 0.0  ;;  %v4899_v59 = vld [vmem:[%s14972_s3 + $0x5e0] sm:$0xff] }
 0x2ea   :  { %v4704_v51 = vmax.f32 %v4700_v63, 0.0  ;;  %v4896_v63 = vld [vmem:[%s14972_s3 + $0x5c8] sm:$0xff] }
 0x2eb   :  { %v13598_v20 = vpack.c.bf16 %v4703_v5, %v4703_v5  ;;  %v9475_v5 = vcombine.low %v4888_v24, %v4892_v56  ;;  %v9484_v7 = vcombine.high %v4896_v63, %v4900_v1 }
 0x2ec   :  { %v13594_v17 = vpack.c.bf16 %v4704_v51, %v4704_v51  ;;  %v9482_v51 = vcombine.high %v4895_v15, %v4899_v59 }
 0x2ee   :  { %6321 = vmatprep.mubr.bf16.mxu0 %v13594_v17  ;;  %6403 = vmatprep.mubr.bf16.mxu1 %v13594_v17 }
 0x2ef   :  { %6322 = vmatmul.mubr.bf16.vlgmr.msra.gmra.mrb[8].mxu0 %v13598_v20  ;;  %6404 = vmatmul.mubr.bf16.vlgmr.msra.gmra.mrb[16].mxu1 %v13598_v20 }
 0x2f0   :  { %6331 = vmatpush1.bf16.msra.mxu0 %v9425_v11  ;;  %6413 = vmatpush1.bf16.msra.mxu1 %v9427_v18  ;;  %v9441_v11 = vcombine.low %v4855_v22, %v4859_v4  ;;  %v4907_v18 = vld [vmem:[%s14972_s3 + $0x620] sm:$0xff]  ;;  %v9481_v22 = vcombine.low %v4895_v15, %v4899_v59  ;;  %v9483_v4 = vcombine.low %v4896_v63, %v4900_v1 }
 0x2f1   :  { %6332 = vmatprep.subr.bf16.mxu0 %v9434_v36  ;;  %6414 = vmatprep.subr.bf16.mxu1 %v9436_v42  ;;  %v4904_v36 = vld [vmem:[%s14972_s3 + $0x608] sm:$0xff]  ;;  %v9490_v14 = vcombine.high %v4903_v10, %v4907_v18  ;;  %v9489_v37 = vcombine.low %v4903_v10, %v4907_v18 }
 0x2f2   :  { %v4908_v42 = vld [vmem:[%s14972_s3 + $0x628] sm:$0xff] }
 0x2f3   :  { %v9492_v47 = vcombine.high %v4904_v36, %v4908_v42  ;;  %v9491_v38 = vcombine.low %v4904_v36, %v4908_v42 }
 0x2f4   :  { %6333 = vmatpush1.bf16.msra.mxu0 %v9433_v26  ;;  %6415 = vmatpush1.bf16.msra.mxu1 %v9435_v27  ;;  %v4911_v26 = vld [vmem:[%s14972_s3 + $0x640] sm:$0xff] }
 0x2f5   :  { %6334 = vmatprep.subr.bf16.mxu0 %v9442_v33  ;;  %6416 = vmatprep.subr.bf16.mxu1 %v9444_v30  ;;  %v4915_v27 = vld [vmem:[%s14972_s3 + $0x660] sm:$0xff]  ;;  %v4912_v33 = vld [vmem:[%s14972_s3 + $0x648] sm:$0xff] }
 0x2f6   :  { %v4916_v30 = vld [vmem:[%s14972_s3 + $0x668] sm:$0xff]  ;;  %v9498_v9 = vcombine.high %v4911_v26, %v4915_v27  ;;  %v9497_v44 = vcombine.low %v4911_v26, %v4915_v27 }
 0x2f7   :  { %v9500_v39 = vcombine.high %v4912_v33, %v4916_v30  ;;  %v9499_v23 = vcombine.low %v4912_v33, %v4916_v30 }
 0x2f8   :  { %6335 = vmatpush1.bf16.msra.mxu0 %v9441_v11  ;;  %6417 = vmatpush1.bf16.msra.mxu1 %v9443_v31  ;;  %v4919_v11 = vld [vmem:[%s14972_s3 + $0x680] sm:$0xff] }
 0x2f9   :  { %6336 = vmatprep.subr.bf16.mxu0 %v9450_v41  ;;  %6418 = vmatprep.subr.bf16.mxu1 %v9452_v43  ;;  %v4923_v31 = vld [vmem:[%s14972_s3 + $0x6a0] sm:$0xff]  ;;  %v4920_v41 = vld [vmem:[%s14972_s3 + $0x688] sm:$0xff] }
 0x2fa   :  { %v4924_v43 = vld [vmem:[%s14972_s3 + $0x6a8] sm:$0xff]  ;;  %v9506_v53 = vcombine.high %v4919_v11, %v4923_v31  ;;  %v9505_v40 = vcombine.low %v4919_v11, %v4923_v31 }
 0x2fb   :  { %v9508_v35 = vcombine.high %v4920_v41, %v4924_v43  ;;  %v9507_v28 = vcombine.low %v4920_v41, %v4924_v43 }
 0x2fc   :  { %6337 = vmatpush1.bf16.msra.mxu0 %v9449_v19  ;;  %6419 = vmatpush1.bf16.msra.mxu1 %v9451_v45  ;;  %v4927_v19 = vld [vmem:[%s14972_s3 + $0x6c0] sm:$0xff] }
 0x2fd   :  { %6338 = vmatprep.subr.bf16.mxu0 %v9458_v46  ;;  %6420 = vmatprep.subr.bf16.mxu1 %v9460_v54  ;;  %v4931_v45 = vld [vmem:[%s14972_s3 + $0x6e0] sm:$0xff]  ;;  %v4928_v46 = vld [vmem:[%s14972_s3 + $0x6c8] sm:$0xff] }
 0x2fe   :  { %v4932_v54 = vld [vmem:[%s14972_s3 + $0x6e8] sm:$0xff]  ;;  %v9514_v49 = vcombine.high %v4927_v19, %v4931_v45  ;;  %v9513_v55 = vcombine.low %v4927_v19, %v4931_v45  ;;  %v13783_v19 = vsub.s32 3, %v13537_v48 }
 0x2ff   :  { %v9516_v50 = vcombine.high %v4928_v46, %v4932_v54  ;;  %v9515_v62 = vcombine.low %v4928_v46, %v4932_v54 }
 0x300   :  { %6339 = vmatpush1.bf16.msra.mxu0 %v9457_v52  ;;  %6421 = vmatpush1.bf16.msra.mxu1 %v9459_v25  ;;  %v4935_v52 = vld [vmem:[%s14972_s3 + $0x700] sm:$0xff] }
 0x301   :  { %6340 = vmatprep.subr.bf16.mxu0 %v9466_v32  ;;  %6422 = vmatprep.subr.bf16.mxu1 %v9468_v61  ;;  %v4939_v25 = vld [vmem:[%s14972_s3 + $0x720] sm:$0xff]  ;;  %v4936_v32 = vld [vmem:[%s14972_s3 + $0x708] sm:$0xff] }
 0x302   :  { %v4940_v61 = vld [vmem:[%s14972_s3 + $0x728] sm:$0xff]  ;;  %v9522_v24 = vcombine.high %v4935_v52, %v4939_v25  ;;  %v9521_v15 = vcombine.low %v4935_v52, %v4939_v25 }
 0x303   :  { %v9524_v56 = vcombine.high %v4936_v32, %v4940_v61  ;;  %v9523_v59 = vcombine.low %v4936_v32, %v4940_v61 }
 0x304   :  { %6341 = vmatpush1.bf16.msra.mxu0 %v9465_v8  ;;  %6423 = vmatpush1.bf16.msra.mxu1 %v9467_v57  ;;  %v4943_v8 = vld [vmem:[%s14972_s3 + $0x740] sm:$0xff] }
 0x305   :  { %6342 = vmatprep.subr.bf16.mxu0 %v9474_v29  ;;  %6424 = vmatprep.subr.bf16.mxu1 %v9476_v58  ;;  %v4947_v57 = vld [vmem:[%s14972_s3 + $0x760] sm:$0xff]  ;;  %v4944_v29 = vld [vmem:[%s14972_s3 + $0x748] sm:$0xff] }
 0x306   :  { %v4948_v58 = vld [vmem:[%s14972_s3 + $0x768] sm:$0xff]  ;;  %v9530_v63 = vcombine.high %v4943_v8, %v4947_v57  ;;  %v9529_v10 = vcombine.low %v4943_v8, %v4947_v57  ;;  %v4722_v8 = vld [vmem:[%s14972_s3 + $0x58] sm:$0xff] }
 0x307   :  { %v9532_v1 = vcombine.high %v4944_v29, %v4948_v58  ;;  %v9531_v18 = vcombine.low %v4944_v29, %v4948_v58  ;;  %v4729_v58 = vld [vmem:[%s14972_s3 + $0x90] sm:$0xff] }
 0x308   :  { %6343 = vmatpush1.bf16.msra.mxu0 %v9473_v34  ;;  %6425 = vmatpush1.bf16.msra.mxu1 %v9475_v5  ;;  %v4951_v34 = vld [vmem:[%s14972_s3 + $0x780] sm:$0xff] }
 0x309   :  { %6344 = vmatprep.subr.bf16.mxu0 %v9482_v51  ;;  %6426 = vmatprep.subr.bf16.mxu1 %v9484_v7  ;;  %v4955_v5 = vld [vmem:[%s14972_s3 + $0x7a0] sm:$0xff]  ;;  %v4952_v51 = vld [vmem:[%s14972_s3 + $0x788] sm:$0xff] }
 0x30a   :  { %v4956_v7 = vld [vmem:[%s14972_s3 + $0x7a8] sm:$0xff]  ;;  %v9538_v36 = vcombine.high %v4951_v34, %v4955_v5  ;;  %v9537_v26 = vcombine.low %v4951_v34, %v4955_v5  ;;  %v4734_v34 = vld [vmem:[%s14972_s3 + $0xb8] sm:$0xff] }
 0x30b   :  { %v9540_v42 = vcombine.high %v4952_v51, %v4956_v7  ;;  %v9539_v27 = vcombine.low %v4952_v51, %v4956_v7  ;;  %v4737_v7 = vld [vmem:[%s14972_s3 + $0xd0] sm:$0xff] }
 0x30c   :  { %6345 = vmatpush1.bf16.msra.mxu0 %v9481_v22  ;;  %6427 = vmatpush1.bf16.msra.mxu1 %v9483_v4  ;;  %v4959_v22 = vld [vmem:[%s14972_s3 + $0x7c0] sm:$0xff] }
 0x30d   :  { %6346 = vmatprep.subr.bf16.mxu0 %v9490_v14  ;;  %6428 = vmatprep.subr.bf16.mxu1 %v9492_v47  ;;  %v4963_v4 = vld [vmem:[%s14972_s3 + $0x7e0] sm:$0xff]  ;;  %v4960_v14 = vld [vmem:[%s14972_s3 + $0x7c8] sm:$0xff] }
 0x30e   :  { %v4964_v47 = vld [vmem:[%s14972_s3 + $0x7e8] sm:$0xff]  ;;  %v9546_v33 = vcombine.high %v4959_v22, %v4963_v4 }
 0x30f   :  { %v9548_v30 = vcombine.high %v4960_v14, %v4964_v47 }
 0x310   :  { %6347 = vmatpush1.bf16.msra.mxu0 %v9489_v37  ;;  %6429 = vmatpush1.bf16.msra.mxu1 %v9491_v38  ;;  %v9545_v37 = vcombine.low %v4959_v22, %v4963_v4  ;;  %v9547_v38 = vcombine.low %v4960_v14, %v4964_v47  ;;  %v4746_v22 = vld [vmem:[%s14972_s3 + $0x118] sm:$0xff] }
 0x311   :  { %6348 = vmatprep.subr.bf16.mxu0 %v9498_v9  ;;  %6430 = vmatprep.subr.bf16.mxu1 %v9500_v39  ;;  %v9302_v9 = vcombine.high %v13567_v21, %v13572_v3  ;;  %v9304_v39 = vcombine.high %v13577_v6, %v13588_v12  ;;  %v4738_v6 = vld [vmem:[%s14972_s3 + $0xd8] sm:$0xff] }
 0x312   :  { %v4742_v12 = vld [vmem:[%s14972_s3 + $0xf8] sm:$0xff] }
 0x313   :  { %v4750_v4 = vld [vmem:[%s14972_s3 + $0x138] sm:$0xff]  ;;  %v9327_v47 = vcombine.low %v4738_v6, %v4742_v12 }
 0x314   :  { %6349 = vmatpush1.bf16.msra.mxu0 %v9497_v44  ;;  %6431 = vmatpush1.bf16.msra.mxu1 %v9499_v23 }
 0x315   :  { %6350 = vmatprep.subr.bf16.mxu0 %v9506_v53  ;;  %6432 = vmatprep.subr.bf16.mxu1 %v9508_v35  ;;  %v13780_v53 = vsub.s32 2, %v13537_v48 }
 0x318   :  { %6351 = vmatpush1.bf16.msra.mxu0 %v9505_v40  ;;  %6433 = vmatpush1.bf16.msra.mxu1 %v9507_v28  ;;  %v4690_v40 = vrot.slane %v13547_v0, %v13780_v53 }
 0x319   :  { %6352 = vmatprep.subr.bf16.mxu0 %v9514_v49  ;;  %6434 = vmatprep.subr.bf16.mxu1 %v9516_v50  ;;  %v4694_v50 = vrot.slane %v13547_v0, %v13783_v19  ;;  %v4726_v0 = vld [vmem:[%s14972_s3 + $0x78] sm:$0xff] }
 0x31a   :  { %v9311_v51 = vcombine.low %v4722_v8, %v4726_v0 }
 0x31c   :  { %6353 = vmatpush1.bf16.msra.mxu0 %v9513_v55  ;;  %6435 = vmatpush1.bf16.msra.mxu1 %v9515_v62 }
 0x31d   :  { %6354 = vmatprep.subr.bf16.mxu0 %v9522_v24  ;;  %6436 = vmatprep.subr.bf16.mxu1 %v9524_v56  ;;  %v4721_v24 = vld [vmem:[%s14972_s3 + $0x50] sm:$0xff] }
 0x31e   :  { %v4725_v56 = vld [vmem:[%s14972_s3 + $0x70] sm:$0xff] }
 0x31f   :  { %v9309_v5 = vcombine.low %v4721_v24, %v4725_v56 }
 0x320   :  { %6355 = vmatpush1.bf16.msra.mxu0 %v9521_v15  ;;  %6437 = vmatpush1.bf16.msra.mxu1 %v9523_v59  ;;  %v9310_v15 = vcombine.high %v4721_v24, %v4725_v56  ;;  %v9312_v59 = vcombine.high %v4722_v8, %v4726_v0  ;;  %v4778_v24 = vld [vmem:[%s14972_s3 + $0x218] sm:$0xff] }
 0x321   :  { %6356 = vmatprep.subr.bf16.mxu0 %v9530_v63  ;;  %6438 = vmatprep.subr.bf16.mxu1 %v9532_v1  ;;  %v4733_v63 = vld [vmem:[%s14972_s3 + $0xb0] sm:$0xff]  ;;  %v4730_v1 = vld [vmem:[%s14972_s3 + $0x98] sm:$0xff] }
 0x322   :  { %v9318_v21 = vcombine.high %v4729_v58, %v4733_v63  ;;  %v9320_v3 = vcombine.high %v4730_v1, %v4734_v34  ;;  %v4782_v56 = vld [vmem:[%s14972_s3 + $0x238] sm:$0xff] }
 0x324   :  { %6357 = vmatpush1.bf16.msra.mxu0 %v9529_v10  ;;  %6439 = vmatpush1.bf16.msra.mxu1 %v9531_v18  ;;  %v4741_v10 = vld [vmem:[%s14972_s3 + $0xf0] sm:$0xff] }
 0x325   :  { %6358 = vmatprep.subr.bf16.mxu0 %v9538_v36  ;;  %6440 = vmatprep.subr.bf16.mxu1 %v9540_v42  ;;  %v4749_v18 = vld [vmem:[%s14972_s3 + $0x130] sm:$0xff]  ;;  %v9326_v36 = vcombine.high %v4737_v7, %v4741_v10  ;;  %v9328_v42 = vcombine.high %v4738_v6, %v4742_v12  ;;  %v9325_v14 = vcombine.low %v4737_v7, %v4741_v10  ;;  %v4794_v6 = vld [vmem:[%s14972_s3 + $0x298] sm:$0xff] }
 0x326   :  { %v4798_v12 = vld [vmem:[%s14972_s3 + $0x2b8] sm:$0xff] }
 0x328   :  { %6359 = vmatpush1.bf16.msra.mxu0 %v9537_v26  ;;  %6441 = vmatpush1.bf16.msra.mxu1 %v9539_v27  ;;  %v4753_v26 = vld [vmem:[%s14972_s3 + $0x150] sm:$0xff] }
 0x329   :  { %6360 = vmatprep.subr.bf16.mxu0 %v9546_v33  ;;  %6442 = vmatprep.subr.bf16.mxu1 %v9548_v30  ;;  %v4757_v27 = vld [vmem:[%s14972_s3 + $0x170] sm:$0xff]  ;;  %v9336_v30 = vcombine.high %v4746_v22, %v4750_v4 }
 0x32c   :  { %6361 = vmatpush1.bf16.msra.mxu0 %v9545_v37  ;;  %6443 = vmatpush1.bf16.msra.mxu1 %v9547_v38  ;;  %v4754_v37 = vld [vmem:[%s14972_s3 + $0x158] sm:$0xff] }
 0x32d   :  { %6453 = vmatprep.subr.bf16.mxu0 %v9302_v9  ;;  %6535 = vmatprep.subr.bf16.mxu1 %v9304_v39  ;;  %v4758_v38 = vld [vmem:[%s14972_s3 + $0x178] sm:$0xff]  ;;  %v9335_v39 = vcombine.low %v4746_v22, %v4750_v4 }
 0x32e   :  { %v4802_v22 = vld [vmem:[%s14972_s3 + $0x2d8] sm:$0xff] }
 0x32f   :  { %v4806_v4 = vld [vmem:[%s14972_s3 + $0x2f8] sm:$0xff] }
 0x355   :  { %v4646_v11 = vpop.f32.mrb[8].mxu1 }
 0x356   :  { %v4648_v31 = vpop.f32.mrb[9].mxu1 }
 0x357   :  { %v4650_v41 = vpop.f32.mrb[10].mxu1 }
 0x358   :  { %v4667_v43 = vmax.f32 %v4646_v11, %v4650_v41  ;;  %v4652_v44 = vpop.f32.mrb[11].mxu1  ;;  %v9342_v11 = vcombine.high %v4753_v26, %v4757_v27  ;;  %v4761_v41 = vld [vmem:[%s14972_s3 + $0x190] sm:$0xff] }
 0x359   :  { %v4668_v23 = vmax.f32 %v4648_v31, %v4652_v44  ;;  %v9344_v31 = vcombine.high %v4754_v37, %v4758_v38  ;;  %v4762_v44 = vld [vmem:[%s14972_s3 + $0x198] sm:$0xff] }
 0x35d   :  { %v4656_v35 = vpop.f32.mrb[12].mxu1 }
 0x35e   :  { %v4658_v45 = vpop.f32.mrb[13].mxu1 }
 0x35f   :  { %v4660_v46 = vpop.f32.mrb[14].mxu1 }
 0x360   :  { %v4671_v54 = vmax.f32 %v4656_v35, %v4660_v46  ;;  %v4662_v28 = vpop.f32.mrb[15].mxu1  ;;  %v9341_v35 = vcombine.low %v4753_v26, %v4757_v27  ;;  %v9392_v27 = vcombine.high %v4802_v22, %v4806_v4 }
 0x361   :  { %v4672_v49 = vmax.f32 %v4658_v45, %v4662_v28  ;;  %v9343_v45 = vcombine.low %v4754_v37, %v4758_v38  ;;  %v4773_v28 = vld [vmem:[%s14972_s3 + $0x1f0] sm:$0xff]  ;;  %v4810_v37 = vld [vmem:[%s14972_s3 + $0x318] sm:$0xff] }
 0x362   :  { %v4675_v52 = vmax.f32 %v4667_v43, %v4671_v54  ;;  %v4765_v43 = vld [vmem:[%s14972_s3 + $0x1b0] sm:$0xff]  ;;  %v4814_v38 = vld [vmem:[%s14972_s3 + $0x338] sm:$0xff] }
 0x363   :  { %v4676_v25 = vmax.f32 %v4668_v23, %v4672_v49  ;;  %v4766_v23 = vld [vmem:[%s14972_s3 + $0x1b8] sm:$0xff]  ;;  %v9350_v46 = vcombine.high %v4761_v41, %v4765_v43 }
 0x364   :  { %v4701_v32 = vadd.f32 %v4690_v40, %v4675_v52  ;;  %v9352_v54 = vcombine.high %v4762_v44, %v4766_v23  ;;  %v4769_v40 = vld [vmem:[%s14972_s3 + $0x1d0] sm:$0xff]  ;;  %v4770_v49 = vld [vmem:[%s14972_s3 + $0x1d8] sm:$0xff]  ;;  %v9349_v52 = vcombine.low %v4761_v41, %v4765_v43 }
 0x365   :  { %v4702_v61 = vadd.f32 %v4694_v50, %v4676_v25  ;;  %v4774_v50 = vld [vmem:[%s14972_s3 + $0x1f8] sm:$0xff]  ;;  %v9351_v25 = vcombine.low %v4762_v44, %v4766_v23  ;;  %v9357_v8 = vcombine.low %v4769_v40, %v4773_v28  ;;  %v4817_v41 = vld [vmem:[%s14972_s3 + $0x350] sm:$0xff] }
 0x366   :  { %v4705_v55 = vmax.f32 %v4701_v32, 0.0  ;;  %v9358_v32 = vcombine.high %v4769_v40, %v4773_v28  ;;  %v9359_v0 = vcombine.low %v4770_v49, %v4774_v50  ;;  %v4821_v43 = vld [vmem:[%s14972_s3 + $0x370] sm:$0xff]  ;;  %v4818_v44 = vld [vmem:[%s14972_s3 + $0x358] sm:$0xff] }
 0x367   :  { %v4706_v62 = vmax.f32 %v4702_v61, 0.0  ;;  %v9360_v61 = vcombine.high %v4770_v49, %v4774_v50  ;;  %v4822_v23 = vld [vmem:[%s14972_s3 + $0x378] sm:$0xff]  ;;  %v4825_v40 = vld [vmem:[%s14972_s3 + $0x390] sm:$0xff] }
 0x368   :  { %v13803_v29 = vpack.c.bf16 %v4705_v55, %v4705_v55  ;;  %v4777_v55 = vld [vmem:[%s14972_s3 + $0x210] sm:$0xff]  ;;  %v4826_v49 = vld [vmem:[%s14972_s3 + $0x398] sm:$0xff] }
 0x369   :  { %v13801_v57 = vpack.c.bf16 %v4706_v62, %v4706_v62  ;;  %v4781_v62 = vld [vmem:[%s14972_s3 + $0x230] sm:$0xff]  ;;  %v4830_v50 = vld [vmem:[%s14972_s3 + $0x3b8] sm:$0xff] }
 0x36a   :  { %v4829_v28 = vld [vmem:[%s14972_s3 + $0x3b0] sm:$0xff] }
 0x36b   :  { %6362 = vmatprep.mubr.bf16.mxu0 %v13801_v57  ;;  %6444 = vmatprep.mubr.bf16.mxu1 %v13801_v57 }
 0x36c   :  { %6363 = vmatmul.mubr.bf16.vlgmr.msra.gmra.mrb[8].mxu0 %v13803_v29  ;;  %6445 = vmatmul.mubr.bf16.vlgmr.msra.gmra.mrb[16].mxu1 %v13803_v29 }
 0x36d   :  { %6454 = vmatpush1.bf16.msra.mxu0 %v9301_v13  ;;  %6536 = vmatpush1.bf16.msra.mxu1 %v9303_v16  ;;  %v9317_v13 = vcombine.low %v4729_v58, %v4733_v63  ;;  %v9319_v16 = vcombine.low %v4730_v1, %v4734_v34  ;;  %v9366_v58 = vcombine.high %v4777_v55, %v4781_v62  ;;  %v4789_v63 = vld [vmem:[%s14972_s3 + $0x270] sm:$0xff]  ;;  %v4786_v1 = vld [vmem:[%s14972_s3 + $0x258] sm:$0xff] }
 0x36e   :  { %6485 = vmatprep.mubr.bf16.mxu0 %v13594_v17  ;;  %6567 = vmatprep.mubr.bf16.mxu1 %v13594_v17  ;;  %v4745_v17 = vld [vmem:[%s14972_s3 + $0x110] sm:$0xff]  ;;  %v4790_v34 = vld [vmem:[%s14972_s3 + $0x278] sm:$0xff] }
 0x36f   :  { %6455 = vmatprep.subr.bf16.mxu0 %v9310_v15  ;;  %6537 = vmatprep.subr.bf16.mxu1 %v9312_v59  ;;  %v9334_v33 = vcombine.high %v4745_v17, %v4749_v18  ;;  %v9333_v9 = vcombine.low %v4745_v17, %v4749_v18  ;;  %v9368_v15 = vcombine.high %v4778_v24, %v4782_v56  ;;  %v4785_v59 = vld [vmem:[%s14972_s3 + $0x250] sm:$0xff] }
 0x370   :  { %v9374_v7 = vcombine.high %v4785_v59, %v4789_v63  ;;  %v9376_v10 = vcombine.high %v4786_v1, %v4790_v34  ;;  %v9384_v18 = vcombine.high %v4794_v6, %v4798_v12 }
 0x371   :  { %6456 = vmatpush1.bf16.msra.mxu0 %v9309_v5  ;;  %6538 = vmatpush1.bf16.msra.mxu1 %v9311_v51  ;;  %v9365_v5 = vcombine.low %v4777_v55, %v4781_v62  ;;  %v9367_v51 = vcombine.low %v4778_v24, %v4782_v56  ;;  %v4833_v55 = vld [vmem:[%s14972_s3 + $0x3d0] sm:$0xff]  ;;  %v4834_v24 = vld [vmem:[%s14972_s3 + $0x3d8] sm:$0xff] }
 0x372   :  { %6457 = vmatprep.subr.bf16.mxu0 %v9318_v21  ;;  %6539 = vmatprep.subr.bf16.mxu1 %v9320_v3  ;;  %v4793_v21 = vld [vmem:[%s14972_s3 + $0x290] sm:$0xff]  ;;  %v4838_v56 = vld [vmem:[%s14972_s3 + $0x3f8] sm:$0xff] }
 0x373   :  { %v4797_v3 = vld [vmem:[%s14972_s3 + $0x2b0] sm:$0xff] }
 0x374   :  { %v9382_v17 = vcombine.high %v4793_v21, %v4797_v3  ;;  %v4837_v62 = vld [vmem:[%s14972_s3 + $0x3f0] sm:$0xff] }
 0x375   :  { %6458 = vmatpush1.bf16.msra.mxu0 %v9317_v13  ;;  %6540 = vmatpush1.bf16.msra.mxu1 %v9319_v16  ;;  %v9373_v13 = vcombine.low %v4785_v59, %v4789_v63  ;;  %v9375_v16 = vcombine.low %v4786_v1, %v4790_v34  ;;  %v4841_v59 = vld [vmem:[%s14972_s3 + $0x410] sm:$0xff]  ;;  %v4842_v1 = vld [vmem:[%s14972_s3 + $0x418] sm:$0xff] }
 0x376   :  { %6459 = vmatprep.subr.bf16.mxu0 %v9326_v36  ;;  %6541 = vmatprep.subr.bf16.mxu1 %v9328_v42  ;;  %v4801_v36 = vld [vmem:[%s14972_s3 + $0x2d0] sm:$0xff]  ;;  %v4846_v34 = vld [vmem:[%s14972_s3 + $0x438] sm:$0xff] }
 0x377   :  { %v4805_v42 = vld [vmem:[%s14972_s3 + $0x2f0] sm:$0xff] }
 0x378   :  { %v9390_v26 = vcombine.high %v4801_v36, %v4805_v42  ;;  %v4845_v63 = vld [vmem:[%s14972_s3 + $0x430] sm:$0xff] }
 0x379   :  { %6460 = vmatpush1.bf16.msra.mxu0 %v9325_v14  ;;  %6542 = vmatpush1.bf16.msra.mxu1 %v9327_v47  ;;  %v9381_v14 = vcombine.low %v4793_v21, %v4797_v3  ;;  %v9383_v47 = vcombine.low %v4794_v6, %v4798_v12  ;;  %v4849_v21 = vld [vmem:[%s14972_s3 + $0x450] sm:$0xff]  ;;  %v4850_v6 = vld [vmem:[%s14972_s3 + $0x458] sm:$0xff] }
 0x37a   :  { %6461 = vmatprep.subr.bf16.mxu0 %v9334_v33  ;;  %6543 = vmatprep.subr.bf16.mxu1 %v9336_v30  ;;  %v4809_v33 = vld [vmem:[%s14972_s3 + $0x310] sm:$0xff]  ;;  %v4854_v12 = vld [vmem:[%s14972_s3 + $0x478] sm:$0xff] }
 0x37b   :  { %v4813_v30 = vld [vmem:[%s14972_s3 + $0x330] sm:$0xff] }
 0x37c   :  { %v4853_v3 = vld [vmem:[%s14972_s3 + $0x470] sm:$0xff] }
 0x37d   :  { %6462 = vmatpush1.bf16.msra.mxu0 %v9333_v9  ;;  %6544 = vmatpush1.bf16.msra.mxu1 %v9335_v39  ;;  %v9389_v9 = vcombine.low %v4801_v36, %v4805_v42  ;;  %v9391_v39 = vcombine.low %v4802_v22, %v4806_v4  ;;  %v4857_v36 = vld [vmem:[%s14972_s3 + $0x490] sm:$0xff]  ;;  %v4858_v22 = vld [vmem:[%s14972_s3 + $0x498] sm:$0xff] }
 0x37e   :  { %6463 = vmatprep.subr.bf16.mxu0 %v9342_v11  ;;  %6545 = vmatprep.subr.bf16.mxu1 %v9344_v31  ;;  %v9398_v11 = vcombine.high %v4809_v33, %v4813_v30  ;;  %v9400_v31 = vcombine.high %v4810_v37, %v4814_v38  ;;  %v4861_v42 = vld [vmem:[%s14972_s3 + $0x4b0] sm:$0xff]  ;;  %v4862_v4 = vld [vmem:[%s14972_s3 + $0x4b8] sm:$0xff] }
 0x381   :  { %6464 = vmatpush1.bf16.msra.mxu0 %v9341_v35  ;;  %6546 = vmatpush1.bf16.msra.mxu1 %v9343_v45  ;;  %v9397_v35 = vcombine.low %v4809_v33, %v4813_v30  ;;  %v9399_v45 = vcombine.low %v4810_v37, %v4814_v38  ;;  %v4869_v33 = vld [vmem:[%s14972_s3 + $0x4f0] sm:$0xff]  ;;  %v4866_v30 = vld [vmem:[%s14972_s3 + $0x4d8] sm:$0xff]  ;;  %v9445_v37 = vcombine.low %v4857_v36, %v4861_v42 }
 0x382   :  { %6465 = vmatprep.subr.bf16.mxu0 %v9350_v46  ;;  %6547 = vmatprep.subr.bf16.mxu1 %v9352_v54  ;;  %v9406_v46 = vcombine.high %v4817_v41, %v4821_v43  ;;  %v9408_v54 = vcombine.high %v4818_v44, %v4822_v23  ;;  %v9447_v38 = vcombine.low %v4858_v22, %v4862_v4 }
 0x385   :  { %6466 = vmatpush1.bf16.msra.mxu0 %v9349_v52  ;;  %6548 = vmatpush1.bf16.msra.mxu1 %v9351_v25  ;;  %v9405_v52 = vcombine.low %v4817_v41, %v4821_v43  ;;  %v9407_v25 = vcombine.low %v4818_v44, %v4822_v23  ;;  %v4874_v41 = vld [vmem:[%s14972_s3 + $0x518] sm:$0xff] }
 0x386   :  { %6467 = vmatprep.subr.bf16.mxu0 %v9358_v32  ;;  %6549 = vmatprep.subr.bf16.mxu1 %v9360_v61  ;;  %v9414_v32 = vcombine.high %v4825_v40, %v4829_v28  ;;  %v9416_v61 = vcombine.high %v4826_v49, %v4830_v50  ;;  %v4878_v43 = vld [vmem:[%s14972_s3 + $0x538] sm:$0xff] }
 0x389   :  { %6468 = vmatpush1.bf16.msra.mxu0 %v9357_v8  ;;  %6550 = vmatpush1.bf16.msra.mxu1 %v9359_v0  ;;  %v9413_v8 = vcombine.low %v4825_v40, %v4829_v28  ;;  %v9415_v0 = vcombine.low %v4826_v49, %v4830_v50  ;;  %v4882_v40 = vld [vmem:[%s14972_s3 + $0x558] sm:$0xff]  ;;  %v9463_v50 = vcombine.low %v4874_v41, %v4878_v43 }
 0x38a   :  { %6469 = vmatprep.subr.bf16.mxu0 %v9366_v58  ;;  %6551 = vmatprep.subr.bf16.mxu1 %v9368_v15  ;;  %v9422_v58 = vcombine.high %v4833_v55, %v4837_v62  ;;  %v9424_v15 = vcombine.high %v4834_v24, %v4838_v56  ;;  %v4886_v28 = vld [vmem:[%s14972_s3 + $0x578] sm:$0xff] }
 0x38d   :  { %6470 = vmatpush1.bf16.msra.mxu0 %v9365_v5  ;;  %6552 = vmatpush1.bf16.msra.mxu1 %v9367_v51  ;;  %v9421_v5 = vcombine.low %v4833_v55, %v4837_v62  ;;  %v9423_v51 = vcombine.low %v4834_v24, %v4838_v56  ;;  %v4890_v55 = vld [vmem:[%s14972_s3 + $0x598] sm:$0xff]  ;;  %v9471_v56 = vcombine.low %v4882_v40, %v4886_v28 }
 0x38e   :  { %6471 = vmatprep.subr.bf16.mxu0 %v9374_v7  ;;  %6553 = vmatprep.subr.bf16.mxu1 %v9376_v10  ;;  %v9430_v7 = vcombine.high %v4841_v59, %v4845_v63  ;;  %v9432_v10 = vcombine.high %v4842_v1, %v4846_v34  ;;  %v4894_v62 = vld [vmem:[%s14972_s3 + $0x5b8] sm:$0xff] }
 0x391   :  { %6472 = vmatpush1.bf16.msra.mxu0 %v9373_v13  ;;  %6554 = vmatpush1.bf16.msra.mxu1 %v9375_v16  ;;  %v9429_v13 = vcombine.low %v4841_v59, %v4845_v63  ;;  %v9431_v16 = vcombine.low %v4842_v1, %v4846_v34  ;;  %v4898_v59 = vld [vmem:[%s14972_s3 + $0x5d8] sm:$0xff]  ;;  %v9479_v34 = vcombine.low %v4890_v55, %v4894_v62 }
 0x392   :  { %6473 = vmatprep.subr.bf16.mxu0 %v9382_v17  ;;  %6555 = vmatprep.subr.bf16.mxu1 %v9384_v18  ;;  %v9438_v17 = vcombine.high %v4849_v21, %v4853_v3  ;;  %v9440_v18 = vcombine.high %v4850_v6, %v4854_v12  ;;  %v4902_v63 = vld [vmem:[%s14972_s3 + $0x5f8] sm:$0xff] }
 0x395   :  { %6474 = vmatpush1.bf16.msra.mxu0 %v9381_v14  ;;  %6556 = vmatpush1.bf16.msra.mxu1 %v9383_v47  ;;  %v9437_v14 = vcombine.low %v4849_v21, %v4853_v3  ;;  %v9439_v47 = vcombine.low %v4850_v6, %v4854_v12  ;;  %v4906_v21 = vld [vmem:[%s14972_s3 + $0x618] sm:$0xff]  ;;  %v9487_v12 = vcombine.low %v4898_v59, %v4902_v63 }
 0x396   :  { %6475 = vmatprep.subr.bf16.mxu0 %v9390_v26  ;;  %6557 = vmatprep.subr.bf16.mxu1 %v9392_v27  ;;  %v9446_v26 = vcombine.high %v4857_v36, %v4861_v42  ;;  %v4865_v27 = vld [vmem:[%s14972_s3 + $0x4d0] sm:$0xff]  ;;  %v4910_v3 = vld [vmem:[%s14972_s3 + $0x638] sm:$0xff] }
 0x397   :  { %v9453_v44 = vcombine.low %v4865_v27, %v4869_v33  ;;  %v4914_v36 = vld [vmem:[%s14972_s3 + $0x658] sm:$0xff] }
 0x398   :  { %v4918_v42 = vld [vmem:[%s14972_s3 + $0x678] sm:$0xff] }
 0x399   :  { %6476 = vmatpush1.bf16.msra.mxu0 %v9389_v9  ;;  %6558 = vmatpush1.bf16.msra.mxu1 %v9391_v39  ;;  %v9454_v9 = vcombine.high %v4865_v27, %v4869_v33  ;;  %v4922_v27 = vld [vmem:[%s14972_s3 + $0x698] sm:$0xff] }
 0x39a   :  { %6477 = vmatprep.subr.bf16.mxu0 %v9398_v11  ;;  %6559 = vmatprep.subr.bf16.mxu1 %v9400_v31  ;;  %v4873_v11 = vld [vmem:[%s14972_s3 + $0x510] sm:$0xff]  ;;  %v4926_v33 = vld [vmem:[%s14972_s3 + $0x6b8] sm:$0xff] }
 0x39b   :  { %v4877_v31 = vld [vmem:[%s14972_s3 + $0x530] sm:$0xff] }
 0x39c   :  { %v9461_v49 = vcombine.low %v4873_v11, %v4877_v31 }
 0x39d   :  { %6478 = vmatpush1.bf16.msra.mxu0 %v9397_v35  ;;  %6560 = vmatpush1.bf16.msra.mxu1 %v9399_v45  ;;  %v9462_v35 = vcombine.high %v4873_v11, %v4877_v31  ;;  %v9464_v45 = vcombine.high %v4874_v41, %v4878_v43  ;;  %v4930_v11 = vld [vmem:[%s14972_s3 + $0x6d8] sm:$0xff]  ;;  %v9511_v43 = vcombine.low %v4922_v27, %v4926_v33 }
 0x39e   :  { %6479 = vmatprep.subr.bf16.mxu0 %v9406_v46  ;;  %6561 = vmatprep.subr.bf16.mxu1 %v9408_v54  ;;  %v4881_v46 = vld [vmem:[%s14972_s3 + $0x550] sm:$0xff]  ;;  %v4934_v31 = vld [vmem:[%s14972_s3 + $0x6f8] sm:$0xff] }
 0x39f   :  { %v4885_v54 = vld [vmem:[%s14972_s3 + $0x570] sm:$0xff] }
 0x3a0   :  { %v9469_v24 = vcombine.low %v4881_v46, %v4885_v54 }
 0x3a1   :  { %6480 = vmatpush1.bf16.msra.mxu0 %v9405_v52  ;;  %6562 = vmatpush1.bf16.msra.mxu1 %v9407_v25  ;;  %v9470_v52 = vcombine.high %v4881_v46, %v4885_v54  ;;  %v9472_v25 = vcombine.high %v4882_v40, %v4886_v28  ;;  %v4938_v46 = vld [vmem:[%s14972_s3 + $0x718] sm:$0xff]  ;;  %v9519_v28 = vcombine.low %v4930_v11, %v4934_v31 }
 0x3a2   :  { %6481 = vmatprep.subr.bf16.mxu0 %v9414_v32  ;;  %6563 = vmatprep.subr.bf16.mxu1 %v9416_v61  ;;  %v4889_v32 = vld [vmem:[%s14972_s3 + $0x590] sm:$0xff]  ;;  %v4942_v54 = vld [vmem:[%s14972_s3 + $0x738] sm:$0xff] }
 0x3a3   :  { %v4893_v61 = vld [vmem:[%s14972_s3 + $0x5b0] sm:$0xff] }
 0x3a4   :  { %v9477_v1 = vcombine.low %v4889_v32, %v4893_v61 }
 0x3a5   :  { %6482 = vmatpush1.bf16.msra.mxu0 %v9413_v8  ;;  %6564 = vmatpush1.bf16.msra.mxu1 %v9415_v0  ;;  %v9478_v8 = vcombine.high %v4889_v32, %v4893_v61  ;;  %v9480_v0 = vcombine.high %v4890_v55, %v4894_v62  ;;  %v4946_v32 = vld [vmem:[%s14972_s3 + $0x758] sm:$0xff]  ;;  %v9527_v62 = vcombine.low %v4938_v46, %v4942_v54 }
 0x3a6   :  { %6483 = vmatprep.subr.bf16.mxu0 %v9422_v58  ;;  %6565 = vmatprep.subr.bf16.mxu1 %v9424_v15  ;;  %v4897_v58 = vld [vmem:[%s14972_s3 + $0x5d0] sm:$0xff]  ;;  %v4950_v61 = vld [vmem:[%s14972_s3 + $0x778] sm:$0xff] }
 0x3a7   :  { %v4901_v15 = vld [vmem:[%s14972_s3 + $0x5f0] sm:$0xff] }
 0x3a8   :  { %v9485_v6 = vcombine.low %v4897_v58, %v4901_v15 }
 0x3a9   :  { %6484 = vmatpush1.bf16.msra.mxu0 %v9421_v5  ;;  %6566 = vmatpush1.bf16.msra.mxu1 %v9423_v51  ;;  %v9486_v5 = vcombine.high %v4897_v58, %v4901_v15  ;;  %v9488_v51 = vcombine.high %v4898_v59, %v4902_v63  ;;  %v4954_v58 = vld [vmem:[%s14972_s3 + $0x798] sm:$0xff]  ;;  %v9535_v63 = vcombine.low %v4946_v32, %v4950_v61 }
 0x3aa   :  { %6494 = vmatprep.subr.bf16.mxu0 %v9430_v7  ;;  %6576 = vmatprep.subr.bf16.mxu1 %v9432_v10  ;;  %v4905_v7 = vld [vmem:[%s14972_s3 + $0x610] sm:$0xff]  ;;  %v4958_v15 = vld [vmem:[%s14972_s3 + $0x7b8] sm:$0xff] }
 0x3ab   :  { %v4909_v10 = vld [vmem:[%s14972_s3 + $0x630] sm:$0xff] }
 0x3ac   :  { %6486 = vmatmul.mubr.bf16.vlgmr.msra.gmra.mrb[12].mxu0 %v13598_v20  ;;  %6568 = vmatmul.mubr.bf16.vlgmr.msra.gmra.mrb[20].mxu1 %v13598_v20  ;;  %v9448_v20 = vcombine.high %v4858_v22, %v4862_v4  ;;  %v9493_v22 = vcombine.low %v4905_v7, %v4909_v10  ;;  %v9495_v4 = vcombine.low %v4906_v21, %v4910_v3 }
 0x3ad   :  { %6495 = vmatpush1.bf16.msra.mxu0 %v9429_v13  ;;  %6526 = vmatprep.mubr.bf16.mxu0 %v13801_v57  ;;  %v9494_v13 = vcombine.high %v4905_v7, %v4909_v10  ;;  %v4962_v7 = vld [vmem:[%s14972_s3 + $0x7d8] sm:$0xff] }
 0x3ae   :  { %6577 = vmatpush1.bf16.msra.mxu1 %v9431_v16  ;;  %6608 = vmatprep.mubr.bf16.mxu1 %v13801_v57  ;;  %v4870_v57 = vld [vmem:[%s14972_s3 + $0x4f8] sm:$0xff]  ;;  %v9496_v16 = vcombine.high %v4906_v21, %v4910_v3  ;;  %v9543_v3 = vcombine.low %v4954_v58, %v4958_v15 }
 0x3af   :  { %6496 = vmatprep.subr.bf16.mxu0 %v9438_v17  ;;  %6578 = vmatprep.subr.bf16.mxu1 %v9440_v18  ;;  %v9456_v39 = vcombine.high %v4866_v30, %v4870_v57  ;;  %v9455_v23 = vcombine.low %v4866_v30, %v4870_v57  ;;  %v4913_v17 = vld [vmem:[%s14972_s3 + $0x650] sm:$0xff]  ;;  %v9503_v57 = vcombine.low %v4914_v36, %v4918_v42  ;;  %v4966_v10 = vld [vmem:[%s14972_s3 + $0x7f8] sm:$0xff] }
 0x3b0   :  { %v4917_v18 = vld [vmem:[%s14972_s3 + $0x670] sm:$0xff] }
 0x3b1   :  { %6497 = vmatpush1.bf16.msra.mxu0 %v9437_v14  ;;  %v9502_v14 = vcombine.high %v4913_v17, %v4917_v18  ;;  %v9501_v30 = vcombine.low %v4913_v17, %v4917_v18  ;;  %v10851_v17 = vld [vmem:[%s14974_s5 + $0x4] ss:$16 sps:$4 sm:$0xff]   ;;  %v10854_v18 = vld [vmem:[%s14974_s5 + $0xc] ss:$16 sps:$4 sm:$0xff]  }
 0x3b2   :  { %6579 = vmatpush1.bf16.msra.mxu1 %v9439_v47  ;;  %6498 = vmatprep.subr.bf16.mxu0 %v9446_v26  ;;  %v9504_v47 = vcombine.high %v4914_v36, %v4918_v42  ;;  %v4921_v26 = vld [vmem:[%s14972_s3 + $0x690] sm:$0xff]  ;;  %v10852_v42 = vld [vmem:[%s14974_s5 + $0x8] ss:$16 sps:$4 sm:$0xff]  }
 0x3b3   :  { %6580 = vmatprep.subr.bf16.mxu1 %v9448_v20  ;;  %v4925_v20 = vld [vmem:[%s14972_s3 + $0x6b0] sm:$0xff] }
 0x3b4   :  { %v9509_v41 = vcombine.low %v4921_v26, %v4925_v20  ;;  %v10849_v36 = vld [vmem:[%s14974_s5] ss:$16 sps:$4 sm:$0xff]  }
 0x3b5   :  { %6499 = vmatpush1.bf16.msra.mxu0 %v9445_v37  ;;  %v9510_v37 = vcombine.high %v4921_v26, %v4925_v20  ;;  %v10863_v26 = vld [vmem:[%s14974_s5 + $0x44] ss:$16 sps:$4 sm:$0xff]   ;;  %v10861_v20 = vld [vmem:[%s14974_s5 + $0x40] ss:$16 sps:$4 sm:$0xff]  }
 0x3b6   :  { %6581 = vmatpush1.bf16.msra.mxu1 %v9447_v38  ;;  %6500 = vmatprep.subr.bf16.mxu0 %v9454_v9  ;;  %v9512_v38 = vcombine.high %v4922_v27, %v4926_v33  ;;  %v4929_v9 = vld [vmem:[%s14972_s3 + $0x6d0] sm:$0xff]  ;;  %v10864_v27 = vld [vmem:[%s14974_s5 + $0x48] ss:$16 sps:$4 sm:$0xff]  }
 0x3b7   :  { %6582 = vmatprep.subr.bf16.mxu1 %v9456_v39  ;;  %v4933_v39 = vld [vmem:[%s14972_s3 + $0x6f0] sm:$0xff] }
 0x3b8   :  { %v9517_v40 = vcombine.low %v4929_v9, %v4933_v39  ;;  %v10869_v33 = vld [vmem:[%s14974_s5 + $0x64] ss:$16 sps:$4 sm:$0xff]  }
 0x3b9   :  { %6501 = vmatpush1.bf16.msra.mxu0 %v9453_v44  ;;  %v9518_v44 = vcombine.high %v4929_v9, %v4933_v39  ;;  %v10878_v9 = vld [vmem:[%s14974_s5 + $0x8c] ss:$16 sps:$4 sm:$0xff]   ;;  %v10873_v39 = vld [vmem:[%s14974_s5 + $0x80] ss:$16 sps:$4 sm:$0xff]  }
 0x3ba   :  { %6583 = vmatpush1.bf16.msra.mxu1 %v9455_v23  ;;  %6502 = vmatprep.subr.bf16.mxu0 %v9462_v35  ;;  %v9520_v23 = vcombine.high %v4930_v11, %v4934_v31  ;;  %v4937_v35 = vld [vmem:[%s14972_s3 + $0x710] sm:$0xff]  ;;  %v10876_v11 = vld [vmem:[%s14974_s5 + $0x88] ss:$16 sps:$4 sm:$0xff]  }
 0x3bb   :  { %6584 = vmatprep.subr.bf16.mxu1 %v9464_v45  ;;  %v4941_v45 = vld [vmem:[%s14972_s3 + $0x730] sm:$0xff] }
 0x3bc   :  { %v9525_v55 = vcombine.low %v4937_v35, %v4941_v45  ;;  %v10881_v31 = vld [vmem:[%s14974_s5 + $0xa4] ss:$16 sps:$4 sm:$0xff]  }
 0x3bd   :  { %6503 = vmatpush1.bf16.msra.mxu0 %v9461_v49  ;;  %v9526_v49 = vcombine.high %v4937_v35, %v4941_v45  ;;  %v10890_v35 = vld [vmem:[%s14974_s5 + $0xcc] ss:$16 sps:$4 sm:$0xff]   ;;  %v10885_v45 = vld [vmem:[%s14974_s5 + $0xc0] ss:$16 sps:$4 sm:$0xff]  }
 0x3be   :  { %6585 = vmatpush1.bf16.msra.mxu1 %v9463_v50  ;;  %6504 = vmatprep.subr.bf16.mxu0 %v9470_v52  ;;  %v9528_v50 = vcombine.high %v4938_v46, %v4942_v54  ;;  %v4945_v52 = vld [vmem:[%s14972_s3 + $0x750] sm:$0xff]  ;;  %v10888_v46 = vld [vmem:[%s14974_s5 + $0xc8] ss:$16 sps:$4 sm:$0xff]  }
 0x3bf   :  { %6586 = vmatprep.subr.bf16.mxu1 %v9472_v25  ;;  %v4949_v25 = vld [vmem:[%s14972_s3 + $0x770] sm:$0xff] }
 0x3c0   :  { %v9533_v59 = vcombine.low %v4945_v52, %v4949_v25  ;;  %v10893_v54 = vld [vmem:[%s14974_s5 + $0xe4] ss:$16 sps:$4 sm:$0xff]  }
 0x3c1   :  { %6505 = vmatpush1.bf16.msra.mxu0 %v9469_v24  ;;  %v9534_v24 = vcombine.high %v4945_v52, %v4949_v25  ;;  %v10902_v52 = vld [vmem:[%s14974_s5 + $0x10c] ss:$16 sps:$4 sm:$0xff]   ;;  %v10897_v25 = vld [vmem:[%s14974_s5 + $0x100] ss:$16 sps:$4 sm:$0xff]  }
 0x3c2   :  { %6587 = vmatpush1.bf16.msra.mxu1 %v9471_v56  ;;  %6506 = vmatprep.subr.bf16.mxu0 %v9478_v8  ;;  %v9536_v56 = vcombine.high %v4946_v32, %v4950_v61  ;;  %v4953_v8 = vld [vmem:[%s14972_s3 + $0x790] sm:$0xff]  ;;  %v10900_v32 = vld [vmem:[%s14974_s5 + $0x108] ss:$16 sps:$4 sm:$0xff]  }
 0x3c3   :  { %6588 = vmatprep.subr.bf16.mxu1 %v9480_v0  ;;  %v4957_v0 = vld [vmem:[%s14972_s3 + $0x7b0] sm:$0xff] }
 0x3c4   :  { %v9541_v21 = vcombine.low %v4953_v8, %v4957_v0  ;;  %v10905_v61 = vld [vmem:[%s14974_s5 + $0x124] ss:$16 sps:$4 sm:$0xff]  }
 0x3c5   :  { %6507 = vmatpush1.bf16.msra.mxu0 %v9477_v1  ;;  %v9542_v1 = vcombine.high %v4953_v8, %v4957_v0  ;;  %v10914_v8 = vld [vmem:[%s14974_s5 + $0x14c] ss:$16 sps:$4 sm:$0xff]   ;;  %v10909_v0 = vld [vmem:[%s14974_s5 + $0x140] ss:$16 sps:$4 sm:$0xff]  }
 0x3c6   :  { %6589 = vmatpush1.bf16.msra.mxu1 %v9479_v34  ;;  %6508 = vmatprep.subr.bf16.mxu0 %v9486_v5  ;;  %v9544_v34 = vcombine.high %v4954_v58, %v4958_v15  ;;  %v4961_v5 = vld [vmem:[%s14972_s3 + $0x7d0] sm:$0xff]  ;;  %v10912_v58 = vld [vmem:[%s14974_s5 + $0x148] ss:$16 sps:$4 sm:$0xff]  }
 0x3c7   :  { %6590 = vmatprep.subr.bf16.mxu1 %v9488_v51  ;;  %v4965_v51 = vld [vmem:[%s14972_s3 + $0x7f0] sm:$0xff] }
 0x3c8   :  { %v10917_v15 = vld [vmem:[%s14974_s5 + $0x164] ss:$16 sps:$4 sm:$0xff]  }
 0x3c9   :  { %6509 = vmatpush1.bf16.msra.mxu0 %v9485_v6  ;;  %v9550_v6 = vcombine.high %v4961_v5, %v4965_v51 }
 0x3ca   :  { %6591 = vmatpush1.bf16.msra.mxu1 %v9487_v12  ;;  %6510 = vmatprep.subr.bf16.mxu0 %v9494_v13  ;;  %v9552_v12 = vcombine.high %v4962_v7, %v4966_v10  ;;  %v9549_v13 = vcombine.low %v4961_v5, %v4965_v51  ;;  %v10926_v5 = vld [vmem:[%s14974_s5 + $0x18c] ss:$16 sps:$4 sm:$0xff]   ;;  %v10921_v51 = vld [vmem:[%s14974_s5 + $0x180] ss:$16 sps:$4 sm:$0xff]  }
 0x3cb   :  { %6592 = vmatprep.subr.bf16.mxu1 %v9496_v16  ;;  %v9551_v16 = vcombine.low %v4962_v7, %v4966_v10  ;;  %v10924_v7 = vld [vmem:[%s14974_s5 + $0x188] ss:$16 sps:$4 sm:$0xff]   ;;  %v10929_v10 = vld [vmem:[%s14974_s5 + $0x1a4] ss:$16 sps:$4 sm:$0xff]  }
 0x3cd   :  { %6511 = vmatpush1.bf16.msra.mxu0 %v9493_v22  ;;  %v10857_v22 = vld [vmem:[%s14974_s5 + $0x24] ss:$16 sps:$4 sm:$0xff]  }
 0x3ce   :  { %6593 = vmatpush1.bf16.msra.mxu1 %v9495_v4  ;;  %6512 = vmatprep.subr.bf16.mxu0 %v9502_v14  ;;  %v10860_v4 = vld [vmem:[%s14974_s5 + $0x2c] ss:$16 sps:$4 sm:$0xff]   ;;  %v10855_v14 = vld [vmem:[%s14974_s5 + $0x20] ss:$16 sps:$4 sm:$0xff]  }
 0x3cf   :  { %6594 = vmatprep.subr.bf16.mxu1 %v9504_v47  ;;  %v10858_v47 = vld [vmem:[%s14974_s5 + $0x28] ss:$16 sps:$4 sm:$0xff]  }
 0x3d1   :  { %6513 = vmatpush1.bf16.msra.mxu0 %v9501_v30  ;;  %v10872_v30 = vld [vmem:[%s14974_s5 + $0x6c] ss:$16 sps:$4 sm:$0xff]  }
 0x3d2   :  { %6595 = vmatpush1.bf16.msra.mxu1 %v9503_v57  ;;  %6514 = vmatprep.subr.bf16.mxu0 %v9510_v37  ;;  %v10867_v57 = vld [vmem:[%s14974_s5 + $0x60] ss:$16 sps:$4 sm:$0xff]   ;;  %v10870_v37 = vld [vmem:[%s14974_s5 + $0x68] ss:$16 sps:$4 sm:$0xff]  }
 0x3d3   :  { %6596 = vmatprep.subr.bf16.mxu1 %v9512_v38  ;;  %v10875_v38 = vld [vmem:[%s14974_s5 + $0x84] ss:$16 sps:$4 sm:$0xff]  }
 0x3d5   :  { %6515 = vmatpush1.bf16.msra.mxu0 %v9509_v41  ;;  %v10884_v41 = vld [vmem:[%s14974_s5 + $0xac] ss:$16 sps:$4 sm:$0xff]  }
 0x3d6   :  { %6597 = vmatpush1.bf16.msra.mxu1 %v9511_v43  ;;  %6516 = vmatprep.subr.bf16.mxu0 %v9518_v44  ;;  %v10879_v43 = vld [vmem:[%s14974_s5 + $0xa0] ss:$16 sps:$4 sm:$0xff]   ;;  %v10882_v44 = vld [vmem:[%s14974_s5 + $0xa8] ss:$16 sps:$4 sm:$0xff]  }
 0x3d7   :  { %6598 = vmatprep.subr.bf16.mxu1 %v9520_v23  ;;  %v10887_v23 = vld [vmem:[%s14974_s5 + $0xc4] ss:$16 sps:$4 sm:$0xff]  }
 0x3d9   :  { %6517 = vmatpush1.bf16.msra.mxu0 %v9517_v40  ;;  %v10896_v40 = vld [vmem:[%s14974_s5 + $0xec] ss:$16 sps:$4 sm:$0xff]  }
 0x3da   :  { %6599 = vmatpush1.bf16.msra.mxu1 %v9519_v28  ;;  %6518 = vmatprep.subr.bf16.mxu0 %v9526_v49  ;;  %v10891_v28 = vld [vmem:[%s14974_s5 + $0xe0] ss:$16 sps:$4 sm:$0xff]   ;;  %v10894_v49 = vld [vmem:[%s14974_s5 + $0xe8] ss:$16 sps:$4 sm:$0xff]  }
 0x3db   :  { %6600 = vmatprep.subr.bf16.mxu1 %v9528_v50  ;;  %v10899_v50 = vld [vmem:[%s14974_s5 + $0x104] ss:$16 sps:$4 sm:$0xff]  }
 0x3dd   :  { %6519 = vmatpush1.bf16.msra.mxu0 %v9525_v55  ;;  %v10908_v55 = vld [vmem:[%s14974_s5 + $0x12c] ss:$16 sps:$4 sm:$0xff]  }
 0x3de   :  { %6601 = vmatpush1.bf16.msra.mxu1 %v9527_v62  ;;  %6520 = vmatprep.subr.bf16.mxu0 %v9534_v24  ;;  %v10903_v62 = vld [vmem:[%s14974_s5 + $0x120] ss:$16 sps:$4 sm:$0xff]   ;;  %v10906_v24 = vld [vmem:[%s14974_s5 + $0x128] ss:$16 sps:$4 sm:$0xff]  }
 0x3df   :  { %6602 = vmatprep.subr.bf16.mxu1 %v9536_v56  ;;  %v10911_v56 = vld [vmem:[%s14974_s5 + $0x144] ss:$16 sps:$4 sm:$0xff]  }
 0x3e1   :  { %6521 = vmatpush1.bf16.msra.mxu0 %v9533_v59  ;;  %v10920_v59 = vld [vmem:[%s14974_s5 + $0x16c] ss:$16 sps:$4 sm:$0xff]  }
 0x3e2   :  { %6603 = vmatpush1.bf16.msra.mxu1 %v9535_v63  ;;  %6522 = vmatprep.subr.bf16.mxu0 %v9542_v1  ;;  %v10915_v63 = vld [vmem:[%s14974_s5 + $0x160] ss:$16 sps:$4 sm:$0xff]   ;;  %v10918_v1 = vld [vmem:[%s14974_s5 + $0x168] ss:$16 sps:$4 sm:$0xff]  }
 0x3e3   :  { %6604 = vmatprep.subr.bf16.mxu1 %v9544_v34  ;;  %v10923_v34 = vld [vmem:[%s14974_s5 + $0x184] ss:$16 sps:$4 sm:$0xff]  }
 0x3e5   :  { %6523 = vmatpush1.bf16.msra.mxu0 %v9541_v21  ;;  %v10932_v21 = vld [vmem:[%s14974_s5 + $0x1ac] ss:$16 sps:$4 sm:$0xff]  }
 0x3e6   :  { %6605 = vmatpush1.bf16.msra.mxu1 %v9543_v3  ;;  %6524 = vmatprep.subr.bf16.mxu0 %v9550_v6  ;;  %v10927_v3 = vld [vmem:[%s14974_s5 + $0x1a0] ss:$16 sps:$4 sm:$0xff]   ;;  %v10930_v6 = vld [vmem:[%s14974_s5 + $0x1a8] ss:$16 sps:$4 sm:$0xff]  }
 0x3e7   :  { %6606 = vmatprep.subr.bf16.mxu1 %v9552_v12  ;;  %v10935_v12 = vld [vmem:[%s14974_s5 + $0x1c4] ss:$16 sps:$4 sm:$0xff]  }
 0x3e9   :  { %6525 = vmatpush1.bf16.msra.mxu0 %v9549_v13  ;;  %v10938_v13 = vld [vmem:[%s14974_s5 + $0x1cc] ss:$16 sps:$4 sm:$0xff]  }
 0x3ea   :  { %6607 = vmatpush1.bf16.msra.mxu1 %v9551_v16  ;;  %7063 = vmatprep.subr.bf16.mxu0 %v10851_v17  ;;  %v10933_v16 = vld [vmem:[%s14974_s5 + $0x1c0] ss:$16 sps:$4 sm:$0xff]   ;;  %v10936_v17 = vld [vmem:[%s14974_s5 + $0x1c8] ss:$16 sps:$4 sm:$0xff]  }
 0x3eb   :  { %7116 = vmatprep.subr.bf16.mxu1 %v10854_v18  ;;  %v10941_v18 = vld [vmem:[%s14974_s5 + $0x1e4] ss:$16 sps:$4 sm:$0xff]  }
 0x3ec   :  { %6527 = vmatmul.mubr.bf16.vlgmr.msra.gmra.mrb[12].mxu0 %v13803_v29 }
 0x3ed   :  { %6609 = vmatmul.mubr.bf16.vlgmr.msra.gmra.mrb[20].mxu1 %v13803_v29  ;;  %7064 = vmatpush1.bf16.msra.mxu0 %v10849_v36  ;;  %v10866_v29 = vld [vmem:[%s14974_s5 + $0x4c] ss:$16 sps:$4 sm:$0xff]  }
 0x3ee   :  { %7117 = vmatpush1.bf16.msra.mxu1 %v10852_v42  ;;  %7065 = vmatprep.subr.bf16.mxu0 %v10857_v22  ;;  %v10944_v36 = vld [vmem:[%s14974_s5 + $0x1ec] ss:$16 sps:$4 sm:$0xff]   ;;  %v10939_v42 = vld [vmem:[%s14974_s5 + $0x1e0] ss:$16 sps:$4 sm:$0xff]   ;;  %v10942_v22 = vld [vmem:[%s14974_s5 + $0x1e8] ss:$16 sps:$4 sm:$0xff]  }
 0x3ef   :  { %7118 = vmatprep.subr.bf16.mxu1 %v10860_v4  ;;  %v14378_v4 = vld [vmem:[%s14975_s4] sm:$0xff] }
 0x3f1   :  { %7066 = vmatpush1.bf16.msra.mxu0 %v10855_v14  ;;  %v4972_v14 = vrot.slane %v14378_v4, %v13541_v60 }
 0x3f2   :  { %7119 = vmatpush1.bf16.msra.mxu1 %v10858_v47  ;;  %7067 = vmatprep.subr.bf16.mxu0 %v10863_v26  ;;  %v4980_v47 = vrot.slane %v14378_v4, %v13780_v53  ;;  %v4976_v26 = vrot.slane %v14378_v4, %v13550_v2 }
 0x3f3   :  { %7120 = vmatprep.subr.bf16.mxu1 %v10866_v29  ;;  %v4984_v29 = vrot.slane %v14378_v4, %v13783_v19 }
 0x3f5   :  { %7068 = vmatpush1.bf16.msra.mxu0 %v10861_v20 }
 0x3f6   :  { %7121 = vmatpush1.bf16.msra.mxu1 %v10864_v27  ;;  %7069 = vmatprep.subr.bf16.mxu0 %v10869_v33 }
 0x3f7   :  { %7122 = vmatprep.subr.bf16.mxu1 %v10872_v30 }
 0x3f9   :  { %7070 = vmatpush1.bf16.msra.mxu0 %v10867_v57 }
 0x3fa   :  { %7123 = vmatpush1.bf16.msra.mxu1 %v10870_v37  ;;  %7071 = vmatprep.subr.bf16.mxu0 %v10875_v38 }
 0x3fb   :  { %7124 = vmatprep.subr.bf16.mxu1 %v10878_v9 }
 0x3fd   :  { %7072 = vmatpush1.bf16.msra.mxu0 %v10873_v39 }
 0x3fe   :  { %7125 = vmatpush1.bf16.msra.mxu1 %v10876_v11  ;;  %7073 = vmatprep.subr.bf16.mxu0 %v10881_v31 }
 0x3ff   :  { %7126 = vmatprep.subr.bf16.mxu1 %v10884_v41 }
 0x401   :  { %7074 = vmatpush1.bf16.msra.mxu0 %v10879_v43 }
 0x402   :  { %7127 = vmatpush1.bf16.msra.mxu1 %v10882_v44  ;;  %7075 = vmatprep.subr.bf16.mxu0 %v10887_v23 }
 0x403   :  { %7128 = vmatprep.subr.bf16.mxu1 %v10890_v35 }
 0x405   :  { %7076 = vmatpush1.bf16.msra.mxu0 %v10885_v45 }
 0x406   :  { %7129 = vmatpush1.bf16.msra.mxu1 %v10888_v46  ;;  %7077 = vmatprep.subr.bf16.mxu0 %v10893_v54 }
 0x407   :  { %7130 = vmatprep.subr.bf16.mxu1 %v10896_v40 }
 0x409   :  { %7078 = vmatpush1.bf16.msra.mxu0 %v10891_v28 }
 0x40a   :  { %7131 = vmatpush1.bf16.msra.mxu1 %v10894_v49  ;;  %7079 = vmatprep.subr.bf16.mxu0 %v10899_v50 }
 0x40b   :  { %7132 = vmatprep.subr.bf16.mxu1 %v10902_v52 }
 0x40d   :  { %7080 = vmatpush1.bf16.msra.mxu0 %v10897_v25  ;;  %v10945_v25 = vld [vmem:[%s14976_s7] ss:$16 sps:$4 sm:$0xff]  }
 0x40e   :  { %7133 = vmatpush1.bf16.msra.mxu1 %v10900_v32  ;;  %7081 = vmatprep.subr.bf16.mxu0 %v10905_v61  ;;  %v10947_v32 = vld [vmem:[%s14976_s7 + $0x4] ss:$16 sps:$4 sm:$0xff]   ;;  %v10948_v61 = vld [vmem:[%s14976_s7 + $0x8] ss:$16 sps:$4 sm:$0xff]  }
 0x40f   :  { %7134 = vmatprep.subr.bf16.mxu1 %v10908_v55  ;;  %v10950_v55 = vld [vmem:[%s14976_s7 + $0xc] ss:$16 sps:$4 sm:$0xff]  }
 0x411   :  { %7082 = vmatpush1.bf16.msra.mxu0 %v10903_v62  ;;  %v10951_v62 = vld [vmem:[%s14976_s7 + $0x20] ss:$16 sps:$4 sm:$0xff]  }
 0x412   :  { %7135 = vmatpush1.bf16.msra.mxu1 %v10906_v24  ;;  %7083 = vmatprep.subr.bf16.mxu0 %v10911_v56  ;;  %v10953_v24 = vld [vmem:[%s14976_s7 + $0x24] ss:$16 sps:$4 sm:$0xff]   ;;  %v10954_v56 = vld [vmem:[%s14976_s7 + $0x28] ss:$16 sps:$4 sm:$0xff]  }
 0x413   :  { %7136 = vmatprep.subr.bf16.mxu1 %v10914_v8  ;;  %v10956_v8 = vld [vmem:[%s14976_s7 + $0x2c] ss:$16 sps:$4 sm:$0xff]  }
 0x415   :  { %7084 = vmatpush1.bf16.msra.mxu0 %v10909_v0  ;;  %v10959_v0 = vld [vmem:[%s14976_s7 + $0x44] ss:$16 sps:$4 sm:$0xff]  }
 0x416   :  { %7137 = vmatpush1.bf16.msra.mxu1 %v10912_v58  ;;  %7085 = vmatprep.subr.bf16.mxu0 %v10917_v15  ;;  %v10957_v58 = vld [vmem:[%s14976_s7 + $0x40] ss:$16 sps:$4 sm:$0xff]   ;;  %v10962_v15 = vld [vmem:[%s14976_s7 + $0x4c] ss:$16 sps:$4 sm:$0xff]  }
 0x417   :  { %7138 = vmatprep.subr.bf16.mxu1 %v10920_v59  ;;  %v10960_v59 = vld [vmem:[%s14976_s7 + $0x48] ss:$16 sps:$4 sm:$0xff]  }
 0x419   :  { %7086 = vmatpush1.bf16.msra.mxu0 %v10915_v63  ;;  %v10965_v63 = vld [vmem:[%s14976_s7 + $0x64] ss:$16 sps:$4 sm:$0xff]  }
 0x41a   :  { %7139 = vmatpush1.bf16.msra.mxu1 %v10918_v1  ;;  %7087 = vmatprep.subr.bf16.mxu0 %v10923_v34  ;;  %v10968_v1 = vld [vmem:[%s14976_s7 + $0x6c] ss:$16 sps:$4 sm:$0xff]   ;;  %v10963_v34 = vld [vmem:[%s14976_s7 + $0x60] ss:$16 sps:$4 sm:$0xff]  }
 0x41b   :  { %7140 = vmatprep.subr.bf16.mxu1 %v10926_v5  ;;  %v10966_v5 = vld [vmem:[%s14976_s7 + $0x68] ss:$16 sps:$4 sm:$0xff]  }
 0x41d   :  { %7088 = vmatpush1.bf16.msra.mxu0 %v10921_v51  ;;  %v10971_v51 = vld [vmem:[%s14976_s7 + $0x84] ss:$16 sps:$4 sm:$0xff]  }
 0x41e   :  { %7141 = vmatpush1.bf16.msra.mxu1 %v10924_v7  ;;  %7089 = vmatprep.subr.bf16.mxu0 %v10929_v10  ;;  %v10969_v7 = vld [vmem:[%s14976_s7 + $0x80] ss:$16 sps:$4 sm:$0xff]   ;;  %v10974_v10 = vld [vmem:[%s14976_s7 + $0x8c] ss:$16 sps:$4 sm:$0xff]  }
 0x41f   :  { %7142 = vmatprep.subr.bf16.mxu1 %v10932_v21  ;;  %v10972_v21 = vld [vmem:[%s14976_s7 + $0x88] ss:$16 sps:$4 sm:$0xff]  }
 0x421   :  { %7090 = vmatpush1.bf16.msra.mxu0 %v10927_v3  ;;  %v10977_v3 = vld [vmem:[%s14976_s7 + $0xa4] ss:$16 sps:$4 sm:$0xff]  }
 0x422   :  { %7143 = vmatpush1.bf16.msra.mxu1 %v10930_v6  ;;  %7091 = vmatprep.subr.bf16.mxu0 %v10935_v12  ;;  %v10980_v6 = vld [vmem:[%s14976_s7 + $0xac] ss:$16 sps:$4 sm:$0xff]   ;;  %v10975_v12 = vld [vmem:[%s14976_s7 + $0xa0] ss:$16 sps:$4 sm:$0xff]  }
 0x423   :  { %7144 = vmatprep.subr.bf16.mxu1 %v10938_v13  ;;  %v10978_v13 = vld [vmem:[%s14976_s7 + $0xa8] ss:$16 sps:$4 sm:$0xff]  }
 0x425   :  { %7092 = vmatpush1.bf16.msra.mxu0 %v10933_v16  ;;  %v10983_v16 = vld [vmem:[%s14976_s7 + $0xc4] ss:$16 sps:$4 sm:$0xff]  }
 0x426   :  { %7145 = vmatpush1.bf16.msra.mxu1 %v10936_v17  ;;  %7093 = vmatprep.subr.bf16.mxu0 %v10941_v18  ;;  %v10986_v17 = vld [vmem:[%s14976_s7 + $0xcc] ss:$16 sps:$4 sm:$0xff]   ;;  %v10981_v18 = vld [vmem:[%s14976_s7 + $0xc0] ss:$16 sps:$4 sm:$0xff]  }
 0x427   :  { %7146 = vmatprep.subr.bf16.mxu1 %v10944_v36  ;;  %v10984_v36 = vld [vmem:[%s14976_s7 + $0xc8] ss:$16 sps:$4 sm:$0xff]  }
 0x429   :  { %7094 = vmatpush1.bf16.msra.mxu0 %v10939_v42  ;;  %v10989_v42 = vld [vmem:[%s14976_s7 + $0xe4] ss:$16 sps:$4 sm:$0xff]  }
 0x42a   :  { %7147 = vmatpush1.bf16.msra.mxu1 %v10942_v22  ;;  %7423 = vmatprep.subr.bf16.mxu0 %v10947_v32  ;;  %v10992_v22 = vld [vmem:[%s14976_s7 + $0xec] ss:$16 sps:$4 sm:$0xff]  }
 0x42b   :  { %7536 = vmatprep.subr.bf16.mxu1 %v10950_v55 }
 0x43f   :  { %v6364_v20 = vpop.f32.mrb[8].mxu0  ;;  %v6446_v27 = vpop.f32.mrb[16].mxu1 }
 0x440   :  { %v9786_v33 = vadd.f32 %v6364_v20, %v4972_v14  ;;  %v9788_v30 = vadd.f32 %v6446_v27, %v4980_v47  ;;  %v6366_v57 = vpop.f32.mrb[9].mxu0  ;;  %v6448_v37 = vpop.f32.mrb[17].mxu1  ;;  %v10987_v14 = vld [vmem:[%s14976_s7 + $0xe0] ss:$16 sps:$4 sm:$0xff]   ;;  %v10990_v47 = vld [vmem:[%s14976_s7 + $0xe8] ss:$16 sps:$4 sm:$0xff]  }
 0x441   :  { %v9787_v38 = vadd.f32 %v6366_v57, %v4976_v26  ;;  %v9789_v9 = vadd.f32 %v6448_v37, %v4984_v29  ;;  %v6368_v39 = vpop.f32.mrb[10].mxu0  ;;  %v6450_v11 = vpop.f32.mrb[18].mxu1  ;;  %v4987_v26 = vsub.s32 4, %v13537_v48  ;;  %v4995_v29 = vsub.s32 6, %v13537_v48 }
 0x442   :  { %v6617_v31 = vmax.f32 %v9786_v33, 0.0  ;;  %v6619_v41 = vmax.f32 %v9788_v30, 0.0  ;;  %v6369_v43 = vpop.f32.mrb[11].mxu0  ;;  %v6451_v44 = vpop.f32.mrb[19].mxu1  ;;  %v4991_v20 = vsub.s32 5, %v13537_v48  ;;  %v4999_v27 = vsub.s32 7, %v13537_v48 }
 0x443   :  { %v6618_v23 = vmax.f32 %v9787_v38, 0.0  ;;  %v6620_v35 = vmax.f32 %v9789_v9, 0.0  ;;  %v4988_v33 = vrot.slane %v14378_v4, %v4987_v26  ;;  %v4996_v30 = vrot.slane %v14378_v4, %v4995_v29 }
 0x444   :  { %v6625_v45 = vpack.c.bf16 %v6617_v31, %v6617_v31  ;;  %v6627_v46 = vpack.c.bf16 %v6619_v41, %v6619_v41  ;;  %v4992_v57 = vrot.slane %v14378_v4, %v4991_v20  ;;  %v5000_v37 = vrot.slane %v14378_v4, %v4999_v27 }
 0x445   :  { %v6626_v54 = vpack.c.bf16 %v6618_v23, %v6618_v23  ;;  %v6628_v40 = vpack.c.bf16 %v6620_v35, %v6620_v35 }
 0x446   :  { %6633 = vst [vmem:[#allocation2] sm:$0xf] %v6625_v45  ;;  %v6637_v28 = vrot.slane %v6627_v46, 4 }
 0x447   :  { %6634 = vst [vmem:[#allocation2 + $0x8] sm:$0xf] %v6626_v54  ;;  %v6638_v49 = vrot.slane %v6628_v40, 4 }
 0x448   :  { %6641 = vst [vmem:[#allocation2] sm:$0xf0] %v6637_v28 }
 0x449   :  { %6642 = vst [vmem:[#allocation2 + $0x8] sm:$0xf0] %v6638_v49 }
 0x44f   :  { %v6653_v52 = vld [vmem:[#allocation2] sm:$0xff] }
 0x450   :  { %v6654_v50 = vld [vmem:[#allocation2 + $0x8] sm:$0xff] }
 0x451   :  { %7095 = vmatprep.mubr.bf16.mxu0 %v6654_v50  ;;  %7148 = vmatprep.mubr.bf16.mxu1 %v6654_v50 }
 0x452   :  { %7096 = vmatmul.mubr.bf16.vlgmr.msra.gmra.mrb[16].mxu0 %v6653_v52  ;;  %7149 = vmatmul.mubr.bf16.vlgmr.msra.gmra.mrb[24].mxu1 %v6653_v52 }
 0x453   :  { %7424 = vmatpush1.bf16.msra.mxu0 %v10945_v25  ;;  %7537 = vmatpush1.bf16.msra.mxu1 %v10948_v61 }
 0x454   :  { %7425 = vmatprep.subr.bf16.mxu0 %v10953_v24  ;;  %7538 = vmatprep.subr.bf16.mxu1 %v10956_v8  ;;  %v6721_v24 = vld [vmem:[%s14977_s6] sm:$0xf] }
 0x455   :  { %v14501_v8 = vrot.slane %v6721_v24, %v13780_v53 }
 0x457   :  { %7426 = vmatpush1.bf16.msra.mxu0 %v10951_v62  ;;  %7539 = vmatpush1.bf16.msra.mxu1 %v10954_v56  ;;  %v11262_v62 = vmov 0   ;;  %v14498_v56 = vrot.slane %v6721_v24, %v13541_v60 }
 0x458   :  { %7427 = vmatprep.subr.bf16.mxu0 %v10959_v0  ;;  %7540 = vmatprep.subr.bf16.mxu1 %v10962_v15  ;;  %v14504_v0 = vrot.slane %v6721_v24, %v13550_v2 }
 0x45b   :  { %7428 = vmatpush1.bf16.msra.mxu0 %v10957_v58  ;;  %7541 = vmatpush1.bf16.msra.mxu1 %v10960_v59  ;;  %v14507_v58 = vrot.slane %v6721_v24, %v13783_v19 }
 0x45c   :  { %7429 = vmatprep.subr.bf16.mxu0 %v10965_v63  ;;  %7542 = vmatprep.subr.bf16.mxu1 %v10968_v1 }
 0x45f   :  { %7430 = vmatpush1.bf16.msra.mxu0 %v10963_v34  ;;  %7543 = vmatpush1.bf16.msra.mxu1 %v10966_v5 }
 0x460   :  { %7431 = vmatprep.subr.bf16.mxu0 %v10971_v51  ;;  %7544 = vmatprep.subr.bf16.mxu1 %v10974_v10 }
 0x463   :  { %7432 = vmatpush1.bf16.msra.mxu0 %v10969_v7  ;;  %7545 = vmatpush1.bf16.msra.mxu1 %v10972_v21 }
 0x464   :  { %7433 = vmatprep.subr.bf16.mxu0 %v10977_v3  ;;  %7546 = vmatprep.subr.bf16.mxu1 %v10980_v6 }
 0x467   :  { %7434 = vmatpush1.bf16.msra.mxu0 %v10975_v12  ;;  %7547 = vmatpush1.bf16.msra.mxu1 %v10978_v13 }
 0x468   :  { %7435 = vmatprep.subr.bf16.mxu0 %v10983_v16  ;;  %7548 = vmatprep.subr.bf16.mxu1 %v10986_v17 }
 0x46b   :  { %7436 = vmatpush1.bf16.msra.mxu0 %v10981_v18  ;;  %7549 = vmatpush1.bf16.msra.mxu1 %v10984_v36 }
 0x46c   :  { %7437 = vmatprep.subr.bf16.mxu0 %v10989_v42  ;;  %7550 = vmatprep.subr.bf16.mxu1 %v10992_v22 }
 0x46f   :  { %7438 = vmatpush1.bf16.msra.mxu0 %v10987_v14  ;;  %7551 = vmatpush1.bf16.msra.mxu1 %v10990_v47 }
 0x4bf   :  { %v6528_v38 = vpop.f32.mrb[12].mxu0 }
 0x4c0   :  { %v9790_v9 = vadd.f32 %v6528_v38, %v4988_v33  ;;  %v6610_v39 = vpop.f32.mrb[20].mxu1  ;;  %v6530_v11 = vpop.f32.mrb[13].mxu0  ;;  %v10995_v38 = vld [vmem:[%s14978_s9 + $0x10] sm:$0xff]  }
 0x4c1   :  { %v9792_v31 = vadd.f32 %v6610_v39, %v4996_v30  ;;  %v9791_v41 = vadd.f32 %v6530_v11, %v4992_v57  ;;  %v6612_v43 = vpop.f32.mrb[21].mxu1  ;;  %v6532_v44 = vpop.f32.mrb[14].mxu0  ;;  %v10993_v57 = vld [vmem:[%s14978_s9] sm:$0xff]   ;;  %v10998_v11 = vld [vmem:[%s14978_s9 + $0x28] sm:$0xff]  }
 0x4c2   :  { %v6621_v23 = vmax.f32 %v9790_v9, 0.0  ;;  %v9793_v35 = vadd.f32 %v6612_v43, %v5000_v37  ;;  %v6614_v45 = vpop.f32.mrb[22].mxu1  ;;  %v6533_v48 = vpop.f32.mrb[15].mxu0  ;;  %v10994_v37 = vld [vmem:[%s14978_s9 + $0x8] sm:$0xff]   ;;  %9698 = vmatprep.subr.bf16.mxu0 %v10993_v57  ;;  %v10996_v9 = vld [vmem:[%s14978_s9 + $0x18] sm:$0xff]   ;;  %v10997_v39 = vld [vmem:[%s14978_s9 + $0x20] sm:$0xff]  }
 0x4c3   :  { %v6623_v46 = vmax.f32 %v9792_v31, 0.0  ;;  %v6622_v54 = vmax.f32 %v9791_v41, 0.0  ;;  %v6615_v40 = vpop.f32.mrb[23].mxu1 }
 0x4c4   :  { %v6629_v28 = vpack.c.bf16 %v6621_v23, %v6621_v23  ;;  %v6624_v49 = vmax.f32 %v9793_v35, 0.0 }
 0x4c5   :  { %v6631_v50 = vpack.c.bf16 %v6623_v46, %v6623_v46  ;;  %v6630_v52 = vpack.c.bf16 %v6622_v54, %v6622_v54 }
 0x4c6   :  { %6643 = vst [vmem:[#allocation2 + $0x10] sm:$0xf] %v6629_v28  ;;  %v6632_v4 = vpack.c.bf16 %v6624_v49, %v6624_v49 }
 0x4c7   :  { %v6647_v25 = vrot.slane %v6631_v50, 4  ;;  %6644 = vst [vmem:[#allocation2 + $0x18] sm:$0xf] %v6630_v52 }
 0x4c8   :  { %v6648_v32 = vrot.slane %v6632_v4, 4 }
 0x4c9   :  { %6651 = vst [vmem:[#allocation2 + $0x10] sm:$0xf0] %v6647_v25 }
 0x4ca   :  { %6652 = vst [vmem:[#allocation2 + $0x18] sm:$0xf0] %v6648_v32 }
 0x4d0   :  { %v6655_v55 = vld [vmem:[#allocation2 + $0x10] sm:$0xff] }
 0x4d1   :  { %v6656_v61 = vld [vmem:[#allocation2 + $0x18] sm:$0xff] }
 0x4d2   :  { %7105 = vmatprep.mubr.bf16.mxu0 %v6656_v61  ;;  %7158 = vmatprep.mubr.bf16.mxu1 %v6656_v61 }
 0x4d3   :  { %7106 = vmatmul.mubr.bf16.gmra.mrb[20].mxu0 %v6655_v55  ;;  %7159 = vmatmul.mubr.bf16.gmra.mrb[28].mxu1 %v6655_v55 }
 0x4d4   :  { %7455 = vmatprep.mubr.bf16.mxu0 %v11262_v62  ;;  %7568 = vmatprep.mubr.bf16.mxu1 %v11262_v62 }
 0x525   :  { %v7097_v15 = vpop.f32.mrb[16].mxu0  ;;  %v7150_v59 = vpop.f32.mrb[24].mxu1 }
 0x526   :  { %v7098_v63 = vadd.f32 %v7097_v15, %v14498_v56  ;;  %v7151_v1 = vadd.f32 %v7150_v59, %v14501_v8  ;;  %v7099_v34 = vpop.f32.mrb[17].mxu0  ;;  %v7152_v5 = vpop.f32.mrb[25].mxu1 }
 0x527   :  { %v7100_v51 = vadd.f32 %v7099_v34, %v14504_v0  ;;  %v7153_v7 = vadd.f32 %v7152_v5, %v14507_v58  ;;  %v7101_v10 = vpop.f32.mrb[18].mxu0  ;;  %v7154_v21 = vpop.f32.mrb[26].mxu1 }
 0x528   :  { %v7102_v3 = vadd.f32 %v7101_v10, %v14498_v56  ;;  %v7155_v6 = vadd.f32 %v7154_v21, %v14501_v8  ;;  %v7103_v12 = vpop.f32.mrb[19].mxu0  ;;  %v7156_v13 = vpop.f32.mrb[27].mxu1  ;;  %v7169_v18 = vmax.f32 %v7098_v63, 0.0  ;;  %v7171_v36 = vmax.f32 %v7151_v1, 0.0  ;;  %v10999_v21 = vld [vmem:[%s14978_s9 + $0x30] sm:$0xff]  }
 0x529   :  { %v7104_v16 = vadd.f32 %v7103_v12, %v14504_v0  ;;  %v7157_v17 = vadd.f32 %v7156_v13, %v14507_v58  ;;  %v7170_v14 = vmax.f32 %v7100_v51, 0.0  ;;  %v7172_v47 = vmax.f32 %v7153_v7, 0.0 }
 0x52a   :  { %v7173_v42 = vmax.f32 %v7102_v3, 0.0  ;;  %v7175_v22 = vmax.f32 %v7155_v6, 0.0 }
 0x52b   :  { %v7174_v26 = vmax.f32 %v7104_v16, 0.0  ;;  %v7176_v29 = vmax.f32 %v7157_v17, 0.0 }
 0x52c   :  { %v7185_v20 = vpack.c.bf16 %v7173_v42, %v7169_v18  ;;  %v14517_v27 = vpack.c.bf16 %v7175_v22, %v7171_v36 }
 0x52d   :  { %v7186_v33 = vpack.c.bf16 %v7174_v26, %v7170_v14  ;;  %v14519_v30 = vpack.c.bf16 %v7176_v29, %v7172_v47  ;;  %v11000_v14 = vld [vmem:[%s14978_s9 + $0x38] sm:$0xff]  }
 0x52e   :  { %7456 = vmatmul.mubr.bf16.vlgmr.msra.gmra.mrb[24].mxu0 %v7185_v20  ;;  %7569 = vmatmul.mubr.bf16.vlgmr.msra.gmra.mrb[32].mxu1 %v7185_v20 }
 0x52f   :  { %7465 = vmatprep.mubr.bf16.mxu0 %v11262_v62  ;;  %7578 = vmatprep.mubr.bf16.mxu1 %v11262_v62 }
 0x530   :  { %9699 = vmatpush3.bf16.msra.mxu0 %v10993_v57 }
 0x531   :  { %9700 = vmatprep.subr.bf16.mxu0 %v10994_v37 }
 0x534   :  { %9701 = vmatpush3.bf16.msra.mxu0 %v10994_v37 }
 0x535   :  { %9702 = vmatprep.subr.bf16.mxu0 %v10995_v38 }
 0x538   :  { %9703 = vmatpush3.bf16.msra.mxu0 %v10995_v38 }
 0x539   :  { %9704 = vmatprep.subr.bf16.mxu0 %v10996_v9 }
 0x53c   :  { %9705 = vmatpush3.bf16.msra.mxu0 %v10996_v9 }
 0x53d   :  { %9706 = vmatprep.subr.bf16.mxu0 %v10997_v39 }
 0x540   :  { %9707 = vmatpush3.bf16.msra.mxu0 %v10997_v39 }
 0x541   :  { %9708 = vmatprep.subr.bf16.mxu0 %v10998_v11 }
 0x544   :  { %9709 = vmatpush3.bf16.msra.mxu0 %v10998_v11 }
 0x545   :  { %9710 = vmatprep.subr.bf16.mxu0 %v10999_v21 }
 0x548   :  { %9711 = vmatpush3.bf16.msra.mxu0 %v10999_v21 }
 0x549   :  { %9712 = vmatprep.subr.bf16.mxu0 %v11000_v14 }
 0x54c   :  { %9713 = vmatpush3.bf16.msra.mxu0 %v11000_v14 }
 0x5a6   :  { %v7107_v31 = vpop.f32.mrb[20].mxu0  ;;  %v7160_v41 = vpop.f32.mrb[28].mxu1 }
 0x5a7   :  { %v7108_v43 = vadd.f32 %v7107_v31, %v14498_v56  ;;  %v7161_v44 = vadd.f32 %v7160_v41, %v14501_v8  ;;  %v7109_v23 = vpop.f32.mrb[21].mxu0  ;;  %v7162_v35 = vpop.f32.mrb[29].mxu1 }
 0x5a8   :  { %v7110_v45 = vadd.f32 %v7109_v23, %v14504_v0  ;;  %v7163_v48 = vadd.f32 %v7162_v35, %v14507_v58  ;;  %v7111_v46 = vpop.f32.mrb[22].mxu0  ;;  %v7164_v54 = vpop.f32.mrb[30].mxu1 }
 0x5a9   :  { %v7112_v40 = vadd.f32 %v7111_v46, %v14498_v56  ;;  %v7165_v28 = vadd.f32 %v7164_v54, %v14501_v8  ;;  %v7113_v49 = vpop.f32.mrb[23].mxu0  ;;  %v7166_v50 = vpop.f32.mrb[31].mxu1  ;;  %v7177_v25 = vmax.f32 %v7108_v43, 0.0  ;;  %v7179_v32 = vmax.f32 %v7161_v44, 0.0  ;;  %v7241_v8 = vld [vmem:[%s14979_s8] sm:$0xf] }
 0x5aa   :  { %v7114_v52 = vadd.f32 %v7113_v49, %v14504_v0  ;;  %v7167_v4 = vadd.f32 %v7166_v50, %v14507_v58  ;;  %v7178_v24 = vmax.f32 %v7110_v45, 0.0  ;;  %v7180_v15 = vmax.f32 %v7163_v48, 0.0 }
 0x5ab   :  { %v7181_v61 = vmax.f32 %v7112_v40, 0.0  ;;  %v7183_v55 = vmax.f32 %v7165_v28, 0.0  ;;  %v14569_v0 = vrot.slane %v7241_v8, %v13541_v60  ;;  %v14572_v58 = vrot.slane %v7241_v8, %v13780_v53 }
 0x5ac   :  { %v7182_v59 = vmax.f32 %v7114_v52, 0.0  ;;  %v7184_v63 = vmax.f32 %v7167_v4, 0.0  ;;  %v14575_v51 = vrot.slane %v7241_v8, %v13550_v2  ;;  %v14578_v7 = vrot.slane %v7241_v8, %v13783_v19 }
 0x5ad   :  { %v7189_v1 = vpack.c.bf16 %v7181_v61, %v7177_v25  ;;  %v7191_v34 = vpack.c.bf16 %v7183_v55, %v7179_v32 }
 0x5ae   :  { %v7190_v5 = vpack.c.bf16 %v7182_v59, %v7178_v24  ;;  %v7192_v56 = vpack.c.bf16 %v7184_v63, %v7180_v15 }
 0x5af   :  { %7466 = vmatmul.mubr.bf16.gmra.mrb[28].mxu0 %v7189_v1  ;;  %7579 = vmatmul.mubr.bf16.gmra.mrb[36].mxu1 %v7189_v1 }
 0x5b0   :  { %7475 = vmatprep.mubr.bf16.mxu0 %v11262_v62  ;;  %7588 = vmatprep.mubr.bf16.mxu1 %v11262_v62 }
 0x5b7   :  { %7476 = vmatmul.mubr.bf16.gmra.mrb[32].mxu0 %v7186_v33  ;;  %7589 = vmatmul.mubr.bf16.gmra.mrb[40].mxu1 %v7186_v33 }
 0x5b8   :  { %7485 = vmatprep.mubr.bf16.mxu0 %v11262_v62  ;;  %7598 = vmatprep.mubr.bf16.mxu1 %v11262_v62 }
 0x5bf   :  { %7486 = vmatmul.mubr.bf16.gmra.mrb[36].mxu0 %v7190_v5  ;;  %7599 = vmatmul.mubr.bf16.gmra.mrb[44].mxu1 %v7190_v5 }
 0x5c0   :  { %7495 = vmatprep.mubr.bf16.mxu0 %v11262_v62  ;;  %7608 = vmatprep.mubr.bf16.mxu1 %v11262_v62 }
 0x5c7   :  { %7496 = vmatmul.mubr.bf16.gmra.mrb[40].mxu0 %v14517_v27  ;;  %7609 = vmatmul.mubr.bf16.gmra.mrb[48].mxu1 %v14517_v27 }
 0x5c8   :  { %7505 = vmatprep.mubr.bf16.mxu0 %v11262_v62  ;;  %7618 = vmatprep.mubr.bf16.mxu1 %v11262_v62 }
 0x5cf   :  { %7506 = vmatmul.mubr.bf16.gmra.mrb[44].mxu0 %v7191_v34  ;;  %7619 = vmatmul.mubr.bf16.gmra.mrb[52].mxu1 %v7191_v34 }
 0x5d0   :  { %7515 = vmatprep.mubr.bf16.mxu0 %v11262_v62  ;;  %7628 = vmatprep.mubr.bf16.mxu1 %v11262_v62 }
 0x5d7   :  { %7516 = vmatmul.mubr.bf16.gmra.mrb[48].mxu0 %v14519_v30  ;;  %7629 = vmatmul.mubr.bf16.gmra.mrb[56].mxu1 %v14519_v30 }
 0x5d8   :  { %7525 = vmatprep.mubr.bf16.mxu0 %v11262_v62  ;;  %7638 = vmatprep.mubr.bf16.mxu1 %v11262_v62 }
 0x5df   :  { %7526 = vmatmul.mubr.bf16.gmra.mrb[52].mxu0 %v7192_v56  ;;  %7639 = vmatmul.mubr.bf16.gmra.mrb[60].mxu1 %v7192_v56 }
 0x601   :  { %v7457_v10 = vpop.f32.mrb[24].mxu0  ;;  %v7570_v62 = vpop.f32.mrb[32].mxu1 }
 0x602   :  { %v7458_v3 = vadd.f32 %v7457_v10, %v14569_v0  ;;  %v7571_v60 = vadd.f32 %v7570_v62, %v14572_v58  ;;  %v7459_v6 = vpop.f32.mrb[25].mxu0  ;;  %v7572_v12 = vpop.f32.mrb[33].mxu1 }
 0x603   :  { %v7460_v53 = vadd.f32 %v7459_v6, %v14575_v51  ;;  %v7573_v2 = vadd.f32 %v7572_v12, %v14578_v7  ;;  %v7461_v13 = vpop.f32.mrb[26].mxu0  ;;  %v7574_v16 = vpop.f32.mrb[34].mxu1 }
 0x604   :  { %v7462_v19 = vadd.f32 %v7461_v13, %v14569_v0  ;;  %v7575_v17 = vadd.f32 %v7574_v16, %v14572_v58  ;;  %v7463_v18 = vpop.f32.mrb[27].mxu0  ;;  %v7576_v36 = vpop.f32.mrb[35].mxu1  ;;  %v7649_v47 = vmax.f32 %v7458_v3, 0.0  ;;  %v7651_v26 = vmax.f32 %v7571_v60, 0.0 }
 0x605   :  { %v7464_v42 = vadd.f32 %v7463_v18, %v14575_v51  ;;  %v7577_v22 = vadd.f32 %v7576_v36, %v14578_v7  ;;  %v7650_v27 = vmax.f32 %v7460_v53, 0.0  ;;  %v7652_v33 = vmax.f32 %v7573_v2, 0.0 }
 0x606   :  { %v7653_v29 = vmax.f32 %v7462_v19, 0.0  ;;  %v7655_v20 = vmax.f32 %v7575_v17, 0.0 }
 0x607   :  { %v7654_v30 = vmax.f32 %v7464_v42, 0.0  ;;  %v7656_v57 = vmax.f32 %v7577_v22, 0.0 }
 0x608   :  { %v7713_v37 = vpack.c.bf16 %v7653_v29, %v7649_v47  ;;  %v14594_v38 = vpack.c.bf16 %v7655_v20, %v7651_v26 }
 0x609   :  { %v14596_v9 = vpack.c.bf16 %v7654_v30, %v7650_v27  ;;  %v14598_v39 = vpack.c.bf16 %v7656_v57, %v7652_v33 }
 0x60a   :  { %9714 = vmatprep.mubr.bf16.mxu0 %v7713_v37 }
 0x682   :  { %v7467_v11 = vpop.f32.mrb[28].mxu0  ;;  %v7580_v31 = vpop.f32.mrb[36].mxu1 }
 0x683   :  { %v7468_v41 = vadd.f32 %v7467_v11, %v14569_v0  ;;  %v7581_v43 = vadd.f32 %v7580_v31, %v14572_v58  ;;  %v7469_v44 = vpop.f32.mrb[29].mxu0  ;;  %v7582_v23 = vpop.f32.mrb[37].mxu1 }
 0x684   :  { %v7470_v35 = vadd.f32 %v7469_v44, %v14575_v51  ;;  %v7583_v45 = vadd.f32 %v7582_v23, %v14578_v7  ;;  %v7471_v48 = vpop.f32.mrb[30].mxu0  ;;  %v7584_v46 = vpop.f32.mrb[38].mxu1 }
 0x685   :  { %v7472_v54 = vadd.f32 %v7471_v48, %v14569_v0  ;;  %v7585_v40 = vadd.f32 %v7584_v46, %v14572_v58  ;;  %v7473_v28 = vpop.f32.mrb[31].mxu0  ;;  %v7586_v49 = vpop.f32.mrb[39].mxu1  ;;  %v7657_v4 = vmax.f32 %v7468_v41, 0.0  ;;  %v7659_v25 = vmax.f32 %v7581_v43, 0.0 }
 0x686   :  { %v7474_v50 = vadd.f32 %v7473_v28, %v14575_v51  ;;  %v7587_v52 = vadd.f32 %v7586_v49, %v14578_v7  ;;  %v7658_v55 = vmax.f32 %v7470_v35, 0.0  ;;  %v7660_v24 = vmax.f32 %v7583_v45, 0.0 }
 0x687   :  { %v7661_v32 = vmax.f32 %v7472_v54, 0.0  ;;  %v7663_v61 = vmax.f32 %v7585_v40, 0.0 }
 0x688   :  { %v7662_v15 = vmax.f32 %v7474_v50, 0.0  ;;  %v7664_v59 = vmax.f32 %v7587_v52, 0.0 }
 0x689   :  { %v7717_v63 = vpack.c.bf16 %v7661_v32, %v7657_v4  ;;  %v14608_v1 = vpack.c.bf16 %v7663_v61, %v7659_v25 }
 0x68a   :  { %v14610_v34 = vpack.c.bf16 %v7662_v15, %v7658_v55  ;;  %v14612_v5 = vpack.c.bf16 %v7664_v59, %v7660_v24  ;;  %v7477_v56 = vpop.f32.mrb[32].mxu0  ;;  %v7590_v8 = vpop.f32.mrb[40].mxu1 }
 0x68b   :  { %v7478_v10 = vadd.f32 %v7477_v56, %v14569_v0  ;;  %v7591_v62 = vadd.f32 %v7590_v8, %v14572_v58  ;;  %v7479_v21 = vpop.f32.mrb[33].mxu0  ;;  %v7592_v3 = vpop.f32.mrb[41].mxu1  ;;  %9715 = vmatmul.mubr.bf16.vlgmr.msra.gmra.mrb[56].mxu0 %v7717_v63 }
 0x68c   :  { %v7480_v60 = vadd.f32 %v7479_v21, %v14575_v51  ;;  %v7593_v6 = vadd.f32 %v7592_v3, %v14578_v7  ;;  %v7481_v12 = vpop.f32.mrb[34].mxu0  ;;  %v7594_v53 = vpop.f32.mrb[42].mxu1 }
 0x68d   :  { %v7482_v2 = vadd.f32 %v7481_v12, %v14569_v0  ;;  %v7595_v13 = vadd.f32 %v7594_v53, %v14572_v58  ;;  %v7483_v16 = vpop.f32.mrb[35].mxu0  ;;  %v7596_v19 = vpop.f32.mrb[43].mxu1  ;;  %v7665_v36 = vmax.f32 %v7478_v10, 0.0  ;;  %v7667_v42 = vmax.f32 %v7591_v62, 0.0 }
 0x68e   :  { %v7484_v17 = vadd.f32 %v7483_v16, %v14575_v51  ;;  %v7597_v18 = vadd.f32 %v7596_v19, %v14578_v7  ;;  %v7666_v47 = vmax.f32 %v7480_v60, 0.0  ;;  %v7668_v26 = vmax.f32 %v7593_v6, 0.0 }
 0x68f   :  { %v7669_v22 = vmax.f32 %v7482_v2, 0.0  ;;  %v7671_v14 = vmax.f32 %v7595_v13, 0.0 }
 0x690   :  { %v7670_v29 = vmax.f32 %v7484_v17, 0.0  ;;  %v7672_v20 = vmax.f32 %v7597_v18, 0.0 }
 0x691   :  { %v7721_v27 = vpack.c.bf16 %v7669_v22, %v7665_v36  ;;  %v14622_v33 = vpack.c.bf16 %v7671_v14, %v7667_v42 }
 0x692   :  { %v14624_v30 = vpack.c.bf16 %v7670_v29, %v7666_v47  ;;  %v14626_v57 = vpack.c.bf16 %v7672_v20, %v7668_v26  ;;  %v7487_v37 = vpop.f32.mrb[36].mxu0  ;;  %v7600_v11 = vpop.f32.mrb[44].mxu1 }
 0x693   :  { %v7488_v31 = vadd.f32 %v7487_v37, %v14569_v0  ;;  %v7601_v41 = vadd.f32 %v7600_v11, %v14572_v58  ;;  %v7489_v43 = vpop.f32.mrb[37].mxu0  ;;  %v7602_v44 = vpop.f32.mrb[45].mxu1  ;;  %9718 = vmatprep.mubr.bf16.mxu0 %v7721_v27 }
 0x694   :  { %v7490_v23 = vadd.f32 %v7489_v43, %v14575_v51  ;;  %v7603_v35 = vadd.f32 %v7602_v44, %v14578_v7  ;;  %v7491_v45 = vpop.f32.mrb[38].mxu0  ;;  %v7604_v48 = vpop.f32.mrb[46].mxu1 }
 0x695   :  { %v7492_v46 = vadd.f32 %v7491_v45, %v14569_v0  ;;  %v7605_v54 = vadd.f32 %v7604_v48, %v14572_v58  ;;  %v7493_v40 = vpop.f32.mrb[39].mxu0  ;;  %v7606_v28 = vpop.f32.mrb[47].mxu1  ;;  %v7673_v52 = vmax.f32 %v7488_v31, 0.0  ;;  %v7675_v4 = vmax.f32 %v7601_v41, 0.0 }
 0x696   :  { %v7494_v49 = vadd.f32 %v7493_v40, %v14575_v51  ;;  %v7607_v50 = vadd.f32 %v7606_v28, %v14578_v7  ;;  %v7674_v61 = vmax.f32 %v7490_v23, 0.0  ;;  %v7676_v55 = vmax.f32 %v7603_v35, 0.0 }
 0x697   :  { %v7677_v25 = vmax.f32 %v7492_v46, 0.0  ;;  %v7679_v32 = vmax.f32 %v7605_v54, 0.0 }
 0x698   :  { %v7678_v24 = vmax.f32 %v7494_v49, 0.0  ;;  %v7680_v15 = vmax.f32 %v7607_v50, 0.0 }
 0x699   :  { %v7725_v59 = vpack.c.bf16 %v7677_v25, %v7673_v52  ;;  %v14636_v63 = vpack.c.bf16 %v7679_v32, %v7675_v4 }
 0x69a   :  { %v14638_v56 = vpack.c.bf16 %v7678_v24, %v7674_v61  ;;  %v14640_v8 = vpack.c.bf16 %v7680_v15, %v7676_v55  ;;  %v7497_v10 = vpop.f32.mrb[40].mxu0  ;;  %v7610_v62 = vpop.f32.mrb[48].mxu1 }
 0x69b   :  { %v7498_v21 = vadd.f32 %v7497_v10, %v14569_v0  ;;  %v7611_v3 = vadd.f32 %v7610_v62, %v14572_v58  ;;  %v7499_v60 = vpop.f32.mrb[41].mxu0  ;;  %v7612_v6 = vpop.f32.mrb[49].mxu1  ;;  %9719 = vmatmul.mubr.bf16.gmra.mrb[60].mxu0 %v7725_v59 }
 0x69c   :  { %v7500_v12 = vadd.f32 %v7499_v60, %v14575_v51  ;;  %v7613_v53 = vadd.f32 %v7612_v6, %v14578_v7  ;;  %v7501_v2 = vpop.f32.mrb[42].mxu0  ;;  %v7614_v13 = vpop.f32.mrb[50].mxu1 }
 0x69d   :  { %v7502_v16 = vadd.f32 %v7501_v2, %v14569_v0  ;;  %v7615_v19 = vadd.f32 %v7614_v13, %v14572_v58  ;;  %v7503_v17 = vpop.f32.mrb[43].mxu0  ;;  %v7616_v18 = vpop.f32.mrb[51].mxu1  ;;  %v7681_v22 = vmax.f32 %v7498_v21, 0.0  ;;  %v7683_v14 = vmax.f32 %v7611_v3, 0.0 }
 0x69e   :  { %v7504_v36 = vadd.f32 %v7503_v17, %v14575_v51  ;;  %v7617_v42 = vadd.f32 %v7616_v18, %v14578_v7  ;;  %v7682_v29 = vmax.f32 %v7500_v12, 0.0  ;;  %v7684_v20 = vmax.f32 %v7613_v53, 0.0 }
 0x69f   :  { %v7685_v47 = vmax.f32 %v7502_v16, 0.0  ;;  %v7687_v26 = vmax.f32 %v7615_v19, 0.0 }
 0x6a0   :  { %v7686_v27 = vmax.f32 %v7504_v36, 0.0  ;;  %v7688_v37 = vmax.f32 %v7617_v42, 0.0 }
 0x6a1   :  { %v7729_v11 = vpack.c.bf16 %v7685_v47, %v7681_v22  ;;  %v14650_v31 = vpack.c.bf16 %v7687_v26, %v7683_v14 }
 0x6a2   :  { %v14652_v41 = vpack.c.bf16 %v7686_v27, %v7682_v29  ;;  %v14654_v43 = vpack.c.bf16 %v7688_v37, %v7684_v20  ;;  %v7507_v44 = vpop.f32.mrb[44].mxu0  ;;  %v7620_v23 = vpop.f32.mrb[52].mxu1 }
 0x6a3   :  { %v7508_v35 = vadd.f32 %v7507_v44, %v14569_v0  ;;  %v7621_v45 = vadd.f32 %v7620_v23, %v14572_v58  ;;  %v7509_v48 = vpop.f32.mrb[45].mxu0  ;;  %v7622_v46 = vpop.f32.mrb[53].mxu1  ;;  %9722 = vmatprep.mubr.bf16.mxu0 %v7729_v11 }
 0x6a4   :  { %v7510_v54 = vadd.f32 %v7509_v48, %v14575_v51  ;;  %v7623_v40 = vadd.f32 %v7622_v46, %v14578_v7  ;;  %v7511_v28 = vpop.f32.mrb[46].mxu0  ;;  %v7624_v49 = vpop.f32.mrb[54].mxu1 }
 0x6a5   :  { %v7512_v50 = vadd.f32 %v7511_v28, %v14569_v0  ;;  %v7625_v52 = vadd.f32 %v7624_v49, %v14572_v58  ;;  %v7513_v4 = vpop.f32.mrb[47].mxu0  ;;  %v7626_v25 = vpop.f32.mrb[55].mxu1  ;;  %v7689_v55 = vmax.f32 %v7508_v35, 0.0  ;;  %v7691_v24 = vmax.f32 %v7621_v45, 0.0 }
 0x6a6   :  { %v7514_v32 = vadd.f32 %v7513_v4, %v14575_v51  ;;  %v7627_v61 = vadd.f32 %v7626_v25, %v14578_v7  ;;  %v7690_v10 = vmax.f32 %v7510_v54, 0.0  ;;  %v7692_v62 = vmax.f32 %v7623_v40, 0.0 }
 0x6a7   :  { %v7693_v15 = vmax.f32 %v7512_v50, 0.0  ;;  %v7695_v59 = vmax.f32 %v7625_v52, 0.0 }
 0x6a8   :  { %v7694_v21 = vmax.f32 %v7514_v32, 0.0  ;;  %v7696_v3 = vmax.f32 %v7627_v61, 0.0 }
 0x6a9   :  { %v7733_v60 = vpack.c.bf16 %v7693_v15, %v7689_v55  ;;  %v14664_v6 = vpack.c.bf16 %v7695_v59, %v7691_v24 }
 0x6aa   :  { %v14666_v12 = vpack.c.bf16 %v7694_v21, %v7690_v10  ;;  %v14668_v53 = vpack.c.bf16 %v7696_v3, %v7692_v62  ;;  %v7517_v2 = vpop.f32.mrb[48].mxu0  ;;  %v7630_v13 = vpop.f32.mrb[56].mxu1 }
 0x6ab   :  { %v7518_v16 = vadd.f32 %v7517_v2, %v14569_v0  ;;  %v7631_v19 = vadd.f32 %v7630_v13, %v14572_v58  ;;  %v7519_v17 = vpop.f32.mrb[49].mxu0  ;;  %v7632_v18 = vpop.f32.mrb[57].mxu1  ;;  %9723 = vmatmul.mubr.bf16.gmra.mrb[64].mxu0 %v7733_v60 }
 0x6ac   :  { %v7520_v36 = vadd.f32 %v7519_v17, %v14575_v51  ;;  %v7633_v42 = vadd.f32 %v7632_v18, %v14578_v7  ;;  %v7521_v22 = vpop.f32.mrb[50].mxu0  ;;  %v7634_v14 = vpop.f32.mrb[58].mxu1 }
 0x6ad   :  { %v7522_v47 = vadd.f32 %v7521_v22, %v14569_v0  ;;  %v7635_v26 = vadd.f32 %v7634_v14, %v14572_v58  ;;  %v7523_v29 = vpop.f32.mrb[51].mxu0  ;;  %v7636_v20 = vpop.f32.mrb[59].mxu1  ;;  %v7697_v11 = vmax.f32 %v7518_v16, 0.0  ;;  %v7699_v44 = vmax.f32 %v7631_v19, 0.0 }
 0x6ae   :  { %v7524_v27 = vadd.f32 %v7523_v29, %v14575_v51  ;;  %v7637_v37 = vadd.f32 %v7636_v20, %v14578_v7  ;;  %v7698_v45 = vmax.f32 %v7520_v36, 0.0  ;;  %v7700_v48 = vmax.f32 %v7633_v42, 0.0 }
 0x6af   :  { %v7701_v23 = vmax.f32 %v7522_v47, 0.0  ;;  %v7703_v35 = vmax.f32 %v7635_v26, 0.0 }
 0x6b0   :  { %v7702_v46 = vmax.f32 %v7524_v27, 0.0  ;;  %v7704_v54 = vmax.f32 %v7637_v37, 0.0 }
 0x6b1   :  { %v7737_v40 = vpack.c.bf16 %v7701_v23, %v7697_v11  ;;  %v7739_v28 = vpack.c.bf16 %v7703_v35, %v7699_v44 }
 0x6b2   :  { %v7738_v49 = vpack.c.bf16 %v7702_v46, %v7698_v45  ;;  %v7740_v50 = vpack.c.bf16 %v7704_v54, %v7700_v48  ;;  %v7527_v52 = vpop.f32.mrb[52].mxu0  ;;  %v7640_v4 = vpop.f32.mrb[60].mxu1 }
 0x6b3   :  { %v7528_v25 = vadd.f32 %v7527_v52, %v14569_v0  ;;  %v7641_v32 = vadd.f32 %v7640_v4, %v14572_v58  ;;  %v7529_v61 = vpop.f32.mrb[53].mxu0  ;;  %v7642_v55 = vpop.f32.mrb[61].mxu1  ;;  %9726 = vmatprep.mubr.bf16.mxu0 %v7737_v40 }
 0x6b4   :  { %v7530_v24 = vadd.f32 %v7529_v61, %v14575_v51  ;;  %v7643_v15 = vadd.f32 %v7642_v55, %v14578_v7  ;;  %v7531_v59 = vpop.f32.mrb[54].mxu0  ;;  %v7644_v10 = vpop.f32.mrb[62].mxu1 }
 0x6b5   :  { %v7532_v62 = vadd.f32 %v7531_v59, %v14569_v0  ;;  %v7645_v21 = vadd.f32 %v7644_v10, %v14572_v58  ;;  %v7533_v3 = vpop.f32.mrb[55].mxu0  ;;  %v7646_v60 = vpop.f32.mrb[63].mxu1  ;;  %v7705_v16 = vmax.f32 %v7528_v25, 0.0  ;;  %v7707_v19 = vmax.f32 %v7641_v32, 0.0  ;;  %v14707_v58 = vld [vmem:[%s14980_s10] ss:$0 sm:$0xff] }
 0x6b6   :  { %v7534_v2 = vadd.f32 %v7533_v3, %v14575_v51  ;;  %v7647_v13 = vadd.f32 %v7646_v60, %v14578_v7  ;;  %v7706_v36 = vmax.f32 %v7530_v24, 0.0  ;;  %v7708_v42 = vmax.f32 %v7643_v15, 0.0 }
 0x6b7   :  { %v7709_v17 = vmax.f32 %v7532_v62, 0.0  ;;  %v7711_v18 = vmax.f32 %v7645_v21, 0.0 }
 0x6b8   :  { %v7710_v22 = vmax.f32 %v7534_v2, 0.0  ;;  %v7712_v14 = vmax.f32 %v7647_v13, 0.0 }
 0x6b9   :  { %v7741_v47 = vpack.c.bf16 %v7709_v17, %v7705_v16  ;;  %v7743_v26 = vpack.c.bf16 %v7711_v18, %v7707_v19 }
 0x6ba   :  { %v7742_v29 = vpack.c.bf16 %v7710_v22, %v7706_v36  ;;  %v7744_v0 = vpack.c.bf16 %v7712_v14, %v7708_v42 }
 0x6bb   :  { %9727 = vmatmul.mubr.bf16.gmra.mrb[68].mxu0 %v7741_v47 }
 0x6bc   :  { %9730 = vmatprep.mubr.bf16.mxu0 %v14596_v9 }
 0x6c3   :  { %9731 = vmatmul.mubr.bf16.gmra.mrb[72].mxu0 %v14610_v34 }
 0x6c4   :  { %9734 = vmatprep.mubr.bf16.mxu0 %v14624_v30 }
 0x6cb   :  { %9735 = vmatmul.mubr.bf16.gmra.mrb[76].mxu0 %v14638_v56 }
 0x6cc   :  { %9738 = vmatprep.mubr.bf16.mxu0 %v14652_v41 }
 0x6d3   :  { %9739 = vmatmul.mubr.bf16.gmra.mrb[80].mxu0 %v14666_v12 }
 0x6d4   :  { %9742 = vmatprep.mubr.bf16.mxu0 %v7738_v49 }
 0x6db   :  { %9743 = vmatmul.mubr.bf16.gmra.mrb[84].mxu0 %v7742_v29 }
 0x6dc   :  { %9746 = vmatprep.mubr.bf16.mxu0 %v14594_v38 }
 0x6e3   :  { %9747 = vmatmul.mubr.bf16.gmra.mrb[88].mxu0 %v14608_v1 }
 0x6e4   :  { %9750 = vmatprep.mubr.bf16.mxu0 %v14622_v33 }
 0x6eb   :  { %9751 = vmatmul.mubr.bf16.gmra.mrb[92].mxu0 %v14636_v63 }
 0x6ec   :  { %9754 = vmatprep.mubr.bf16.mxu0 %v14650_v31 }
 0x6f3   :  { %9755 = vmatmul.mubr.bf16.gmra.mrb[96].mxu0 %v14664_v6 }
 0x6f4   :  { %9758 = vmatprep.mubr.bf16.mxu0 %v7739_v28 }
 0x6fb   :  { %9759 = vmatmul.mubr.bf16.gmra.mrb[100].mxu0 %v7743_v26 }
 0x6fc   :  { %9762 = vmatprep.mubr.bf16.mxu0 %v14598_v39 }
 0x703   :  { %9763 = vmatmul.mubr.bf16.gmra.mrb[104].mxu0 %v14612_v5 }
 0x704   :  { %9766 = vmatprep.mubr.bf16.mxu0 %v14626_v57 }
 0x70b   :  { %9767 = vmatmul.mubr.bf16.gmra.mrb[108].mxu0 %v14640_v8 }
 0x70c   :  { %9770 = vmatprep.mubr.bf16.mxu0 %v14654_v43 }
 0x713   :  { %9771 = vmatmul.mubr.bf16.gmra.mrb[112].mxu0 %v14668_v53 }
 0x714   :  { %9774 = vmatprep.mubr.bf16.mxu0 %v7740_v50 }
 0x71b   :  { %9775 = vmatmul.mubr.bf16.gmra.mrb[116].mxu0 %v7744_v0 }
 0x75e   :  { %v9716_v51 = vpop.f32.mrb[56].mxu0 }
 0x75f   :  { %v7923_v7 = vadd.f32 %v9716_v51, %v14707_v58  ;;  %v7914_v38 = vpop.f32.mrb[57].mxu0 }
 0x760   :  { %v7915_v9 = vadd.f32 %v14707_v58, %v7914_v38  ;;  %v9717_v39 = vpop.f32.mrb[58].mxu0 }
 0x761   :  { %v8171_v1 = vsub.f32 0.0, %v7923_v7  ;;  %v7926_v34 = vadd.f32 %v9717_v39, %v14707_v58  ;;  %v7917_v5 = vpop.f32.mrb[59].mxu0 }
 0x762   :  { %v8169_v33 = vsub.f32 0.0, %v7915_v9  ;;  %v7918_v30 = vadd.f32 %v14707_v58, %v7917_v5 }
 0x763   :  { %v8237_v57 = vmul.f32 1.442695, %v8171_v1  ;;  %v8172_v63 = vsub.f32 0.0, %v7926_v34 }
 0x764   :  { %v8233_v56 = vmul.f32 1.442695, %v8169_v33  ;;  %v8170_v8 = vsub.f32 0.0, %v7918_v30 }
 0x765   :  { %11001 = vpow2.f32 %v8237_v57  ;;  %v8239_v31 = vmul.f32 1.442695, %v8172_v63 }
 0x766   :  { %11003 = vpow2.f32 %v8233_v56  ;;  %v8235_v41 = vmul.f32 1.442695, %v8170_v8 }
 0x767   :  { %11005 = vpow2.f32 %v8239_v31 }
 0x768   :  { %11007 = vpow2.f32 %v8235_v41 }
 0x76e   :  { %v9720_v43 = vpop.f32.mrb[60].mxu0 }
 0x76f   :  { %v11002_v6 = vpop.eup %11001  ;;  %v7939_v12 = vadd.f32 %v9720_v43, %v14707_v58  ;;  %v7930_v53 = vpop.f32.mrb[61].mxu0 }
 0x770   :  { %v11004_v20 = vpop.eup %11003  ;;  %v8363_v27 = vadd.f32 1.0, %v11002_v6  ;;  %v7931_v37 = vadd.f32 %v14707_v58, %v7930_v53  ;;  %v9721_v11 = vpop.f32.mrb[62].mxu0 }
 0x771   :  { %v11006_v44 = vpop.eup %11005  ;;  %v8361_v23 = vadd.f32 1.0, %v11004_v20  ;;  %v8175_v35 = vsub.f32 0.0, %v7939_v12  ;;  %v7942_v45 = vadd.f32 %v9721_v11, %v14707_v58  ;;  %v7933_v48 = vpop.f32.mrb[63].mxu0 }
 0x772   :  { %v11008_v46 = vpop.eup %11007  ;;  %11009 = vrcp.f32 %v8363_v27  ;;  %v8364_v54 = vadd.f32 1.0, %v11006_v44  ;;  %v8173_v40 = vsub.f32 0.0, %v7931_v37  ;;  %v7934_v28 = vadd.f32 %v14707_v58, %v7933_v48 }
 0x773   :  { %11011 = vrcp.f32 %v8361_v23  ;;  %v8362_v49 = vadd.f32 1.0, %v11008_v46  ;;  %v8245_v50 = vmul.f32 1.442695, %v8175_v35  ;;  %v8176_v52 = vsub.f32 0.0, %v7942_v45 }
 0x774   :  { %11013 = vrcp.f32 %v8364_v54  ;;  %v8241_v4 = vmul.f32 1.442695, %v8173_v40  ;;  %v8174_v25 = vsub.f32 0.0, %v7934_v28 }
 0x775   :  { %11015 = vrcp.f32 %v8362_v49  ;;  %v8247_v32 = vmul.f32 1.442695, %v8176_v52 }
 0x776   :  { %11017 = vpow2.f32 %v8245_v50  ;;  %v8243_v61 = vmul.f32 1.442695, %v8174_v25 }
 0x777   :  { %11019 = vpow2.f32 %v8241_v4 }
 0x778   :  { %11021 = vpow2.f32 %v8247_v32 }
 0x779   :  { %11023 = vpow2.f32 %v8243_v61 }
 0x77c   :  { %v11010_v55 = vpop.eup %11009 }
 0x77d   :  { %v11012_v24 = vpop.eup %11011  ;;  %v8491_v15 = vmin.f32 %v11010_v55, 1.0 }
 0x77e   :  { %v11014_v59 = vpop.eup %11013  ;;  %v8489_v10 = vmin.f32 %v11012_v24, 1.0  ;;  %v9724_v62 = vpop.f32.mrb[64].mxu0 }
 0x77f   :  { %v11016_v21 = vpop.eup %11015  ;;  %v8555_v3 = vmax.f32 %v8491_v15, 0.0  ;;  %v8492_v60 = vmin.f32 %v11014_v59, 1.0  ;;  %v7955_v2 = vadd.f32 %v9724_v62, %v14707_v58  ;;  %v7946_v13 = vpop.f32.mrb[65].mxu0 }
 0x780   :  { %v11018_v16 = vpop.eup %11017  ;;  %v8553_v19 = vmax.f32 %v8489_v10, 0.0  ;;  %v8490_v17 = vmin.f32 %v11016_v21, 1.0  ;;  %v7947_v18 = vadd.f32 %v14707_v58, %v7946_v13  ;;  %v9725_v36 = vpop.f32.mrb[66].mxu0 }
 0x781   :  { %v11020_v42 = vpop.eup %11019  ;;  %8619 = vst [vmem:[%s14981_s11 + $0x10] sm:$0xff] %v8555_v3  ;;  %v8556_v22 = vmax.f32 %v8492_v60, 0.0  ;;  %v8367_v14 = vadd.f32 1.0, %v11018_v16  ;;  %v8179_v47 = vsub.f32 0.0, %v7955_v2  ;;  %v7958_v26 = vadd.f32 %v9725_v36, %v14707_v58  ;;  %v7949_v29 = vpop.f32.mrb[67].mxu0 }
 0x782   :  { %v11022_v0 = vpop.eup %11021  ;;  %8617 = vst [vmem:[%s14981_s11] sm:$0xff] %v8553_v19  ;;  %v8554_v51 = vmax.f32 %v8490_v17, 0.0  ;;  %v8365_v7 = vadd.f32 1.0, %v11020_v42  ;;  %v8177_v38 = vsub.f32 0.0, %v7947_v18  ;;  %v7950_v9 = vadd.f32 %v14707_v58, %v7949_v29 }
 0x783   :  { %v11024_v39 = vpop.eup %11023  ;;  %8620 = vst [vmem:[%s14981_s11 + $0x18] sm:$0xff] %v8556_v22  ;;  %11025 = vrcp.f32 %v8367_v14  ;;  %v8368_v1 = vadd.f32 1.0, %v11022_v0  ;;  %v8253_v34 = vmul.f32 1.442695, %v8179_v47  ;;  %v8180_v5 = vsub.f32 0.0, %v7958_v26 }
 0x784   :  { %8618 = vst [vmem:[%s14981_s11 + $0x8] sm:$0xff] %v8554_v51  ;;  %11027 = vrcp.f32 %v8365_v7  ;;  %v8366_v33 = vadd.f32 1.0, %v11024_v39  ;;  %v8249_v30 = vmul.f32 1.442695, %v8177_v38  ;;  %v8178_v57 = vsub.f32 0.0, %v7950_v9 }
 0x785   :  { %11029 = vrcp.f32 %v8368_v1  ;;  %v8255_v63 = vmul.f32 1.442695, %v8180_v5 }
 0x786   :  { %11031 = vrcp.f32 %v8366_v33  ;;  %v8251_v56 = vmul.f32 1.442695, %v8178_v57 }
 0x787   :  { %11033 = vpow2.f32 %v8253_v34 }
 0x788   :  { %11035 = vpow2.f32 %v8249_v30 }
 0x789   :  { %11037 = vpow2.f32 %v8255_v63 }
 0x78a   :  { %11039 = vpow2.f32 %v8251_v56 }
 0x78d   :  { %v11026_v8 = vpop.eup %11025 }
 0x78e   :  { %v11028_v31 = vpop.eup %11027  ;;  %v8495_v41 = vmin.f32 %v11026_v8, 1.0  ;;  %v9728_v43 = vpop.f32.mrb[68].mxu0 }
 0x78f   :  { %v11030_v6 = vpop.eup %11029  ;;  %v8493_v12 = vmin.f32 %v11028_v31, 1.0  ;;  %v7971_v53 = vadd.f32 %v9728_v43, %v14707_v58  ;;  %v7962_v20 = vpop.f32.mrb[69].mxu0 }
 0x790   :  { %v11032_v27 = vpop.eup %11031  ;;  %v8559_v37 = vmax.f32 %v8495_v41, 0.0  ;;  %v8496_v11 = vmin.f32 %v11030_v6, 1.0  ;;  %v7963_v44 = vadd.f32 %v14707_v58, %v7962_v20  ;;  %v9729_v23 = vpop.f32.mrb[70].mxu0 }
 0x791   :  { %v11034_v35 = vpop.eup %11033  ;;  %v8557_v45 = vmax.f32 %v8493_v12, 0.0  ;;  %v8494_v48 = vmin.f32 %v11032_v27, 1.0  ;;  %v8183_v46 = vsub.f32 0.0, %v7971_v53  ;;  %v7974_v54 = vadd.f32 %v9729_v23, %v14707_v58  ;;  %v7965_v40 = vpop.f32.mrb[71].mxu0 }
 0x792   :  { %v11036_v28 = vpop.eup %11035  ;;  %8623 = vst [vmem:[%s14981_s11 + $0x30] sm:$0xff] %v8559_v37  ;;  %v8560_v49 = vmax.f32 %v8496_v11, 0.0  ;;  %v8371_v50 = vadd.f32 1.0, %v11034_v35  ;;  %v8181_v52 = vsub.f32 0.0, %v7963_v44  ;;  %v7966_v4 = vadd.f32 %v14707_v58, %v7965_v40 }
 0x793   :  { %v11038_v25 = vpop.eup %11037  ;;  %8621 = vst [vmem:[%s14981_s11 + $0x20] sm:$0xff] %v8557_v45  ;;  %v8558_v32 = vmax.f32 %v8494_v48, 0.0  ;;  %v8369_v61 = vadd.f32 1.0, %v11036_v28  ;;  %v8184_v55 = vsub.f32 0.0, %v7974_v54  ;;  %v8261_v59 = vmul.f32 1.442695, %v8183_v46 }
 0x794   :  { %v11040_v24 = vpop.eup %11039  ;;  %8624 = vst [vmem:[%s14981_s11 + $0x38] sm:$0xff] %v8560_v49  ;;  %11041 = vrcp.f32 %v8371_v50  ;;  %v8372_v15 = vadd.f32 1.0, %v11038_v25  ;;  %v8182_v10 = vsub.f32 0.0, %v7966_v4  ;;  %v8257_v21 = vmul.f32 1.442695, %v8181_v52 }
 0x795   :  { %8622 = vst [vmem:[%s14981_s11 + $0x28] sm:$0xff] %v8558_v32  ;;  %11043 = vrcp.f32 %v8369_v61  ;;  %v8370_v62 = vadd.f32 1.0, %v11040_v24  ;;  %v8263_v3 = vmul.f32 1.442695, %v8184_v55 }
 0x796   :  { %11045 = vrcp.f32 %v8372_v15  ;;  %v9732_v60 = vpop.f32.mrb[72].mxu0  ;;  %v8259_v2 = vmul.f32 1.442695, %v8182_v10 }
 0x797   :  { %11047 = vrcp.f32 %v8370_v62  ;;  %v7987_v13 = vadd.f32 %v9732_v60, %v14707_v58  ;;  %v7978_v16 = vpop.f32.mrb[73].mxu0 }
 0x798   :  { %11049 = vpow2.f32 %v8261_v59  ;;  %v7979_v19 = vadd.f32 %v14707_v58, %v7978_v16  ;;  %v9733_v17 = vpop.f32.mrb[74].mxu0 }
 0x799   :  { %11051 = vpow2.f32 %v8257_v21  ;;  %v8187_v18 = vsub.f32 0.0, %v7987_v13  ;;  %v7990_v36 = vadd.f32 %v9733_v17, %v14707_v58  ;;  %v7981_v42 = vpop.f32.mrb[75].mxu0 }
 0x79a   :  { %11053 = vpow2.f32 %v8263_v3  ;;  %v8185_v22 = vsub.f32 0.0, %v7979_v19  ;;  %v7982_v14 = vadd.f32 %v14707_v58, %v7981_v42 }
 0x79b   :  { %11055 = vpow2.f32 %v8259_v2  ;;  %v8269_v47 = vmul.f32 1.442695, %v8187_v18  ;;  %v8188_v26 = vsub.f32 0.0, %v7990_v36 }
 0x79c   :  { %v8265_v29 = vmul.f32 1.442695, %v8185_v22  ;;  %v8186_v0 = vsub.f32 0.0, %v7982_v14 }
 0x79d   :  { %11057 = vpow2.f32 %v8269_v47  ;;  %v8271_v51 = vmul.f32 1.442695, %v8188_v26 }
 0x79e   :  { %v11042_v7 = vpop.eup %11041  ;;  %11059 = vpow2.f32 %v8265_v29  ;;  %v8267_v38 = vmul.f32 1.442695, %v8186_v0  ;;  %v9736_v9 = vpop.f32.mrb[76].mxu0 }
 0x79f   :  { %v11044_v39 = vpop.eup %11043  ;;  %v8499_v1 = vmin.f32 %v11042_v7, 1.0  ;;  %11061 = vpow2.f32 %v8271_v51  ;;  %v8003_v34 = vadd.f32 %v9736_v9, %v14707_v58  ;;  %v7994_v5 = vpop.f32.mrb[77].mxu0 }
 0x7a0   :  { %v11046_v33 = vpop.eup %11045  ;;  %v8497_v30 = vmin.f32 %v11044_v39, 1.0  ;;  %11063 = vpow2.f32 %v8267_v38  ;;  %v7995_v57 = vadd.f32 %v14707_v58, %v7994_v5  ;;  %v9737_v63 = vpop.f32.mrb[78].mxu0 }
 0x7a1   :  { %v11048_v56 = vpop.eup %11047  ;;  %v8563_v8 = vmax.f32 %v8499_v1, 0.0  ;;  %v8500_v31 = vmin.f32 %v11046_v33, 1.0  ;;  %v8191_v41 = vsub.f32 0.0, %v8003_v34  ;;  %v7997_v43 = vpop.f32.mrb[79].mxu0  ;;  %v8006_v44 = vadd.f32 %v9737_v63, %v14707_v58 }
 0x7a2   :  { %v11050_v6 = vpop.eup %11049  ;;  %v8561_v12 = vmax.f32 %v8497_v30, 0.0  ;;  %v8498_v53 = vmin.f32 %v11048_v56, 1.0  ;;  %v8189_v11 = vsub.f32 0.0, %v7995_v57  ;;  %v7998_v48 = vadd.f32 %v14707_v58, %v7997_v43 }
 0x7a3   :  { %v11052_v20 = vpop.eup %11051  ;;  %8627 = vst [vmem:[%s14981_s11 + $0x50] sm:$0xff] %v8563_v8  ;;  %v8564_v27 = vmax.f32 %v8500_v31, 0.0  ;;  %v8375_v37 = vadd.f32 1.0, %v11050_v6  ;;  %v8277_v40 = vmul.f32 1.442695, %v8191_v41  ;;  %v8192_v4 = vsub.f32 0.0, %v8006_v44 }
 0x7a4   :  { %v11054_v23 = vpop.eup %11053  ;;  %8625 = vst [vmem:[%s14981_s11 + $0x40] sm:$0xff] %v8561_v12  ;;  %v8562_v35 = vmax.f32 %v8498_v53, 0.0  ;;  %v8373_v45 = vadd.f32 1.0, %v11052_v20  ;;  %v8273_v52 = vmul.f32 1.442695, %v8189_v11  ;;  %v8190_v24 = vsub.f32 0.0, %v7998_v48 }
 0x7a5   :  { %v11056_v46 = vpop.eup %11055  ;;  %8628 = vst [vmem:[%s14981_s11 + $0x58] sm:$0xff] %v8564_v27  ;;  %11065 = vrcp.f32 %v8375_v37  ;;  %v8376_v54 = vadd.f32 1.0, %v11054_v23  ;;  %v8279_v18 = vmul.f32 1.442695, %v8192_v4 }
 0x7a6   :  { %8626 = vst [vmem:[%s14981_s11 + $0x48] sm:$0xff] %v8562_v35  ;;  %11067 = vrcp.f32 %v8373_v45  ;;  %v8374_v28 = vadd.f32 1.0, %v11056_v46  ;;  %v9740_v49 = vpop.f32.mrb[80].mxu0  ;;  %v8275_v42 = vmul.f32 1.442695, %v8190_v24 }
 0x7a7   :  { %v11058_v50 = vpop.eup %11057  ;;  %11069 = vrcp.f32 %v8376_v54  ;;  %v8019_v25 = vadd.f32 %v9740_v49, %v14707_v58  ;;  %v8010_v32 = vpop.f32.mrb[81].mxu0 }
 0x7a8   :  { %v11060_v61 = vpop.eup %11059  ;;  %11071 = vrcp.f32 %v8374_v28  ;;  %v8379_v55 = vadd.f32 1.0, %v11058_v50  ;;  %v8011_v15 = vadd.f32 %v14707_v58, %v8010_v32  ;;  %v9741_v59 = vpop.f32.mrb[82].mxu0 }
 0x7a9   :  { %v11062_v10 = vpop.eup %11061  ;;  %v8377_v62 = vadd.f32 1.0, %v11060_v61  ;;  %11073 = vpow2.f32 %v8277_v40  ;;  %v8195_v21 = vsub.f32 0.0, %v8019_v25  ;;  %v8022_v3 = vadd.f32 %v9741_v59, %v14707_v58  ;;  %v8013_v60 = vpop.f32.mrb[83].mxu0 }
 0x7aa   :  { %v11064_v2 = vpop.eup %11063  ;;  %11075 = vrcp.f32 %v8379_v55  ;;  %v8380_v13 = vadd.f32 1.0, %v11062_v10  ;;  %v8193_v16 = vsub.f32 0.0, %v8011_v15  ;;  %v8014_v19 = vadd.f32 %v14707_v58, %v8013_v60 }
 0x7ab   :  { %11077 = vrcp.f32 %v8377_v62  ;;  %v8378_v17 = vadd.f32 1.0, %v11064_v2  ;;  %v8196_v36 = vsub.f32 0.0, %v8022_v3  ;;  %v8285_v14 = vmul.f32 1.442695, %v8195_v21 }
 0x7ac   :  { %11079 = vrcp.f32 %v8380_v13  ;;  %v8194_v22 = vsub.f32 0.0, %v8014_v19  ;;  %v8281_v47 = vmul.f32 1.442695, %v8193_v16 }
 0x7ad   :  { %11081 = vrcp.f32 %v8378_v17  ;;  %v8287_v0 = vmul.f32 1.442695, %v8196_v36 }
 0x7ae   :  { %11083 = vpow2.f32 %v8273_v52  ;;  %v9744_v26 = vpop.f32.mrb[84].mxu0  ;;  %v8283_v39 = vmul.f32 1.442695, %v8194_v22 }
 0x7af   :  { %v11066_v29 = vpop.eup %11065  ;;  %11085 = vpow2.f32 %v8279_v18  ;;  %v8035_v51 = vadd.f32 %v9744_v26, %v14707_v58  ;;  %v8026_v7 = vpop.f32.mrb[85].mxu0 }
 0x7b0   :  { %v11068_v38 = vpop.eup %11067  ;;  %v8503_v9 = vmin.f32 %v11066_v29, 1.0  ;;  %11087 = vpow2.f32 %v8275_v42  ;;  %v8027_v1 = vadd.f32 %v14707_v58, %v8026_v7  ;;  %v9745_v34 = vpop.f32.mrb[86].mxu0 }
 0x7b1   :  { %v11070_v5 = vpop.eup %11069  ;;  %v8501_v33 = vmin.f32 %v11068_v38, 1.0  ;;  %11089 = vpow2.f32 %v8285_v14  ;;  %v8199_v30 = vsub.f32 0.0, %v8035_v51  ;;  %v8038_v57 = vadd.f32 %v9745_v34, %v14707_v58  ;;  %v8029_v63 = vpop.f32.mrb[87].mxu0 }
 0x7b2   :  { %v11072_v56 = vpop.eup %11071  ;;  %v8567_v8 = vmax.f32 %v8503_v9, 0.0  ;;  %v8504_v31 = vmin.f32 %v11070_v5, 1.0  ;;  %11091 = vpow2.f32 %v8281_v47  ;;  %v8197_v41 = vsub.f32 0.0, %v8027_v1 }
 0x7b3   :  { %v11074_v43 = vpop.eup %11073  ;;  %v8565_v6 = vmax.f32 %v8501_v33, 0.0  ;;  %v8502_v12 = vmin.f32 %v11072_v56, 1.0  ;;  %11093 = vpow2.f32 %v8287_v0  ;;  %v8293_v53 = vmul.f32 1.442695, %v8199_v30 }
 0x7b4   :  { %v11076_v20 = vpop.eup %11075  ;;  %8631 = vst [vmem:[%s14981_s11 + $0x70] sm:$0xff] %v8567_v8  ;;  %v8568_v27 = vmax.f32 %v8504_v31, 0.0  ;;  %v8383_v37 = vadd.f32 1.0, %v11074_v43  ;;  %11095 = vpow2.f32 %v8283_v39  ;;  %v8289_v11 = vmul.f32 1.442695, %v8197_v41 }
 0x7b5   :  { %v11078_v44 = vpop.eup %11077  ;;  %8629 = vst [vmem:[%s14981_s11 + $0x60] sm:$0xff] %v8565_v6  ;;  %v8566_v23 = vmax.f32 %v8502_v12, 0.0  ;;  %v8507_v35 = vmin.f32 %v11076_v20, 1.0  ;;  %11097 = vpow2.f32 %v8293_v53  ;;  %v8200_v45 = vsub.f32 0.0, %v8038_v57 }
 0x7b6   :  { %v11080_v48 = vpop.eup %11079  ;;  %8632 = vst [vmem:[%s14981_s11 + $0x78] sm:$0xff] %v8568_v27  ;;  %v8505_v46 = vmin.f32 %v11078_v44, 1.0  ;;  %11099 = vrcp.f32 %v8383_v37  ;;  %v8030_v54 = vadd.f32 %v14707_v58, %v8029_v63  ;;  %v9748_v40 = vpop.f32.mrb[88].mxu0 }
 0x7b7   :  { %v11082_v28 = vpop.eup %11081  ;;  %8630 = vst [vmem:[%s14981_s11 + $0x68] sm:$0xff] %v8566_v23  ;;  %v8571_v49 = vmax.f32 %v8507_v35, 0.0  ;;  %v8508_v50 = vmin.f32 %v11080_v48, 1.0  ;;  %11101 = vpow2.f32 %v8289_v11  ;;  %v8295_v52 = vmul.f32 1.442695, %v8200_v45  ;;  %v8042_v4 = vpop.f32.mrb[89].mxu0 }
 0x7b8   :  { %v11084_v25 = vpop.eup %11083  ;;  %v8569_v32 = vmax.f32 %v8505_v46, 0.0  ;;  %v8506_v61 = vmin.f32 %v11082_v28, 1.0  ;;  %v8051_v55 = vadd.f32 %v9748_v40, %v14707_v58  ;;  %v9749_v24 = vpop.f32.mrb[90].mxu0  ;;  %v8198_v62 = vsub.f32 0.0, %v8030_v54 }
 0x7b9   :  { %v11086_v15 = vpop.eup %11085  ;;  %8635 = vst [vmem:[%s14981_s11 + $0x90] sm:$0xff] %v8571_v49  ;;  %v8572_v59 = vmax.f32 %v8508_v50, 0.0  ;;  %v8381_v10 = vadd.f32 1.0, %v11084_v25  ;;  %11103 = vpow2.f32 %v8295_v52  ;;  %v8045_v21 = vpop.f32.mrb[91].mxu0  ;;  %v8043_v16 = vadd.f32 %v14707_v58, %v8042_v4 }
 0x7ba   :  { %v11088_v3 = vpop.eup %11087  ;;  %8633 = vst [vmem:[%s14981_s11 + $0x80] sm:$0xff] %v8569_v32  ;;  %v8570_v60 = vmax.f32 %v8506_v61, 0.0  ;;  %v8384_v2 = vadd.f32 1.0, %v11086_v15  ;;  %v8203_v13 = vsub.f32 0.0, %v8051_v55  ;;  %v8054_v18 = vadd.f32 %v9749_v24, %v14707_v58 }
 0x7bb   :  { %v11090_v19 = vpop.eup %11089  ;;  %8636 = vst [vmem:[%s14981_s11 + $0x98] sm:$0xff] %v8572_v59  ;;  %11105 = vrcp.f32 %v8381_v10  ;;  %v8382_v17 = vadd.f32 1.0, %v11088_v3  ;;  %v8046_v22 = vadd.f32 %v14707_v58, %v8045_v21  ;;  %v8291_v26 = vmul.f32 1.442695, %v8198_v62 }
 0x7bc   :  { %v11092_v36 = vpop.eup %11091  ;;  %8634 = vst [vmem:[%s14981_s11 + $0x88] sm:$0xff] %v8570_v60  ;;  %11107 = vrcp.f32 %v8384_v2  ;;  %v8387_v42 = vadd.f32 1.0, %v11090_v19  ;;  %v8301_v51 = vmul.f32 1.442695, %v8203_v13  ;;  %v8201_v7 = vsub.f32 0.0, %v8043_v16 }
 0x7bd   :  { %v11094_v14 = vpop.eup %11093  ;;  %11109 = vrcp.f32 %v8382_v17  ;;  %v8385_v47 = vadd.f32 1.0, %v11092_v36  ;;  %v8204_v1 = vsub.f32 0.0, %v8054_v18  ;;  %v8202_v57 = vsub.f32 0.0, %v8046_v22 }
 0x7be   :  { %v11096_v29 = vpop.eup %11095  ;;  %11111 = vrcp.f32 %v8387_v42  ;;  %v8388_v0 = vadd.f32 1.0, %v11094_v14  ;;  %v9752_v38 = vpop.f32.mrb[92].mxu0  ;;  %v8297_v11 = vmul.f32 1.442695, %v8201_v7 }
 0x7bf   :  { %v11098_v9 = vpop.eup %11097  ;;  %11113 = vrcp.f32 %v8385_v47  ;;  %v8386_v39 = vadd.f32 1.0, %v11096_v29  ;;  %v8067_v34 = vadd.f32 %v9752_v38, %v14707_v58  ;;  %v8058_v5 = vpop.f32.mrb[93].mxu0  ;;  %v8303_v35 = vmul.f32 1.442695, %v8204_v1 }
 0x7c0   :  { %v11100_v33 = vpop.eup %11099  ;;  %11115 = vrcp.f32 %v8388_v0  ;;  %v8391_v30 = vadd.f32 1.0, %v11098_v9  ;;  %v8059_v63 = vadd.f32 %v14707_v58, %v8058_v5  ;;  %v9753_v56 = vpop.f32.mrb[94].mxu0  ;;  %v8299_v46 = vmul.f32 1.442695, %v8202_v57 }
 0x7c1   :  { %v11102_v8 = vpop.eup %11101  ;;  %v8511_v31 = vmin.f32 %v11100_v33, 1.0  ;;  %11117 = vrcp.f32 %v8386_v39  ;;  %v8207_v41 = vsub.f32 0.0, %v8067_v34  ;;  %v8070_v43 = vadd.f32 %v9753_v56, %v14707_v58  ;;  %v8061_v6 = vpop.f32.mrb[95].mxu0 }
 0x7c2   :  { %11119 = vrcp.f32 %v8391_v30  ;;  %v8389_v12 = vadd.f32 1.0, %v11102_v8  ;;  %v8205_v53 = vsub.f32 0.0, %v8059_v63  ;;  %v8062_v20 = vadd.f32 %v14707_v58, %v8061_v6 }
 0x7c3   :  { %v11104_v27 = vpop.eup %11103  ;;  %v8575_v37 = vmax.f32 %v8511_v31, 0.0  ;;  %11121 = vpow2.f32 %v8291_v26  ;;  %v8208_v44 = vsub.f32 0.0, %v8070_v43  ;;  %v8309_v54 = vmul.f32 1.442695, %v8207_v41 }
 0x7c4   :  { %11123 = vrcp.f32 %v8389_v12  ;;  %v8392_v23 = vadd.f32 1.0, %v11104_v27  ;;  %v8206_v45 = vsub.f32 0.0, %v8062_v20  ;;  %v8305_v49 = vmul.f32 1.442695, %v8205_v53 }
 0x7c5   :  { %v11106_v48 = vpop.eup %11105  ;;  %8639 = vst [vmem:[%s14981_s11 + $0xb0] sm:$0xff] %v8575_v37  ;;  %11125 = vpow2.f32 %v8301_v51  ;;  %v8311_v50 = vmul.f32 1.442695, %v8208_v44 }
 0x7c6   :  { %v11108_v40 = vpop.eup %11107  ;;  %v8509_v28 = vmin.f32 %v11106_v48, 1.0  ;;  %11127 = vrcp.f32 %v8392_v23  ;;  %v9756_v52 = vpop.f32.mrb[96].mxu0  ;;  %v8307_v32 = vmul.f32 1.442695, %v8206_v45 }
 0x7c7   :  { %v11110_v4 = vpop.eup %11109  ;;  %v8512_v25 = vmin.f32 %v11108_v40, 1.0  ;;  %11129 = vpow2.f32 %v8297_v11  ;;  %v8083_v61 = vadd.f32 %v9756_v52, %v14707_v58  ;;  %v8074_v55 = vpop.f32.mrb[97].mxu0 }
 0x7c8   :  { %v11112_v24 = vpop.eup %11111  ;;  %v8573_v15 = vmax.f32 %v8509_v28, 0.0  ;;  %v8510_v59 = vmin.f32 %v11110_v4, 1.0  ;;  %11131 = vpow2.f32 %v8303_v35  ;;  %v8075_v10 = vadd.f32 %v14707_v58, %v8074_v55  ;;  %v9757_v62 = vpop.f32.mrb[98].mxu0 }
 0x7c9   :  { %v11114_v21 = vpop.eup %11113  ;;  %v8576_v3 = vmax.f32 %v8512_v25, 0.0  ;;  %v8515_v60 = vmin.f32 %v11112_v24, 1.0  ;;  %11133 = vpow2.f32 %v8299_v46  ;;  %v8211_v2 = vsub.f32 0.0, %v8083_v61  ;;  %v8077_v13 = vpop.f32.mrb[99].mxu0 }
 0x7ca   :  { %v11116_v16 = vpop.eup %11115  ;;  %8637 = vst [vmem:[%s14981_s11 + $0xa0] sm:$0xff] %v8573_v15  ;;  %v8574_v19 = vmax.f32 %v8510_v59, 0.0  ;;  %v8513_v17 = vmin.f32 %v11114_v21, 1.0  ;;  %11135 = vpow2.f32 %v8309_v54  ;;  %v8209_v18 = vsub.f32 0.0, %v8075_v10 }
 0x7cb   :  { %v11118_v36 = vpop.eup %11117  ;;  %8640 = vst [vmem:[%s14981_s11 + $0xb8] sm:$0xff] %v8576_v3  ;;  %v8579_v42 = vmax.f32 %v8515_v60, 0.0  ;;  %v8516_v22 = vmin.f32 %v11116_v16, 1.0  ;;  %11137 = vpow2.f32 %v8305_v49  ;;  %v8317_v14 = vmul.f32 1.442695, %v8211_v2 }
 0x7cc   :  { %v11120_v47 = vpop.eup %11119  ;;  %8638 = vst [vmem:[%s14981_s11 + $0xa8] sm:$0xff] %v8574_v19  ;;  %v8577_v26 = vmax.f32 %v8513_v17, 0.0  ;;  %v8514_v29 = vmin.f32 %v11118_v36, 1.0  ;;  %11139 = vpow2.f32 %v8311_v50  ;;  %v8313_v0 = vmul.f32 1.442695, %v8209_v18 }
 0x7cd   :  { %v11122_v51 = vpop.eup %11121  ;;  %8643 = vst [vmem:[%s14981_s11 + $0xd0] sm:$0xff] %v8579_v42  ;;  %v8580_v7 = vmax.f32 %v8516_v22, 0.0  ;;  %v8519_v38 = vmin.f32 %v11120_v47, 1.0  ;;  %11141 = vpow2.f32 %v8307_v32  ;;  %v8086_v9 = vadd.f32 %v9757_v62, %v14707_v58 }
 0x7ce   :  { %v11124_v39 = vpop.eup %11123  ;;  %8641 = vst [vmem:[%s14981_s11 + $0xc0] sm:$0xff] %v8577_v26  ;;  %v8578_v1 = vmax.f32 %v8514_v29, 0.0  ;;  %v8390_v34 = vadd.f32 1.0, %v11122_v51  ;;  %11143 = vpow2.f32 %v8317_v14  ;;  %v8078_v5 = vadd.f32 %v14707_v58, %v8077_v13  ;;  %v9760_v33 = vpop.f32.mrb[100].mxu0 }
 0x7cf   :  { %v11126_v30 = vpop.eup %11125  ;;  %8644 = vst [vmem:[%s14981_s11 + $0xd8] sm:$0xff] %v8580_v7  ;;  %v8583_v57 = vmax.f32 %v8519_v38, 0.0  ;;  %v8517_v63 = vmin.f32 %v11124_v39, 1.0  ;;  %11145 = vpow2.f32 %v8313_v0  ;;  %v8212_v56 = vsub.f32 0.0, %v8086_v9  ;;  %v8090_v8 = vpop.f32.mrb[101].mxu0 }
 0x7d0   :  { %v11128_v31 = vpop.eup %11127  ;;  %8642 = vst [vmem:[%s14981_s11 + $0xc8] sm:$0xff] %v8578_v1  ;;  %11147 = vrcp.f32 %v8390_v34  ;;  %v8395_v41 = vadd.f32 1.0, %v11126_v30  ;;  %v8099_v43 = vadd.f32 %v9760_v33, %v14707_v58  ;;  %v9761_v6 = vpop.f32.mrb[102].mxu0  ;;  %v8091_v37 = vadd.f32 %v14707_v58, %v8090_v8 }
 0x7d1   :  { %v11130_v12 = vpop.eup %11129  ;;  %8647 = vst [vmem:[%s14981_s11 + $0xf0] sm:$0xff] %v8583_v57  ;;  %v8581_v53 = vmax.f32 %v8517_v63, 0.0  ;;  %v8520_v20 = vmin.f32 %v11128_v31, 1.0  ;;  %v8319_v27 = vmul.f32 1.442695, %v8212_v56  ;;  %v8093_v11 = vpop.f32.mrb[103].mxu0  ;;  %v8102_v49 = vadd.f32 %v9761_v6, %v14707_v58 }
 0x7d2   :  { %v11132_v44 = vpop.eup %11131  ;;  %11149 = vrcp.f32 %v8395_v41  ;;  %v8393_v23 = vadd.f32 1.0, %v11130_v12  ;;  %v8210_v35 = vsub.f32 0.0, %v8078_v5  ;;  %v8215_v45 = vsub.f32 0.0, %v8099_v43 }
 0x7d3   :  { %v11134_v48 = vpop.eup %11133  ;;  %8645 = vst [vmem:[%s14981_s11 + $0xe0] sm:$0xff] %v8581_v53  ;;  %v8584_v46 = vmax.f32 %v8520_v20, 0.0  ;;  %v8396_v54 = vadd.f32 1.0, %v11132_v44  ;;  %11151 = vpow2.f32 %v8319_v27  ;;  %v8213_v4 = vsub.f32 0.0, %v8091_v37  ;;  %v14860_v27 = vld [vmem:[%s14980_s10] ss:$0 sm:$0xff] }
 0x7d4   :  { %v11136_v40 = vpop.eup %11135  ;;  %11153 = vrcp.f32 %v8393_v23  ;;  %v8394_v28 = vadd.f32 1.0, %v11134_v48  ;;  %v8094_v25 = vadd.f32 %v14707_v58, %v8093_v11  ;;  %v8315_v55 = vmul.f32 1.442695, %v8210_v35 }
 0x7d5   :  { %v11138_v50 = vpop.eup %11137  ;;  %8648 = vst [vmem:[%s14981_s11 + $0xf8] sm:$0xff] %v8584_v46  ;;  %11155 = vrcp.f32 %v8396_v54  ;;  %v8399_v52 = vadd.f32 1.0, %v11136_v40  ;;  %v8325_v24 = vmul.f32 1.442695, %v8215_v45  ;;  %v8216_v62 = vsub.f32 0.0, %v8102_v49 }
 0x7d6   :  { %v11140_v32 = vpop.eup %11139  ;;  %11157 = vrcp.f32 %v8394_v28  ;;  %v8397_v61 = vadd.f32 1.0, %v11138_v50  ;;  %v9764_v15 = vpop.f32.mrb[104].mxu0  ;;  %v8214_v13 = vsub.f32 0.0, %v8094_v25  ;;  %v8321_v36 = vmul.f32 1.442695, %v8213_v4 }
 0x7d7   :  { %v11142_v59 = vpop.eup %11141  ;;  %11159 = vrcp.f32 %v8399_v52  ;;  %v8400_v10 = vadd.f32 1.0, %v11140_v32  ;;  %v8115_v21 = vadd.f32 %v9764_v15, %v14707_v58  ;;  %v8106_v3 = vpop.f32.mrb[105].mxu0  ;;  %v8327_v51 = vmul.f32 1.442695, %v8216_v62 }
 0x7d8   :  { %v11144_v60 = vpop.eup %11143  ;;  %11161 = vrcp.f32 %v8397_v61  ;;  %v8398_v2 = vadd.f32 1.0, %v11142_v59  ;;  %v8107_v16 = vadd.f32 %v14707_v58, %v8106_v3  ;;  %v9765_v19 = vpop.f32.mrb[106].mxu0  ;;  %v8323_v9 = vmul.f32 1.442695, %v8214_v13 }
 0x7d9   :  { %v11146_v17 = vpop.eup %11145  ;;  %11163 = vrcp.f32 %v8400_v10  ;;  %v8403_v18 = vadd.f32 1.0, %v11144_v60  ;;  %v8219_v42 = vsub.f32 0.0, %v8115_v21  ;;  %v8109_v22 = vpop.f32.mrb[107].mxu0  ;;  %v8118_v29 = vadd.f32 %v9765_v19, %v14707_v58 }
 0x7da   :  { %v11148_v14 = vpop.eup %11147  ;;  %11165 = vrcp.f32 %v8398_v2  ;;  %v8401_v47 = vadd.f32 1.0, %v11146_v17  ;;  %v8217_v26 = vsub.f32 0.0, %v8107_v16  ;;  %v8110_v7 = vadd.f32 %v14707_v58, %v8109_v22 }
 0x7db   :  { %v8518_v0 = vmin.f32 %v11148_v14, 1.0  ;;  %11167 = vrcp.f32 %v8403_v18  ;;  %v8333_v39 = vmul.f32 1.442695, %v8219_v42  ;;  %v8220_v1 = vsub.f32 0.0, %v8118_v29 }
 0x7dc   :  { %v11150_v38 = vpop.eup %11149  ;;  %11169 = vrcp.f32 %v8401_v47  ;;  %v8218_v30 = vsub.f32 0.0, %v8110_v7  ;;  %v8329_v56 = vmul.f32 1.442695, %v8217_v26 }
 0x7dd   :  { %v11152_v34 = vpop.eup %11151  ;;  %v8582_v5 = vmax.f32 %v8518_v0, 0.0  ;;  %v8523_v33 = vmin.f32 %v11150_v38, 1.0  ;;  %11171 = vpow2.f32 %v8315_v55  ;;  %v8335_v8 = vmul.f32 1.442695, %v8220_v1 }
 0x7de   :  { %v11154_v57 = vpop.eup %11153  ;;  %v8404_v63 = vadd.f32 1.0, %v11152_v34  ;;  %11173 = vpow2.f32 %v8325_v24  ;;  %v9768_v31 = vpop.f32.mrb[108].mxu0  ;;  %v8331_v6 = vmul.f32 1.442695, %v8218_v30 }
 0x7df   :  { %v11156_v41 = vpop.eup %11155  ;;  %8646 = vst [vmem:[%s14981_s11 + $0xe8] sm:$0xff] %v8582_v5  ;;  %v8587_v58 = vmax.f32 %v8523_v33, 0.0  ;;  %v8521_v43 = vmin.f32 %v11154_v57, 1.0  ;;  %11175 = vpow2.f32 %v8321_v36  ;;  %v8122_v12 = vpop.f32.mrb[109].mxu0  ;;  %v8131_v37 = vadd.f32 %v14860_v27, %v9768_v31 }
 0x7e0   :  { %v11158_v53 = vpop.eup %11157  ;;  %v8524_v20 = vmin.f32 %v11156_v41, 1.0  ;;  %11177 = vrcp.f32 %v8404_v63  ;;  %v8123_v11 = vadd.f32 %v14860_v27, %v8122_v12  ;;  %v9769_v44 = vpop.f32.mrb[110].mxu0 }
 0x7e1   :  { %v11160_v23 = vpop.eup %11159  ;;  %8651 = vst [vmem:[%s14981_s11 + $0x110] sm:$0xff] %v8587_v58  ;;  %v8585_v35 = vmax.f32 %v8521_v43, 0.0  ;;  %v8522_v45 = vmin.f32 %v11158_v53, 1.0  ;;  %11179 = vpow2.f32 %v8327_v51  ;;  %v8134_v48 = vadd.f32 %v14860_v27, %v9769_v44  ;;  %v8125_v46 = vpop.f32.mrb[111].mxu0 }
 0x7e2   :  { %v11162_v54 = vpop.eup %11161  ;;  %v8588_v40 = vmax.f32 %v8524_v20, 0.0  ;;  %v8527_v28 = vmin.f32 %v11160_v23, 1.0  ;;  %11181 = vpow2.f32 %v8323_v9  ;;  %v8223_v49 = vsub.f32 0.0, %v8131_v37 }
 0x7e3   :  { %v11164_v50 = vpop.eup %11163  ;;  %8649 = vst [vmem:[%s14981_s11 + $0x100] sm:$0xff] %v8585_v35  ;;  %v8586_v52 = vmax.f32 %v8522_v45, 0.0  ;;  %v8525_v4 = vmin.f32 %v11162_v54, 1.0  ;;  %11183 = vpow2.f32 %v8333_v39  ;;  %v8221_v25 = vsub.f32 0.0, %v8123_v11 }
 0x7e4   :  { %v11166_v32 = vpop.eup %11165  ;;  %8652 = vst [vmem:[%s14981_s11 + $0x118] sm:$0xff] %v8588_v40  ;;  %v8591_v61 = vmax.f32 %v8527_v28, 0.0  ;;  %v8528_v55 = vmin.f32 %v11164_v50, 1.0  ;;  %11185 = vpow2.f32 %v8329_v56  ;;  %v8341_v24 = vmul.f32 1.442695, %v8223_v49 }
 0x7e5   :  { %v11168_v15 = vpop.eup %11167  ;;  %8650 = vst [vmem:[%s14981_s11 + $0x108] sm:$0xff] %v8586_v52  ;;  %v8589_v59 = vmax.f32 %v8525_v4, 0.0  ;;  %v8526_v10 = vmin.f32 %v11166_v32, 1.0  ;;  %11187 = vpow2.f32 %v8335_v8  ;;  %v8337_v62 = vmul.f32 1.442695, %v8221_v25 }
 0x7e6   :  { %v11170_v21 = vpop.eup %11169  ;;  %8655 = vst [vmem:[%s14981_s11 + $0x130] sm:$0xff] %v8591_v61  ;;  %v8592_v3 = vmax.f32 %v8528_v55, 0.0  ;;  %v8531_v60 = vmin.f32 %v11168_v15, 1.0  ;;  %11189 = vpow2.f32 %v8331_v6  ;;  %v8224_v2 = vsub.f32 0.0, %v8134_v48  ;;  %v9772_v13 = vpop.f32.mrb[112].mxu0 }
 0x7e7   :  { %v11172_v16 = vpop.eup %11171  ;;  %8653 = vst [vmem:[%s14981_s11 + $0x120] sm:$0xff] %v8589_v59  ;;  %v8590_v19 = vmax.f32 %v8526_v10, 0.0  ;;  %v8529_v17 = vmin.f32 %v11170_v21, 1.0  ;;  %11191 = vpow2.f32 %v8341_v24  ;;  %v8126_v18 = vadd.f32 %v14860_v27, %v8125_v46  ;;  %v8138_v36 = vpop.f32.mrb[113].mxu0 }
 0x7e8   :  { %v11174_v42 = vpop.eup %11173  ;;  %8656 = vst [vmem:[%s14981_s11 + $0x138] sm:$0xff] %v8592_v3  ;;  %v8595_v22 = vmax.f32 %v8531_v60, 0.0  ;;  %v8402_v14 = vadd.f32 1.0, %v11172_v16  ;;  %11193 = vpow2.f32 %v8337_v62  ;;  %v9773_v47 = vpop.f32.mrb[114].mxu0  ;;  %v8343_v51 = vmul.f32 1.442695, %v8224_v2 }
 0x7e9   :  { %v11176_v26 = vpop.eup %11175  ;;  %8654 = vst [vmem:[%s14981_s11 + $0x128] sm:$0xff] %v8590_v19  ;;  %v8593_v29 = vmax.f32 %v8529_v17, 0.0  ;;  %v8407_v0 = vadd.f32 1.0, %v11174_v42  ;;  %v8141_v7 = vpop.f32.mrb[115].mxu0  ;;  %v8222_v39 = vsub.f32 0.0, %v8126_v18  ;;  %v8147_v5 = vadd.f32 %v14860_v27, %v9772_v13 }
 0x7ea   :  { %v11178_v38 = vpop.eup %11177  ;;  %8659 = vst [vmem:[%s14981_s11 + $0x150] sm:$0xff] %v8595_v22  ;;  %11195 = vrcp.f32 %v8402_v14  ;;  %v8405_v9 = vadd.f32 1.0, %v11176_v26  ;;  %v8139_v57 = vadd.f32 %v14860_v27, %v8138_v36  ;;  %v8150_v31 = vadd.f32 %v14860_v27, %v9773_v47 }
 0x7eb   :  { %v11180_v1 = vpop.eup %11179  ;;  %8657 = vst [vmem:[%s14981_s11 + $0x140] sm:$0xff] %v8593_v29  ;;  %v8532_v34 = vmin.f32 %v11178_v38, 1.0  ;;  %11197 = vrcp.f32 %v8407_v0  ;;  %v8339_v43 = vmul.f32 1.442695, %v8222_v39  ;;  %v8227_v20 = vsub.f32 0.0, %v8147_v5 }
 0x7ec   :  { %v11182_v33 = vpop.eup %11181  ;;  %11199 = vrcp.f32 %v8405_v9  ;;  %v8408_v30 = vadd.f32 1.0, %v11180_v1  ;;  %v8142_v37 = vadd.f32 %v14860_v27, %v8141_v7  ;;  %v8225_v35 = vsub.f32 0.0, %v8139_v57 }
 0x7ed   :  { %v11184_v63 = vpop.eup %11183  ;;  %v8596_v56 = vmax.f32 %v8532_v34, 0.0  ;;  %v8406_v8 = vadd.f32 1.0, %v11182_v33  ;;  %11201 = vpow2.f32 %v8343_v51  ;;  %v8228_v40 = vsub.f32 0.0, %v8150_v31 }
 0x7ee   :  { %v11186_v41 = vpop.eup %11185  ;;  %11203 = vrcp.f32 %v8408_v30  ;;  %v8411_v58 = vadd.f32 1.0, %v11184_v63  ;;  %v9776_v6 = vpop.f32.mrb[116].mxu0  ;;  %v8226_v4 = vsub.f32 0.0, %v8142_v37  ;;  %v8349_v61 = vmul.f32 1.442695, %v8227_v20 }
 0x7ef   :  { %v11188_v12 = vpop.eup %11187  ;;  %8660 = vst [vmem:[%s14981_s11 + $0x158] sm:$0xff] %v8596_v56  ;;  %11205 = vrcp.f32 %v8406_v8  ;;  %v8409_v53 = vadd.f32 1.0, %v11186_v41  ;;  %v8154_v11 = vpop.f32.mrb[117].mxu0  ;;  %v8163_v45 = vadd.f32 %v14860_v27, %v9776_v6  ;;  %v8345_v24 = vmul.f32 1.442695, %v8225_v35 }
 0x7f0   :  { %v11190_v44 = vpop.eup %11189  ;;  %11207 = vrcp.f32 %v8411_v58  ;;  %v8412_v23 = vadd.f32 1.0, %v11188_v12  ;;  %v9777_v48 = vpop.f32.mrb[118].mxu0  ;;  %v8155_v28 = vadd.f32 %v14860_v27, %v8154_v11  ;;  %v8351_v21 = vmul.f32 1.442695, %v8228_v40 }
 0x7f1   :  { %v11192_v46 = vpop.eup %11191  ;;  %11209 = vrcp.f32 %v8409_v53  ;;  %v8410_v54 = vadd.f32 1.0, %v11190_v44  ;;  %v8157_v49 = vpop.f32.mrb[119].mxu0  ;;  %v8166_v25 = vadd.f32 %v14860_v27, %v9777_v48  ;;  %v8231_v15 = vsub.f32 0.0, %v8163_v45 }
 0x7f2   :  { %v11194_v50 = vpop.eup %11193  ;;  %11211 = vrcp.f32 %v8412_v23  ;;  %v8415_v52 = vadd.f32 1.0, %v11192_v46  ;;  %v8158_v59 = vadd.f32 %v14860_v27, %v8157_v49  ;;  %v8229_v3 = vsub.f32 0.0, %v8155_v28 }
 0x7f3   :  { %11213 = vrcp.f32 %v8410_v54  ;;  %v8413_v32 = vadd.f32 1.0, %v11194_v50  ;;  %v8347_v13 = vmul.f32 1.442695, %v8226_v4  ;;  %v8232_v16 = vsub.f32 0.0, %v8166_v25 }
 0x7f4   :  { %v11196_v55 = vpop.eup %11195  ;;  %11215 = vrcp.f32 %v8415_v52  ;;  %v8230_v36 = vsub.f32 0.0, %v8158_v59  ;;  %v8357_v27 = vmul.f32 1.442695, %v8231_v15  ;;  %v8353_v0 = vmul.f32 1.442695, %v8229_v3 }
 0x7f5   :  { %v11198_v10 = vpop.eup %11197  ;;  %v8530_v62 = vmin.f32 %v11196_v55, 1.0  ;;  %11217 = vrcp.f32 %v8413_v32  ;;  %v8359_v38 = vmul.f32 1.442695, %v8232_v16 }
 0x7f6   :  { %v11200_v60 = vpop.eup %11199  ;;  %v8535_v2 = vmin.f32 %v11198_v10, 1.0  ;;  %11219 = vpow2.f32 %v8339_v43  ;;  %v8355_v34 = vmul.f32 1.442695, %v8230_v36 }
 0x7f7   :  { %v11202_v19 = vpop.eup %11201  ;;  %v8594_v17 = vmax.f32 %v8530_v62, 0.0  ;;  %v8533_v18 = vmin.f32 %v11200_v60, 1.0  ;;  %11221 = vpow2.f32 %v8349_v61 }
 0x7f8   :  { %v11204_v42 = vpop.eup %11203  ;;  %v8599_v22 = vmax.f32 %v8535_v2, 0.0  ;;  %v8416_v14 = vadd.f32 1.0, %v11202_v19  ;;  %11223 = vpow2.f32 %v8345_v24 }
 0x7f9   :  { %v11206_v47 = vpop.eup %11205  ;;  %8658 = vst [vmem:[%s14981_s11 + $0x148] sm:$0xff] %v8594_v17  ;;  %v8597_v26 = vmax.f32 %v8533_v18, 0.0  ;;  %v8536_v29 = vmin.f32 %v11204_v42, 1.0  ;;  %11225 = vpow2.f32 %v8351_v21 }
 0x7fa   :  { %v11208_v51 = vpop.eup %11207  ;;  %8663 = vst [vmem:[%s14981_s11 + $0x170] sm:$0xff] %v8599_v22  ;;  %v8534_v7 = vmin.f32 %v11206_v47, 1.0  ;;  %11227 = vrcp.f32 %v8416_v14 }
 0x7fb   :  { %v11210_v9 = vpop.eup %11209  ;;  %8661 = vst [vmem:[%s14981_s11 + $0x160] sm:$0xff] %v8597_v26  ;;  %v8600_v39 = vmax.f32 %v8536_v29, 0.0  ;;  %v8539_v1 = vmin.f32 %v11208_v51, 1.0  ;;  %11229 = vpow2.f32 %v8347_v13 }
 0x7fc   :  { %v11212_v5 = vpop.eup %11211  ;;  %v8598_v33 = vmax.f32 %v8534_v7, 0.0  ;;  %v8537_v30 = vmin.f32 %v11210_v9, 1.0  ;;  %11231 = vpow2.f32 %v8357_v27 }
 0x7fd   :  { %v11214_v57 = vpop.eup %11213  ;;  %8664 = vst [vmem:[%s14981_s11 + $0x178] sm:$0xff] %v8600_v39  ;;  %v8603_v63 = vmax.f32 %v8539_v1, 0.0  ;;  %v8540_v56 = vmin.f32 %v11212_v5, 1.0  ;;  %11233 = vpow2.f32 %v8353_v0 }
 0x7fe   :  { %v11216_v8 = vpop.eup %11215  ;;  %8662 = vst [vmem:[%s14981_s11 + $0x168] sm:$0xff] %v8598_v33  ;;  %v8601_v31 = vmax.f32 %v8537_v30, 0.0  ;;  %v8538_v41 = vmin.f32 %v11214_v57, 1.0  ;;  %11235 = vpow2.f32 %v8359_v38 }
 0x7ff   :  { %v11218_v58 = vpop.eup %11217  ;;  %8667 = vst [vmem:[%s14981_s11 + $0x190] sm:$0xff] %v8603_v63  ;;  %v8604_v43 = vmax.f32 %v8540_v56, 0.0  ;;  %v8543_v6 = vmin.f32 %v11216_v8, 1.0  ;;  %11237 = vpow2.f32 %v8355_v34 }
 0x800   :  { %v11220_v12 = vpop.eup %11219  ;;  %8665 = vst [vmem:[%s14981_s11 + $0x180] sm:$0xff] %v8601_v31  ;;  %v8602_v53 = vmax.f32 %v8538_v41, 0.0  ;;  %v8541_v20 = vmin.f32 %v11218_v58, 1.0 }
 0x801   :  { %v11222_v37 = vpop.eup %11221  ;;  %8668 = vst [vmem:[%s14981_s11 + $0x198] sm:$0xff] %v8604_v43  ;;  %v8607_v11 = vmax.f32 %v8543_v6, 0.0  ;;  %v8414_v44 = vadd.f32 1.0, %v11220_v12 }
 0x802   :  { %v11224_v23 = vpop.eup %11223  ;;  %8666 = vst [vmem:[%s14981_s11 + $0x188] sm:$0xff] %v8602_v53  ;;  %v8605_v35 = vmax.f32 %v8541_v20, 0.0  ;;  %v8419_v45 = vadd.f32 1.0, %v11222_v37 }
 0x803   :  { %v11226_v48 = vpop.eup %11225  ;;  %8671 = vst [vmem:[%s14981_s11 + $0x1b0] sm:$0xff] %v8607_v11  ;;  %11239 = vrcp.f32 %v8414_v44  ;;  %v8417_v46 = vadd.f32 1.0, %v11224_v23 }
 0x804   :  { %v11228_v54 = vpop.eup %11227  ;;  %8669 = vst [vmem:[%s14981_s11 + $0x1a0] sm:$0xff] %v8605_v35  ;;  %11241 = vrcp.f32 %v8419_v45  ;;  %v8420_v40 = vadd.f32 1.0, %v11226_v48 }
 0x805   :  { %v11230_v28 = vpop.eup %11229  ;;  %v8544_v49 = vmin.f32 %v11228_v54, 1.0  ;;  %11243 = vrcp.f32 %v8417_v46 }
 0x806   :  { %v11232_v50 = vpop.eup %11231  ;;  %11245 = vrcp.f32 %v8420_v40  ;;  %v8418_v52 = vadd.f32 1.0, %v11230_v28 }
 0x807   :  { %v11234_v4 = vpop.eup %11233  ;;  %v8608_v25 = vmax.f32 %v8544_v49, 0.0  ;;  %v8423_v32 = vadd.f32 1.0, %v11232_v50 }
 0x808   :  { %v11236_v61 = vpop.eup %11235  ;;  %11247 = vrcp.f32 %v8418_v52  ;;  %v8421_v55 = vadd.f32 1.0, %v11234_v4 }
 0x809   :  { %v11238_v24 = vpop.eup %11237  ;;  %8672 = vst [vmem:[%s14981_s11 + $0x1b8] sm:$0xff] %v8608_v25  ;;  %11249 = vrcp.f32 %v8423_v32  ;;  %v8424_v15 = vadd.f32 1.0, %v11236_v61 }
 0x80a   :  { %11251 = vrcp.f32 %v8421_v55  ;;  %v8422_v59 = vadd.f32 1.0, %v11238_v24 }
 0x80b   :  { %11253 = vrcp.f32 %v8424_v15 }
 0x80c   :  { %11255 = vrcp.f32 %v8422_v59 }
 0x80d   :  { %v11240_v10 = vpop.eup %11239 }
 0x80e   :  { %v11242_v62 = vpop.eup %11241  ;;  %v8542_v21 = vmin.f32 %v11240_v10, 1.0 }
 0x80f   :  { %v11244_v3 = vpop.eup %11243  ;;  %v8547_v60 = vmin.f32 %v11242_v62, 1.0 }
 0x810   :  { %v11246_v2 = vpop.eup %11245  ;;  %v8606_v13 = vmax.f32 %v8542_v21, 0.0  ;;  %v8545_v16 = vmin.f32 %v11244_v3, 1.0 }
 0x811   :  { %v8611_v19 = vmax.f32 %v8547_v60, 0.0  ;;  %v8548_v17 = vmin.f32 %v11246_v2, 1.0 }
 0x812   :  { %v11248_v18 = vpop.eup %11247  ;;  %8670 = vst [vmem:[%s14981_s11 + $0x1a8] sm:$0xff] %v8606_v13  ;;  %v8609_v36 = vmax.f32 %v8545_v16, 0.0 }
 0x813   :  { %v11250_v42 = vpop.eup %11249  ;;  %8675 = vst [vmem:[%s14981_s11 + $0x1d0] sm:$0xff] %v8611_v19  ;;  %v8612_v22 = vmax.f32 %v8548_v17, 0.0  ;;  %v8546_v14 = vmin.f32 %v11248_v18, 1.0 }
 0x814   :  { %v11252_v27 = vpop.eup %11251  ;;  %8673 = vst [vmem:[%s14981_s11 + $0x1c0] sm:$0xff] %v8609_v36  ;;  %v8551_v47 = vmin.f32 %v11250_v42, 1.0 }
 0x815   :  { %v11254_v26 = vpop.eup %11253  ;;  %8676 = vst [vmem:[%s14981_s11 + $0x1d8] sm:$0xff] %v8612_v22  ;;  %v8610_v29 = vmax.f32 %v8546_v14, 0.0  ;;  %v8549_v0 = vmin.f32 %v11252_v27, 1.0 }
 0x816   :  { %v11256_v51 = vpop.eup %11255  ;;  %v8615_v7 = vmax.f32 %v8551_v47, 0.0  ;;  %v8552_v38 = vmin.f32 %v11254_v26, 1.0 }
 0x817   :  { %8674 = vst [vmem:[%s14981_s11 + $0x1c8] sm:$0xff] %v8610_v29  ;;  %v8613_v9 = vmax.f32 %v8549_v0, 0.0  ;;  %v8550_v39 = vmin.f32 %v11256_v51, 1.0 }
 0x818   :  { %8679 = vst [vmem:[%s14981_s11 + $0x1f0] sm:$0xff] %v8615_v7  ;;  %v8616_v1 = vmax.f32 %v8552_v38, 0.0 }
 0x819   :  { %8677 = vst [vmem:[%s14981_s11 + $0x1e0] sm:$0xff] %v8613_v9  ;;  %v8614_v34 = vmax.f32 %v8550_v39, 0.0 }
 0x81a   :  { %8680 = vst [vmem:[%s14981_s11 + $0x1f8] sm:$0xff] %v8616_v1 }
 0x81b   :  { %8678 = vst [vmem:[%s14981_s11 + $0x1e8] sm:$0xff] %v8614_v34 }

</bundles_post_ra>
